<compile_context>
chip_gen: v7x
topology: tpu7x:2x2x1
jax: 0.10.0
libtpu: 0.0.40
codegen_flags: <defaults>
</compile_context>

<pallas_src>
import functools

import jax
import jax.numpy as jnp
from jax.experimental import pallas as pl
from jax.experimental.pallas import tpu as pltpu

TILE_H, TILE_W = 9, 16        # tilemap_shape
SAL_H, SAL_W = 256, 256       # salmap_shape
KSH, KSW = SAL_H // TILE_H, SAL_W // TILE_W   # AvgPool2d kernel/stride = (28, 16)


# ---------------------------------------------------------------------------
# Reference helpers (glue, plain JAX) -- re-implemented per the TRACK-style
# convention since they are not part of the provided module source.
# ---------------------------------------------------------------------------
def get_xyz_grid(height, width):
    """Unit xyz vectors at the equirectangular tile centers, shape (H, W, 3)."""
    yaw = (jnp.arange(width, dtype=jnp.float32) + 0.5) / width * (2.0 * jnp.pi)
    pitch = (jnp.arange(height, dtype=jnp.float32) + 0.5) / height * jnp.pi
    yaw_g, pitch_g = jnp.meshgrid(yaw, pitch)
    x = jnp.sin(pitch_g) * jnp.cos(yaw_g)
    y = jnp.sin(pitch_g) * jnp.sin(yaw_g)
    z = jnp.cos(pitch_g)
    return jnp.stack([x, y, z], axis=-1)


def from_position_to_tile_probability_cartesian(pos, xyz_grid, sigma=0.1):
    """Gaussian of the great-circle distance from pos to each tile center.

    pos: (B, S, 3) unit vectors -> returns (B, S, TILE_H, TILE_W) float32.
    """
    dot = jnp.einsum("bsc,hwc->bshw", pos, xyz_grid)
    dot = jnp.clip(dot, -1.0, 1.0)
    # TODO(synk): arccos has no reliable Mosaic lowering, so this tiny
    # (B*S*144 element) elementwise step stays in JAX glue; the heavy pooling
    # and conv compute live in the Pallas kernel below.
    gcd = jnp.arccos(dot)
    return jnp.exp(-(gcd ** 2) / (2.0 * sigma ** 2))


# ---------------------------------------------------------------------------
# Pallas kernel: each grid step processes TILE_S consecutive timesteps of one
# batch element, lane-packed as (9, TILE_S*16) tiles:
#   1) AvgPool2d(28,16): 28-row pooling on the VPU (contiguous slab loads +
#      sublane sums in f32), then one tiny block-diagonal MXU matmul for the
#      16-column pooling that lands lane-dense,
#   2) fuse with the precomputed lane-packed fixation channel,
#   3) per-timestep 3x3 conv (padding=1) via lane/row shifts + 18 full-width
#      VPU MACs with lane-broadcast weights, then bias + ReLU.
# ---------------------------------------------------------------------------
def _fuse_kernel(sal_ref, comb_ref, bsum_ref, out_ref, rp_ref, *, tile_s, inv_area):
    lanes = tile_s * TILE_W

    # --- AvgPool2d part 1: 28-row pooling on the VPU; the full sal stream
    # stays off the MXU.  Row-pooled maps land lane-packed (map t in lanes
    # [t*256, (t+1)*256)) in the rp scratch.
    for t in range(tile_s):
        rows = []
        for r in range(TILE_H):
            slab = sal_ref[0, t, r * KSH:(r + 1) * KSH, :].astype(jnp.float32)  # (28, 256)
            rows.append(jnp.sum(slab, axis=0, keepdims=True))                   # (1, 256)
        rp_ref[:, t * SAL_W:(t + 1) * SAL_W] = jnp.concatenate(rows, axis=0)     # (9, 256)

    # --- AvgPool2d part 2: 16-column pooling as ONE tiny matmul against the
    # block-diagonal 0/1 indicator kron(I_tile_s, colpool) -> pooled result is
    # lane-dense with each timestep in its own 16-lane slot.
    pooled = jnp.dot(rp_ref[...], bsum_ref[...],
                     preferred_element_type=jnp.float32) * inv_area              # (9, lanes)

    fix = comb_ref[0, 0, :TILE_H, :]                    # (9, lanes)  fixation channel
    w = comb_ref[0, 0, TILE_H:TILE_H + 19, :]           # (19, lanes) lane-broadcast conv params

    # --- 3x3 conv (padding=1) with per-timestep weights: lane shifts masked at
    # the 16-lane timestep-slot boundaries, zero-padded row shifts, and
    # full-width VPU MACs.  No MXU work, no rcat/umat constants.
    col = jax.lax.broadcasted_iota(jnp.int32, (TILE_H, lanes), 1) % TILE_W
    not_first_col = col != 0
    not_last_col = col != TILE_W - 1

    def hshift(x, dx):                                  # value at column col+dx (zero outside)
        if dx == 0:
            return x
        if dx == 1:
            return jnp.where(not_last_col, jnp.roll(x, -1, axis=1), 0.0)
        return jnp.where(not_first_col, jnp.roll(x, 1, axis=1), 0.0)

    zero_row = jnp.zeros((1, lanes), jnp.float32)

    def vshift(x, dy):                                  # value at row r+dy (zero outside)
        if dy == 0:
            return x
        if dy == 1:
            return jnp.concatenate([x[1:, :], zero_row], axis=0)
        return jnp.concatenate([zero_row, x[:-1, :]], axis=0)

    chans = (fix, pooled)                               # channel order matches torch.cat
    hs = [[hshift(chans[c], kx - 1) for kx in range(3)] for c in range(2)]

    out = jnp.zeros((TILE_H, lanes), jnp.float32)
    for ky in range(3):
        inner = jnp.zeros((TILE_H, lanes), jnp.float32)
        for c in range(2):
            for kx in range(3):
                p = c * 9 + ky * 3 + kx
                inner = inner + w[p:p + 1, :] * hs[c][kx]        # full-width VPU MAC
        out = out + vshift(inner, ky - 1)
    out = out + w[18:19, :]                                      # bias
    out_ref[0, 0] = jnp.maximum(out, 0.0)                        # ReLU


def fuse_pos_sal(pos, sal, conv_w, conv_b, tile_s=None):
    """pos: (B,S,3), sal: (B,S,256,256) f32/bf16, conv_w: (S,1,2,3,3), conv_b: (S,1)."""
    B, S, _ = pos.shape
    # tile_s restricted to {8, 16} so lanes = tile_s*16 is a multiple of 128
    # (lane-dense tiles / unmasked output stores); pad S instead of shrinking.
    if tile_s is None:
        tile_s = 16 if S % 16 == 0 else 8
    sg = pl.cdiv(S, tile_s)
    s_pad = sg * tile_s
    lanes = tile_s * TILE_W

    # Fixation channel (tiny): computed in JAX glue.
    xyz_grid = get_xyz_grid(TILE_H, TILE_W)
    fixmap = from_position_to_tile_probability_cartesian(pos, xyz_grid).astype(jnp.float32)

    # Per-timestep Conv2d(2->1, 3x3) weights + bias, flattened to 19 scalars.
    w_flat = jnp.concatenate([conv_w.reshape(S, 18).astype(jnp.float32),
                              conv_b.reshape(S, 1).astype(jnp.float32)], axis=-1)   # (S, 19)

    if s_pad != S:   # pad dummy timesteps; their outputs are sliced off below.
        pad = s_pad - S
        sal = jnp.pad(sal, ((0, 0), (0, pad), (0, 0), (0, 0)))
        fixmap = jnp.pad(fixmap, ((0, 0), (0, pad), (0, 0), (0, 0)))
        w_flat = jnp.pad(w_flat, ((0, pad), (0, 0)))

    # Lane-packed fixation channel: (B, sg, 9, lanes), lane = t*16 + col.
    fix_pack = (fixmap.reshape(B, sg, tile_s, TILE_H, TILE_W)
                .transpose(0, 1, 3, 2, 4).reshape(B, sg, TILE_H, lanes))
    # Conv params broadcast across each timestep's 16-lane slot.
    w_pack = w_flat.reshape(sg, tile_s, 19).transpose(0, 2, 1)                   # (sg, 19, tile_s)
    w_pack = jnp.broadcast_to(w_pack[..., None],
                              (sg, 19, tile_s, TILE_W)).reshape(sg, 19, lanes)
    w_pack = jnp.broadcast_to(w_pack[None], (B, sg, 19, lanes))
    # One merged per-step side input => one DMA descriptor per grid step.
    comb = jnp.concatenate([fix_pack, w_pack], axis=2)                           # (B, sg, 28, lanes)

    # Block-diagonal 0/1 column-pool matrix: kron(I_tile_s, colpool) so each
    # map's 16 pooled columns land in its own 16-lane slot (exact in f32).
    cols = jnp.arange(SAL_W)
    colpool = ((cols[:, None] // KSW) == jnp.arange(TILE_W)[None, :]).astype(jnp.float32)  # (256,16)
    bsum_bd = jnp.kron(jnp.eye(tile_s, dtype=jnp.float32), colpool)              # (tile_s*256, lanes)

    kernel = functools.partial(_fuse_kernel, tile_s=tile_s,
                               inv_area=1.0 / float(KSH * KSW))

    out = pl.pallas_call(
        kernel,
        grid=(B, sg),
        in_specs=[
            pl.BlockSpec((1, tile_s, SAL_H, SAL_W), lambda b, g: (b, g, 0, 0)),  # saliency maps
            pl.BlockSpec((1, 1, TILE_H + 19, lanes), lambda b, g: (b, g, 0, 0)), # fix + conv params
            pl.BlockSpec((tile_s * SAL_W, lanes), lambda b, g: (0, 0)),          # col-pool 0/1 (resident)
        ],
        out_specs=pl.BlockSpec((1, 1, TILE_H, lanes), lambda b, g: (b, g, 0, 0)),
        out_shape=jax.ShapeDtypeStruct((B, sg, TILE_H, lanes), jnp.float32),
        scratch_shapes=[pltpu.VMEM((TILE_H, tile_s * SAL_W), jnp.float32)],      # row-pooled maps
        compiler_params=pltpu.CompilerParams(
            dimension_semantics=("parallel", "parallel")),
    )(sal, comb, bsum_bd)

    # Un-pack the lane-packed output back to (B, S, 1, 9, 16).
    out = (out.reshape(B, sg, TILE_H, tile_s, TILE_W)
           .transpose(0, 1, 3, 2, 4).reshape(B, s_pad, 1, TILE_H, TILE_W))
    return out[:, :S]


# ---------------------------------------------------------------------------
# Pure-JAX reference of the PyTorch forward (for validation).
# ---------------------------------------------------------------------------
def reference(pos, sal, conv_w, conv_b):
    B, S, _ = pos.shape
    xyz_grid = get_xyz_grid(TILE_H, TILE_W)
    fixmap = from_position_to_tile_probability_cartesian(pos, xyz_grid)
    salp = sal[:, :, : TILE_H * KSH, : TILE_W * KSW].reshape(
        B, S, TILE_H, KSH, TILE_W, KSW).mean(axis=(3, 5))
    fuse = jnp.stack([fixmap, salp], axis=2)                              # (B, S, 2, 9, 16)
    outs = []
    for i in range(S):
        y = jax.lax.conv_general_dilated(
            fuse[:, i], conv_w[i], window_strides=(1, 1), padding="SAME",
            dimension_numbers=("NCHW", "OIHW", "NCHW"))
        y = jnp.maximum(y + conv_b[i].reshape(1, 1, 1, 1), 0.0)
        outs.append(y)
    return jnp.stack(outs, axis=1)                                        # (B, S, 1, 9, 16)


if __name__ == "__main__":
    B, S = 4, 8                            # H_WINDOW = 8; B=4 -> 4 grid steps (2 per v7x TC)
    key = jax.random.PRNGKey(0)
    kp, ks, kw, kb = jax.random.split(key, 4)

    pos = jax.random.normal(kp, (B, S, 3), jnp.float32)
    pos = pos / jnp.linalg.norm(pos, axis=-1, keepdims=True)
    # Saliency stream arrives in bf16 (halves the HBM traffic the kernel reads);
    # all pooling / conv accumulation inside the kernel remains f32.
    sal = jax.random.uniform(ks, (B, S, SAL_H, SAL_W), dtype=jnp.float32).astype(jnp.bfloat16)

    # Deterministic Conv2d(2, 1, 3, padding=1) params per timestep (kaiming-ish uniform).
    bound = 1.0 / jnp.sqrt(2.0 * 3.0 * 3.0)
    conv_w = jax.random.uniform(kw, (S, 1, 2, 3, 3), jnp.float32, -bound, bound)
    conv_b = jax.random.uniform(kb, (S, 1), jnp.float32, -bound, bound)

    out = jax.block_until_ready(fuse_pos_sal(pos, sal, conv_w, conv_b))
    ref = reference(pos, sal.astype(jnp.float32), conv_w, conv_b)

    assert out.shape == (B, S, 1, TILE_H, TILE_W), out.shape
    if not jnp.allclose(out, ref, atol=1e-4, rtol=1e-4):
        raise AssertionError(
            f"kernel/reference mismatch, max err {jnp.max(jnp.abs(out - ref))}")
    print("KERNEL_OK")
</pallas_src>

<mosaic_0001>
module attributes {stable_mosaic.version = 11 : i64} {
  func.func @_fuse_kernel(%arg0: i32, %arg1: i32, %arg2: memref<1x8x256x256xbf16, #tpu.memory_space<vmem>>, %arg3: memref<1x1x28x128xf32, #tpu.memory_space<vmem>>, %arg4: memref<2048x128xf32, #tpu.memory_space<vmem>>, %arg5: memref<1x1x9x128xf32, #tpu.memory_space<vmem>>, %arg6: memref<9x2048xf32, #tpu.memory_space<vmem>>) attributes {dimension_semantics = [#tpu.dimension_semantics<parallel>, #tpu.dimension_semantics<parallel>], iteration_bounds = array<i64: 4, 1>, scalar_prefetch = 0 : i64, scratch_operands = 1 : i64, tpu.core_type = #tpu.core_type<tc>, window_params = [{transform_indices = @transform_0, window_bounds = array<i64: 1, 8, 256, 256>}, {transform_indices = @transform_1, window_bounds = array<i64: 1, 1, 28, 128>}, {pipeline_mode = #tpu.pipeline_mode<synchronous>, transform_indices = @transform_2, window_bounds = array<i64: 2048, 128>}, {transform_indices = @transform_3, window_bounds = array<i64: 1, 1, 9, 128>}]} {
    %c0 = arith.constant 0 : index
    %c0_0 = arith.constant 0 : index
    %c0_1 = arith.constant 0 : index
    %c0_2 = arith.constant 0 : index
    %0 = vector.load %arg2[%c0, %c0_0, %c0_1, %c0_2] : memref<1x8x256x256xbf16, #tpu.memory_space<vmem>>, vector<1x1x28x256xbf16>
    %1 = vector.shape_cast %0 : vector<1x1x28x256xbf16> to vector<28x256xbf16>
    %2 = arith.extf %1 : vector<28x256xbf16> to vector<28x256xf32>
    %cst = arith.constant dense<0.000000e+00> : vector<256xf32>
    %3 = vector.multi_reduction <add>, %2, %cst [0] : vector<28x256xf32> to vector<256xf32>
    %4 = vector.shape_cast %3 : vector<256xf32> to vector<1x256xf32>
    %c0_3 = arith.constant 0 : index
    %c0_4 = arith.constant 0 : index
    %c28 = arith.constant 28 : index
    %c0_5 = arith.constant 0 : index
    %5 = vector.load %arg2[%c0_3, %c0_4, %c28, %c0_5] : memref<1x8x256x256xbf16, #tpu.memory_space<vmem>>, vector<1x1x28x256xbf16>
    %6 = vector.shape_cast %5 : vector<1x1x28x256xbf16> to vector<28x256xbf16>
    %7 = arith.extf %6 : vector<28x256xbf16> to vector<28x256xf32>
    %cst_6 = arith.constant dense<0.000000e+00> : vector<256xf32>
    %8 = vector.multi_reduction <add>, %7, %cst_6 [0] : vector<28x256xf32> to vector<256xf32>
    %9 = vector.shape_cast %8 : vector<256xf32> to vector<1x256xf32>
    %c0_7 = arith.constant 0 : index
    %c0_8 = arith.constant 0 : index
    %c56 = arith.constant 56 : index
    %c0_9 = arith.constant 0 : index
    %10 = vector.load %arg2[%c0_7, %c0_8, %c56, %c0_9] : memref<1x8x256x256xbf16, #tpu.memory_space<vmem>>, vector<1x1x28x256xbf16>
    %11 = vector.shape_cast %10 : vector<1x1x28x256xbf16> to vector<28x256xbf16>
    %12 = arith.extf %11 : vector<28x256xbf16> to vector<28x256xf32>
    %cst_10 = arith.constant dense<0.000000e+00> : vector<256xf32>
    %13 = vector.multi_reduction <add>, %12, %cst_10 [0] : vector<28x256xf32> to vector<256xf32>
    %14 = vector.shape_cast %13 : vector<256xf32> to vector<1x256xf32>
    %c0_11 = arith.constant 0 : index
    %c0_12 = arith.constant 0 : index
    %c84 = arith.constant 84 : index
    %c0_13 = arith.constant 0 : index
    %15 = vector.load %arg2[%c0_11, %c0_12, %c84, %c0_13] : memref<1x8x256x256xbf16, #tpu.memory_space<vmem>>, vector<1x1x28x256xbf16>
    %16 = vector.shape_cast %15 : vector<1x1x28x256xbf16> to vector<28x256xbf16>
    %17 = arith.extf %16 : vector<28x256xbf16> to vector<28x256xf32>
    %cst_14 = arith.constant dense<0.000000e+00> : vector<256xf32>
    %18 = vector.multi_reduction <add>, %17, %cst_14 [0] : vector<28x256xf32> to vector<256xf32>
    %19 = vector.shape_cast %18 : vector<256xf32> to vector<1x256xf32>
    %c0_15 = arith.constant 0 : index
    %c0_16 = arith.constant 0 : index
    %c112 = arith.constant 112 : index
    %c0_17 = arith.constant 0 : index
    %20 = vector.load %arg2[%c0_15, %c0_16, %c112, %c0_17] : memref<1x8x256x256xbf16, #tpu.memory_space<vmem>>, vector<1x1x28x256xbf16>
    %21 = vector.shape_cast %20 : vector<1x1x28x256xbf16> to vector<28x256xbf16>
    %22 = arith.extf %21 : vector<28x256xbf16> to vector<28x256xf32>
    %cst_18 = arith.constant dense<0.000000e+00> : vector<256xf32>
    %23 = vector.multi_reduction <add>, %22, %cst_18 [0] : vector<28x256xf32> to vector<256xf32>
    %24 = vector.shape_cast %23 : vector<256xf32> to vector<1x256xf32>
    %c0_19 = arith.constant 0 : index
    %c0_20 = arith.constant 0 : index
    %c140 = arith.constant 140 : index
    %c0_21 = arith.constant 0 : index
    %25 = vector.load %arg2[%c0_19, %c0_20, %c140, %c0_21] : memref<1x8x256x256xbf16, #tpu.memory_space<vmem>>, vector<1x1x28x256xbf16>
    %26 = vector.shape_cast %25 : vector<1x1x28x256xbf16> to vector<28x256xbf16>
    %27 = arith.extf %26 : vector<28x256xbf16> to vector<28x256xf32>
    %cst_22 = arith.constant dense<0.000000e+00> : vector<256xf32>
    %28 = vector.multi_reduction <add>, %27, %cst_22 [0] : vector<28x256xf32> to vector<256xf32>
    %29 = vector.shape_cast %28 : vector<256xf32> to vector<1x256xf32>
    %c0_23 = arith.constant 0 : index
    %c0_24 = arith.constant 0 : index
    %c168 = arith.constant 168 : index
    %c0_25 = arith.constant 0 : index
    %30 = vector.load %arg2[%c0_23, %c0_24, %c168, %c0_25] : memref<1x8x256x256xbf16, #tpu.memory_space<vmem>>, vector<1x1x28x256xbf16>
    %31 = vector.shape_cast %30 : vector<1x1x28x256xbf16> to vector<28x256xbf16>
    %32 = arith.extf %31 : vector<28x256xbf16> to vector<28x256xf32>
    %cst_26 = arith.constant dense<0.000000e+00> : vector<256xf32>
    %33 = vector.multi_reduction <add>, %32, %cst_26 [0] : vector<28x256xf32> to vector<256xf32>
    %34 = vector.shape_cast %33 : vector<256xf32> to vector<1x256xf32>
    %c0_27 = arith.constant 0 : index
    %c0_28 = arith.constant 0 : index
    %c196 = arith.constant 196 : index
    %c0_29 = arith.constant 0 : index
    %35 = vector.load %arg2[%c0_27, %c0_28, %c196, %c0_29] : memref<1x8x256x256xbf16, #tpu.memory_space<vmem>>, vector<1x1x28x256xbf16>
    %36 = vector.shape_cast %35 : vector<1x1x28x256xbf16> to vector<28x256xbf16>
    %37 = arith.extf %36 : vector<28x256xbf16> to vector<28x256xf32>
    %cst_30 = arith.constant dense<0.000000e+00> : vector<256xf32>
    %38 = vector.multi_reduction <add>, %37, %cst_30 [0] : vector<28x256xf32> to vector<256xf32>
    %39 = vector.shape_cast %38 : vector<256xf32> to vector<1x256xf32>
    %c0_31 = arith.constant 0 : index
    %c0_32 = arith.constant 0 : index
    %c224 = arith.constant 224 : index
    %c0_33 = arith.constant 0 : index
    %40 = vector.load %arg2[%c0_31, %c0_32, %c224, %c0_33] : memref<1x8x256x256xbf16, #tpu.memory_space<vmem>>, vector<1x1x28x256xbf16>
    %41 = vector.shape_cast %40 : vector<1x1x28x256xbf16> to vector<28x256xbf16>
    %42 = arith.extf %41 : vector<28x256xbf16> to vector<28x256xf32>
    %cst_34 = arith.constant dense<0.000000e+00> : vector<256xf32>
    %43 = vector.multi_reduction <add>, %42, %cst_34 [0] : vector<28x256xf32> to vector<256xf32>
    %44 = vector.shape_cast %43 : vector<256xf32> to vector<1x256xf32>
    %45 = tpu.concatenate %4, %9, %14, %19, %24, %29, %34, %39, %44 in 0 : vector<1x256xf32>, vector<1x256xf32>, vector<1x256xf32>, vector<1x256xf32>, vector<1x256xf32>, vector<1x256xf32>, vector<1x256xf32>, vector<1x256xf32>, vector<1x256xf32> -> vector<9x256xf32>
    %c0_35 = arith.constant 0 : index
    %c0_36 = arith.constant 0 : index
    %46 = vector.load %arg6[%c0_35, %c0_36] : memref<9x2048xf32, #tpu.memory_space<vmem>>, vector<9x256xf32>
    tpu.vector_store %arg6[%c0_35, %c0_36], %45 {strides = array<i32>} : memref<9x2048xf32, #tpu.memory_space<vmem>>, vector<9x256xf32>,
    %c0_37 = arith.constant 0 : index
    %c1 = arith.constant 1 : index
    %c0_38 = arith.constant 0 : index
    %c0_39 = arith.constant 0 : index
    %47 = vector.load %arg2[%c0_37, %c1, %c0_38, %c0_39] : memref<1x8x256x256xbf16, #tpu.memory_space<vmem>>, vector<1x1x28x256xbf16>
    %48 = vector.shape_cast %47 : vector<1x1x28x256xbf16> to vector<28x256xbf16>
    %49 = arith.extf %48 : vector<28x256xbf16> to vector<28x256xf32>
    %cst_40 = arith.constant dense<0.000000e+00> : vector<256xf32>
    %50 = vector.multi_reduction <add>, %49, %cst_40 [0] : vector<28x256xf32> to vector<256xf32>
    %51 = vector.shape_cast %50 : vector<256xf32> to vector<1x256xf32>
    %c0_41 = arith.constant 0 : index
    %c1_42 = arith.constant 1 : index
    %c28_43 = arith.constant 28 : index
    %c0_44 = arith.constant 0 : index
    %52 = vector.load %arg2[%c0_41, %c1_42, %c28_43, %c0_44] : memref<1x8x256x256xbf16, #tpu.memory_space<vmem>>, vector<1x1x28x256xbf16>
    %53 = vector.shape_cast %52 : vector<1x1x28x256xbf16> to vector<28x256xbf16>
    %54 = arith.extf %53 : vector<28x256xbf16> to vector<28x256xf32>
    %cst_45 = arith.constant dense<0.000000e+00> : vector<256xf32>
    %55 = vector.multi_reduction <add>, %54, %cst_45 [0] : vector<28x256xf32> to vector<256xf32>
    %56 = vector.shape_cast %55 : vector<256xf32> to vector<1x256xf32>
    %c0_46 = arith.constant 0 : index
    %c1_47 = arith.constant 1 : index
    %c56_48 = arith.constant 56 : index
    %c0_49 = arith.constant 0 : index
    %57 = vector.load %arg2[%c0_46, %c1_47, %c56_48, %c0_49] : memref<1x8x256x256xbf16, #tpu.memory_space<vmem>>, vector<1x1x28x256xbf16>
    %58 = vector.shape_cast %57 : vector<1x1x28x256xbf16> to vector<28x256xbf16>
    %59 = arith.extf %58 : vector<28x256xbf16> to vector<28x256xf32>
    %cst_50 = arith.constant dense<0.000000e+00> : vector<256xf32>
    %60 = vector.multi_reduction <add>, %59, %cst_50 [0] : vector<28x256xf32> to vector<256xf32>
    %61 = vector.shape_cast %60 : vector<256xf32> to vector<1x256xf32>
    %c0_51 = arith.constant 0 : index
    %c1_52 = arith.constant 1 : index
    %c84_53 = arith.constant 84 : index
    %c0_54 = arith.constant 0 : index
    %62 = vector.load %arg2[%c0_51, %c1_52, %c84_53, %c0_54] : memref<1x8x256x256xbf16, #tpu.memory_space<vmem>>, vector<1x1x28x256xbf16>
    %63 = vector.shape_cast %62 : vector<1x1x28x256xbf16> to vector<28x256xbf16>
    %64 = arith.extf %63 : vector<28x256xbf16> to vector<28x256xf32>
    %cst_55 = arith.constant dense<0.000000e+00> : vector<256xf32>
    %65 = vector.multi_reduction <add>, %64, %cst_55 [0] : vector<28x256xf32> to vector<256xf32>
    %66 = vector.shape_cast %65 : vector<256xf32> to vector<1x256xf32>
    %c0_56 = arith.constant 0 : index
    %c1_57 = arith.constant 1 : index
    %c112_58 = arith.constant 112 : index
    %c0_59 = arith.constant 0 : index
    %67 = vector.load %arg2[%c0_56, %c1_57, %c112_58, %c0_59] : memref<1x8x256x256xbf16, #tpu.memory_space<vmem>>, vector<1x1x28x256xbf16>
    %68 = vector.shape_cast %67 : vector<1x1x28x256xbf16> to vector<28x256xbf16>
    %69 = arith.extf %68 : vector<28x256xbf16> to vector<28x256xf32>
    %cst_60 = arith.constant dense<0.000000e+00> : vector<256xf32>
    %70 = vector.multi_reduction <add>, %69, %cst_60 [0] : vector<28x256xf32> to vector<256xf32>
    %71 = vector.shape_cast %70 : vector<256xf32> to vector<1x256xf32>
    %c0_61 = arith.constant 0 : index
    %c1_62 = arith.constant 1 : index
    %c140_63 = arith.constant 140 : index
    %c0_64 = arith.constant 0 : index
    %72 = vector.load %arg2[%c0_61, %c1_62, %c140_63, %c0_64] : memref<1x8x256x256xbf16, #tpu.memory_space<vmem>>, vector<1x1x28x256xbf16>
    %73 = vector.shape_cast %72 : vector<1x1x28x256xbf16> to vector<28x256xbf16>
    %74 = arith.extf %73 : vector<28x256xbf16> to vector<28x256xf32>
    %cst_65 = arith.constant dense<0.000000e+00> : vector<256xf32>
    %75 = vector.multi_reduction <add>, %74, %cst_65 [0] : vector<28x256xf32> to vector<256xf32>
    %76 = vector.shape_cast %75 : vector<256xf32> to vector<1x256xf32>
    %c0_66 = arith.constant 0 : index
    %c1_67 = arith.constant 1 : index
    %c168_68 = arith.constant 168 : index
    %c0_69 = arith.constant 0 : index
    %77 = vector.load %arg2[%c0_66, %c1_67, %c168_68, %c0_69] : memref<1x8x256x256xbf16, #tpu.memory_space<vmem>>, vector<1x1x28x256xbf16>
    %78 = vector.shape_cast %77 : vector<1x1x28x256xbf16> to vector<28x256xbf16>
    %79 = arith.extf %78 : vector<28x256xbf16> to vector<28x256xf32>
    %cst_70 = arith.constant dense<0.000000e+00> : vector<256xf32>
    %80 = vector.multi_reduction <add>, %79, %cst_70 [0] : vector<28x256xf32> to vector<256xf32>
    %81 = vector.shape_cast %80 : vector<256xf32> to vector<1x256xf32>
    %c0_71 = arith.constant 0 : index
    %c1_72 = arith.constant 1 : index
    %c196_73 = arith.constant 196 : index
    %c0_74 = arith.constant 0 : index
    %82 = vector.load %arg2[%c0_71, %c1_72, %c196_73, %c0_74] : memref<1x8x256x256xbf16, #tpu.memory_space<vmem>>, vector<1x1x28x256xbf16>
    %83 = vector.shape_cast %82 : vector<1x1x28x256xbf16> to vector<28x256xbf16>
    %84 = arith.extf %83 : vector<28x256xbf16> to vector<28x256xf32>
    %cst_75 = arith.constant dense<0.000000e+00> : vector<256xf32>
    %85 = vector.multi_reduction <add>, %84, %cst_75 [0] : vector<28x256xf32> to vector<256xf32>
    %86 = vector.shape_cast %85 : vector<256xf32> to vector<1x256xf32>
    %c0_76 = arith.constant 0 : index
    %c1_77 = arith.constant 1 : index
    %c224_78 = arith.constant 224 : index
    %c0_79 = arith.constant 0 : index
    %87 = vector.load %arg2[%c0_76, %c1_77, %c224_78, %c0_79] : memref<1x8x256x256xbf16, #tpu.memory_space<vmem>>, vector<1x1x28x256xbf16>
    %88 = vector.shape_cast %87 : vector<1x1x28x256xbf16> to vector<28x256xbf16>
    %89 = arith.extf %88 : vector<28x256xbf16> to vector<28x256xf32>
    %cst_80 = arith.constant dense<0.000000e+00> : vector<256xf32>
    %90 = vector.multi_reduction <add>, %89, %cst_80 [0] : vector<28x256xf32> to vector<256xf32>
    %91 = vector.shape_cast %90 : vector<256xf32> to vector<1x256xf32>
    %92 = tpu.concatenate %51, %56, %61, %66, %71, %76, %81, %86, %91 in 0 : vector<1x256xf32>, vector<1x256xf32>, vector<1x256xf32>, vector<1x256xf32>, vector<1x256xf32>, vector<1x256xf32>, vector<1x256xf32>, vector<1x256xf32>, vector<1x256xf32> -> vector<9x256xf32>
    %c0_81 = arith.constant 0 : index
    %c256 = arith.constant 256 : index
    %93 = vector.load %arg6[%c0_81, %c256] : memref<9x2048xf32, #tpu.memory_space<vmem>>, vector<9x256xf32>
    tpu.vector_store %arg6[%c0_81, %c256], %92 {strides = array<i32>} : memref<9x2048xf32, #tpu.memory_space<vmem>>, vector<9x256xf32>,
    %c0_82 = arith.constant 0 : index
    %c2 = arith.constant 2 : index
    %c0_83 = arith.constant 0 : index
    %c0_84 = arith.constant 0 : index
    %94 = vector.load %arg2[%c0_82, %c2, %c0_83, %c0_84] : memref<1x8x256x256xbf16, #tpu.memory_space<vmem>>, vector<1x1x28x256xbf16>
    %95 = vector.shape_cast %94 : vector<1x1x28x256xbf16> to vector<28x256xbf16>
    %96 = arith.extf %95 : vector<28x256xbf16> to vector<28x256xf32>
    %cst_85 = arith.constant dense<0.000000e+00> : vector<256xf32>
    %97 = vector.multi_reduction <add>, %96, %cst_85 [0] : vector<28x256xf32> to vector<256xf32>
    %98 = vector.shape_cast %97 : vector<256xf32> to vector<1x256xf32>
    %c0_86 = arith.constant 0 : index
    %c2_87 = arith.constant 2 : index
    %c28_88 = arith.constant 28 : index
    %c0_89 = arith.constant 0 : index
    %99 = vector.load %arg2[%c0_86, %c2_87, %c28_88, %c0_89] : memref<1x8x256x256xbf16, #tpu.memory_space<vmem>>, vector<1x1x28x256xbf16>
    %100 = vector.shape_cast %99 : vector<1x1x28x256xbf16> to vector<28x256xbf16>
    %101 = arith.extf %100 : vector<28x256xbf16> to vector<28x256xf32>
    %cst_90 = arith.constant dense<0.000000e+00> : vector<256xf32>
    %102 = vector.multi_reduction <add>, %101, %cst_90 [0] : vector<28x256xf32> to vector<256xf32>
    %103 = vector.shape_cast %102 : vector<256xf32> to vector<1x256xf32>
    %c0_91 = arith.constant 0 : index
    %c2_92 = arith.constant 2 : index
    %c56_93 = arith.constant 56 : index
    %c0_94 = arith.constant 0 : index
    %104 = vector.load %arg2[%c0_91, %c2_92, %c56_93, %c0_94] : memref<1x8x256x256xbf16, #tpu.memory_space<vmem>>, vector<1x1x28x256xbf16>
    %105 = vector.shape_cast %104 : vector<1x1x28x256xbf16> to vector<28x256xbf16>
    %106 = arith.extf %105 : vector<28x256xbf16> to vector<28x256xf32>
    %cst_95 = arith.constant dense<0.000000e+00> : vector<256xf32>
    %107 = vector.multi_reduction <add>, %106, %cst_95 [0] : vector<28x256xf32> to vector<256xf32>
    %108 = vector.shape_cast %107 : vector<256xf32> to vector<1x256xf32>
    %c0_96 = arith.constant 0 : index
    %c2_97 = arith.constant 2 : index
    %c84_98 = arith.constant 84 : index
    %c0_99 = arith.constant 0 : index
    %109 = vector.load %arg2[%c0_96, %c2_97, %c84_98, %c0_99] : memref<1x8x256x256xbf16, #tpu.memory_space<vmem>>, vector<1x1x28x256xbf16>
    %110 = vector.shape_cast %109 : vector<1x1x28x256xbf16> to vector<28x256xbf16>
    %111 = arith.extf %110 : vector<28x256xbf16> to vector<28x256xf32>
    %cst_100 = arith.constant dense<0.000000e+00> : vector<256xf32>
    %112 = vector.multi_reduction <add>, %111, %cst_100 [0] : vector<28x256xf32> to vector<256xf32>
    %113 = vector.shape_cast %112 : vector<256xf32> to vector<1x256xf32>
    %c0_101 = arith.constant 0 : index
    %c2_102 = arith.constant 2 : index
    %c112_103 = arith.constant 112 : index
    %c0_104 = arith.constant 0 : index
    %114 = vector.load %arg2[%c0_101, %c2_102, %c112_103, %c0_104] : memref<1x8x256x256xbf16, #tpu.memory_space<vmem>>, vector<1x1x28x256xbf16>
    %115 = vector.shape_cast %114 : vector<1x1x28x256xbf16> to vector<28x256xbf16>
    %116 = arith.extf %115 : vector<28x256xbf16> to vector<28x256xf32>
    %cst_105 = arith.constant dense<0.000000e+00> : vector<256xf32>
    %117 = vector.multi_reduction <add>, %116, %cst_105 [0] : vector<28x256xf32> to vector<256xf32>
    %118 = vector.shape_cast %117 : vector<256xf32> to vector<1x256xf32>
    %c0_106 = arith.constant 0 : index
    %c2_107 = arith.constant 2 : index
    %c140_108 = arith.constant 140 : index
    %c0_109 = arith.constant 0 : index
    %119 = vector.load %arg2[%c0_106, %c2_107, %c140_108, %c0_109] : memref<1x8x256x256xbf16, #tpu.memory_space<vmem>>, vector<1x1x28x256xbf16>
    %120 = vector.shape_cast %119 : vector<1x1x28x256xbf16> to vector<28x256xbf16>
    %121 = arith.extf %120 : vector<28x256xbf16> to vector<28x256xf32>
    %cst_110 = arith.constant dense<0.000000e+00> : vector<256xf32>
    %122 = vector.multi_reduction <add>, %121, %cst_110 [0] : vector<28x256xf32> to vector<256xf32>
    %123 = vector.shape_cast %122 : vector<256xf32> to vector<1x256xf32>
    %c0_111 = arith.constant 0 : index
    %c2_112 = arith.constant 2 : index
    %c168_113 = arith.constant 168 : index
    %c0_114 = arith.constant 0 : index
    %124 = vector.load %arg2[%c0_111, %c2_112, %c168_113, %c0_114] : memref<1x8x256x256xbf16, #tpu.memory_space<vmem>>, vector<1x1x28x256xbf16>
    %125 = vector.shape_cast %124 : vector<1x1x28x256xbf16> to vector<28x256xbf16>
    %126 = arith.extf %125 : vector<28x256xbf16> to vector<28x256xf32>
    %cst_115 = arith.constant dense<0.000000e+00> : vector<256xf32>
    %127 = vector.multi_reduction <add>, %126, %cst_115 [0] : vector<28x256xf32> to vector<256xf32>
    %128 = vector.shape_cast %127 : vector<256xf32> to vector<1x256xf32>
    %c0_116 = arith.constant 0 : index
    %c2_117 = arith.constant 2 : index
    %c196_118 = arith.constant 196 : index
    %c0_119 = arith.constant 0 : index
    %129 = vector.load %arg2[%c0_116, %c2_117, %c196_118, %c0_119] : memref<1x8x256x256xbf16, #tpu.memory_space<vmem>>, vector<1x1x28x256xbf16>
    %130 = vector.shape_cast %129 : vector<1x1x28x256xbf16> to vector<28x256xbf16>
    %131 = arith.extf %130 : vector<28x256xbf16> to vector<28x256xf32>
    %cst_120 = arith.constant dense<0.000000e+00> : vector<256xf32>
    %132 = vector.multi_reduction <add>, %131, %cst_120 [0] : vector<28x256xf32> to vector<256xf32>
    %133 = vector.shape_cast %132 : vector<256xf32> to vector<1x256xf32>
    %c0_121 = arith.constant 0 : index
    %c2_122 = arith.constant 2 : index
    %c224_123 = arith.constant 224 : index
    %c0_124 = arith.constant 0 : index
    %134 = vector.load %arg2[%c0_121, %c2_122, %c224_123, %c0_124] : memref<1x8x256x256xbf16, #tpu.memory_space<vmem>>, vector<1x1x28x256xbf16>
    %135 = vector.shape_cast %134 : vector<1x1x28x256xbf16> to vector<28x256xbf16>
    %136 = arith.extf %135 : vector<28x256xbf16> to vector<28x256xf32>
    %cst_125 = arith.constant dense<0.000000e+00> : vector<256xf32>
    %137 = vector.multi_reduction <add>, %136, %cst_125 [0] : vector<28x256xf32> to vector<256xf32>
    %138 = vector.shape_cast %137 : vector<256xf32> to vector<1x256xf32>
    %139 = tpu.concatenate %98, %103, %108, %113, %118, %123, %128, %133, %138 in 0 : vector<1x256xf32>, vector<1x256xf32>, vector<1x256xf32>, vector<1x256xf32>, vector<1x256xf32>, vector<1x256xf32>, vector<1x256xf32>, vector<1x256xf32>, vector<1x256xf32> -> vector<9x256xf32>
    %c0_126 = arith.constant 0 : index
    %c512 = arith.constant 512 : index
    %140 = vector.load %arg6[%c0_126, %c512] : memref<9x2048xf32, #tpu.memory_space<vmem>>, vector<9x256xf32>
    tpu.vector_store %arg6[%c0_126, %c512], %139 {strides = array<i32>} : memref<9x2048xf32, #tpu.memory_space<vmem>>, vector<9x256xf32>,
    %c0_127 = arith.constant 0 : index
    %c3 = arith.constant 3 : index
    %c0_128 = arith.constant 0 : index
    %c0_129 = arith.constant 0 : index
    %141 = vector.load %arg2[%c0_127, %c3, %c0_128, %c0_129] : memref<1x8x256x256xbf16, #tpu.memory_space<vmem>>, vector<1x1x28x256xbf16>
    %142 = vector.shape_cast %141 : vector<1x1x28x256xbf16> to vector<28x256xbf16>
    %143 = arith.extf %142 : vector<28x256xbf16> to vector<28x256xf32>
    %cst_130 = arith.constant dense<0.000000e+00> : vector<256xf32>
    %144 = vector.multi_reduction <add>, %143, %cst_130 [0] : vector<28x256xf32> to vector<256xf32>
    %145 = vector.shape_cast %144 : vector<256xf32> to vector<1x256xf32>
    %c0_131 = arith.constant 0 : index
    %c3_132 = arith.constant 3 : index
    %c28_133 = arith.constant 28 : index
    %c0_134 = arith.constant 0 : index
    %146 = vector.load %arg2[%c0_131, %c3_132, %c28_133, %c0_134] : memref<1x8x256x256xbf16, #tpu.memory_space<vmem>>, vector<1x1x28x256xbf16>
    %147 = vector.shape_cast %146 : vector<1x1x28x256xbf16> to vector<28x256xbf16>
    %148 = arith.extf %147 : vector<28x256xbf16> to vector<28x256xf32>
    %cst_135 = arith.constant dense<0.000000e+00> : vector<256xf32>
    %149 = vector.multi_reduction <add>, %148, %cst_135 [0] : vector<28x256xf32> to vector<256xf32>
    %150 = vector.shape_cast %149 : vector<256xf32> to vector<1x256xf32>
    %c0_136 = arith.constant 0 : index
    %c3_137 = arith.constant 3 : index
    %c56_138 = arith.constant 56 : index
    %c0_139 = arith.constant 0 : index
    %151 = vector.load %arg2[%c0_136, %c3_137, %c56_138, %c0_139] : memref<1x8x256x256xbf16, #tpu.memory_space<vmem>>, vector<1x1x28x256xbf16>
    %152 = vector.shape_cast %151 : vector<1x1x28x256xbf16> to vector<28x256xbf16>
    %153 = arith.extf %152 : vector<28x256xbf16> to vector<28x256xf32>
    %cst_140 = arith.constant dense<0.000000e+00> : vector<256xf32>
    %154 = vector.multi_reduction <add>, %153, %cst_140 [0] : vector<28x256xf32> to vector<256xf32>
    %155 = vector.shape_cast %154 : vector<256xf32> to vector<1x256xf32>
    %c0_141 = arith.constant 0 : index
    %c3_142 = arith.constant 3 : index
    %c84_143 = arith.constant 84 : index
    %c0_144 = arith.constant 0 : index
    %156 = vector.load %arg2[%c0_141, %c3_142, %c84_143, %c0_144] : memref<1x8x256x256xbf16, #tpu.memory_space<vmem>>, vector<1x1x28x256xbf16>
    %157 = vector.shape_cast %156 : vector<1x1x28x256xbf16> to vector<28x256xbf16>
    %158 = arith.extf %157 : vector<28x256xbf16> to vector<28x256xf32>
    %cst_145 = arith.constant dense<0.000000e+00> : vector<256xf32>
    %159 = vector.multi_reduction <add>, %158, %cst_145 [0] : vector<28x256xf32> to vector<256xf32>
    %160 = vector.shape_cast %159 : vector<256xf32> to vector<1x256xf32>
    %c0_146 = arith.constant 0 : index
    %c3_147 = arith.constant 3 : index
    %c112_148 = arith.constant 112 : index
    %c0_149 = arith.constant 0 : index
    %161 = vector.load %arg2[%c0_146, %c3_147, %c112_148, %c0_149] : memref<1x8x256x256xbf16, #tpu.memory_space<vmem>>, vector<1x1x28x256xbf16>
    %162 = vector.shape_cast %161 : vector<1x1x28x256xbf16> to vector<28x256xbf16>
    %163 = arith.extf %162 : vector<28x256xbf16> to vector<28x256xf32>
    %cst_150 = arith.constant dense<0.000000e+00> : vector<256xf32>
    %164 = vector.multi_reduction <add>, %163, %cst_150 [0] : vector<28x256xf32> to vector<256xf32>
    %165 = vector.shape_cast %164 : vector<256xf32> to vector<1x256xf32>
    %c0_151 = arith.constant 0 : index
    %c3_152 = arith.constant 3 : index
    %c140_153 = arith.constant 140 : index
    %c0_154 = arith.constant 0 : index
    %166 = vector.load %arg2[%c0_151, %c3_152, %c140_153, %c0_154] : memref<1x8x256x256xbf16, #tpu.memory_space<vmem>>, vector<1x1x28x256xbf16>
    %167 = vector.shape_cast %166 : vector<1x1x28x256xbf16> to vector<28x256xbf16>
    %168 = arith.extf %167 : vector<28x256xbf16> to vector<28x256xf32>
    %cst_155 = arith.constant dense<0.000000e+00> : vector<256xf32>
    %169 = vector.multi_reduction <add>, %168, %cst_155 [0] : vector<28x256xf32> to vector<256xf32>
    %170 = vector.shape_cast %169 : vector<256xf32> to vector<1x256xf32>
    %c0_156 = arith.constant 0 : index
    %c3_157 = arith.constant 3 : index
    %c168_158 = arith.constant 168 : index
    %c0_159 = arith.constant 0 : index
    %171 = vector.load %arg2[%c0_156, %c3_157, %c168_158, %c0_159] : memref<1x8x256x256xbf16, #tpu.memory_space<vmem>>, vector<1x1x28x256xbf16>
    %172 = vector.shape_cast %171 : vector<1x1x28x256xbf16> to vector<28x256xbf16>
    %173 = arith.extf %172 : vector<28x256xbf16> to vector<28x256xf32>
    %cst_160 = arith.constant dense<0.000000e+00> : vector<256xf32>
    %174 = vector.multi_reduction <add>, %173, %cst_160 [0] : vector<28x256xf32> to vector<256xf32>
    %175 = vector.shape_cast %174 : vector<256xf32> to vector<1x256xf32>
    %c0_161 = arith.constant 0 : index
    %c3_162 = arith.constant 3 : index
    %c196_163 = arith.constant 196 : index
    %c0_164 = arith.constant 0 : index
    %176 = vector.load %arg2[%c0_161, %c3_162, %c196_163, %c0_164] : memref<1x8x256x256xbf16, #tpu.memory_space<vmem>>, vector<1x1x28x256xbf16>
    %177 = vector.shape_cast %176 : vector<1x1x28x256xbf16> to vector<28x256xbf16>
    %178 = arith.extf %177 : vector<28x256xbf16> to vector<28x256xf32>
    %cst_165 = arith.constant dense<0.000000e+00> : vector<256xf32>
    %179 = vector.multi_reduction <add>, %178, %cst_165 [0] : vector<28x256xf32> to vector<256xf32>
    %180 = vector.shape_cast %179 : vector<256xf32> to vector<1x256xf32>
    %c0_166 = arith.constant 0 : index
    %c3_167 = arith.constant 3 : index
    %c224_168 = arith.constant 224 : index
    %c0_169 = arith.constant 0 : index
    %181 = vector.load %arg2[%c0_166, %c3_167, %c224_168, %c0_169] : memref<1x8x256x256xbf16, #tpu.memory_space<vmem>>, vector<1x1x28x256xbf16>
    %182 = vector.shape_cast %181 : vector<1x1x28x256xbf16> to vector<28x256xbf16>
    %183 = arith.extf %182 : vector<28x256xbf16> to vector<28x256xf32>
    %cst_170 = arith.constant dense<0.000000e+00> : vector<256xf32>
    %184 = vector.multi_reduction <add>, %183, %cst_170 [0] : vector<28x256xf32> to vector<256xf32>
    %185 = vector.shape_cast %184 : vector<256xf32> to vector<1x256xf32>
    %186 = tpu.concatenate %145, %150, %155, %160, %165, %170, %175, %180, %185 in 0 : vector<1x256xf32>, vector<1x256xf32>, vector<1x256xf32>, vector<1x256xf32>, vector<1x256xf32>, vector<1x256xf32>, vector<1x256xf32>, vector<1x256xf32>, vector<1x256xf32> -> vector<9x256xf32>
    %c0_171 = arith.constant 0 : index
    %c768 = arith.constant 768 : index
    %187 = vector.load %arg6[%c0_171, %c768] : memref<9x2048xf32, #tpu.memory_space<vmem>>, vector<9x256xf32>
    tpu.vector_store %arg6[%c0_171, %c768], %186 {strides = array<i32>} : memref<9x2048xf32, #tpu.memory_space<vmem>>, vector<9x256xf32>,
    %c0_172 = arith.constant 0 : index
    %c4 = arith.constant 4 : index
    %c0_173 = arith.constant 0 : index
    %c0_174 = arith.constant 0 : index
    %188 = vector.load %arg2[%c0_172, %c4, %c0_173, %c0_174] : memref<1x8x256x256xbf16, #tpu.memory_space<vmem>>, vector<1x1x28x256xbf16>
    %189 = vector.shape_cast %188 : vector<1x1x28x256xbf16> to vector<28x256xbf16>
    %190 = arith.extf %189 : vector<28x256xbf16> to vector<28x256xf32>
    %cst_175 = arith.constant dense<0.000000e+00> : vector<256xf32>
    %191 = vector.multi_reduction <add>, %190, %cst_175 [0] : vector<28x256xf32> to vector<256xf32>
    %192 = vector.shape_cast %191 : vector<256xf32> to vector<1x256xf32>
    %c0_176 = arith.constant 0 : index
    %c4_177 = arith.constant 4 : index
    %c28_178 = arith.constant 28 : index
    %c0_179 = arith.constant 0 : index
    %193 = vector.load %arg2[%c0_176, %c4_177, %c28_178, %c0_179] : memref<1x8x256x256xbf16, #tpu.memory_space<vmem>>, vector<1x1x28x256xbf16>
    %194 = vector.shape_cast %193 : vector<1x1x28x256xbf16> to vector<28x256xbf16>
    %195 = arith.extf %194 : vector<28x256xbf16> to vector<28x256xf32>
    %cst_180 = arith.constant dense<0.000000e+00> : vector<256xf32>
    %196 = vector.multi_reduction <add>, %195, %cst_180 [0] : vector<28x256xf32> to vector<256xf32>
    %197 = vector.shape_cast %196 : vector<256xf32> to vector<1x256xf32>
    %c0_181 = arith.constant 0 : index
    %c4_182 = arith.constant 4 : index
    %c56_183 = arith.constant 56 : index
    %c0_184 = arith.constant 0 : index
    %198 = vector.load %arg2[%c0_181, %c4_182, %c56_183, %c0_184] : memref<1x8x256x256xbf16, #tpu.memory_space<vmem>>, vector<1x1x28x256xbf16>
    %199 = vector.shape_cast %198 : vector<1x1x28x256xbf16> to vector<28x256xbf16>
    %200 = arith.extf %199 : vector<28x256xbf16> to vector<28x256xf32>
    %cst_185 = arith.constant dense<0.000000e+00> : vector<256xf32>
    %201 = vector.multi_reduction <add>, %200, %cst_185 [0] : vector<28x256xf32> to vector<256xf32>
    %202 = vector.shape_cast %201 : vector<256xf32> to vector<1x256xf32>
    %c0_186 = arith.constant 0 : index
    %c4_187 = arith.constant 4 : index
    %c84_188 = arith.constant 84 : index
    %c0_189 = arith.constant 0 : index
    %203 = vector.load %arg2[%c0_186, %c4_187, %c84_188, %c0_189] : memref<1x8x256x256xbf16, #tpu.memory_space<vmem>>, vector<1x1x28x256xbf16>
    %204 = vector.shape_cast %203 : vector<1x1x28x256xbf16> to vector<28x256xbf16>
    %205 = arith.extf %204 : vector<28x256xbf16> to vector<28x256xf32>
    %cst_190 = arith.constant dense<0.000000e+00> : vector<256xf32>
    %206 = vector.multi_reduction <add>, %205, %cst_190 [0] : vector<28x256xf32> to vector<256xf32>
    %207 = vector.shape_cast %206 : vector<256xf32> to vector<1x256xf32>
    %c0_191 = arith.constant 0 : index
    %c4_192 = arith.constant 4 : index
    %c112_193 = arith.constant 112 : index
    %c0_194 = arith.constant 0 : index
    %208 = vector.load %arg2[%c0_191, %c4_192, %c112_193, %c0_194] : memref<1x8x256x256xbf16, #tpu.memory_space<vmem>>, vector<1x1x28x256xbf16>
    %209 = vector.shape_cast %208 : vector<1x1x28x256xbf16> to vector<28x256xbf16>
    %210 = arith.extf %209 : vector<28x256xbf16> to vector<28x256xf32>
    %cst_195 = arith.constant dense<0.000000e+00> : vector<256xf32>
    %211 = vector.multi_reduction <add>, %210, %cst_195 [0] : vector<28x256xf32> to vector<256xf32>
    %212 = vector.shape_cast %211 : vector<256xf32> to vector<1x256xf32>
    %c0_196 = arith.constant 0 : index
    %c4_197 = arith.constant 4 : index
    %c140_198 = arith.constant 140 : index
    %c0_199 = arith.constant 0 : index
    %213 = vector.load %arg2[%c0_196, %c4_197, %c140_198, %c0_199] : memref<1x8x256x256xbf16, #tpu.memory_space<vmem>>, vector<1x1x28x256xbf16>
    %214 = vector.shape_cast %213 : vector<1x1x28x256xbf16> to vector<28x256xbf16>
    %215 = arith.extf %214 : vector<28x256xbf16> to vector<28x256xf32>
    %cst_200 = arith.constant dense<0.000000e+00> : vector<256xf32>
    %216 = vector.multi_reduction <add>, %215, %cst_200 [0] : vector<28x256xf32> to vector<256xf32>
    %217 = vector.shape_cast %216 : vector<256xf32> to vector<1x256xf32>
    %c0_201 = arith.constant 0 : index
    %c4_202 = arith.constant 4 : index
    %c168_203 = arith.constant 168 : index
    %c0_204 = arith.constant 0 : index
    %218 = vector.load %arg2[%c0_201, %c4_202, %c168_203, %c0_204] : memref<1x8x256x256xbf16, #tpu.memory_space<vmem>>, vector<1x1x28x256xbf16>
    %219 = vector.shape_cast %218 : vector<1x1x28x256xbf16> to vector<28x256xbf16>
    %220 = arith.extf %219 : vector<28x256xbf16> to vector<28x256xf32>
    %cst_205 = arith.constant dense<0.000000e+00> : vector<256xf32>
    %221 = vector.multi_reduction <add>, %220, %cst_205 [0] : vector<28x256xf32> to vector<256xf32>
    %222 = vector.shape_cast %221 : vector<256xf32> to vector<1x256xf32>
    %c0_206 = arith.constant 0 : index
    %c4_207 = arith.constant 4 : index
    %c196_208 = arith.constant 196 : index
    %c0_209 = arith.constant 0 : index
    %223 = vector.load %arg2[%c0_206, %c4_207, %c196_208, %c0_209] : memref<1x8x256x256xbf16, #tpu.memory_space<vmem>>, vector<1x1x28x256xbf16>
    %224 = vector.shape_cast %223 : vector<1x1x28x256xbf16> to vector<28x256xbf16>
    %225 = arith.extf %224 : vector<28x256xbf16> to vector<28x256xf32>
    %cst_210 = arith.constant dense<0.000000e+00> : vector<256xf32>
    %226 = vector.multi_reduction <add>, %225, %cst_210 [0] : vector<28x256xf32> to vector<256xf32>
    %227 = vector.shape_cast %226 : vector<256xf32> to vector<1x256xf32>
    %c0_211 = arith.constant 0 : index
    %c4_212 = arith.constant 4 : index
    %c224_213 = arith.constant 224 : index
    %c0_214 = arith.constant 0 : index
    %228 = vector.load %arg2[%c0_211, %c4_212, %c224_213, %c0_214] : memref<1x8x256x256xbf16, #tpu.memory_space<vmem>>, vector<1x1x28x256xbf16>
    %229 = vector.shape_cast %228 : vector<1x1x28x256xbf16> to vector<28x256xbf16>
    %230 = arith.extf %229 : vector<28x256xbf16> to vector<28x256xf32>
    %cst_215 = arith.constant dense<0.000000e+00> : vector<256xf32>
    %231 = vector.multi_reduction <add>, %230, %cst_215 [0] : vector<28x256xf32> to vector<256xf32>
    %232 = vector.shape_cast %231 : vector<256xf32> to vector<1x256xf32>
    %233 = tpu.concatenate %192, %197, %202, %207, %212, %217, %222, %227, %232 in 0 : vector<1x256xf32>, vector<1x256xf32>, vector<1x256xf32>, vector<1x256xf32>, vector<1x256xf32>, vector<1x256xf32>, vector<1x256xf32>, vector<1x256xf32>, vector<1x256xf32> -> vector<9x256xf32>
    %c0_216 = arith.constant 0 : index
    %c1024 = arith.constant 1024 : index
    %234 = vector.load %arg6[%c0_216, %c1024] : memref<9x2048xf32, #tpu.memory_space<vmem>>, vector<9x256xf32>
    tpu.vector_store %arg6[%c0_216, %c1024], %233 {strides = array<i32>} : memref<9x2048xf32, #tpu.memory_space<vmem>>, vector<9x256xf32>,
    %c0_217 = arith.constant 0 : index
    %c5 = arith.constant 5 : index
    %c0_218 = arith.constant 0 : index
    %c0_219 = arith.constant 0 : index
    %235 = vector.load %arg2[%c0_217, %c5, %c0_218, %c0_219] : memref<1x8x256x256xbf16, #tpu.memory_space<vmem>>, vector<1x1x28x256xbf16>
    %236 = vector.shape_cast %235 : vector<1x1x28x256xbf16> to vector<28x256xbf16>
    %237 = arith.extf %236 : vector<28x256xbf16> to vector<28x256xf32>
    %cst_220 = arith.constant dense<0.000000e+00> : vector<256xf32>
    %238 = vector.multi_reduction <add>, %237, %cst_220 [0] : vector<28x256xf32> to vector<256xf32>
    %239 = vector.shape_cast %238 : vector<256xf32> to vector<1x256xf32>
    %c0_221 = arith.constant 0 : index
    %c5_222 = arith.constant 5 : index
    %c28_223 = arith.constant 28 : index
    %c0_224 = arith.constant 0 : index
    %240 = vector.load %arg2[%c0_221, %c5_222, %c28_223, %c0_224] : memref<1x8x256x256xbf16, #tpu.memory_space<vmem>>, vector<1x1x28x256xbf16>
    %241 = vector.shape_cast %240 : vector<1x1x28x256xbf16> to vector<28x256xbf16>
    %242 = arith.extf %241 : vector<28x256xbf16> to vector<28x256xf32>
    %cst_225 = arith.constant dense<0.000000e+00> : vector<256xf32>
    %243 = vector.multi_reduction <add>, %242, %cst_225 [0] : vector<28x256xf32> to vector<256xf32>
    %244 = vector.shape_cast %243 : vector<256xf32> to vector<1x256xf32>
    %c0_226 = arith.constant 0 : index
    %c5_227 = arith.constant 5 : index
    %c56_228 = arith.constant 56 : index
    %c0_229 = arith.constant 0 : index
    %245 = vector.load %arg2[%c0_226, %c5_227, %c56_228, %c0_229] : memref<1x8x256x256xbf16, #tpu.memory_space<vmem>>, vector<1x1x28x256xbf16>
    %246 = vector.shape_cast %245 : vector<1x1x28x256xbf16> to vector<28x256xbf16>
    %247 = arith.extf %246 : vector<28x256xbf16> to vector<28x256xf32>
    %cst_230 = arith.constant dense<0.000000e+00> : vector<256xf32>
    %248 = vector.multi_reduction <add>, %247, %cst_230 [0] : vector<28x256xf32> to vector<256xf32>
    %249 = vector.shape_cast %248 : vector<256xf32> to vector<1x256xf32>
    %c0_231 = arith.constant 0 : index
    %c5_232 = arith.constant 5 : index
    %c84_233 = arith.constant 84 : index
    %c0_234 = arith.constant 0 : index
    %250 = vector.load %arg2[%c0_231, %c5_232, %c84_233, %c0_234] : memref<1x8x256x256xbf16, #tpu.memory_space<vmem>>, vector<1x1x28x256xbf16>
    %251 = vector.shape_cast %250 : vector<1x1x28x256xbf16> to vector<28x256xbf16>
    %252 = arith.extf %251 : vector<28x256xbf16> to vector<28x256xf32>
    %cst_235 = arith.constant dense<0.000000e+00> : vector<256xf32>
    %253 = vector.multi_reduction <add>, %252, %cst_235 [0] : vector<28x256xf32> to vector<256xf32>
    %254 = vector.shape_cast %253 : vector<256xf32> to vector<1x256xf32>
    %c0_236 = arith.constant 0 : index
    %c5_237 = arith.constant 5 : index
    %c112_238 = arith.constant 112 : index
    %c0_239 = arith.constant 0 : index
    %255 = vector.load %arg2[%c0_236, %c5_237, %c112_238, %c0_239] : memref<1x8x256x256xbf16, #tpu.memory_space<vmem>>, vector<1x1x28x256xbf16>
    %256 = vector.shape_cast %255 : vector<1x1x28x256xbf16> to vector<28x256xbf16>
    %257 = arith.extf %256 : vector<28x256xbf16> to vector<28x256xf32>
    %cst_240 = arith.constant dense<0.000000e+00> : vector<256xf32>
    %258 = vector.multi_reduction <add>, %257, %cst_240 [0] : vector<28x256xf32> to vector<256xf32>
    %259 = vector.shape_cast %258 : vector<256xf32> to vector<1x256xf32>
    %c0_241 = arith.constant 0 : index
    %c5_242 = arith.constant 5 : index
    %c140_243 = arith.constant 140 : index
    %c0_244 = arith.constant 0 : index
    %260 = vector.load %arg2[%c0_241, %c5_242, %c140_243, %c0_244] : memref<1x8x256x256xbf16, #tpu.memory_space<vmem>>, vector<1x1x28x256xbf16>
    %261 = vector.shape_cast %260 : vector<1x1x28x256xbf16> to vector<28x256xbf16>
    %262 = arith.extf %261 : vector<28x256xbf16> to vector<28x256xf32>
    %cst_245 = arith.constant dense<0.000000e+00> : vector<256xf32>
    %263 = vector.multi_reduction <add>, %262, %cst_245 [0] : vector<28x256xf32> to vector<256xf32>
    %264 = vector.shape_cast %263 : vector<256xf32> to vector<1x256xf32>
    %c0_246 = arith.constant 0 : index
    %c5_247 = arith.constant 5 : index
    %c168_248 = arith.constant 168 : index
    %c0_249 = arith.constant 0 : index
    %265 = vector.load %arg2[%c0_246, %c5_247, %c168_248, %c0_249] : memref<1x8x256x256xbf16, #tpu.memory_space<vmem>>, vector<1x1x28x256xbf16>
    %266 = vector.shape_cast %265 : vector<1x1x28x256xbf16> to vector<28x256xbf16>
    %267 = arith.extf %266 : vector<28x256xbf16> to vector<28x256xf32>
    %cst_250 = arith.constant dense<0.000000e+00> : vector<256xf32>
    %268 = vector.multi_reduction <add>, %267, %cst_250 [0] : vector<28x256xf32> to vector<256xf32>
    %269 = vector.shape_cast %268 : vector<256xf32> to vector<1x256xf32>
    %c0_251 = arith.constant 0 : index
    %c5_252 = arith.constant 5 : index
    %c196_253 = arith.constant 196 : index
    %c0_254 = arith.constant 0 : index
    %270 = vector.load %arg2[%c0_251, %c5_252, %c196_253, %c0_254] : memref<1x8x256x256xbf16, #tpu.memory_space<vmem>>, vector<1x1x28x256xbf16>
    %271 = vector.shape_cast %270 : vector<1x1x28x256xbf16> to vector<28x256xbf16>
    %272 = arith.extf %271 : vector<28x256xbf16> to vector<28x256xf32>
    %cst_255 = arith.constant dense<0.000000e+00> : vector<256xf32>
    %273 = vector.multi_reduction <add>, %272, %cst_255 [0] : vector<28x256xf32> to vector<256xf32>
    %274 = vector.shape_cast %273 : vector<256xf32> to vector<1x256xf32>
    %c0_256 = arith.constant 0 : index
    %c5_257 = arith.constant 5 : index
    %c224_258 = arith.constant 224 : index
    %c0_259 = arith.constant 0 : index
    %275 = vector.load %arg2[%c0_256, %c5_257, %c224_258, %c0_259] : memref<1x8x256x256xbf16, #tpu.memory_space<vmem>>, vector<1x1x28x256xbf16>
    %276 = vector.shape_cast %275 : vector<1x1x28x256xbf16> to vector<28x256xbf16>
    %277 = arith.extf %276 : vector<28x256xbf16> to vector<28x256xf32>
    %cst_260 = arith.constant dense<0.000000e+00> : vector<256xf32>
    %278 = vector.multi_reduction <add>, %277, %cst_260 [0] : vector<28x256xf32> to vector<256xf32>
    %279 = vector.shape_cast %278 : vector<256xf32> to vector<1x256xf32>
    %280 = tpu.concatenate %239, %244, %249, %254, %259, %264, %269, %274, %279 in 0 : vector<1x256xf32>, vector<1x256xf32>, vector<1x256xf32>, vector<1x256xf32>, vector<1x256xf32>, vector<1x256xf32>, vector<1x256xf32>, vector<1x256xf32>, vector<1x256xf32> -> vector<9x256xf32>
    %c0_261 = arith.constant 0 : index
    %c1280 = arith.constant 1280 : index
    %281 = vector.load %arg6[%c0_261, %c1280] : memref<9x2048xf32, #tpu.memory_space<vmem>>, vector<9x256xf32>
    tpu.vector_store %arg6[%c0_261, %c1280], %280 {strides = array<i32>} : memref<9x2048xf32, #tpu.memory_space<vmem>>, vector<9x256xf32>,
    %c0_262 = arith.constant 0 : index
    %c6 = arith.constant 6 : index
    %c0_263 = arith.constant 0 : index
    %c0_264 = arith.constant 0 : index
    %282 = vector.load %arg2[%c0_262, %c6, %c0_263, %c0_264] : memref<1x8x256x256xbf16, #tpu.memory_space<vmem>>, vector<1x1x28x256xbf16>
    %283 = vector.shape_cast %282 : vector<1x1x28x256xbf16> to vector<28x256xbf16>
    %284 = arith.extf %283 : vector<28x256xbf16> to vector<28x256xf32>
    %cst_265 = arith.constant dense<0.000000e+00> : vector<256xf32>
    %285 = vector.multi_reduction <add>, %284, %cst_265 [0] : vector<28x256xf32> to vector<256xf32>
    %286 = vector.shape_cast %285 : vector<256xf32> to vector<1x256xf32>
    %c0_266 = arith.constant 0 : index
    %c6_267 = arith.constant 6 : index
    %c28_268 = arith.constant 28 : index
    %c0_269 = arith.constant 0 : index
    %287 = vector.load %arg2[%c0_266, %c6_267, %c28_268, %c0_269] : memref<1x8x256x256xbf16, #tpu.memory_space<vmem>>, vector<1x1x28x256xbf16>
    %288 = vector.shape_cast %287 : vector<1x1x28x256xbf16> to vector<28x256xbf16>
    %289 = arith.extf %288 : vector<28x256xbf16> to vector<28x256xf32>
    %cst_270 = arith.constant dense<0.000000e+00> : vector<256xf32>
    %290 = vector.multi_reduction <add>, %289, %cst_270 [0] : vector<28x256xf32> to vector<256xf32>
    %291 = vector.shape_cast %290 : vector<256xf32> to vector<1x256xf32>
    %c0_271 = arith.constant 0 : index
    %c6_272 = arith.constant 6 : index
    %c56_273 = arith.constant 56 : index
    %c0_274 = arith.constant 0 : index
    %292 = vector.load %arg2[%c0_271, %c6_272, %c56_273, %c0_274] : memref<1x8x256x256xbf16, #tpu.memory_space<vmem>>, vector<1x1x28x256xbf16>
    %293 = vector.shape_cast %292 : vector<1x1x28x256xbf16> to vector<28x256xbf16>
    %294 = arith.extf %293 : vector<28x256xbf16> to vector<28x256xf32>
    %cst_275 = arith.constant dense<0.000000e+00> : vector<256xf32>
    %295 = vector.multi_reduction <add>, %294, %cst_275 [0] : vector<28x256xf32> to vector<256xf32>
    %296 = vector.shape_cast %295 : vector<256xf32> to vector<1x256xf32>
    %c0_276 = arith.constant 0 : index
    %c6_277 = arith.constant 6 : index
    %c84_278 = arith.constant 84 : index
    %c0_279 = arith.constant 0 : index
    %297 = vector.load %arg2[%c0_276, %c6_277, %c84_278, %c0_279] : memref<1x8x256x256xbf16, #tpu.memory_space<vmem>>, vector<1x1x28x256xbf16>
    %298 = vector.shape_cast %297 : vector<1x1x28x256xbf16> to vector<28x256xbf16>
    %299 = arith.extf %298 : vector<28x256xbf16> to vector<28x256xf32>
    %cst_280 = arith.constant dense<0.000000e+00> : vector<256xf32>
    %300 = vector.multi_reduction <add>, %299, %cst_280 [0] : vector<28x256xf32> to vector<256xf32>
    %301 = vector.shape_cast %300 : vector<256xf32> to vector<1x256xf32>
    %c0_281 = arith.constant 0 : index
    %c6_282 = arith.constant 6 : index
    %c112_283 = arith.constant 112 : index
    %c0_284 = arith.constant 0 : index
    %302 = vector.load %arg2[%c0_281, %c6_282, %c112_283, %c0_284] : memref<1x8x256x256xbf16, #tpu.memory_space<vmem>>, vector<1x1x28x256xbf16>
    %303 = vector.shape_cast %302 : vector<1x1x28x256xbf16> to vector<28x256xbf16>
    %304 = arith.extf %303 : vector<28x256xbf16> to vector<28x256xf32>
    %cst_285 = arith.constant dense<0.000000e+00> : vector<256xf32>
    %305 = vector.multi_reduction <add>, %304, %cst_285 [0] : vector<28x256xf32> to vector<256xf32>
    %306 = vector.shape_cast %305 : vector<256xf32> to vector<1x256xf32>
    %c0_286 = arith.constant 0 : index
    %c6_287 = arith.constant 6 : index
    %c140_288 = arith.constant 140 : index
    %c0_289 = arith.constant 0 : index
    %307 = vector.load %arg2[%c0_286, %c6_287, %c140_288, %c0_289] : memref<1x8x256x256xbf16, #tpu.memory_space<vmem>>, vector<1x1x28x256xbf16>
    %308 = vector.shape_cast %307 : vector<1x1x28x256xbf16> to vector<28x256xbf16>
    %309 = arith.extf %308 : vector<28x256xbf16> to vector<28x256xf32>
    %cst_290 = arith.constant dense<0.000000e+00> : vector<256xf32>
    %310 = vector.multi_reduction <add>, %309, %cst_290 [0] : vector<28x256xf32> to vector<256xf32>
    %311 = vector.shape_cast %310 : vector<256xf32> to vector<1x256xf32>
    %c0_291 = arith.constant 0 : index
    %c6_292 = arith.constant 6 : index
    %c168_293 = arith.constant 168 : index
    %c0_294 = arith.constant 0 : index
    %312 = vector.load %arg2[%c0_291, %c6_292, %c168_293, %c0_294] : memref<1x8x256x256xbf16, #tpu.memory_space<vmem>>, vector<1x1x28x256xbf16>
    %313 = vector.shape_cast %312 : vector<1x1x28x256xbf16> to vector<28x256xbf16>
    %314 = arith.extf %313 : vector<28x256xbf16> to vector<28x256xf32>
    %cst_295 = arith.constant dense<0.000000e+00> : vector<256xf32>
    %315 = vector.multi_reduction <add>, %314, %cst_295 [0] : vector<28x256xf32> to vector<256xf32>
    %316 = vector.shape_cast %315 : vector<256xf32> to vector<1x256xf32>
    %c0_296 = arith.constant 0 : index
    %c6_297 = arith.constant 6 : index
    %c196_298 = arith.constant 196 : index
    %c0_299 = arith.constant 0 : index
    %317 = vector.load %arg2[%c0_296, %c6_297, %c196_298, %c0_299] : memref<1x8x256x256xbf16, #tpu.memory_space<vmem>>, vector<1x1x28x256xbf16>
    %318 = vector.shape_cast %317 : vector<1x1x28x256xbf16> to vector<28x256xbf16>
    %319 = arith.extf %318 : vector<28x256xbf16> to vector<28x256xf32>
    %cst_300 = arith.constant dense<0.000000e+00> : vector<256xf32>
    %320 = vector.multi_reduction <add>, %319, %cst_300 [0] : vector<28x256xf32> to vector<256xf32>
    %321 = vector.shape_cast %320 : vector<256xf32> to vector<1x256xf32>
    %c0_301 = arith.constant 0 : index
    %c6_302 = arith.constant 6 : index
    %c224_303 = arith.constant 224 : index
    %c0_304 = arith.constant 0 : index
    %322 = vector.load %arg2[%c0_301, %c6_302, %c224_303, %c0_304] : memref<1x8x256x256xbf16, #tpu.memory_space<vmem>>, vector<1x1x28x256xbf16>
    %323 = vector.shape_cast %322 : vector<1x1x28x256xbf16> to vector<28x256xbf16>
    %324 = arith.extf %323 : vector<28x256xbf16> to vector<28x256xf32>
    %cst_305 = arith.constant dense<0.000000e+00> : vector<256xf32>
    %325 = vector.multi_reduction <add>, %324, %cst_305 [0] : vector<28x256xf32> to vector<256xf32>
    %326 = vector.shape_cast %325 : vector<256xf32> to vector<1x256xf32>
    %327 = tpu.concatenate %286, %291, %296, %301, %306, %311, %316, %321, %326 in 0 : vector<1x256xf32>, vector<1x256xf32>, vector<1x256xf32>, vector<1x256xf32>, vector<1x256xf32>, vector<1x256xf32>, vector<1x256xf32>, vector<1x256xf32>, vector<1x256xf32> -> vector<9x256xf32>
    %c0_306 = arith.constant 0 : index
    %c1536 = arith.constant 1536 : index
    %328 = vector.load %arg6[%c0_306, %c1536] : memref<9x2048xf32, #tpu.memory_space<vmem>>, vector<9x256xf32>
    tpu.vector_store %arg6[%c0_306, %c1536], %327 {strides = array<i32>} : memref<9x2048xf32, #tpu.memory_space<vmem>>, vector<9x256xf32>,
    %c0_307 = arith.constant 0 : index
    %c7 = arith.constant 7 : index
    %c0_308 = arith.constant 0 : index
    %c0_309 = arith.constant 0 : index
    %329 = vector.load %arg2[%c0_307, %c7, %c0_308, %c0_309] : memref<1x8x256x256xbf16, #tpu.memory_space<vmem>>, vector<1x1x28x256xbf16>
    %330 = vector.shape_cast %329 : vector<1x1x28x256xbf16> to vector<28x256xbf16>
    %331 = arith.extf %330 : vector<28x256xbf16> to vector<28x256xf32>
    %cst_310 = arith.constant dense<0.000000e+00> : vector<256xf32>
    %332 = vector.multi_reduction <add>, %331, %cst_310 [0] : vector<28x256xf32> to vector<256xf32>
    %333 = vector.shape_cast %332 : vector<256xf32> to vector<1x256xf32>
    %c0_311 = arith.constant 0 : index
    %c7_312 = arith.constant 7 : index
    %c28_313 = arith.constant 28 : index
    %c0_314 = arith.constant 0 : index
    %334 = vector.load %arg2[%c0_311, %c7_312, %c28_313, %c0_314] : memref<1x8x256x256xbf16, #tpu.memory_space<vmem>>, vector<1x1x28x256xbf16>
    %335 = vector.shape_cast %334 : vector<1x1x28x256xbf16> to vector<28x256xbf16>
    %336 = arith.extf %335 : vector<28x256xbf16> to vector<28x256xf32>
    %cst_315 = arith.constant dense<0.000000e+00> : vector<256xf32>
    %337 = vector.multi_reduction <add>, %336, %cst_315 [0] : vector<28x256xf32> to vector<256xf32>
    %338 = vector.shape_cast %337 : vector<256xf32> to vector<1x256xf32>
    %c0_316 = arith.constant 0 : index
    %c7_317 = arith.constant 7 : index
    %c56_318 = arith.constant 56 : index
    %c0_319 = arith.constant 0 : index
    %339 = vector.load %arg2[%c0_316, %c7_317, %c56_318, %c0_319] : memref<1x8x256x256xbf16, #tpu.memory_space<vmem>>, vector<1x1x28x256xbf16>
    %340 = vector.shape_cast %339 : vector<1x1x28x256xbf16> to vector<28x256xbf16>
    %341 = arith.extf %340 : vector<28x256xbf16> to vector<28x256xf32>
    %cst_320 = arith.constant dense<0.000000e+00> : vector<256xf32>
    %342 = vector.multi_reduction <add>, %341, %cst_320 [0] : vector<28x256xf32> to vector<256xf32>
    %343 = vector.shape_cast %342 : vector<256xf32> to vector<1x256xf32>
    %c0_321 = arith.constant 0 : index
    %c7_322 = arith.constant 7 : index
    %c84_323 = arith.constant 84 : index
    %c0_324 = arith.constant 0 : index
    %344 = vector.load %arg2[%c0_321, %c7_322, %c84_323, %c0_324] : memref<1x8x256x256xbf16, #tpu.memory_space<vmem>>, vector<1x1x28x256xbf16>
    %345 = vector.shape_cast %344 : vector<1x1x28x256xbf16> to vector<28x256xbf16>
    %346 = arith.extf %345 : vector<28x256xbf16> to vector<28x256xf32>
    %cst_325 = arith.constant dense<0.000000e+00> : vector<256xf32>
    %347 = vector.multi_reduction <add>, %346, %cst_325 [0] : vector<28x256xf32> to vector<256xf32>
    %348 = vector.shape_cast %347 : vector<256xf32> to vector<1x256xf32>
    %c0_326 = arith.constant 0 : index
    %c7_327 = arith.constant 7 : index
    %c112_328 = arith.constant 112 : index
    %c0_329 = arith.constant 0 : index
    %349 = vector.load %arg2[%c0_326, %c7_327, %c112_328, %c0_329] : memref<1x8x256x256xbf16, #tpu.memory_space<vmem>>, vector<1x1x28x256xbf16>
    %350 = vector.shape_cast %349 : vector<1x1x28x256xbf16> to vector<28x256xbf16>
    %351 = arith.extf %350 : vector<28x256xbf16> to vector<28x256xf32>
    %cst_330 = arith.constant dense<0.000000e+00> : vector<256xf32>
    %352 = vector.multi_reduction <add>, %351, %cst_330 [0] : vector<28x256xf32> to vector<256xf32>
    %353 = vector.shape_cast %352 : vector<256xf32> to vector<1x256xf32>
    %c0_331 = arith.constant 0 : index
    %c7_332 = arith.constant 7 : index
    %c140_333 = arith.constant 140 : index
    %c0_334 = arith.constant 0 : index
    %354 = vector.load %arg2[%c0_331, %c7_332, %c140_333, %c0_334] : memref<1x8x256x256xbf16, #tpu.memory_space<vmem>>, vector<1x1x28x256xbf16>
    %355 = vector.shape_cast %354 : vector<1x1x28x256xbf16> to vector<28x256xbf16>
    %356 = arith.extf %355 : vector<28x256xbf16> to vector<28x256xf32>
    %cst_335 = arith.constant dense<0.000000e+00> : vector<256xf32>
    %357 = vector.multi_reduction <add>, %356, %cst_335 [0] : vector<28x256xf32> to vector<256xf32>
    %358 = vector.shape_cast %357 : vector<256xf32> to vector<1x256xf32>
    %c0_336 = arith.constant 0 : index
    %c7_337 = arith.constant 7 : index
    %c168_338 = arith.constant 168 : index
    %c0_339 = arith.constant 0 : index
    %359 = vector.load %arg2[%c0_336, %c7_337, %c168_338, %c0_339] : memref<1x8x256x256xbf16, #tpu.memory_space<vmem>>, vector<1x1x28x256xbf16>
    %360 = vector.shape_cast %359 : vector<1x1x28x256xbf16> to vector<28x256xbf16>
    %361 = arith.extf %360 : vector<28x256xbf16> to vector<28x256xf32>
    %cst_340 = arith.constant dense<0.000000e+00> : vector<256xf32>
    %362 = vector.multi_reduction <add>, %361, %cst_340 [0] : vector<28x256xf32> to vector<256xf32>
    %363 = vector.shape_cast %362 : vector<256xf32> to vector<1x256xf32>
    %c0_341 = arith.constant 0 : index
    %c7_342 = arith.constant 7 : index
    %c196_343 = arith.constant 196 : index
    %c0_344 = arith.constant 0 : index
    %364 = vector.load %arg2[%c0_341, %c7_342, %c196_343, %c0_344] : memref<1x8x256x256xbf16, #tpu.memory_space<vmem>>, vector<1x1x28x256xbf16>
    %365 = vector.shape_cast %364 : vector<1x1x28x256xbf16> to vector<28x256xbf16>
    %366 = arith.extf %365 : vector<28x256xbf16> to vector<28x256xf32>
    %cst_345 = arith.constant dense<0.000000e+00> : vector<256xf32>
    %367 = vector.multi_reduction <add>, %366, %cst_345 [0] : vector<28x256xf32> to vector<256xf32>
    %368 = vector.shape_cast %367 : vector<256xf32> to vector<1x256xf32>
    %c0_346 = arith.constant 0 : index
    %c7_347 = arith.constant 7 : index
    %c224_348 = arith.constant 224 : index
    %c0_349 = arith.constant 0 : index
    %369 = vector.load %arg2[%c0_346, %c7_347, %c224_348, %c0_349] : memref<1x8x256x256xbf16, #tpu.memory_space<vmem>>, vector<1x1x28x256xbf16>
    %370 = vector.shape_cast %369 : vector<1x1x28x256xbf16> to vector<28x256xbf16>
    %371 = arith.extf %370 : vector<28x256xbf16> to vector<28x256xf32>
    %cst_350 = arith.constant dense<0.000000e+00> : vector<256xf32>
    %372 = vector.multi_reduction <add>, %371, %cst_350 [0] : vector<28x256xf32> to vector<256xf32>
    %373 = vector.shape_cast %372 : vector<256xf32> to vector<1x256xf32>
    %374 = tpu.concatenate %333, %338, %343, %348, %353, %358, %363, %368, %373 in 0 : vector<1x256xf32>, vector<1x256xf32>, vector<1x256xf32>, vector<1x256xf32>, vector<1x256xf32>, vector<1x256xf32>, vector<1x256xf32>, vector<1x256xf32>, vector<1x256xf32> -> vector<9x256xf32>
    %c0_351 = arith.constant 0 : index
    %c1792 = arith.constant 1792 : index
    %375 = vector.load %arg6[%c0_351, %c1792] : memref<9x2048xf32, #tpu.memory_space<vmem>>, vector<9x256xf32>
    tpu.vector_store %arg6[%c0_351, %c1792], %374 {strides = array<i32>} : memref<9x2048xf32, #tpu.memory_space<vmem>>, vector<9x256xf32>,
    %c0_352 = arith.constant 0 : index
    %c0_353 = arith.constant 0 : index
    %376 = vector.load %arg6[%c0_352, %c0_353] : memref<9x2048xf32, #tpu.memory_space<vmem>>, vector<9x2048xf32>
    %c0_354 = arith.constant 0 : index
    %c0_355 = arith.constant 0 : index
    %377 = vector.load %arg4[%c0_354, %c0_355] : memref<2048x128xf32, #tpu.memory_space<vmem>>, vector<2048x128xf32>
    %cst_356 = arith.constant dense<0.000000e+00> : vector<9x128xf32>
    %378 = tpu.matmul %376, %377, %cst_356 {dimension_numbers = #tpu.dot_dimension_numbers<[1], [0], [0], [1], [0, 0, 1, 1], [], []>} : vector<9x2048xf32>, vector<2048x128xf32>, vector<9x128xf32> -> vector<9x128xf32>
    %cst_357 = arith.constant 0.00223214296 : f32
    %379 = vector.broadcast %cst_357 : f32 to vector<9x128xf32>
    %380 = arith.mulf %378, %379 : vector<9x128xf32>
    %c0_358 = arith.constant 0 : index
    %c0_359 = arith.constant 0 : index
    %c0_360 = arith.constant 0 : index
    %c0_361 = arith.constant 0 : index
    %381 = vector.load %arg3[%c0_358, %c0_359, %c0_360, %c0_361] : memref<1x1x28x128xf32, #tpu.memory_space<vmem>>, vector<1x1x9x128xf32>
    %382 = vector.shape_cast %381 : vector<1x1x9x128xf32> to vector<9x128xf32>
    %c0_362 = arith.constant 0 : index
    %c0_363 = arith.constant 0 : index
    %c9 = arith.constant 9 : index
    %c0_364 = arith.constant 0 : index
    %383 = vector.load %arg3[%c0_362, %c0_363, %c9, %c0_364] : memref<1x1x28x128xf32, #tpu.memory_space<vmem>>, vector<1x1x19x128xf32>
    %384 = vector.shape_cast %383 : vector<1x1x19x128xf32> to vector<19x128xf32>
    %385 = tpu.iota {dimensions = array<i32: 1>} : vector<9x128xi32>
    %c16_i32 = arith.constant 16 : i32
    %c0_i32 = arith.constant 0 : i32
    %386 = arith.cmpi eq, %c16_i32, %c0_i32 : i32
    %c1_i32 = arith.constant 1 : i32
    %387 = arith.select %386, %c1_i32, %c16_i32 : i32
    %388 = vector.broadcast %387 : i32 to vector<9x128xi32>
    %389 = arith.remsi %385, %388 : vector<9x128xi32>
    %c0_i32_365 = arith.constant 0 : i32
    %390 = vector.broadcast %c0_i32_365 : i32 to vector<9x128xi32>
    %391 = arith.cmpi ne, %389, %390 : vector<9x128xi32>
    %c0_i32_366 = arith.constant 0 : i32
    %392 = vector.broadcast %c0_i32_366 : i32 to vector<9x128xi32>
    %393 = arith.cmpi slt, %389, %392 : vector<9x128xi32>
    %c0_i32_367 = arith.constant 0 : i32
    %394 = arith.cmpi slt, %387, %c0_i32_367 : i32
    %395 = vector.broadcast %394 : i1 to vector<9x128xi1>
    %396 = vector.broadcast %395 : vector<9x128xi1> to vector<9x128xi1>
    %397 = arith.xori %393, %396 : vector<9x128xi1>
    %398 = arith.andi %397, %391 : vector<9x128xi1>
    %399 = vector.broadcast %387 : i32 to vector<9x128xi32>
    %400 = arith.addi %389, %399 : vector<9x128xi32>
    %401 = arith.select %398, %400, %389 : vector<9x128xi1>, vector<9x128xi32>
    %c0_i32_368 = arith.constant 0 : i32
    %402 = vector.broadcast %c0_i32_368 : i32 to vector<9x128xi32>
    %403 = arith.cmpi ne, %401, %402 : vector<9x128xi32>
    %c15_i32 = arith.constant 15 : i32
    %404 = vector.broadcast %c15_i32 : i32 to vector<9x128xi32>
    %405 = arith.cmpi ne, %401, %404 : vector<9x128xi32>
    %cst_369 = arith.constant 0.000000e+00 : f32
    %406 = vector.broadcast %cst_369 : f32 to vector<1x128xf32>
    %407 = vector.extract_strided_slice %382 {offsets = [0, 127], sizes = [9, 1], strides = [1, 1]} : vector<9x128xf32> to vector<9x1xf32>
    %408 = vector.extract_strided_slice %382 {offsets = [0, 0], sizes = [9, 127], strides = [1, 1]} : vector<9x128xf32> to vector<9x127xf32>
    %409 = tpu.concatenate %407, %408 in 1 : vector<9x1xf32>, vector<9x127xf32> -> vector<9x128xf32>
    %cst_370 = arith.constant 0.000000e+00 : f32
    %410 = vector.broadcast %cst_370 : f32 to vector<9x128xf32>
    %411 = arith.select %403, %409, %410 : vector<9x128xi1>, vector<9x128xf32>
    %412 = vector.extract_strided_slice %382 {offsets = [0, 1], sizes = [9, 127], strides = [1, 1]} : vector<9x128xf32> to vector<9x127xf32>
    %413 = vector.extract_strided_slice %382 {offsets = [0, 0], sizes = [9, 1], strides = [1, 1]} : vector<9x128xf32> to vector<9x1xf32>
    %414 = tpu.concatenate %412, %413 in 1 : vector<9x127xf32>, vector<9x1xf32> -> vector<9x128xf32>
    %cst_371 = arith.constant 0.000000e+00 : f32
    %415 = vector.broadcast %cst_371 : f32 to vector<9x128xf32>
    %416 = arith.select %405, %414, %415 : vector<9x128xi1>, vector<9x128xf32>
    %417 = vector.extract_strided_slice %380 {offsets = [0, 127], sizes = [9, 1], strides = [1, 1]} : vector<9x128xf32> to vector<9x1xf32>
    %418 = vector.extract_strided_slice %380 {offsets = [0, 0], sizes = [9, 127], strides = [1, 1]} : vector<9x128xf32> to vector<9x127xf32>
    %419 = tpu.concatenate %417, %418 in 1 : vector<9x1xf32>, vector<9x127xf32> -> vector<9x128xf32>
    %cst_372 = arith.constant 0.000000e+00 : f32
    %420 = vector.broadcast %cst_372 : f32 to vector<9x128xf32>
    %421 = arith.select %403, %419, %420 : vector<9x128xi1>, vector<9x128xf32>
    %422 = vector.extract_strided_slice %380 {offsets = [0, 1], sizes = [9, 127], strides = [1, 1]} : vector<9x128xf32> to vector<9x127xf32>
    %423 = vector.extract_strided_slice %380 {offsets = [0, 0], sizes = [9, 1], strides = [1, 1]} : vector<9x128xf32> to vector<9x1xf32>
    %424 = tpu.concatenate %422, %423 in 1 : vector<9x127xf32>, vector<9x1xf32> -> vector<9x128xf32>
    %cst_373 = arith.constant 0.000000e+00 : f32
    %425 = vector.broadcast %cst_373 : f32 to vector<9x128xf32>
    %426 = arith.select %405, %424, %425 : vector<9x128xi1>, vector<9x128xf32>
    %cst_374 = arith.constant 0.000000e+00 : f32
    %427 = vector.broadcast %cst_374 : f32 to vector<9x128xf32>
    %cst_375 = arith.constant 0.000000e+00 : f32
    %428 = vector.broadcast %cst_375 : f32 to vector<9x128xf32>
    %429 = vector.extract_strided_slice %384 {offsets = [0, 0], sizes = [1, 128], strides = [1, 1]} : vector<19x128xf32> to vector<1x128xf32>
    %430 = vector.broadcast %429 : vector<1x128xf32> to vector<9x128xf32>
    %431 = arith.mulf %430, %411 : vector<9x128xf32>
    %432 = arith.addf %428, %431 : vector<9x128xf32>
    %433 = vector.extract_strided_slice %384 {offsets = [1, 0], sizes = [1, 128], strides = [1, 1]} : vector<19x128xf32> to vector<1x128xf32>
    %434 = vector.broadcast %433 : vector<1x128xf32> to vector<9x128xf32>
    %435 = arith.mulf %434, %382 : vector<9x128xf32>
    %436 = arith.addf %432, %435 : vector<9x128xf32>
    %437 = vector.extract_strided_slice %384 {offsets = [2, 0], sizes = [1, 128], strides = [1, 1]} : vector<19x128xf32> to vector<1x128xf32>
    %438 = vector.broadcast %437 : vector<1x128xf32> to vector<9x128xf32>
    %439 = arith.mulf %438, %416 : vector<9x128xf32>
    %440 = arith.addf %436, %439 : vector<9x128xf32>
    %441 = vector.extract_strided_slice %384 {offsets = [9, 0], sizes = [1, 128], strides = [1, 1]} : vector<19x128xf32> to vector<1x128xf32>
    %442 = vector.broadcast %441 : vector<1x128xf32> to vector<9x128xf32>
    %443 = arith.mulf %442, %421 : vector<9x128xf32>
    %444 = arith.addf %440, %443 : vector<9x128xf32>
    %445 = vector.extract_strided_slice %384 {offsets = [10, 0], sizes = [1, 128], strides = [1, 1]} : vector<19x128xf32> to vector<1x128xf32>
    %446 = vector.broadcast %445 : vector<1x128xf32> to vector<9x128xf32>
    %447 = arith.mulf %446, %380 : vector<9x128xf32>
    %448 = arith.addf %444, %447 : vector<9x128xf32>
    %449 = vector.extract_strided_slice %384 {offsets = [11, 0], sizes = [1, 128], strides = [1, 1]} : vector<19x128xf32> to vector<1x128xf32>
    %450 = vector.broadcast %449 : vector<1x128xf32> to vector<9x128xf32>
    %451 = arith.mulf %450, %426 : vector<9x128xf32>
    %452 = arith.addf %448, %451 : vector<9x128xf32>
    %453 = vector.extract_strided_slice %452 {offsets = [0, 0], sizes = [8, 128], strides = [1, 1]} : vector<9x128xf32> to vector<8x128xf32>
    %454 = tpu.concatenate %406, %453 in 0 : vector<1x128xf32>, vector<8x128xf32> -> vector<9x128xf32>
    %455 = arith.addf %427, %454 : vector<9x128xf32>
    %cst_376 = arith.constant 0.000000e+00 : f32
    %456 = vector.broadcast %cst_376 : f32 to vector<9x128xf32>
    %457 = vector.extract_strided_slice %384 {offsets = [3, 0], sizes = [1, 128], strides = [1, 1]} : vector<19x128xf32> to vector<1x128xf32>
    %458 = vector.broadcast %457 : vector<1x128xf32> to vector<9x128xf32>
    %459 = arith.mulf %458, %411 : vector<9x128xf32>
    %460 = arith.addf %456, %459 : vector<9x128xf32>
    %461 = vector.extract_strided_slice %384 {offsets = [4, 0], sizes = [1, 128], strides = [1, 1]} : vector<19x128xf32> to vector<1x128xf32>
    %462 = vector.broadcast %461 : vector<1x128xf32> to vector<9x128xf32>
    %463 = arith.mulf %462, %382 : vector<9x128xf32>
    %464 = arith.addf %460, %463 : vector<9x128xf32>
    %465 = vector.extract_strided_slice %384 {offsets = [5, 0], sizes = [1, 128], strides = [1, 1]} : vector<19x128xf32> to vector<1x128xf32>
    %466 = vector.broadcast %465 : vector<1x128xf32> to vector<9x128xf32>
    %467 = arith.mulf %466, %416 : vector<9x128xf32>
    %468 = arith.addf %464, %467 : vector<9x128xf32>
    %469 = vector.extract_strided_slice %384 {offsets = [12, 0], sizes = [1, 128], strides = [1, 1]} : vector<19x128xf32> to vector<1x128xf32>
    %470 = vector.broadcast %469 : vector<1x128xf32> to vector<9x128xf32>
    %471 = arith.mulf %470, %421 : vector<9x128xf32>
    %472 = arith.addf %468, %471 : vector<9x128xf32>
    %473 = vector.extract_strided_slice %384 {offsets = [13, 0], sizes = [1, 128], strides = [1, 1]} : vector<19x128xf32> to vector<1x128xf32>
    %474 = vector.broadcast %473 : vector<1x128xf32> to vector<9x128xf32>
    %475 = arith.mulf %474, %380 : vector<9x128xf32>
    %476 = arith.addf %472, %475 : vector<9x128xf32>
    %477 = vector.extract_strided_slice %384 {offsets = [14, 0], sizes = [1, 128], strides = [1, 1]} : vector<19x128xf32> to vector<1x128xf32>
    %478 = vector.broadcast %477 : vector<1x128xf32> to vector<9x128xf32>
    %479 = arith.mulf %478, %426 : vector<9x128xf32>
    %480 = arith.addf %476, %479 : vector<9x128xf32>
    %481 = arith.addf %455, %480 : vector<9x128xf32>
    %cst_377 = arith.constant 0.000000e+00 : f32
    %482 = vector.broadcast %cst_377 : f32 to vector<9x128xf32>
    %483 = vector.extract_strided_slice %384 {offsets = [6, 0], sizes = [1, 128], strides = [1, 1]} : vector<19x128xf32> to vector<1x128xf32>
    %484 = vector.broadcast %483 : vector<1x128xf32> to vector<9x128xf32>
    %485 = arith.mulf %484, %411 : vector<9x128xf32>
    %486 = arith.addf %482, %485 : vector<9x128xf32>
    %487 = vector.extract_strided_slice %384 {offsets = [7, 0], sizes = [1, 128], strides = [1, 1]} : vector<19x128xf32> to vector<1x128xf32>
    %488 = vector.broadcast %487 : vector<1x128xf32> to vector<9x128xf32>
    %489 = arith.mulf %488, %382 : vector<9x128xf32>
    %490 = arith.addf %486, %489 : vector<9x128xf32>
    %491 = vector.extract_strided_slice %384 {offsets = [8, 0], sizes = [1, 128], strides = [1, 1]} : vector<19x128xf32> to vector<1x128xf32>
    %492 = vector.broadcast %491 : vector<1x128xf32> to vector<9x128xf32>
    %493 = arith.mulf %492, %416 : vector<9x128xf32>
    %494 = arith.addf %490, %493 : vector<9x128xf32>
    %495 = vector.extract_strided_slice %384 {offsets = [15, 0], sizes = [1, 128], strides = [1, 1]} : vector<19x128xf32> to vector<1x128xf32>
    %496 = vector.broadcast %495 : vector<1x128xf32> to vector<9x128xf32>
    %497 = arith.mulf %496, %421 : vector<9x128xf32>
    %498 = arith.addf %494, %497 : vector<9x128xf32>
    %499 = vector.extract_strided_slice %384 {offsets = [16, 0], sizes = [1, 128], strides = [1, 1]} : vector<19x128xf32> to vector<1x128xf32>
    %500 = vector.broadcast %499 : vector<1x128xf32> to vector<9x128xf32>
    %501 = arith.mulf %500, %380 : vector<9x128xf32>
    %502 = arith.addf %498, %501 : vector<9x128xf32>
    %503 = vector.extract_strided_slice %384 {offsets = [17, 0], sizes = [1, 128], strides = [1, 1]} : vector<19x128xf32> to vector<1x128xf32>
    %504 = vector.broadcast %503 : vector<1x128xf32> to vector<9x128xf32>
    %505 = arith.mulf %504, %426 : vector<9x128xf32>
    %506 = arith.addf %502, %505 : vector<9x128xf32>
    %507 = vector.extract_strided_slice %506 {offsets = [1, 0], sizes = [8, 128], strides = [1, 1]} : vector<9x128xf32> to vector<8x128xf32>
    %508 = tpu.concatenate %507, %406 in 0 : vector<8x128xf32>, vector<1x128xf32> -> vector<9x128xf32>
    %509 = arith.addf %481, %508 : vector<9x128xf32>
    %510 = vector.extract_strided_slice %384 {offsets = [18, 0], sizes = [1, 128], strides = [1, 1]} : vector<19x128xf32> to vector<1x128xf32>
    %511 = vector.broadcast %510 : vector<1x128xf32> to vector<9x128xf32>
    %512 = arith.addf %509, %511 : vector<9x128xf32>
    %cst_378 = arith.constant 0.000000e+00 : f32
    %513 = vector.broadcast %cst_378 : f32 to vector<9x128xf32>
    %514 = arith.maximumf %512, %513 : vector<9x128xf32>
    %c0_379 = arith.constant 0 : index
    %c0_380 = arith.constant 0 : index
    %c0_381 = arith.constant 0 : index
    %c0_382 = arith.constant 0 : index
    %515 = vector.load %arg5[%c0_379, %c0_380, %c0_381, %c0_382] : memref<1x1x9x128xf32, #tpu.memory_space<vmem>>, vector<1x1x9x128xf32>
    %516 = vector.shape_cast %515 : vector<1x1x9x128xf32> to vector<9x128xf32>
    %517 = vector.shape_cast %514 : vector<9x128xf32> to vector<1x1x9x128xf32>
    tpu.vector_store %arg5[%c0_379, %c0_380, %c0_381, %c0_382], %517 {strides = array<i32>} : memref<1x1x9x128xf32, #tpu.memory_space<vmem>>, vector<1x1x9x128xf32>,
    return
  }
  func.func @transform_0(%arg0: i32, %arg1: i32) -> (i32, i32, i32, i32) {
    %c0_i32 = arith.constant 0 : i32
    %c0_i32_0 = arith.constant 0 : i32
    %c0_i32_1 = arith.constant 0 : i32
    return %arg0, %arg1, %c0_i32, %c0_i32_0 : i32, i32, i32, i32
  }
  func.func @transform_1(%arg0: i32, %arg1: i32) -> (i32, i32, i32, i32) {
    %c0_i32 = arith.constant 0 : i32
    %c0_i32_0 = arith.constant 0 : i32
    %c0_i32_1 = arith.constant 0 : i32
    return %arg0, %arg1, %c0_i32, %c0_i32_0 : i32, i32, i32, i32
  }
  func.func @transform_2(%arg0: i32, %arg1: i32) -> (i32, i32) {
    %c0_i32 = arith.constant 0 : i32
    %c0_i32_0 = arith.constant 0 : i32
    %c0_i32_1 = arith.constant 0 : i32
    return %c0_i32, %c0_i32_0 : i32, i32
  }
  func.func @transform_3(%arg0: i32, %arg1: i32) -> (i32, i32, i32, i32) {
    %c0_i32 = arith.constant 0 : i32
    %c0_i32_0 = arith.constant 0 : i32
    %c0_i32_1 = arith.constant 0 : i32
    return %arg0, %arg1, %c0_i32, %c0_i32_0 : i32, i32, i32, i32
  }
}

</mosaic_0001>

<bundles_post_ra>
// kernel: tpu_custom_call.1
= control target key start
LH: loop header
LB: loop body
LE: loop exit
PB: predicated region body
PF: predicated region fallthrough
CT: control target
= control target key end

     0   :  { %8 = vsyncpa [#allocation4], 0  ;;  %s8944_s0 = inlined_call_operand.hbm [shape: bf16[4,8,256,256], index: 0, kind: input, shape index: {}]   ;;  %s8945_s1 = inlined_call_operand.vmem [shape: f32[4,1,28,128], index: 1, kind: input, shape index: {}]   ;;  %s8946_s2 = inlined_call_operand.hbm [shape: f32[2048,128], index: 2, kind: input, shape index: {}]   ;;  %s8947_s3 = inlined_call_operand.vmem [shape: f32[4,1,9,128], index: 3, kind: output, shape index: {}]  }
   0x1   :  { %10 = vsyncpa [#allocation4 + $0x1], 0 }
   0x2   :  { %11 = vsyncpa [#allocation6], 0  ;;  %s5966_s12 = smov 0   ;;  %s5968_s13 = smov 0  }
   0x3   :  { %s5970_s14 = smov 0   ;;  %s5972_s15 = smov 0  }
   0x4   :  { %s5974_s16 = smov 0   ;;  %s5976_s17 = smov 0  }
   0x5 LB: > { %s4924_s18 = sadd.s32 4294967295, %s5938_s17   ;;  %p51_p0 = scmp.ne.s32.totalorder %s5922_s13, %s5918_s12  ;;  %s5938_s17 = sphi %s5976_s17, %s17_s17   ;;  %s5934_s16 = sphi %s5974_s16, %s9199_s16   ;;  %s5930_s15 = sphi %s5972_s15, %s9198_s15   ;;  %s5926_s14 = sphi %s5970_s14, %s9197_s14   ;;  %s5922_s13 = sphi %s5968_s13, %s9196_s13   ;;  %s5918_s12 = sphi %s5966_s12, %s9195_s12  }
   0x6   : > { %p5996_p1 = scmp.eq.s32.totalorder %s4924_s18, 0  ;;  %p4926_p2 = scmp.ge.s32.totalorder %s5938_s17, 1 }
   0x7   : > { %p139_p3 = scmp.lt.s32.totalorder %s5938_s17, 5  ;;  %s5940_s22 = smov [#allocation5]  }
   0x8   : > { %s8985_s19 = scalar_select %p5996_p1, 1, 0 }
   0x9   : > { %p6004_p4 = por %p5996_p1, %p51_p0  ;;  %p6008_p5 = pnand %p4926_p2, %p139_p3 }
   0xa   : > { %s151_s23 = sshll.u32 %s5940_s22, 4  ;;  %s29_s25 = sadd.s32 1, %s5934_s16  ;;  %s152_s23 = int_to_ptr.vmem [resolvable:$true] %s151_s23 }
   0xb   : > { %s8986_s20 = scalar_select %p6004_p4, 1, 0 }
   0xc   : > { %s8987_s21 = scalar_select %p6008_p5, 1, 0 }
   0xd   : > { %p5762_p6 = pneg %p6008_p5  ;;  %s5826_s28 = scalar_lea.hbm %s8946_s2, 32768 }
   0xe   : > { %p5827_p8 = scmp.ne.s32.totalorder %s8946_s2, %s5826_s28  ;;  %p5833_p12 = scmp.lt.u32.totalorder %s5826_s28, %s8946_s2 }
   0xf   : > { %p6016_p7 = pnand %p5762_p6, %p5996_p1 }
  0x11   : > { %p5828_p9 = pneg %p6016_p7 }
  0x13   : > { %p5829_p10 = pnand %p5828_p9, %p5827_p8 }
  0x15   : > { %p5830_p11 = pneg %p5829_p10 }
  0x17   : > { %p5835_p13 = pnand %p5833_p12, %p5830_p11 }
  0x19   : > { %5838 = shalt.err (!%p5835_p13)
}
  0x1a   : > { %s5839_s6 = scalar_lea.vmem %s152_s23, 32768  ;;  %p5847_p6 = scmp.lt.s32.totalorder %s152_s23, %s152_s23 }
  0x1b   : > { %p5840_p0 = scmp.ne.s32.totalorder %s152_s23, %s5839_s6  ;;  %p5848_p1 = scmp.lt.s32.totalorder %s5839_s6, %s5839_s6 }
  0x1d   : > { %p5842_p2 = pnand %p5840_p0, %p5828_p9  ;;  %p5849_p4 = por %p5848_p1, %p5847_p6 }
  0x1f   : > { %p5843_p3 = pneg %p5842_p2 }
  0x21   : > { %p5850_p5 = pnand %p5849_p4, %p5843_p3 }
  0x23   : > { %5853 = shalt.err (!%p5850_p5)
}
  0x24   : > { %s5941_s7 = smov 128   ;;  %s5942_s8 = smov 8  }
  0x25   : > { %5765 = dma.hbm_to_vmem [thread:$0]  (!%p6016_p7), %s8946_s2, 32768, %s152_s23, [#allocation6], %s5941_s7, %s5941_s7, %s5942_s8  }
  0x26   : > { %p31_p1 = scmp.ge.s32.totalorder %s29_s25, 4  ;;  %s38_s11 = sadd.s32 1, %s5926_s14 }
  0x27   : > { %p45_p4 = scmp.ne.s32.totalorder %s5926_s14, %s5922_s13  ;;  %p46_p5 = scmp.eq.s32.totalorder %s5938_s17, 0 }
  0x28   : > { %s9201_s25 = smov (%p31_p1, %s29_s25), 0  ;;  %p5771_p9 = scmp.lt.s32.totalorder %s5938_s17, 4 }
  0x29   : > { %p47_p8 = por %p46_p5, %p45_p4  ;;  %s33_s12 = ssub.s32 %s5934_s16, %s9201_s25 }
  0x2a   : > { %s165_s18 = sand.u32 1, %s5926_s14   ;;  %p36_p10 = scmp.eq.s32.totalorder %s33_s12, 0 }
  0x2b   : > { %s4929_s22 = sshll.u32 %s165_s18, 11  ;;  %s5193_s24 = sshll.u32 %s5934_s16, 15 }
  0x2c   : > { %s6052_s26 = scalar_select %p36_p10, %s5926_s14, %s38_s11  }
  0x2d   : > { %s6057_s23 = scalar_lea.hbm %s8944_s0, %s5193_s24  ;;  %s169_s29 = scalar_lea.vmem [#allocation3], %s4929_s22 }
  0x2e   : > { %s179_s30 = sshll.u32 %s169_s29, 4  ;;  %p6059_p7 = pnand %p5771_p9, %p47_p8  ;;  %s6063_s30 = int_to_ptr.vmem [resolvable:$true] %s179_s30 }
  0x2f   : > { %s6065_s5 = scalar_lea.sflag [#allocation4], %s165_s18  ;;  %s5854_s6 = scalar_lea.hbm %s6057_s23, 32768 }
  0x30   : > { %p5855_p11 = scmp.ne.s32.totalorder %s6057_s23, %s5854_s6  ;;  %p5856_p12 = pneg %p6059_p7 }
  0x31   : > { %s5859_s11 = scalar_lea.hbm %s8944_s0, 131072  ;;  %p5860_p2 = scmp.lt.u32.totalorder %s6057_s23, %s8944_s0 }
  0x32   : > { %p5857_p13 = pnand %p5856_p12, %p5855_p11  ;;  %p5861_p3 = scmp.lt.u32.totalorder %s5859_s11, %s5854_s6 }
  0x33   : > { %p5863_p1 = scmp.lt.u32.totalorder %s5854_s6, %s6057_s23 }
  0x34   : > { %p5858_p0 = pneg %p5857_p13  ;;  %p5862_p6 = por %p5861_p3, %p5860_p2 }
  0x36   : > { %p5864_p4 = por %p5863_p1, %p5862_p6 }
  0x38   : > { %p5865_p5 = pnand %p5864_p4, %p5858_p0 }
  0x3a   : > { %5868 = shalt.err (!%p5865_p5)
}
  0x3b   : > { %s5869_s18 = scalar_lea.vmem %s6063_s30, 32768  ;;  %s5943_s24 = smov [#allocation3]  }
  0x3c   : > { %p5870_p8 = scmp.ne.s32.totalorder %s6063_s30, %s5869_s18  ;;  %s5874_s27 = sshll.u32 %s5943_s24, 4  ;;  %s5875_s27 = int_to_ptr.vmem [resolvable:$false] %s5874_s27 }
  0x3d   : > { %s5876_s28 = scalar_lea.vmem %s5875_s27, 65536  ;;  %p5877_p11 = scmp.lt.s32.totalorder %s6063_s30, %s5875_s27 }
  0x3e   : > { %p5872_p9 = pnand %p5870_p8, %p5856_p12  ;;  %p5878_p13 = scmp.lt.s32.totalorder %s5876_s28, %s5869_s18 }
  0x40   : > { %p5873_p10 = pneg %p5872_p9  ;;  %p5879_p2 = por %p5878_p13, %p5877_p11 }
  0x42   : > { %p5880_p3 = pnand %p5879_p2, %p5873_p10 }
  0x44   : > { %5883 = shalt.err (!%p5880_p3)
}
  0x45   : > { %5769 = dma.hbm_to_vmem [thread:$0]  (!%p6059_p7), %s6057_s23, 32768, %s6063_s30, %s6065_s5, %s5941_s7, %s5941_s7, %s5942_s8  }
  0x46   : > { %p8990_p12 = scmp.ne.s32.totalorder %s8987_s21, 0 }
  0x48   : > { %203 = sbr.rel (%p8990_p12) target bundleno = 1150 (0x47e), region = 32 }
  0x4f   : > { %s205_s29 = sand.u32 1, %s5922_s13   ;;  %p8991_p0 = scmp.ne.s32.totalorder %s8986_s20, 0 }
  0x50   : > { %s4933_s6 = sshll.u32 %s205_s29, 11  ;;  %s206_s9 = scalar_lea.sflag [#allocation4], %s205_s29 }
  0x51   : > { %s6099_s10 = scalar_lea.vmem [#allocation3], %s4933_s6 }
  0x52   : > { %5909 = dma.done.wait (%p8991_p0), %s206_s9, 32768  }
  0x53   : > { %5911 = vsyncadd (%p8991_p0), %s206_s9, 4294934528  ;;  %p8992_p6 = scmp.ne.s32.totalorder %s8985_s19, 0 }
  0x55   : > { %5913 = dma.done.wait (%p8992_p6), [#allocation6], 32768  }
  0x56   : > { %5915 = vsyncadd (%p8992_p6), [#allocation6], 4294934528  ;;  %v3738_v0 = vld [vmem:[#allocation5 + $0x80] sm:$0xff]  ;;  %v3739_v1 = vld [vmem:[#allocation5 + $0x88] sm:$0xff]  ;;  %vm282_vm0 = vcmask 1043456   ;;  %vm677_vm1 = vcmask 1040384  }
  0x57   : > { %v3722_v2 = vld [vmem:[#allocation5] sm:$0xff]  ;;  %v5500_v3 = vpack.c.bf16 %v3739_v1, %v3738_v0  ;;  %v3723_v4 = vld [vmem:[#allocation5 + $0x8] sm:$0xff]  ;;  %v3740_v11 = vld [vmem:[#allocation5 + $0x90] sm:$0xff]  ;;  %vm680_vm2 = vcmask 1041408   ;;  %vm683_vm3 = vcmask 1042432   ;;  %vm688_vm4 = vcmask 1044480  }
  0x58   : > { %v3770_v5 = vld [vmem:[#allocation5 + $0x180] sm:$0xff]  ;;  %v3771_v6 = vld [vmem:[#allocation5 + $0x188] sm:$0xff]  ;;  %v5502_v7 = vpack.c.bf16 %v3723_v4, %v3722_v2  ;;  %v3741_v13 = vld [vmem:[#allocation5 + $0x98] sm:$0xff]  ;;  %vm691_vm5 = vcmask 1045504   ;;  %vm694_vm6 = vcmask 1046528   ;;  %p250_p7 = scmp.lt.s32.totalorder %s5930_s15, 3 }
  0x59   : > { %v5532_v8 = vpack.c.bf16 %v3771_v6, %v3770_v5  ;;  %v3754_v9 = vld [vmem:[#allocation5 + $0x100] sm:$0xff]  ;;  %v3755_v10 = vld [vmem:[#allocation5 + $0x108] sm:$0xff]  ;;  %5501 = vmatprep.subr.bf16.mxu0 %v5500_v3  ;;  %v3724_v14 = vld [vmem:[#allocation5 + $0x10] sm:$0xff]  ;;  %v5504_v16 = vpack.c.bf16 %v3741_v13, %v3740_v11  ;;  %s5944_s8 = smov 1   ;;  %s5945_s23 = smov 127  }
  0x5a   : > { %v5534_v12 = vpack.c.bf16 %v3755_v10, %v3754_v9  ;;  %v3725_v15 = vld [vmem:[#allocation5 + $0x18] sm:$0xff]  ;;  %5503 = vmatpush3.bf16.msra.mxu0 %v5502_v7  ;;  %v3772_v18 = vld [vmem:[#allocation5 + $0x190] sm:$0xff]  ;;  %v3742_v23 = vld [vmem:[#allocation5 + $0xa0] sm:$0xff]  ;;  %s9203_s15 = smov (!%p250_p7, %s5930_s15), 3 }
  0x5b   : > { %5533 = vmatprep.subr.bf16.mxu1 %v5532_v8  ;;  %v5506_v17 = vpack.c.bf16 %v3725_v15, %v3724_v14  ;;  %v3773_v19 = vld [vmem:[#allocation5 + $0x198] sm:$0xff]  ;;  %v3756_v20 = vld [vmem:[#allocation5 + $0x110] sm:$0xff]  ;;  %v3743_v24 = vld [vmem:[#allocation5 + $0xa8] sm:$0xff]  ;;  %5505 = vmatprep.subr.bf16.mxu0 %v5504_v16  ;;  %s5194_s19 = sshll.u32 %s9203_s15, 5  ;;  %s5195_s30 = sshll.u32 %s9203_s15, 4 }
  0x5c   : > { %5535 = vmatpush3.bf16.msra.mxu1 %v5534_v12  ;;  %v5536_v21 = vpack.c.bf16 %v3773_v19, %v3772_v18  ;;  %v3757_v22 = vld [vmem:[#allocation5 + $0x118] sm:$0xff]  ;;  %v5508_v26 = vpack.c.bf16 %v3743_v24, %v3742_v23  ;;  %v3726_v27 = vld [vmem:[#allocation5 + $0x20] sm:$0xff]  ;;  %v3727_v28 = vld [vmem:[#allocation5 + $0x28] sm:$0xff]  ;;  %s8839_s7 = scalar_lea.vmem %s8945_s1, %s5194_s19  ;;  %s267_s11 = scalar_lea.vmem %s8947_s3, %s5195_s30 }
  0x5d   : > { %v5538_v25 = vpack.c.bf16 %v3757_v22, %v3756_v20  ;;  %v3774_v29 = vld [vmem:[#allocation5 + $0x1a0] sm:$0xff]  ;;  %v3775_v30 = vld [vmem:[#allocation5 + $0x1a8] sm:$0xff]  ;;  %v5510_v33 = vpack.c.bf16 %v3727_v28, %v3726_v27  ;;  %v3744_v35 = vld [vmem:[#allocation5 + $0xb0] sm:$0xff] }
  0x5e   : > { %5537 = vmatprep.subr.bf16.mxu1 %v5536_v21  ;;  %v3758_v31 = vld [vmem:[#allocation5 + $0x120] sm:$0xff]  ;;  %v3759_v32 = vld [vmem:[#allocation5 + $0x128] sm:$0xff]  ;;  %5507 = vmatpush3.bf16.msra.mxu0 %v5506_v17  ;;  %v5540_v34 = vpack.c.bf16 %v3775_v30, %v3774_v29  ;;  %v3745_v36 = vld [vmem:[#allocation5 + $0xb8] sm:$0xff] }
  0x5f   : > { %v3728_v37 = vld [vmem:[#allocation5 + $0x30] sm:$0xff]  ;;  %5509 = vmatprep.subr.bf16.mxu0 %v5508_v26  ;;  %v5542_v38 = vpack.c.bf16 %v3759_v32, %v3758_v31  ;;  %v5512_v39 = vpack.c.bf16 %v3745_v36, %v3744_v35  ;;  %v3729_v40 = vld [vmem:[#allocation5 + $0x38] sm:$0xff]  ;;  %v3746_v46 = vld [vmem:[#allocation5 + $0xc0] sm:$0xff] }
  0x60   : > { %5539 = vmatpush3.bf16.msra.mxu1 %v5538_v25  ;;  %v3776_v41 = vld [vmem:[#allocation5 + $0x1b0] sm:$0xff]  ;;  %v3777_v42 = vld [vmem:[#allocation5 + $0x1b8] sm:$0xff]  ;;  %v3747_v47 = vld [vmem:[#allocation5 + $0xc8] sm:$0xff]  ;;  %v5514_v50 = vpack.c.bf16 %v3729_v40, %v3728_v37 }
  0x61   : > { %5541 = vmatprep.subr.bf16.mxu1 %v5540_v34  ;;  %v5544_v43 = vpack.c.bf16 %v3777_v42, %v3776_v41  ;;  %v3760_v44 = vld [vmem:[#allocation5 + $0x130] sm:$0xff]  ;;  %v3761_v45 = vld [vmem:[#allocation5 + $0x138] sm:$0xff]  ;;  %v3730_v48 = vld [vmem:[#allocation5 + $0x40] sm:$0xff]  ;;  %v5516_v55 = vpack.c.bf16 %v3747_v47, %v3746_v46 }
  0x62   : > { %v3731_v49 = vld [vmem:[#allocation5 + $0x48] sm:$0xff]  ;;  %5511 = vmatpush3.bf16.msra.mxu0 %v5510_v33  ;;  %v3778_v51 = vld [vmem:[#allocation5 + $0x1c0] sm:$0xff]  ;;  %v5546_v54 = vpack.c.bf16 %v3761_v45, %v3760_v44  ;;  %v3748_v57 = vld [vmem:[#allocation5 + $0xd0] sm:$0xff] }
  0x63   : > { %v3779_v52 = vld [vmem:[#allocation5 + $0x1c8] sm:$0xff]  ;;  %v3762_v53 = vld [vmem:[#allocation5 + $0x140] sm:$0xff]  ;;  %5513 = vmatprep.subr.bf16.mxu0 %v5512_v39  ;;  %v3749_v58 = vld [vmem:[#allocation5 + $0xd8] sm:$0xff]  ;;  %v5518_v2 = vpack.c.bf16 %v3731_v49, %v3730_v48 }
  0x64   : > { %5543 = vmatpush3.bf16.msra.mxu1 %v5542_v38  ;;  %v3763_v56 = vld [vmem:[#allocation5 + $0x148] sm:$0xff]  ;;  %v5548_v59 = vpack.c.bf16 %v3779_v52, %v3778_v51  ;;  %v3732_v60 = vld [vmem:[#allocation5 + $0x50] sm:$0xff]  ;;  %v3733_v61 = vld [vmem:[#allocation5 + $0x58] sm:$0xff]  ;;  %v5520_v7 = vpack.c.bf16 %v3749_v58, %v3748_v57 }
  0x65   : > { %5545 = vmatprep.subr.bf16.mxu1 %v5544_v43  ;;  %v3780_v62 = vld [vmem:[#allocation5 + $0x1d0] sm:$0xff]  ;;  %v3781_v63 = vld [vmem:[#allocation5 + $0x1d8] sm:$0xff]  ;;  %v3750_v3 = vld [vmem:[#allocation5 + $0xe0] sm:$0xff]  ;;  %v5550_v6 = vpack.c.bf16 %v3763_v56, %v3762_v53  ;;  %v5522_v15 = vpack.c.bf16 %v3733_v61, %v3732_v60 }
  0x66   : > { %v6109_v0 = vld [vmem:[#allocation5 + $0x150] sm:$0xff]  ;;  %v6111_v1 = vld [vmem:[#allocation5 + $0x158] sm:$0xff]  ;;  %5515 = vmatpush3.bf16.msra.mxu0 %v5514_v50  ;;  %v3751_v4 = vld [vmem:[#allocation5 + $0xe8] sm:$0xff]  ;;  %v5552_v11 = vpack.c.bf16 %v3781_v63, %v3780_v62 }
  0x67   : > { %v6113_v5 = vld [vmem:[#allocation5 + $0x60] sm:$0xff]  ;;  %5517 = vmatprep.subr.bf16.mxu0 %v5516_v55  ;;  %v6115_v8 = vld [vmem:[#allocation5 + $0x68] sm:$0xff]  ;;  %v6121_v14 = vld [vmem:[#allocation5 + $0xf0] sm:$0xff]  ;;  %v5554_v16 = vpack.c.bf16 %v6111_v1, %v6109_v0  ;;  %v5524_v20 = vpack.c.bf16 %v3751_v4, %v3750_v3 }
  0x68   : > { %5547 = vmatpush3.bf16.msra.mxu1 %v5546_v54  ;;  %v3782_v9 = vld [vmem:[#allocation5 + $0x1e0] sm:$0xff]  ;;  %v3783_v10 = vld [vmem:[#allocation5 + $0x1e8] sm:$0xff]  ;;  %v6125_v17 = vld [vmem:[#allocation5 + $0xf8] sm:$0xff]  ;;  %v5526_v21 = vpack.c.bf16 %v6115_v8, %v6113_v5 }
  0x69   : > { %5549 = vmatprep.subr.bf16.mxu1 %v5548_v59  ;;  %v6117_v12 = vld [vmem:[#allocation5 + $0x160] sm:$0xff]  ;;  %v6119_v13 = vld [vmem:[#allocation5 + $0x168] sm:$0xff]  ;;  %v6127_v18 = vld [vmem:[#allocation5 + $0x70] sm:$0xff]  ;;  %v5556_v22 = vpack.c.bf16 %v3783_v10, %v3782_v9  ;;  %v5528_v27 = vpack.c.bf16 %v6125_v17, %v6121_v14 }
  0x6a   : > { %v6129_v19 = vld [vmem:[#allocation5 + $0x78] sm:$0xff]  ;;  %5519 = vmatpush3.bf16.msra.mxu0 %v5518_v2  ;;  %v5558_v23 = vpack.c.bf16 %v6119_v13, %v6117_v12  ;;  %v6135_v24 = vld [vmem:[#allocation5 + $0x1f0] sm:$0xff]  ;;  %v6150_v31 = vld [vmem:[%s6099_s10] sm:$0xff] }
  0x6b   : > { %v6137_v25 = vld [vmem:[#allocation5 + $0x1f8] sm:$0xff]  ;;  %v6139_v26 = vld [vmem:[#allocation5 + $0x170] sm:$0xff]  ;;  %5521 = vmatprep.subr.bf16.mxu0 %v5520_v7  ;;  %v5530_v28 = vpack.c.bf16 %v6129_v19, %v6127_v18  ;;  %v6153_v32 = vld [vmem:[%s6099_s10 + $0x8] sm:$0xff]  ;;  %v273_v36 = vunpack.c.h.bf16 %v6150_v31 }
  0x6c   : > { %5551 = vmatpush3.bf16.msra.mxu1 %v5550_v6  ;;  %v5560_v29 = vpack.c.bf16 %v6137_v25, %v6135_v24  ;;  %v6147_v30 = vld [vmem:[#allocation5 + $0x178] sm:$0xff]  ;;  %v6158_v34 = vld [vmem:[%s6099_s10 + $0x10] sm:$0xff]  ;;  %v275_v37 = vunpack.c.h.bf16 %v6153_v32  ;;  %v6172_v42 = vld [vmem:[%s6099_s10 + $0x20] sm:$0xff] }
  0x6d   : > { %5553 = vmatprep.subr.bf16.mxu1 %v5552_v11  ;;  %v5562_v33 = vpack.c.bf16 %v6147_v30, %v6139_v26  ;;  %v6161_v35 = vld [vmem:[%s6099_s10 + $0x18] sm:$0x33]  ;;  %v6166_v38 = vld [vmem:[%s6099_s10 + $0x18] sm:$0xcc]  ;;  %v277_v40 = vunpack.c.h.bf16 %v6158_v34  ;;  %v6175_v43 = vld [vmem:[%s6099_s10 + $0x28] sm:$0xff]  ;;  %v308_v48 = vunpack.c.h.bf16 %v6172_v42 }
  0x6e   : > { %v279_v41 = vunpack.c.h.bf16 %v6161_v35  ;;  %v6178_v44 = vld [vmem:[%s6099_s10 + $0x30] sm:$0xff]  ;;  %v306_v45 = vunpack.c.h.bf16 %v6166_v38  ;;  %5523 = vmatpush3.bf16.msra.mxu0 %v5522_v15  ;;  %v291_v47 = vadd.f32 %v275_v37, %v273_v36  ;;  %v310_v49 = vunpack.c.h.bf16 %v6175_v43  ;;  %v6186_v51 = vld [vmem:[%s6099_s10 + $0x38] sm:$0xff]  ;;  %v6189_v52 = vld [vmem:[%s6099_s10 + $0x40] sm:$0xff] }
  0x6f   : > { %v312_v50 = vunpack.c.h.bf16 %v6178_v44  ;;  %v6192_v53 = vld [vmem:[%s6099_s10 + $0x48] sm:$0xff]  ;;  %5525 = vmatprep.subr.bf16.mxu0 %v5524_v20  ;;  %v6196_v56 = vld [vmem:[%s6099_s10 + $0x50] sm:$0x33]  ;;  %v368_v57 = vunpack.c.h.bf16 %v6186_v51  ;;  %v370_v58 = vunpack.c.h.bf16 %v6189_v52  ;;  %v6201_v59 = vld [vmem:[%s6099_s10 + $0x50] sm:$0xcc]  ;;  %v325_v61 = vrot.slane %v308_v48, 4 }
  0x70   : > { %5555 = vmatpush3.bf16.msra.mxu1 %v5554_v16  ;;  %v293_v54 = vsel %vm282_vm0, %v279_v41, 0.0  ;;  %v324_v55 = vrot.slane %v306_v45, 4  ;;  %v292_v60 = vadd.f32 %v291_v47, %v277_v40  ;;  %v329_v62 = vrot.slane %v310_v49, 4  ;;  %v6206_v3 = vld [vmem:[%s6099_s10 + $0x58] sm:$0xff]  ;;  %v6209_v4 = vld [vmem:[%s6099_s10 + $0x60] sm:$0xff]  ;;  %v6212_v5 = vld [vmem:[%s6099_s10 + $0x68] sm:$0xff] }
  0x71   : > { %5557 = vmatprep.subr.bf16.mxu1 %v5556_v22  ;;  %v333_v63 = vrot.slane %v312_v50, 4  ;;  %v372_v0 = vunpack.c.h.bf16 %v6192_v53  ;;  %v374_v1 = vunpack.c.h.bf16 %v6196_v56  ;;  %v385_v2 = vadd.f32 %v370_v58, %v368_v57  ;;  %v6219_v11 = vld [vmem:[%s6099_s10 + $0x70] sm:$0xff]  ;;  %v6227_v22 = vld [vmem:[%s6099_s10 + $0x78] sm:$0xff]  ;;  %v6230_v24 = vld [vmem:[%s6099_s10 + $0x80] sm:$0xff] }
  0x72   : > { %v400_v6 = vunpack.c.h.bf16 %v6201_v59  ;;  %5527 = vmatpush3.bf16.msra.mxu0 %v5526_v21  ;;  %v294_v7 = vadd.f32 %v293_v54, %v292_v60  ;;  %v326_v8 = vsel %vm282_vm0, %v324_v55, %v325_v61  ;;  %v330_v9 = vsel %vm282_vm0, %v325_v61, %v329_v62  ;;  %v6240_v48 = vld [vmem:[%s6099_s10 + $0x88] sm:$0x33]  ;;  %v6245_v19 = vld [vmem:[%s6099_s10 + $0x88] sm:$0xcc]  ;;  %v6251_v30 = vld [vmem:[%s6099_s10 + $0x90] sm:$0xff] }
  0x73   : > { %v334_v10 = vsel %vm282_vm0, %v329_v62, %v333_v63  ;;  %5529 = vmatprep.subr.bf16.mxu0 %v5528_v27  ;;  %v353_v12 = vadd.f32 %v330_v9, %v326_v8  ;;  %v355_v13 = vsel %vm282_vm0, %v333_v63, 0.0  ;;  %v386_v14 = vadd.f32 %v385_v2, %v372_v0  ;;  %v6255_v60 = vld [vmem:[%s6099_s10 + $0x98] sm:$0xff]  ;;  %v6259_v0 = vld [vmem:[%s6099_s10 + $0xa0] sm:$0xff] }
  0x74   : > { %5559 = vmatpush3.bf16.msra.mxu1 %v5558_v23  ;;  %v387_v15 = vsel %vm282_vm0, %v374_v1, 0.0  ;;  %v295_v16 = vrot.slane %v294_v7, 4  ;;  %v402_v17 = vunpack.c.h.bf16 %v6206_v3  ;;  %v404_v20 = vunpack.c.h.bf16 %v6209_v4 }
  0x75   : > { %5561 = vmatprep.subr.bf16.mxu1 %v5560_v29  ;;  %v406_v21 = vunpack.c.h.bf16 %v6212_v5  ;;  %v354_v23 = vadd.f32 %v353_v12, %v334_v10  ;;  %v388_v25 = vadd.f32 %v387_v15, %v386_v14  ;;  %v418_v27 = vrot.slane %v400_v6, 4 }
  0x76   : > { %v462_v36 = vunpack.c.h.bf16 %v6219_v11  ;;  %5531 = vmatpush3.bf16.msra.mxu0 %v5530_v28  ;;  %v296_v29 = vadd.f32 %v295_v16, %v294_v7  ;;  %v419_v37 = vrot.slane %v402_v17, 4  ;;  %v423_v40 = vrot.slane %v404_v20, 4  ;;  %v6267_v20 = vld [vmem:[%s6099_s10 + $0xa8] sm:$0xff] }
  0x77   : > { %v427_v41 = vrot.slane %v406_v21, 4  ;;  %v356_v45 = vadd.f32 %v355_v13, %v354_v23  ;;  %v389_v47 = vrot.slane %v388_v25, 4  ;;  %v464_v49 = vunpack.c.h.bf16 %v6227_v22 }
  0x78   : > { %5563 = vmatpush3.bf16.msra.mxu1 %v5562_v33  ;;  %v466_v18 = vunpack.c.h.bf16 %v6230_v24  ;;  %v297_v28 = vrot.slane %v296_v29, 2  ;;  %v420_v50 = vsel %vm282_vm0, %v418_v27, %v419_v37  ;;  %v424_v54 = vsel %vm282_vm0, %v419_v37, %v423_v40 }
  0x79   : > { %v428_v26 = vsel %vm282_vm0, %v423_v40, %v427_v41  ;;  %v357_v33 = vrot.slane %v356_v45, 4  ;;  %v390_v55 = vadd.f32 %v389_v47, %v388_v25  ;;  %v447_v57 = vadd.f32 %v424_v54, %v420_v50 }
  0x7a   : > { %v449_v58 = vsel %vm282_vm0, %v427_v41, 0.0  ;;  %v298_v61 = vadd.f32 %v297_v28, %v296_v29  ;;  %v468_v62 = vunpack.c.h.bf16 %v6240_v48  ;;  %v479_v63 = vadd.f32 %v464_v49, %v462_v36  ;;  %v6271_v49 = vld [vmem:[%s6099_s10 + $0xb0] sm:$0xff] }
  0x7b   : > { %v494_v1 = vunpack.c.h.bf16 %v6245_v19  ;;  %v358_v2 = vadd.f32 %v357_v33, %v356_v45  ;;  %v391_v6 = vrot.slane %v390_v55, 2  ;;  %v448_v7 = vadd.f32 %v447_v57, %v428_v26  ;;  %v6282_v57 = vld [vmem:[%s6099_s10 + $0xc0] sm:$0xcc] }
  0x7c   : > { %v496_v8 = vunpack.c.h.bf16 %v6251_v30  ;;  %v299_v9 = vrot.slane %v298_v61, 1  ;;  %v480_v10 = vadd.f32 %v479_v63, %v466_v18  ;;  %v481_v12 = vsel %vm282_vm0, %v468_v62, 0.0  ;;  %v6274_v18 = vld [vmem:[%s6099_s10 + $0xb8] sm:$0xff] }
  0x7d   : > { %v498_v13 = vunpack.c.h.bf16 %v6255_v60  ;;  %v359_v14 = vrot.slane %v358_v2, 2  ;;  %v392_v15 = vadd.f32 %v391_v6, %v390_v55  ;;  %v450_v16 = vadd.f32 %v449_v58, %v448_v7  ;;  %v6279_v55 = vld [vmem:[%s6099_s10 + $0xc0] sm:$0x33] }
  0x7e   : > { %v500_v17 = vunpack.c.h.bf16 %v6259_v0  ;;  %v300_v21 = vadd.f32 %v299_v9, %v298_v61  ;;  %v482_v23 = vadd.f32 %v481_v12, %v480_v10  ;;  %v512_v25 = vrot.slane %v494_v1, 4  ;;  %v6287_v1 = vld [vmem:[%s6099_s10 + $0xc8] sm:$0xff]  ;;  %v6295_v10 = vld [vmem:[%s6099_s10 + $0xd8] sm:$0xff] }
  0x7f   : > { %v513_v27 = vrot.slane %v496_v8, 4  ;;  %v360_v36 = vadd.f32 %v359_v14, %v358_v2  ;;  %v393_v29 = vrot.slane %v392_v15, 1  ;;  %v451_v37 = vrot.slane %v450_v16, 4  ;;  %v6290_v2 = vld [vmem:[%s6099_s10 + $0xd0] sm:$0xff] }
  0x80   : > { %v517_v40 = vrot.slane %v498_v13, 4  ;;  %v483_v41 = vrot.slane %v482_v23, 4  ;;  %v521_v47 = vrot.slane %v500_v17, 4  ;;  %v556_v28 = vunpack.c.h.bf16 %v6267_v20 }
  0x81   : > { %v514_v45 = vsel %vm282_vm0, %v512_v25, %v513_v27  ;;  %v361_v50 = vrot.slane %v360_v36, 1  ;;  %v394_v54 = vadd.f32 %v393_v29, %v392_v15  ;;  %v452_v26 = vadd.f32 %v451_v37, %v450_v16 }
  0x82   : > { %v518_v33 = vsel %vm282_vm0, %v513_v27, %v517_v40  ;;  %v484_v58 = vadd.f32 %v483_v41, %v482_v23  ;;  %v522_v61 = vsel %vm282_vm0, %v517_v40, %v521_v47  ;;  %v543_v63 = vsel %vm282_vm0, %v521_v47, 0.0 }
  0x83   : > { %v541_v62 = vadd.f32 %v518_v33, %v514_v45  ;;  %v362_v6 = vadd.f32 %v361_v50, %v360_v36  ;;  %v453_v7 = vrot.slane %v452_v26, 2  ;;  %v558_v8 = vunpack.c.h.bf16 %v6271_v49 }
  0x84   : > { %v560_v9 = vunpack.c.h.bf16 %v6274_v18  ;;  %v485_v12 = vrot.slane %v484_v58, 2  ;;  %v562_v14 = vunpack.c.h.bf16 %v6279_v55  ;;  %v588_v15 = vunpack.c.h.bf16 %v6282_v57 }
  0x85   : > { %v542_v13 = vadd.f32 %v541_v62, %v522_v61  ;;  %v454_v16 = vadd.f32 %v453_v7, %v452_v26  ;;  %v573_v17 = vadd.f32 %v558_v8, %v556_v28  ;;  %v590_v23 = vunpack.c.h.bf16 %v6287_v1  ;;  %v6306_v7 = vld [vmem:[%s6099_s10 + $0x100] sm:$0xff]  ;;  %v6309_v8 = vld [vmem:[%s6099_s10 + $0x108] sm:$0xff] }
  0x86   : > { %v592_v25 = vunpack.c.h.bf16 %v6290_v2  ;;  %v486_v27 = vadd.f32 %v485_v12, %v484_v58  ;;  %v575_v29 = vsel %vm282_vm0, %v562_v14, 0.0  ;;  %v594_v37 = vunpack.c.h.bf16 %v6295_v10  ;;  %8993 = vst [vmem:[#allocation9_spill] sm:$0xff] %v6306_v7  ;;  %8994 = vst [vmem:[#allocation10_spill] sm:$0xff] %v6309_v8 }
  0x87   : > { %v544_v36 = vadd.f32 %v543_v63, %v542_v13  ;;  %v455_v40 = vrot.slane %v454_v16, 1  ;;  %v574_v41 = vadd.f32 %v573_v17, %v560_v9  ;;  %v606_v45 = vrot.slane %v588_v15, 4  ;;  %v6314_v15 = vld [vmem:[%s6099_s10 + $0x110] sm:$0xff] }
  0x88   : > { %v607_v47 = vrot.slane %v590_v23, 4  ;;  %v487_v50 = vrot.slane %v486_v27, 1  ;;  %v611_v28 = vrot.slane %v592_v25, 4  ;;  %v615_v33 = vrot.slane %v594_v37, 4  ;;  %8995 = vst [vmem:[#allocation11_spill] sm:$0xff] %v6314_v15 }
  0x89   : > { %v545_v26 = vrot.slane %v544_v36, 4  ;;  %v456_v61 = vadd.f32 %v455_v40, %v454_v16  ;;  %v576_v62 = vadd.f32 %v575_v29, %v574_v41  ;;  %v679_v63 = vsel %vm677_vm1, %v300_v21, %v362_v6  ;;  %v6319_v23 = vld [vmem:[%s6099_s10 + $0x118] sm:$0x33]  ;;  %v6322_v25 = vld [vmem:[%s6099_s10 + $0x118] sm:$0xcc]  ;;  %v6328_v40 = vld [vmem:[%s6099_s10 + $0x120] sm:$0xff] }
  0x8a   : > { %v608_v58 = vsel %vm282_vm0, %v606_v45, %v607_v47  ;;  %v488_v9 = vadd.f32 %v487_v50, %v486_v27  ;;  %v612_v13 = vsel %vm282_vm0, %v607_v47, %v611_v28  ;;  %v616_v14 = vsel %vm282_vm0, %v611_v28, %v615_v33  ;;  %8996 = vst [vmem:[#allocation12_spill] sm:$0xff] %v6319_v23  ;;  %v6331_v41 = vld [vmem:[%s6099_s10 + $0x128] sm:$0xff] }
  0x8b   : > { %v546_v12 = vadd.f32 %v545_v26, %v544_v36  ;;  %v577_v16 = vrot.slane %v576_v62, 4  ;;  %v635_v17 = vadd.f32 %v612_v13, %v608_v58  ;;  %v637_v21 = vsel %vm282_vm0, %v615_v33, 0.0  ;;  %8997 = vst [vmem:[#allocation13_spill] sm:$0xff] %v6322_v25  ;;  %8998 = vst [vmem:[#allocation14_spill] sm:$0xff] %v6328_v40  ;;  %v6336_v26 = vld [vmem:[%s6099_s10 + $0x130] sm:$0xff] }
  0x8c   : > { %v682_v6 = vsel %vm680_vm2, %v679_v63, %v394_v54  ;;  %v707_v29 = vunpack.c.h.bf16 %v6306_v7  ;;  %v709_v37 = vunpack.c.h.bf16 %v6309_v8  ;;  %8999 = vst [vmem:[#allocation15_spill] sm:$0xff] %v6331_v41  ;;  %v711_v50 = vunpack.c.h.bf16 %v6314_v15  ;;  %9000 = vst [vmem:[#allocation16_spill] sm:$0xff] %v6336_v26 }
  0x8d   : > { %v547_v27 = vrot.slane %v546_v12, 2  ;;  %v685_v36 = vsel %vm683_vm3, %v682_v6, %v456_v61  ;;  %v578_v45 = vadd.f32 %v577_v16, %v576_v62  ;;  %v636_v47 = vadd.f32 %v635_v17, %v616_v14 }
  0x8e   : > { %v687_v54 = vsel %vm282_vm0, %v685_v36, %v488_v9  ;;  %v713_v33 = vunpack.c.h.bf16 %v6319_v23  ;;  %v724_v61 = vadd.f32 %v709_v37, %v707_v29  ;;  %v739_v58 = vunpack.c.h.bf16 %v6322_v25  ;;  %v6394_v25 = vld [vmem:[%s6099_s10 + $0x188] sm:$0x33] }
  0x8f   : > { %v548_v28 = vadd.f32 %v547_v27, %v546_v12  ;;  %v579_v63 = vrot.slane %v578_v45, 2  ;;  %v638_v13 = vadd.f32 %v637_v21, %v636_v47  ;;  %v741_v6 = vunpack.c.h.bf16 %v6328_v40  ;;  %v6345_v12 = vld [vmem:[%s6099_s10 + $0x138] sm:$0xff]  ;;  %v6355_v40 = vld [vmem:[%s6099_s10 + $0x150] sm:$0x33]  ;;  %9012 = vst [vmem:[#allocation28_spill] sm:$0xff] %v6394_v25 }
  0x90   : > { %v743_v62 = vunpack.c.h.bf16 %v6331_v41  ;;  %v725_v16 = vadd.f32 %v724_v61, %v711_v50  ;;  %v726_v9 = vsel %vm282_vm0, %v713_v33, 0.0  ;;  %v745_v17 = vunpack.c.h.bf16 %v6336_v26  ;;  %9001 = vst [vmem:[#allocation17_spill] sm:$0xff] %v6345_v12  ;;  %v6349_v41 = vld [vmem:[%s6099_s10 + $0x140] sm:$0xff]  ;;  %v6352_v26 = vld [vmem:[%s6099_s10 + $0x148] sm:$0xff]  ;;  %9004 = vst [vmem:[#allocation20_spill] sm:$0xff] %v6355_v40 }
  0x91   : > { %v549_v14 = vrot.slane %v548_v28, 1  ;;  %v580_v27 = vadd.f32 %v579_v63, %v578_v45  ;;  %v639_v36 = vrot.slane %v638_v13, 4  ;;  %v757_v29 = vrot.slane %v739_v58, 4  ;;  %9002 = vst [vmem:[#allocation18_spill] sm:$0xff] %v6349_v41  ;;  %9003 = vst [vmem:[#allocation19_spill] sm:$0xff] %v6352_v26 }
  0x92   : > { %v758_v37 = vrot.slane %v741_v6, 4  ;;  %v727_v47 = vadd.f32 %v726_v9, %v725_v16  ;;  %v762_v46 = vrot.slane %v743_v62, 4  ;;  %v766_v39 = vrot.slane %v745_v17, 4  ;;  %v6366_v17 = vld [vmem:[%s6099_s10 + $0x158] sm:$0xff] }
  0x93   : > { %v550_v21 = vadd.f32 %v549_v14, %v548_v28  ;;  %v581_v50 = vrot.slane %v580_v27, 1  ;;  %v640_v61 = vadd.f32 %v639_v36, %v638_v13  ;;  %v801_v45 = vunpack.c.h.bf16 %v6345_v12  ;;  %v6362_v13 = vld [vmem:[%s6099_s10 + $0x150] sm:$0xcc]  ;;  %9006 = vst [vmem:[#allocation22_spill] sm:$0xff] %v6366_v17 }
  0x94   : > { %v759_v33 = vsel %vm282_vm0, %v757_v29, %v758_v37  ;;  %v728_v58 = vrot.slane %v727_v47, 4  ;;  %v763_v63 = vsel %vm282_vm0, %v758_v37, %v762_v46  ;;  %v767_v6 = vsel %vm282_vm0, %v762_v46, %v766_v39  ;;  %9005 = vst [vmem:[#allocation21_spill] sm:$0xff] %v6362_v13  ;;  %v6372_v37 = vld [vmem:[%s6099_s10 + $0x160] sm:$0xff]  ;;  %v6375_v46 = vld [vmem:[%s6099_s10 + $0x168] sm:$0xff] }
  0x95   : > { %v690_v28 = vsel %vm688_vm4, %v687_v54, %v550_v21  ;;  %v582_v62 = vadd.f32 %v581_v50, %v580_v27  ;;  %v641_v14 = vrot.slane %v640_v61, 2  ;;  %v786_v16 = vadd.f32 %v763_v63, %v759_v33  ;;  %9007 = vst [vmem:[#allocation23_spill] sm:$0xff] %v6372_v37  ;;  %9008 = vst [vmem:[#allocation24_spill] sm:$0xff] %v6375_v46 }
  0x96   : > { %v788_v9 = vsel %vm282_vm0, %v766_v39, 0.0  ;;  %v729_v36 = vadd.f32 %v728_v58, %v727_v47  ;;  %v803_v29 = vunpack.c.h.bf16 %v6349_v41  ;;  %v805_v12 = vunpack.c.h.bf16 %v6352_v26 }
  0x97   : > { %v807_v54 = vunpack.c.h.bf16 %v6355_v40  ;;  %v642_v21 = vadd.f32 %v641_v14, %v640_v61  ;;  %v693_v27 = vsel %vm691_vm5, %v690_v28, %v582_v62  ;;  %v787_v50 = vadd.f32 %v786_v16, %v767_v6  ;;  %v6384_v14 = vld [vmem:[%s6099_s10 + $0x170] sm:$0xff] }
  0x98   : > { %v833_v39 = vunpack.c.h.bf16 %v6362_v13  ;;  %v730_v33 = vrot.slane %v729_v36, 2  ;;  %v818_v63 = vadd.f32 %v803_v29, %v801_v45  ;;  %v835_v58 = vunpack.c.h.bf16 %v6366_v17  ;;  %9009 = vst [vmem:[#allocation25_spill] sm:$0xff] %v6384_v14 }
  0x99   : > { %v820_v47 = vsel %vm282_vm0, %v807_v54, 0.0  ;;  %v643_v26 = vrot.slane %v642_v21, 1  ;;  %v789_v41 = vadd.f32 %v788_v9, %v787_v50  ;;  %v837_v40 = vunpack.c.h.bf16 %v6372_v37  ;;  %v6388_v37 = vld [vmem:[%s6099_s10 + $0x178] sm:$0xff] }
  0x9a   : > { %v839_v61 = vunpack.c.h.bf16 %v6375_v46  ;;  %v731_v28 = vadd.f32 %v730_v33, %v729_v36  ;;  %v819_v6 = vadd.f32 %v818_v63, %v805_v12  ;;  %v851_v62 = vrot.slane %v833_v39, 4  ;;  %9010 = vst [vmem:[#allocation26_spill] sm:$0xff] %v6388_v37  ;;  %v6391_v46 = vld [vmem:[%s6099_s10 + $0x180] sm:$0xff]  ;;  %v6401_v39 = vld [vmem:[%s6099_s10 + $0x188] sm:$0xcc]  ;;  %v6404_v33 = vld [vmem:[%s6099_s10 + $0x190] sm:$0xff] }
  0x9b   : > { %v852_v16 = vrot.slane %v835_v58, 4  ;;  %v644_v45 = vadd.f32 %v643_v26, %v642_v21  ;;  %v790_v29 = vrot.slane %v789_v41, 4  ;;  %v856_v54 = vrot.slane %v837_v40, 4  ;;  %9011 = vst [vmem:[#allocation27_spill] sm:$0xff] %v6391_v46  ;;  %9013 = vst [vmem:[#allocation29_spill] sm:$0xff] %v6401_v39 }
  0x9c   : > { %v860_v17 = vrot.slane %v839_v61, 4  ;;  %v732_v13 = vrot.slane %v731_v28, 1  ;;  %v821_v9 = vadd.f32 %v820_v47, %v819_v6  ;;  %v895_v12 = vunpack.c.h.bf16 %v6384_v14  ;;  %9014 = vst [vmem:[#allocation30_spill] sm:$0xff] %v6404_v33  ;;  %v6410_v6 = vld [vmem:[%s6099_s10 + $0x198] sm:$0xff] }
  0x9d   : > { %v853_v50 = vsel %vm282_vm0, %v851_v62, %v852_v16  ;;  %v696_v36 = vsel %vm694_vm6, %v693_v27, %v644_v45  ;;  %v791_v26 = vadd.f32 %v790_v29, %v789_v41  ;;  %v857_v40 = vsel %vm282_vm0, %v852_v16, %v856_v54  ;;  %9015 = vst [vmem:[#allocation31_spill] sm:$0xff] %v6410_v6  ;;  %v6416_v45 = vld [vmem:[%s6099_s10 + $0x1a0] sm:$0xff] }
  0x9e   : > { %v861_v21 = vsel %vm282_vm0, %v856_v54, %v860_v17  ;;  %4042 = vmatprep.mubr.f32.mxu0 %v696_v36  ;;  %v6406_v63 = vadd.f32 %v732_v13, %v731_v28  ;;  %v822_v47 = vrot.slane %v821_v9, 4  ;;  %v880_v58 = vadd.f32 %v857_v40, %v853_v50  ;;  %9016 = vst [vmem:[#allocation32_spill] sm:$0xff] %v6416_v45 }
  0x9f   : > { %v882_v61 = vsel %vm282_vm0, %v860_v17, 0.0  ;;  %v792_v27 = vrot.slane %v791_v26, 2  ;;  %v897_v41 = vunpack.c.h.bf16 %v6388_v37  ;;  %v899_v62 = vunpack.c.h.bf16 %v6391_v46  ;;  %v6423_v37 = vld [vmem:[%s6099_s10 + $0x1a8] sm:$0xff] }
  0xa0   : > { %v901_v16 = vunpack.c.h.bf16 %v6394_v25  ;;  %v823_v29 = vadd.f32 %v822_v47, %v821_v9  ;;  %v881_v54 = vadd.f32 %v880_v58, %v861_v21  ;;  %v927_v13 = vunpack.c.h.bf16 %v6401_v39  ;;  %9017 = vst [vmem:[#allocation33_spill] sm:$0xff] %v6423_v37 }
  0xa1   : > { %v929_v28 = vunpack.c.h.bf16 %v6404_v33  ;;  %v793_v50 = vadd.f32 %v792_v27, %v791_v26  ;;  %v912_v17 = vadd.f32 %v897_v41, %v895_v12  ;;  %v931_v40 = vunpack.c.h.bf16 %v6410_v6  ;;  %v6427_v41 = vld [vmem:[%s6099_s10 + $0x1b0] sm:$0xff] }
  0xa2   : > { %v914_v36 = vsel %vm282_vm0, %v901_v16, 0.0  ;;  %v824_v46 = vrot.slane %v823_v29, 2  ;;  %v883_v25 = vadd.f32 %v882_v61, %v881_v54  ;;  %v933_v14 = vunpack.c.h.bf16 %v6416_v45  ;;  %9018 = vst [vmem:[#allocation34_spill] sm:$0xff] %v6427_v41  ;;  %v6430_v16 = vld [vmem:[%s6099_s10 + $0x1b8] sm:$0xff]  ;;  %v6443_v45 = vld [vmem:[%s6099_s10 + $0x1c8] sm:$0xff] }
  0xa3   : > { %v945_v9 = vrot.slane %v927_v13, 4  ;;  %v794_v21 = vrot.slane %v793_v50, 1  ;;  %v913_v47 = vadd.f32 %v912_v17, %v899_v62  ;;  %v946_v58 = vrot.slane %v929_v28, 4  ;;  %9019 = vst [vmem:[#allocation35_spill] sm:$0xff] %v6430_v16  ;;  %v6436_v28 = vld [vmem:[%s6099_s10 + $0x1c0] sm:$0x33] }
  0xa4   : > { %v950_v33 = vrot.slane %v931_v40, 4  ;;  %v825_v26 = vadd.f32 %v824_v46, %v823_v29  ;;  %v884_v12 = vrot.slane %v883_v25, 4  ;;  %v954_v27 = vrot.slane %v933_v14, 4  ;;  %9020 = vst [vmem:[#allocation36_spill] sm:$0xff] %v6436_v28  ;;  %v6440_v40 = vld [vmem:[%s6099_s10 + $0x1c0] sm:$0xcc] }
  0xa5   : > { %v989_v6 = vunpack.c.h.bf16 %v6423_v37  ;;  %v795_v61 = vadd.f32 %v794_v21, %v793_v50  ;;  %v915_v54 = vadd.f32 %v914_v36, %v913_v47  ;;  %v947_v13 = vsel %vm282_vm0, %v945_v9, %v946_v58  ;;  %v6449_v21 = vld [vmem:[%s6099_s10 + $0x1d0] sm:$0xff] }
  0xa6   : > { %v951_v62 = vsel %vm282_vm0, %v946_v58, %v950_v33  ;;  %v826_v46 = vrot.slane %v825_v26, 1  ;;  %v885_v29 = vadd.f32 %v884_v12, %v883_v25  ;;  %v955_v14 = vsel %vm282_vm0, %v950_v33, %v954_v27  ;;  %9021 = vst [vmem:[#allocation37_spill] sm:$0xff] %v6449_v21  ;;  %v6453_v33 = vld [vmem:[%s6099_s10 + $0x1d8] sm:$0xff] }
  0xa7   : > { %v974_v17 = vadd.f32 %v951_v62, %v947_v13  ;;  %v916_v37 = vrot.slane %v915_v54, 4  ;;  %v976_v50 = vsel %vm282_vm0, %v954_v27, 0.0  ;;  %v991_v36 = vunpack.c.h.bf16 %v6427_v41  ;;  %9022 = vst [vmem:[#allocation38_spill] sm:$0xff] %v6453_v33 }
  0xa8   : > { %v993_v9 = vunpack.c.h.bf16 %v6430_v16  ;;  %v827_v47 = vadd.f32 %v826_v46, %v825_v26  ;;  %v886_v58 = vrot.slane %v885_v29, 2  ;;  %v995_v25 = vunpack.c.h.bf16 %v6436_v28 }
  0xa9   : > { %v975_v39 = vadd.f32 %v974_v17, %v955_v14  ;;  %v917_v12 = vadd.f32 %v916_v37, %v915_v54  ;;  %v1006_v13 = vadd.f32 %v991_v36, %v989_v6  ;;  %v1021_v62 = vunpack.c.h.bf16 %v6440_v40 }
  0xaa   : > { %v1023_v23 = vunpack.c.h.bf16 %v6443_v45  ;;  %v887_v27 = vadd.f32 %v886_v58, %v885_v29  ;;  %v1008_v41 = vsel %vm282_vm0, %v995_v25, 0.0  ;;  %v1025_v16 = vunpack.c.h.bf16 %v6449_v21 }
  0xab   : > { %v977_v15 = vadd.f32 %v976_v50, %v975_v39  ;;  %v918_v8 = vrot.slane %v917_v12, 2  ;;  %v1007_v26 = vadd.f32 %v1006_v13, %v993_v9  ;;  %v1027_v46 = vunpack.c.h.bf16 %v6453_v33  ;;  %v3802_v39 = vld [vmem:[#allocation5 + $0x280] sm:$0xff]  ;;  %v3803_v50 = vld [vmem:[#allocation5 + $0x288] sm:$0xff] }
  0xac   : > { %v1039_v14 = vrot.slane %v1021_v62, 4  ;;  %v888_v17 = vrot.slane %v887_v27, 1  ;;  %v1040_v7 = vrot.slane %v1023_v23, 4  ;;  %v1044_v37 = vrot.slane %v1025_v16, 4 }
  0xad   : > { %v978_v28 = vrot.slane %v977_v15, 4  ;;  %v919_v6 = vadd.f32 %v918_v8, %v917_v12  ;;  %v1009_v54 = vadd.f32 %v1008_v41, %v1007_v26  ;;  %v1048_v36 = vrot.slane %v1027_v46, 4 }
  0xae   : > { %v1111_v29 = vsel %vm677_vm1, %v6406_v63, %v795_v61  ;;  %v889_v58 = vadd.f32 %v888_v17, %v887_v27  ;;  %v1041_v21 = vsel %vm282_vm0, %v1039_v14, %v1040_v7  ;;  %v1045_v9 = vsel %vm282_vm0, %v1040_v7, %v1044_v37 }
  0xaf   : > { %v979_v25 = vadd.f32 %v978_v28, %v977_v15  ;;  %v920_v13 = vrot.slane %v919_v6, 1  ;;  %v1010_v62 = vrot.slane %v1009_v54, 4  ;;  %v1049_v33 = vsel %vm282_vm0, %v1044_v37, %v1048_v36 }
  0xb0   : > { %v1068_v23 = vadd.f32 %v1045_v9, %v1041_v21  ;;  %v1070_v8 = vsel %vm282_vm0, %v1048_v36, 0.0  ;;  %v1113_v41 = vsel %vm680_vm2, %v1111_v29, %v827_v47  ;;  %v5564_v12 = vpack.c.bf16 %v3803_v50, %v3802_v39 }
  0xb1   : > { %v980_v16 = vrot.slane %v979_v25, 2  ;;  %v921_v63 = vadd.f32 %v920_v13, %v919_v6  ;;  %v1011_v61 = vadd.f32 %v1010_v62, %v1009_v54  ;;  %v1115_v15 = vsel %vm683_vm3, %v1113_v41, %v889_v58 }
  0xb2   : > { %v1069_v26 = vadd.f32 %v1068_v23, %v1049_v33  ;;  %5565 = vmatprep.subr.bf16.mxu0 %v5564_v12  ;;  %v276_v7 = vunpack.c.l.bf16 %v6158_v34  ;;  %v278_v27 = vunpack.c.l.bf16 %v6161_v35  ;;  %v9023_v46 = vunpack.c.l.bf16 %v6150_v31 }
  0xb3   : > { %v981_v28 = vadd.f32 %v980_v16, %v979_v25  ;;  %v9024_v21 = vunpack.c.l.bf16 %v6153_v32  ;;  %v1012_v17 = vrot.slane %v1011_v61, 2  ;;  %v1117_v47 = vsel %vm282_vm0, %v1115_v15, %v921_v63 }
  0xb4   : > { %v1071_v37 = vadd.f32 %v1070_v8, %v1069_v26  ;;  %v305_v6 = vunpack.c.l.bf16 %v6166_v38  ;;  %v283_v36 = vsel %vm282_vm0, %v278_v27, 0.0  ;;  %v307_v29 = vunpack.c.l.bf16 %v6172_v42 }
  0xb5   : > { %v280_v14 = vadd.f32 %v9024_v21, %v9023_v46  ;;  %v982_v33 = vrot.slane %v981_v28, 1  ;;  %v1013_v34 = vadd.f32 %v1012_v17, %v1011_v61  ;;  %v309_v35 = vunpack.c.l.bf16 %v6175_v43 }
  0xb6   : > { %v1072_v39 = vrot.slane %v1071_v37, 4  ;;  %v311_v31 = vunpack.c.l.bf16 %v6178_v44  ;;  %v321_v58 = vrot.slane %v305_v6, 4  ;;  %v322_v25 = vrot.slane %v307_v29, 4 }
  0xb7   : > { %v281_v54 = vadd.f32 %v280_v14, %v276_v7  ;;  %v983_v32 = vadd.f32 %v982_v33, %v981_v28  ;;  %v1014_v9 = vrot.slane %v1013_v34, 1  ;;  %v327_v62 = vrot.slane %v309_v35, 4 }
  0xb8   : > { %v1073_v13 = vadd.f32 %v1072_v39, %v1071_v37  ;;  %v331_v38 = vrot.slane %v311_v31, 4  ;;  %v323_v8 = vsel %vm282_vm0, %v321_v58, %v322_v25  ;;  %v367_v42 = vunpack.c.l.bf16 %v6186_v51 }
  0xb9   : > { %v284_v50 = vadd.f32 %v283_v36, %v281_v54  ;;  %v1119_v23 = vsel %vm688_vm4, %v1117_v47, %v983_v32  ;;  %v1015_v41 = vadd.f32 %v1014_v9, %v1013_v34  ;;  %v328_v43 = vsel %vm282_vm0, %v322_v25, %v327_v62 }
  0xba   : > { %v1074_v12 = vrot.slane %v1073_v13, 2  ;;  %v332_v44 = vsel %vm282_vm0, %v327_v62, %v331_v38  ;;  %v343_v61 = vadd.f32 %v328_v43, %v323_v8  ;;  %v345_v26 = vsel %vm282_vm0, %v331_v38, 0.0 }
  0xbb   : > { %v285_v16 = vrot.slane %v284_v50, 4  ;;  %v369_v15 = vunpack.c.l.bf16 %v6189_v52  ;;  %v1121_v7 = vsel %vm691_vm5, %v1119_v23, %v1015_v41  ;;  %v371_v27 = vunpack.c.l.bf16 %v6192_v53 }
  0xbc   : > { %v1075_v28 = vadd.f32 %v1074_v12, %v1073_v13  ;;  %v373_v46 = vunpack.c.l.bf16 %v6196_v56  ;;  %v344_v21 = vadd.f32 %v343_v61, %v332_v44  ;;  %v399_v17 = vunpack.c.l.bf16 %v6201_v59 }
  0xbd   : > { %v286_v63 = vadd.f32 %v285_v16, %v284_v50  ;;  %v375_v14 = vadd.f32 %v369_v15, %v367_v42  ;;  %v401_v6 = vunpack.c.l.bf16 %v6206_v3  ;;  %v403_v33 = vunpack.c.l.bf16 %v6209_v4 }
  0xbe   : > { %v1076_v37 = vrot.slane %v1075_v28, 1  ;;  %v377_v47 = vsel %vm282_vm0, %v373_v46, 0.0  ;;  %v346_v54 = vadd.f32 %v345_v26, %v344_v21  ;;  %v405_v29 = vunpack.c.l.bf16 %v6212_v5 }
  0xbf   : > { %v287_v51 = vrot.slane %v286_v63, 2  ;;  %v376_v36 = vadd.f32 %v375_v14, %v371_v27  ;;  %v415_v34 = vrot.slane %v399_v17, 4  ;;  %v416_v56 = vrot.slane %v401_v6, 4 }
  0xc0   : > { %v1077_v53 = vadd.f32 %v1076_v37, %v1075_v28  ;;  %v421_v39 = vrot.slane %v403_v33, 4  ;;  %v347_v31 = vrot.slane %v346_v54, 4  ;;  %v425_v59 = vrot.slane %v405_v29, 4 }
  0xc1   : > { %v288_v52 = vadd.f32 %v287_v51, %v286_v63  ;;  %v378_v32 = vadd.f32 %v377_v47, %v376_v36  ;;  %v417_v58 = vsel %vm282_vm0, %v415_v34, %v416_v56  ;;  %v461_v4 = vunpack.c.l.bf16 %v6219_v11 }
  0xc2   : > { %v1123_v50 = vsel %vm694_vm6, %v1121_v7, %v1077_v53  ;;  %v422_v3 = vsel %vm282_vm0, %v416_v56, %v421_v39  ;;  %v348_v5 = vadd.f32 %v347_v31, %v346_v54  ;;  %v426_v13 = vsel %vm282_vm0, %v421_v39, %v425_v59 }
  0xc3   : > { %v289_v35 = vrot.slane %v288_v52, 1  ;;  %4117 = vmatprep.mubr.f32.mxu1 %v1123_v50  ;;  %v379_v9 = vrot.slane %v378_v32, 4  ;;  %v437_v62 = vadd.f32 %v422_v3, %v417_v58  ;;  %v439_v38 = vsel %vm282_vm0, %v425_v59, 0.0 }
  0xc4   : > { %v463_v23 = vunpack.c.l.bf16 %v6227_v22  ;;  %v465_v16 = vunpack.c.l.bf16 %v6230_v24  ;;  %v349_v8 = vrot.slane %v348_v5, 2  ;;  %v467_v41 = vunpack.c.l.bf16 %v6240_v48 }
  0xc5   : > { %v6499_v25 = vadd.f32 %v289_v35, %v288_v52  ;;  %v380_v42 = vadd.f32 %v379_v9, %v378_v32  ;;  %v493_v11 = vunpack.c.l.bf16 %v6245_v19  ;;  %v438_v12 = vadd.f32 %v437_v62, %v426_v13 }
  0xc6   : > { %v469_v43 = vadd.f32 %v463_v23, %v461_v4  ;;  %v495_v44 = vunpack.c.l.bf16 %v6251_v30  ;;  %v497_v63 = vunpack.c.l.bf16 %v6255_v60  ;;  %v350_v61 = vadd.f32 %v349_v8, %v348_v5 }
  0xc7   : > { %v381_v26 = vrot.slane %v380_v42, 2  ;;  %v471_v15 = vsel %vm282_vm0, %v467_v41, 0.0  ;;  %v499_v22 = vunpack.c.l.bf16 %v6259_v0  ;;  %v440_v28 = vadd.f32 %v439_v38, %v438_v12 }
  0xc8   : > { %v470_v24 = vadd.f32 %v469_v43, %v465_v16  ;;  %v509_v7 = vrot.slane %v493_v11, 4  ;;  %v510_v27 = vrot.slane %v495_v44, 4  ;;  %v351_v46 = vrot.slane %v350_v61, 1 }
  0xc9   : > { %v382_v48 = vadd.f32 %v381_v26, %v380_v42  ;;  %v515_v51 = vrot.slane %v497_v63, 4  ;;  %v519_v19 = vrot.slane %v499_v22, 4  ;;  %v441_v21 = vrot.slane %v440_v28, 4 }
  0xca   : > { %v472_v14 = vadd.f32 %v471_v15, %v470_v24  ;;  %v511_v30 = vsel %vm282_vm0, %v509_v7, %v510_v27  ;;  %v555_v60 = vunpack.c.l.bf16 %v6267_v20  ;;  %v352_v17 = vadd.f32 %v351_v46, %v350_v61  ;;  %v9025_v15 = vld [vmem:[#allocation9_spill] sm:$0xff] }
  0xcb   : > { %v383_v37 = vrot.slane %v382_v48, 1  ;;  %v516_v47 = vsel %vm282_vm0, %v510_v27, %v515_v51  ;;  %v520_v0 = vsel %vm282_vm0, %v515_v51, %v519_v19  ;;  %v442_v6 = vadd.f32 %v441_v21, %v440_v28  ;;  %v9027_v27 = vld [vmem:[#allocation11_spill] sm:$0xff] }
  0xcc   : > { %v473_v33 = vrot.slane %v472_v14, 4  ;;  %v531_v52 = vadd.f32 %v516_v47, %v511_v30  ;;  %v533_v54 = vsel %vm282_vm0, %v519_v19, 0.0  ;;  %v557_v29 = vunpack.c.l.bf16 %v6271_v49  ;;  %v9028_v19 = vld [vmem:[#allocation12_spill] sm:$0xff]  ;;  %v9030_v47 = vld [vmem:[#allocation14_spill] sm:$0xff] }
  0xcd   : > { %v384_v36 = vadd.f32 %v383_v37, %v382_v48  ;;  %v559_v53 = vunpack.c.l.bf16 %v6274_v18  ;;  %v561_v34 = vunpack.c.l.bf16 %v6279_v55  ;;  %v443_v56 = vrot.slane %v442_v6, 2 }
  0xce   : > { %v474_v20 = vadd.f32 %v473_v33, %v472_v14  ;;  %v532_v39 = vadd.f32 %v531_v52, %v520_v0  ;;  %v587_v35 = vunpack.c.l.bf16 %v6282_v57  ;;  %v563_v31 = vadd.f32 %v557_v29, %v555_v60  ;;  %v9029_v14 = vld [vmem:[#allocation13_spill] sm:$0xff]  ;;  %v9031_v52 = vld [vmem:[#allocation15_spill] sm:$0xff] }
  0xcf   : > { %v565_v32 = vsel %vm282_vm0, %v561_v34, 0.0  ;;  %v589_v59 = vunpack.c.l.bf16 %v6287_v1  ;;  %v591_v50 = vunpack.c.l.bf16 %v6290_v2  ;;  %v444_v58 = vadd.f32 %v443_v56, %v442_v6 }
  0xd0   : > { %v475_v3 = vrot.slane %v474_v20, 2  ;;  %v534_v4 = vadd.f32 %v533_v54, %v532_v39  ;;  %v593_v49 = vunpack.c.l.bf16 %v6295_v10  ;;  %v564_v18 = vadd.f32 %v563_v31, %v559_v53 }
  0xd1   : > { %v603_v5 = vrot.slane %v587_v35, 4  ;;  %v604_v55 = vrot.slane %v589_v59, 4  ;;  %v609_v9 = vrot.slane %v591_v50, 4  ;;  %v445_v13 = vrot.slane %v444_v58, 1 }
  0xd2   : > { %v476_v62 = vadd.f32 %v475_v3, %v474_v20  ;;  %v535_v38 = vrot.slane %v534_v4, 4  ;;  %v613_v57 = vrot.slane %v593_v49, 4  ;;  %v566_v23 = vadd.f32 %v565_v32, %v564_v18  ;;  %v9033_v3 = vld [vmem:[#allocation17_spill] sm:$0xff] }
  0xd3   : > { %v605_v16 = vsel %vm282_vm0, %v603_v5, %v604_v55  ;;  %v610_v1 = vsel %vm282_vm0, %v604_v55, %v609_v9  ;;  %v678_v2 = vsel %vm677_vm1, %v6499_v25, %v352_v17  ;;  %v446_v8 = vadd.f32 %v445_v13, %v444_v58  ;;  %v9026_v25 = vld [vmem:[#allocation10_spill] sm:$0xff] }
  0xd4   : > { %v477_v42 = vrot.slane %v476_v62, 1  ;;  %v536_v41 = vadd.f32 %v535_v38, %v534_v4  ;;  %v614_v10 = vsel %vm282_vm0, %v609_v9, %v613_v57  ;;  %v567_v11 = vrot.slane %v566_v23, 4 }
  0xd5   : > { %v625_v12 = vadd.f32 %v610_v1, %v605_v16  ;;  %v627_v43 = vsel %vm282_vm0, %v613_v57, 0.0  ;;  %v681_v44 = vsel %vm680_vm2, %v678_v2, %v384_v36  ;;  %v706_v22 = vunpack.c.l.bf16 %v9025_v15  ;;  %v9032_v36 = vld [vmem:[#allocation16_spill] sm:$0xff]  ;;  %v9035_v1 = vld [vmem:[#allocation19_spill] sm:$0xff] }
  0xd6   : > { %v478_v63 = vadd.f32 %v477_v42, %v476_v62  ;;  %v537_v61 = vrot.slane %v536_v41, 2  ;;  %v684_v26 = vsel %vm683_vm3, %v681_v44, %v446_v8  ;;  %v568_v28 = vadd.f32 %v567_v11, %v566_v23  ;;  %v9034_v23 = vld [vmem:[#allocation18_spill] sm:$0xff]  ;;  %v9036_v8 = vld [vmem:[#allocation20_spill] sm:$0xff] }
  0xd7   : > { %v626_v24 = vadd.f32 %v625_v12, %v614_v10  ;;  %v708_v7 = vunpack.c.l.bf16 %v9026_v25  ;;  %v710_v46 = vunpack.c.l.bf16 %v9027_v27  ;;  %v712_v21 = vunpack.c.l.bf16 %v9028_v19  ;;  %v9039_v25 = vld [vmem:[#allocation23_spill] sm:$0xff] }
  0xd8   : > { %v538_v48 = vadd.f32 %v537_v61, %v536_v41  ;;  %v686_v51 = vsel %vm282_vm0, %v684_v26, %v478_v63  ;;  %v738_v30 = vunpack.c.l.bf16 %v9029_v14  ;;  %v569_v60 = vrot.slane %v568_v28, 2  ;;  %v9037_v63 = vld [vmem:[#allocation21_spill] sm:$0xff]  ;;  %v9038_v26 = vld [vmem:[#allocation22_spill] sm:$0xff] }
  0xd9   : > { %v628_v17 = vadd.f32 %v627_v43, %v626_v24  ;;  %v714_v37 = vadd.f32 %v708_v7, %v706_v22  ;;  %v740_v0 = vunpack.c.l.bf16 %v9030_v47  ;;  %v716_v33 = vsel %vm282_vm0, %v712_v21, 0.0 }
  0xda   : > { %v539_v6 = vrot.slane %v538_v48, 1  ;;  %v742_v54 = vunpack.c.l.bf16 %v9031_v52  ;;  %v744_v29 = vunpack.c.l.bf16 %v9032_v36  ;;  %v570_v53 = vadd.f32 %v569_v60, %v568_v28 }
  0xdb   : > { %v629_v34 = vrot.slane %v628_v17, 4  ;;  %v715_v56 = vadd.f32 %v714_v37, %v710_v46  ;;  %v754_v20 = vrot.slane %v738_v30, 4  ;;  %v755_v35 = vrot.slane %v740_v0, 4  ;;  %v9040_v46 = vld [vmem:[#allocation24_spill] sm:$0xff]  ;;  %v9041_v0 = vld [vmem:[#allocation25_spill] sm:$0xff] }
  0xdc   : > { %v540_v39 = vadd.f32 %v539_v6, %v538_v48  ;;  %v760_v31 = vrot.slane %v742_v54, 4  ;;  %v764_v32 = vrot.slane %v744_v29, 4  ;;  %v571_v59 = vrot.slane %v570_v53, 1 }
  0xdd   : > { %v630_v50 = vadd.f32 %v629_v34, %v628_v17  ;;  %v717_v58 = vadd.f32 %v716_v33, %v715_v56  ;;  %v800_v4 = vunpack.c.l.bf16 %v9033_v3  ;;  %v756_v18 = vsel %vm282_vm0, %v754_v20, %v755_v35  ;;  %v9044_v3 = vld [vmem:[#allocation28_spill] sm:$0xff] }
  0xde   : > { %v689_v49 = vsel %vm688_vm4, %v686_v51, %v540_v39  ;;  %v761_v5 = vsel %vm282_vm0, %v755_v35, %v760_v31  ;;  %v765_v55 = vsel %vm282_vm0, %v760_v31, %v764_v32  ;;  %v572_v9 = vadd.f32 %v571_v59, %v570_v53  ;;  %v9042_v35 = vld [vmem:[#allocation26_spill] sm:$0xff] }
  0xdf   : > { %v631_v13 = vrot.slane %v630_v50, 2  ;;  %v718_v62 = vrot.slane %v717_v58, 4  ;;  %v776_v38 = vadd.f32 %v761_v5, %v756_v18  ;;  %v778_v57 = vsel %vm282_vm0, %v764_v32, 0.0  ;;  %v9043_v32 = vld [vmem:[#allocation27_spill] sm:$0xff] }
  0xe0   : > { %v802_v16 = vunpack.c.l.bf16 %v9034_v23  ;;  %v804_v2 = vunpack.c.l.bf16 %v9035_v1  ;;  %v806_v42 = vunpack.c.l.bf16 %v9036_v8  ;;  %v692_v10 = vsel %vm691_vm5, %v689_v49, %v572_v9  ;;  %v9045_v49 = vld [vmem:[#allocation29_spill] sm:$0xff]  ;;  %v9046_v9 = vld [vmem:[#allocation30_spill] sm:$0xff]  ;;  %v9048_v1 = vld [vmem:[#allocation32_spill] sm:$0xff] }
  0xe1   : > { %v632_v41 = vadd.f32 %v631_v13, %v630_v50  ;;  %v719_v11 = vadd.f32 %v718_v62, %v717_v58  ;;  %v777_v12 = vadd.f32 %v776_v38, %v765_v55  ;;  %v832_v61 = vunpack.c.l.bf16 %v9037_v63  ;;  %v9047_v62 = vld [vmem:[#allocation31_spill] sm:$0xff] }
  0xe2   : > { %v808_v43 = vadd.f32 %v802_v16, %v800_v4  ;;  %v810_v44 = vsel %vm282_vm0, %v806_v42, 0.0  ;;  %v834_v15 = vunpack.c.l.bf16 %v9038_v26  ;;  %v836_v7 = vunpack.c.l.bf16 %v9039_v25 }
  0xe3   : > { %v633_v22 = vrot.slane %v632_v41, 1  ;;  %v720_v28 = vrot.slane %v719_v11, 2  ;;  %v779_v24 = vadd.f32 %v778_v57, %v777_v12  ;;  %v838_v48 = vunpack.c.l.bf16 %v9040_v46 }
  0xe4   : > { %v809_v27 = vadd.f32 %v808_v43, %v804_v2  ;;  %v848_v51 = vrot.slane %v832_v61, 4  ;;  %v849_v19 = vrot.slane %v834_v15, 4  ;;  %v854_v60 = vrot.slane %v836_v7, 4  ;;  %v9049_v15 = vld [vmem:[#allocation33_spill] sm:$0xff] }
  0xe5   : > { %v634_v21 = vadd.f32 %v633_v22, %v632_v41  ;;  %v721_v14 = vadd.f32 %v720_v28, %v719_v11  ;;  %v780_v30 = vrot.slane %v779_v24, 4  ;;  %v858_v47 = vrot.slane %v838_v48, 4 }
  0xe6   : > { %v811_v17 = vadd.f32 %v810_v44, %v809_v27  ;;  %v850_v37 = vsel %vm282_vm0, %v848_v51, %v849_v19  ;;  %v894_v6 = vunpack.c.l.bf16 %v9041_v0  ;;  %v855_v36 = vsel %vm282_vm0, %v849_v19, %v854_v60  ;;  %v9050_v51 = vld [vmem:[#allocation34_spill] sm:$0xff] }
  0xe7   : > { %v695_v33 = vsel %vm694_vm6, %v692_v10, %v634_v21  ;;  %v722_v52 = vrot.slane %v721_v14, 1  ;;  %v781_v54 = vadd.f32 %v780_v30, %v779_v24  ;;  %v859_v53 = vsel %vm282_vm0, %v854_v60, %v858_v47  ;;  %v9051_v30 = vld [vmem:[#allocation35_spill] sm:$0xff] }
  0xe8   : > { %4043 = vmatmul.mubr.f32.vlgmr.msra.gmra.mrb[0].mxu0 %v695_v33  ;;  %v812_v29 = vrot.slane %v811_v17, 4  ;;  %v870_v34 = vadd.f32 %v855_v36, %v850_v37  ;;  %v872_v56 = vsel %vm282_vm0, %v858_v47, 0.0  ;;  %v896_v31 = vunpack.c.l.bf16 %v9042_v35  ;;  %v9054_v35 = vld [vmem:[#allocation38_spill] sm:$0xff] }
  0xe9   : > { %v6563_v20 = vadd.f32 %v722_v52, %v721_v14  ;;  %v782_v39 = vrot.slane %v781_v54, 2  ;;  %v898_v59 = vunpack.c.l.bf16 %v9043_v32  ;;  %v900_v4 = vunpack.c.l.bf16 %v9044_v3  ;;  %v3786_v3 = vld [vmem:[#allocation5 + $0x200] sm:$0xff] }
  0xea   : > { %v813_v50 = vadd.f32 %v812_v29, %v811_v17  ;;  %v871_v58 = vadd.f32 %v870_v34, %v859_v53  ;;  %v926_v18 = vunpack.c.l.bf16 %v9045_v49  ;;  %v902_v55 = vadd.f32 %v896_v31, %v894_v6  ;;  %v9052_v17 = vld [vmem:[#allocation36_spill] sm:$0xff]  ;;  %v9053_v29 = vld [vmem:[#allocation37_spill] sm:$0xff] }
  0xeb   : > { %v783_v5 = vadd.f32 %v782_v39, %v781_v54  ;;  %v928_v13 = vunpack.c.l.bf16 %v9046_v9  ;;  %v930_v38 = vunpack.c.l.bf16 %v9047_v62  ;;  %v904_v16 = vsel %vm282_vm0, %v900_v4, 0.0  ;;  %v3787_v4 = vld [vmem:[#allocation5 + $0x208] sm:$0xff]  ;;  %v3804_v62 = vld [vmem:[#allocation5 + $0x290] sm:$0xff] }
  0xec   : > { %v814_v57 = vrot.slane %v813_v50, 2  ;;  %v873_v23 = vadd.f32 %v872_v56, %v871_v58  ;;  %v932_v2 = vunpack.c.l.bf16 %v9048_v1  ;;  %v903_v42 = vadd.f32 %v902_v55, %v898_v59  ;;  %v3834_v55 = vld [vmem:[#allocation5 + $0x380] sm:$0xff]  ;;  %v3835_v9 = vld [vmem:[#allocation5 + $0x388] sm:$0xff]  ;;  %v3805_v1 = vld [vmem:[#allocation5 + $0x298] sm:$0xff] }
  0xed   : > { %v784_v8 = vrot.slane %v783_v5, 1  ;;  %v942_v41 = vrot.slane %v926_v18, 4  ;;  %v943_v10 = vrot.slane %v928_v13, 4  ;;  %v948_v43 = vrot.slane %v930_v38, 4  ;;  %v6588_v13 = vld [vmem:[#allocation5 + $0x308] sm:$0xff] }
  0xee   : > { %v815_v11 = vadd.f32 %v814_v57, %v813_v50  ;;  %v874_v12 = vrot.slane %v873_v23, 4  ;;  %v952_v44 = vrot.slane %v932_v2, 4  ;;  %v905_v61 = vadd.f32 %v904_v16, %v903_v42  ;;  %v6594_v2 = vld [vmem:[#allocation5 + $0x210] sm:$0xff] }
  0xef   : > { %v785_v63 = vadd.f32 %v784_v8, %v783_v5  ;;  %v944_v26 = vsel %vm282_vm0, %v942_v41, %v943_v10  ;;  %v988_v22 = vunpack.c.l.bf16 %v9049_v15  ;;  %v949_v25 = vsel %vm282_vm0, %v943_v10, %v948_v43  ;;  %v6596_v8 = vld [vmem:[#allocation5 + $0x218] sm:$0xff] }
  0xf0   : > { %v816_v28 = vrot.slane %v815_v11, 1  ;;  %v875_v24 = vadd.f32 %v874_v12, %v873_v23  ;;  %v953_v7 = vsel %vm282_vm0, %v948_v43, %v952_v44  ;;  %v906_v27 = vrot.slane %v905_v61, 4  ;;  %v6599_v12 = vld [vmem:[#allocation5 + $0x390] sm:$0xff]  ;;  %v6601_v43 = vld [vmem:[#allocation5 + $0x398] sm:$0xff] }
  0xf1   : > { %v964_v46 = vadd.f32 %v949_v25, %v944_v26  ;;  %v966_v48 = vsel %vm282_vm0, %v952_v44, 0.0  ;;  %v990_v19 = vunpack.c.l.bf16 %v9050_v51  ;;  %v992_v60 = vunpack.c.l.bf16 %v9051_v30  ;;  %v6603_v44 = vld [vmem:[#allocation5 + $0x310] sm:$0xff]  ;;  %v6608_v26 = vld [vmem:[%s6099_s10 + $0xe0] sm:$0xff] }
  0xf2   : > { %v817_v21 = vadd.f32 %v816_v28, %v815_v11  ;;  %v876_v14 = vrot.slane %v875_v24, 2  ;;  %v994_v37 = vunpack.c.l.bf16 %v9052_v17  ;;  %v907_v47 = vadd.f32 %v906_v27, %v905_v61  ;;  %v6605_v61 = vld [vmem:[#allocation5 + $0x318] sm:$0xff]  ;;  %v3806_v28 = vld [vmem:[#allocation5 + $0x2a0] sm:$0xff] }
  0xf3   : > { %v965_v0 = vadd.f32 %v964_v46, %v953_v7  ;;  %v996_v6 = vadd.f32 %v990_v19, %v988_v22  ;;  %v1020_v33 = vunpack.c.l.bf16 %v6440_v40  ;;  %v1022_v36 = vunpack.c.l.bf16 %v6443_v45  ;;  %v6586_v45 = vld [vmem:[#allocation5 + $0x300] sm:$0xff]  ;;  %v6614_v7 = vld [vmem:[#allocation5 + $0x228] sm:$0xff]  ;;  %v6627_v17 = vld [vmem:[#allocation5 + $0x2b8] sm:$0xff] }
  0xf4   : > { %v877_v52 = vadd.f32 %v876_v14, %v875_v24  ;;  %v998_v54 = vsel %vm282_vm0, %v994_v37, 0.0  ;;  %v1024_v53 = vunpack.c.l.bf16 %v9053_v29  ;;  %v908_v34 = vrot.slane %v907_v47, 2  ;;  %v3807_v24 = vld [vmem:[#allocation5 + $0x2a8] sm:$0xff]  ;;  %v6612_v25 = vld [vmem:[#allocation5 + $0x220] sm:$0xff] }
  0xf5   : > { %v967_v56 = vadd.f32 %v966_v48, %v965_v0  ;;  %v997_v39 = vadd.f32 %v996_v6, %v992_v60  ;;  %v1026_v31 = vunpack.c.l.bf16 %v9054_v35  ;;  %v1036_v59 = vrot.slane %v1020_v33, 4  ;;  %v6617_v19 = vld [vmem:[#allocation5 + $0x3a0] sm:$0xff]  ;;  %v6619_v14 = vld [vmem:[#allocation5 + $0x3a8] sm:$0xff]  ;;  %v6631_v33 = vld [vmem:[#allocation5 + $0x230] sm:$0xff] }
  0xf6   : > { %v878_v32 = vrot.slane %v877_v52, 1  ;;  %v1037_v50 = vrot.slane %v1022_v36, 4  ;;  %v1042_v58 = vrot.slane %v1024_v53, 4  ;;  %v909_v49 = vadd.f32 %v908_v34, %v907_v47  ;;  %v6621_v30 = vld [vmem:[#allocation5 + $0x320] sm:$0xff]  ;;  %v6623_v60 = vld [vmem:[#allocation5 + $0x328] sm:$0xff]  ;;  %v6637_v36 = vld [vmem:[#allocation5 + $0x3b8] sm:$0xff] }
  0xf7   : > { %v968_v40 = vrot.slane %v967_v56, 4  ;;  %v999_v18 = vadd.f32 %v998_v54, %v997_v39  ;;  %v1046_v5 = vrot.slane %v1026_v31, 4  ;;  %v1110_v16 = vsel %vm677_vm1, %v6563_v20, %v785_v63  ;;  %v6635_v54 = vld [vmem:[#allocation5 + $0x3b0] sm:$0xff]  ;;  %v6644_v35 = vld [vmem:[#allocation5 + $0x338] sm:$0xff]  ;;  %v6646_v31 = vld [vmem:[#allocation5 + $0x2c0] sm:$0xff] }
  0xf8   : > { %v879_v38 = vadd.f32 %v878_v32, %v877_v52  ;;  %v1038_v57 = vsel %vm282_vm0, %v1036_v59, %v1037_v50  ;;  %v1043_v23 = vsel %vm282_vm0, %v1037_v50, %v1042_v58  ;;  %v910_v42 = vrot.slane %v909_v49, 1  ;;  %v6633_v52 = vld [vmem:[#allocation5 + $0x238] sm:$0xff]  ;;  %v6642_v39 = vld [vmem:[#allocation5 + $0x330] sm:$0xff]  ;;  %v6648_v32 = vld [vmem:[#allocation5 + $0x2c8] sm:$0xff] }
  0xf9   : > { %v969_v41 = vadd.f32 %v968_v40, %v967_v56  ;;  %v1000_v10 = vrot.slane %v999_v18, 4  ;;  %v1047_v11 = vsel %vm282_vm0, %v1042_v58, %v1046_v5  ;;  %v1058_v20 = vadd.f32 %v1043_v23, %v1038_v57  ;;  %v6650_v59 = vld [vmem:[#allocation5 + $0x240] sm:$0xff]  ;;  %v6652_v50 = vld [vmem:[#allocation5 + $0x248] sm:$0xff]  ;;  %v6669_v23 = vld [vmem:[#allocation5 + $0x2d0] sm:$0xff] }
  0xfa   : > { %v1060_v63 = vsel %vm282_vm0, %v1046_v5, 0.0  ;;  %v1112_v15 = vsel %vm680_vm2, %v1110_v16, %v817_v21  ;;  %v5566_v22 = vpack.c.bf16 %v3787_v4, %v3786_v3  ;;  %v911_v27 = vadd.f32 %v910_v42, %v909_v49  ;;  %v6625_v21 = vld [vmem:[#allocation5 + $0x2b0] sm:$0xff]  ;;  %v6658_v49 = vld [vmem:[#allocation5 + $0x3c0] sm:$0xff]  ;;  %v6660_v40 = vld [vmem:[#allocation5 + $0x3c8] sm:$0xff] }
  0xfb   : > { %v970_v46 = vrot.slane %v969_v41, 2  ;;  %v1001_v48 = vadd.f32 %v1000_v10, %v999_v18  ;;  %v1114_v51 = vsel %vm683_vm3, %v1112_v15, %v879_v38  ;;  %v1059_v37 = vadd.f32 %v1058_v20, %v1047_v11  ;;  %v6662_v18 = vld [vmem:[#allocation5 + $0x340] sm:$0xff]  ;;  %v6664_v5 = vld [vmem:[#allocation5 + $0x348] sm:$0xff]  ;;  %v6671_v16 = vld [vmem:[#allocation5 + $0x2d8] sm:$0xff] }
  0xfc   : > { %5567 = vmatpush3.bf16.msra.mxu0 %v5566_v22  ;;  %v5596_v47 = vpack.c.bf16 %v3835_v9, %v3834_v55  ;;  %v5568_v6 = vpack.c.bf16 %v3805_v1, %v3804_v62  ;;  %v1116_v34 = vsel %vm282_vm0, %v1114_v51, %v911_v27  ;;  %v5570_v56 = vpack.c.bf16 %v6596_v8, %v6594_v2  ;;  %v6673_v1 = vld [vmem:[#allocation5 + $0x250] sm:$0xff]  ;;  %v6675_v2 = vld [vmem:[#allocation5 + $0x258] sm:$0xff]  ;;  %v6697_v27 = vld [vmem:[#allocation5 + $0x2e8] sm:$0xff] }
  0xfd   : > { %v971_v29 = vadd.f32 %v970_v46, %v969_v41  ;;  %v1002_v53 = vrot.slane %v1001_v48, 2  ;;  %v1061_v58 = vadd.f32 %v1060_v63, %v1059_v37  ;;  %v650_v55 = vunpack.c.h.bf16 %v6608_v26  ;;  %v6683_v11 = vld [vmem:[#allocation5 + $0x3d0] sm:$0xff]  ;;  %v6685_v20 = vld [vmem:[#allocation5 + $0x3d8] sm:$0xff]  ;;  %v646_v46 = vld [vmem:[%s6099_s10 + $0xe8] sm:$0xff] }
  0xfe   : > { %5597 = vmatprep.subr.bf16.mxu1 %v5596_v47  ;;  %5569 = vmatprep.subr.bf16.mxu0 %v5568_v6  ;;  %v5572_v38 = vpack.c.bf16 %v3807_v24, %v3806_v28  ;;  %v5574_v57 = vpack.c.bf16 %v6614_v7, %v6612_v25  ;;  %v5576_v10 = vpack.c.bf16 %v6627_v17, %v6625_v21  ;;  %v6687_v63 = vld [vmem:[#allocation5 + $0x350] sm:$0xff]  ;;  %v6693_v25 = vld [vmem:[#allocation5 + $0x358] sm:$0xff]  ;;  %v6695_v7 = vld [vmem:[#allocation5 + $0x2e0] sm:$0xff]  ;;  %v651_v4 = vunpack.c.l.bf16 %v646_v46 }
  0xff   : > { %v972_v9 = vrot.slane %v971_v29, 1  ;;  %v1003_v62 = vadd.f32 %v1002_v53, %v1001_v48  ;;  %v1062_v8 = vrot.slane %v1061_v58, 4  ;;  %v5578_v28 = vpack.c.bf16 %v6633_v52, %v6631_v33  ;;  %v6706_v37 = vld [vmem:[#allocation5 + $0x260] sm:$0xff]  ;;  %v6708_v47 = vld [vmem:[#allocation5 + $0x268] sm:$0xff]  ;;  %v6713_v33 = vld [vmem:[%s6099_s10 + $0xf0] sm:$0xff] }
 0x100   : > { %5571 = vmatpush3.bf16.msra.mxu0 %v5570_v56  ;;  %v5580_v21 = vpack.c.bf16 %v6648_v32, %v6646_v31  ;;  %v5582_v17 = vpack.c.bf16 %v6652_v50, %v6650_v59  ;;  %v6710_v6 = vld [vmem:[#allocation5 + $0x3e0] sm:$0xff]  ;;  %v6720_v31 = vld [vmem:[#allocation5 + $0x3e8] sm:$0xff]  ;;  %v4974_v56 = vld [vmem:[%s6099_s10 + $0x1f8] sm:$0x33]  ;;  %v653_v0 = vunpack.c.l.bf16 %v6713_v33 }
 0x101   : > { %v973_v15 = vadd.f32 %v972_v9, %v971_v29  ;;  %v1004_v22 = vrot.slane %v1003_v62, 1  ;;  %5573 = vmatprep.subr.bf16.mxu0 %v5572_v38  ;;  %v1063_v48 = vadd.f32 %v1062_v8, %v1061_v58  ;;  %9055 = vst [vmem:[#allocation9_spill] sm:$0xff] %v6710_v6  ;;  %v6722_v32 = vld [vmem:[#allocation5 + $0x360] sm:$0xff]  ;;  %v6724_v59 = vld [vmem:[#allocation5 + $0x368] sm:$0xff]  ;;  %v5584_v58 = vpack.c.bf16 %v6671_v16, %v6669_v23  ;;  %v6743_v16 = vld [vmem:[%s6099_s10 + $0x1f0] sm:$0xff] }
 0x102   : > { %9056 = vst [vmem:[#allocation10_spill] sm:$0xff] %v6722_v32  ;;  %9057 = vst [vmem:[#allocation11_spill] sm:$0xff] %v6724_v59  ;;  %v4971_v38 = vld [vmem:[%s6099_s10 + $0x1e0] sm:$0xff]  ;;  %v4972_v8 = vld [vmem:[%s6099_s10 + $0x1e8] sm:$0xff]  ;;  %v1087_v42 = vunpack.c.h.bf16 %v6743_v16 }
 0x103   : > { %v1005_v52 = vadd.f32 %v1004_v22, %v1003_v62  ;;  %v1118_v29 = vsel %vm688_vm4, %v1116_v34, %v973_v15  ;;  %v1064_v50 = vrot.slane %v1063_v48, 2  ;;  %v648_v62 = vld [vmem:[%s6099_s10 + $0xf8] sm:$0x33]  ;;  %v1083_v51 = vunpack.c.h.bf16 %v4971_v38 }
 0x104   : > { %5575 = vmatpush3.bf16.msra.mxu0 %v5574_v57  ;;  %v656_v22 = vunpack.c.h.bf16 %v648_v62  ;;  %v1085_v24 = vunpack.c.h.bf16 %v4972_v8  ;;  %v1082_v59 = vunpack.c.l.bf16 %v4971_v38  ;;  %v3817_v6 = vld [vmem:[#allocation5 + $0x2f8] sm:$0xff]  ;;  %v9058_v38 = vpack.c.bf16 %v6588_v13, %v6586_v45  ;;  %v6794_v13 = vld [vmem:[%s6099_s10 + $0x210] sm:$0xff] }
 0x105   : > { %v1120_v15 = vsel %vm691_vm5, %v1118_v29, %v1005_v52  ;;  %5577 = vmatprep.subr.bf16.mxu0 %v5576_v10  ;;  %v1065_v53 = vadd.f32 %v1064_v50, %v1063_v48  ;;  %v652_v10 = vunpack.c.h.bf16 %v646_v46  ;;  %v654_v29 = vunpack.c.h.bf16 %v6713_v33 }
 0x106   : > { %v1089_v48 = vunpack.c.h.bf16 %v4974_v56  ;;  %v669_v50 = vsel %vm282_vm0, %v656_v22, 0.0  ;;  %v1100_v9 = vadd.f32 %v1085_v24, %v1083_v51  ;;  %v649_v52 = vunpack.c.l.bf16 %v6608_v26  ;;  %v6762_v22 = vld [vmem:[#allocation5 + $0x278] sm:$0xff]  ;;  %v6766_v51 = vld [vmem:[#allocation5 + $0x3f0] sm:$0xff] }
 0x107   : > { %v1066_v41 = vrot.slane %v1065_v53, 1  ;;  %v667_v23 = vadd.f32 %v652_v10, %v650_v55  ;;  %v655_v55 = vunpack.c.l.bf16 %v648_v62  ;;  %v1084_v24 = vunpack.c.l.bf16 %v4972_v8  ;;  %v6771_v62 = vld [vmem:[#allocation5 + $0x370] sm:$0xff] }
 0x108   : > { %5579 = vmatpush3.bf16.msra.mxu0 %v5578_v28  ;;  %v1102_v3 = vsel %vm282_vm0, %v1089_v48, 0.0  ;;  %v6758_v28 = vld [vmem:[#allocation5 + $0x2f0] sm:$0xff]  ;;  %v1101_v32 = vadd.f32 %v1100_v9, %v1087_v42  ;;  %v657_v10 = vadd.f32 %v651_v4, %v649_v52  ;;  %v1086_v46 = vunpack.c.l.bf16 %v6743_v16  ;;  %v6768_v42 = vld [vmem:[#allocation5 + $0x3f8] sm:$0xff] }
 0x109   : > { %5581 = vmatprep.subr.bf16.mxu0 %v5580_v21  ;;  %v1067_v57 = vadd.f32 %v1066_v41, %v1065_v53  ;;  %v668_v34 = vadd.f32 %v667_v23, %v654_v29  ;;  %v6760_v21 = vld [vmem:[#allocation5 + $0x270] sm:$0xff]  ;;  %v659_v53 = vsel %vm282_vm0, %v655_v55, 0.0  ;;  %v1088_v9 = vunpack.c.l.bf16 %v4974_v56 }
 0x10a   : > { %v1103_v4 = vadd.f32 %v1102_v3, %v1101_v32  ;;  %v658_v33 = vadd.f32 %v657_v10, %v653_v0  ;;  %v5592_v3 = vpack.c.bf16 %v3817_v6, %v6758_v28  ;;  %v5594_v0 = vpack.c.bf16 %v6762_v22, %v6760_v21  ;;  %v6785_v32 = vld [vmem:[%s6099_s10 + $0x208] sm:$0xff] }
 0x10b   : > { %v1122_v26 = vsel %vm694_vm6, %v1120_v15, %v1067_v57  ;;  %v670_v41 = vadd.f32 %v669_v50, %v668_v34  ;;  %v6776_v34 = vld [vmem:[%s6099_s10 + $0x200] sm:$0xff]  ;;  %v1090_v15 = vadd.f32 %v1084_v24, %v1082_v59  ;;  %v9059_v56 = vpack.c.bf16 %v6601_v43, %v6599_v12  ;;  %v6802_v43 = vld [vmem:[%s6099_s10 + $0x218] sm:$0x33] }
 0x10c   : > { %5583 = vmatpush3.bf16.msra.mxu0 %v5582_v17  ;;  %4118 = vmatmul.mubr.f32.vlgmr.msra.gmra.mrb[0].mxu1 %v1122_v26  ;;  %v6773_v17 = vld [vmem:[#allocation5 + $0x378] sm:$0xff]  ;;  %v660_v57 = vadd.f32 %v659_v53, %v658_v33  ;;  %v1092_v23 = vsel %vm282_vm0, %v1088_v9, 0.0  ;;  %v5624_v45 = vpack.c.bf16 %v6768_v42, %v6766_v51  ;;  %v9060_v6 = vpack.c.bf16 %v6675_v2, %v6673_v1  ;;  %v4980_v9 = vld [vmem:[%s6099_s10 + $0x220] sm:$0xff] }
 0x10d   : > { %5585 = vmatprep.subr.bf16.mxu0 %v5584_v58  ;;  %5599 = vmatpush3.bf16.msra.mxu1 %v9058_v38  ;;  %v671_v8 = vrot.slane %v670_v41, 4  ;;  %v1104_v58 = vrot.slane %v1103_v4, 4  ;;  %v1091_v16 = vadd.f32 %v1090_v15, %v1086_v46  ;;  %v5626_v12 = vpack.c.bf16 %v6773_v17, %v6771_v62 }
 0x10e   : > { %5601 = vmatprep.subr.bf16.mxu1 %v9059_v56  ;;  %v1133_v52 = vunpack.c.l.bf16 %v6776_v34  ;;  %v9061_v29 = vpack.c.bf16 %v6697_v27, %v6695_v7  ;;  %v661_v50 = vrot.slane %v660_v57, 4  ;;  %v1134_v28 = vunpack.c.h.bf16 %v6776_v34  ;;  %v4979_v7 = vld [vmem:[%s6099_s10 + $0x218] sm:$0xcc] }
 0x10f   : > { %v672_v59 = vadd.f32 %v671_v8, %v670_v41  ;;  %v1105_v48 = vadd.f32 %v1104_v58, %v1103_v4  ;;  %v1135_v1 = vunpack.c.l.bf16 %v6785_v32  ;;  %v9062_v2 = vpack.c.bf16 %v6605_v61, %v6603_v44 }
 0x110   : > { %5587 = vmatpush3.bf16.msra.mxu0 %v9060_v6  ;;  %v1093_v10 = vadd.f32 %v1092_v23, %v1091_v16  ;;  %v1136_v21 = vunpack.c.h.bf16 %v6785_v32  ;;  %v9063_v27 = vpack.c.bf16 %v6619_v14, %v6617_v19  ;;  %v662_v41 = vadd.f32 %v661_v50, %v660_v57  ;;  %v4981_v14 = vld [vmem:[%s6099_s10 + $0x228] sm:$0xff]  ;;  %v4982_v23 = vld [vmem:[%s6099_s10 + $0x230] sm:$0xff] }
 0x111   : > { %5589 = vmatprep.subr.bf16.mxu0 %v9061_v29  ;;  %5603 = vmatpush3.bf16.msra.mxu1 %v9062_v2  ;;  %v673_v55 = vrot.slane %v672_v59, 2  ;;  %v1106_v26 = vrot.slane %v1105_v48, 2  ;;  %v1138_v24 = vunpack.c.h.bf16 %v6794_v13  ;;  %v9064_v61 = vpack.c.bf16 %v6708_v47, %v6706_v37 }
 0x112   : > { %5605 = vmatprep.subr.bf16.mxu1 %v9063_v27  ;;  %v1094_v4 = vrot.slane %v1093_v10, 4  ;;  %v1140_v33 = vunpack.c.h.bf16 %v6802_v43  ;;  %v1151_v53 = vadd.f32 %v1136_v21, %v1134_v28  ;;  %v663_v19 = vrot.slane %v662_v41, 2 }
 0x113   : > { %v674_v46 = vadd.f32 %v673_v55, %v672_v59  ;;  %v1107_v38 = vadd.f32 %v1106_v26, %v1105_v48  ;;  %v1165_v8 = vunpack.c.l.bf16 %v4979_v7  ;;  %v1166_v15 = vunpack.c.h.bf16 %v4979_v7  ;;  %v6841_v26 = vld [vmem:[%s6099_s10 + $0x238] sm:$0xff] }
 0x114   : > { %5591 = vmatpush3.bf16.msra.mxu0 %v9064_v61  ;;  %v9065_v56 = vpack.c.bf16 %v6623_v60, %v6621_v30  ;;  %v1095_v37 = vadd.f32 %v1094_v4, %v1093_v10  ;;  %v1152_v47 = vadd.f32 %v1151_v53, %v1138_v24  ;;  %v1153_v57 = vsel %vm282_vm0, %v1140_v33, 0.0  ;;  %v6851_v53 = vld [vmem:[%s6099_s10 + $0x240] sm:$0xff] }
 0x115   : > { %5593 = vmatprep.subr.bf16.mxu0 %v5592_v3  ;;  %v675_v58 = vrot.slane %v674_v46, 1  ;;  %v9066_v6 = vpack.c.bf16 %v6637_v36, %v6635_v54  ;;  %v1108_v59 = vrot.slane %v1107_v38, 1  ;;  %v664_v16 = vadd.f32 %v663_v19, %v662_v41 }
 0x116   : > { %5607 = vmatpush3.bf16.msra.mxu1 %v9065_v56  ;;  %v1167_v3 = vunpack.c.l.bf16 %v4980_v9  ;;  %v1168_v29 = vunpack.c.h.bf16 %v4980_v9  ;;  %v1096_v50 = vrot.slane %v1095_v37, 2  ;;  %v1154_v30 = vadd.f32 %v1153_v57, %v1152_v47  ;;  %v4987_v47 = vld [vmem:[%s6099_s10 + $0x250] sm:$0xcc] }
 0x117   : > { %5609 = vmatprep.subr.bf16.mxu1 %v9066_v6  ;;  %v676_v48 = vadd.f32 %v675_v58, %v674_v46  ;;  %v1169_v60 = vunpack.c.l.bf16 %v4981_v14  ;;  %v1109_v28 = vadd.f32 %v1108_v59, %v1107_v38  ;;  %v665_v2 = vrot.slane %v664_v16, 1  ;;  %v6857_v38 = vld [vmem:[%s6099_s10 + $0x248] sm:$0xff]  ;;  %v6865_v58 = vld [vmem:[%s6099_s10 + $0x250] sm:$0x33]  ;;  %v4988_v59 = vld [vmem:[%s6099_s10 + $0x258] sm:$0xff] }
 0x118   : > { %5595 = vmatpush3.bf16.msra.mxu0 %v5594_v0  ;;  %v1170_v55 = vunpack.c.h.bf16 %v4981_v14  ;;  %v1171_v10 = vunpack.c.l.bf16 %v4982_v23  ;;  %v9067_v21 = vpack.c.bf16 %v6644_v35, %v6642_v39  ;;  %v1097_v54 = vadd.f32 %v1096_v50, %v1095_v37  ;;  %v4989_v50 = vld [vmem:[%s6099_s10 + $0x260] sm:$0xff] }
 0x119   : > { %700 = vst [vmem:[#allocation2 + $0x88] sm:$0x1] %v676_v48  ;;  %v1155_v36 = vrot.slane %v1154_v30, 4  ;;  %v1172_v7 = vunpack.c.h.bf16 %v4982_v23  ;;  %v6838_v27 = vrot.slane %v1165_v8, 4  ;;  %v9068_v0 = vpack.c.bf16 %v6660_v40, %v6658_v49  ;;  %1127 = vst [vmem:[#allocation2 + $0x98] sm:$0x1] %v1109_v28 }
 0x11a   : > { %5611 = vmatpush3.bf16.msra.mxu1 %v9067_v21  ;;  %v666_v41 = vadd.f32 %v665_v2, %v664_v16  ;;  %v6846_v24 = vrot.slane %v1167_v3, 4  ;;  %v1184_v39 = vrot.slane %v1166_v15, 4  ;;  %v1185_v35 = vrot.slane %v1168_v29, 4  ;;  %v4990_v28 = vld [vmem:[%s6099_s10 + $0x268] sm:$0xff] }
 0x11b   : > { %5613 = vmatprep.subr.bf16.mxu1 %v9068_v0  ;;  %v1098_v61 = vrot.slane %v1097_v54, 1  ;;  %v1156_v46 = vadd.f32 %v1155_v36, %v1154_v30  ;;  %v6848_v4 = vrot.slane %v1169_v60, 4  ;;  %v1189_v33 = vrot.slane %v1170_v55, 4  ;;  %v9072_v0 = vld [vmem:[#allocation9_spill] sm:$0xff] }
 0x11c   : > { %699 = vst [vmem:[#allocation2 + $0x80] sm:$0x1] %v666_v41  ;;  %v1186_v49 = vsel %vm282_vm0, %v1184_v39, %v1185_v35  ;;  %v6854_v40 = vrot.slane %v1171_v10, 4  ;;  %v1193_v9 = vrot.slane %v1172_v7, 4  ;;  %v9069_v14 = vpack.c.bf16 %v6664_v5, %v6662_v18 }
 0x11d   : > { %v1099_v8 = vadd.f32 %v1098_v61, %v1097_v54  ;;  %v1157_v15 = vrot.slane %v1156_v46, 2  ;;  %v1190_v56 = vsel %vm282_vm0, %v1185_v35, %v1189_v33  ;;  %v1228_v37 = vunpack.c.h.bf16 %v6841_v26 }
 0x11e   : > { %5615 = vmatpush3.bf16.msra.mxu1 %v9069_v14  ;;  %v9070_v57 = vpack.c.bf16 %v6685_v20, %v6683_v11  ;;  %v1194_v23 = vsel %vm282_vm0, %v1189_v33, %v1193_v9  ;;  %v1213_v6 = vadd.f32 %v1190_v56, %v1186_v49  ;;  %v1215_v18 = vsel %vm282_vm0, %v1193_v9, 0.0  ;;  %v6897_v56 = vld [vmem:[%s6099_s10 + $0x270] sm:$0xff] }
 0x11f   : > { %1126 = vst [vmem:[#allocation2 + $0x90] sm:$0x1] %v1099_v8  ;;  %v1158_v16 = vadd.f32 %v1157_v15, %v1156_v46  ;;  %v1230_v3 = vunpack.c.h.bf16 %v6851_v53  ;;  %v1232_v48 = vunpack.c.h.bf16 %v6857_v38  ;;  %v1234_v60 = vunpack.c.h.bf16 %v6865_v58 }
 0x120   : > { %5617 = vmatprep.subr.bf16.mxu1 %v9070_v57  ;;  %v3707_v11 = vld [vmem:[#allocation2 + $0x88] sm:$0x1]  ;;  %v1214_v20 = vadd.f32 %v1213_v6, %v1194_v23  ;;  %v1259_v2 = vunpack.c.l.bf16 %v4987_v47  ;;  %v9071_v55 = vpack.c.bf16 %v6693_v25, %v6687_v63  ;;  %v3709_v10 = vld [vmem:[#allocation2 + $0x98] sm:$0x1]  ;;  %v1260_v36 = vunpack.c.h.bf16 %v4987_v47 }
 0x121   : > { %4047 = vmatprep.mubr.f32.mxu0 %v3707_v11  ;;  %v1159_v21 = vrot.slane %v1158_v16, 1  ;;  %v1245_v54 = vadd.f32 %v1230_v3, %v1228_v37  ;;  %v1261_v7 = vunpack.c.l.bf16 %v4988_v59  ;;  %v9073_v41 = vpack.c.bf16 %v6720_v31, %v9072_v0  ;;  %4122 = vmatprep.mubr.f32.mxu1 %v3709_v10  ;;  %v9074_v37 = vld [vmem:[#allocation11_spill] sm:$0xff]  ;;  %v9075_v47 = vld [vmem:[#allocation10_spill] sm:$0xff] }
 0x122   : > { %5619 = vmatpush3.bf16.msra.mxu1 %v9071_v55  ;;  %v1216_v39 = vadd.f32 %v1215_v18, %v1214_v20  ;;  %v1247_v35 = vsel %vm282_vm0, %v1234_v60, 0.0  ;;  %v1262_v61 = vunpack.c.h.bf16 %v4988_v59  ;;  %v1263_v46 = vunpack.c.l.bf16 %v4989_v50  ;;  %v6910_v20 = vld [vmem:[%s6099_s10 + $0x278] sm:$0xff]  ;;  %v6917_v55 = vld [vmem:[%s6099_s10 + $0x288] sm:$0x33] }
 0x123   : > { %5621 = vmatprep.subr.bf16.mxu1 %v9073_v41  ;;  %v3706_v33 = vld [vmem:[#allocation2 + $0x80] sm:$0x1]  ;;  %v6890_v63 = vadd.f32 %v1159_v21, %v1158_v16  ;;  %v1246_v25 = vadd.f32 %v1245_v54, %v1232_v48  ;;  %v1264_v49 = vunpack.c.h.bf16 %v4989_v50  ;;  %v1265_v9 = vunpack.c.l.bf16 %v4990_v28 }
 0x124   : > { %4048 = vmatmul.mubr.f32.gmra.mrb[2].mxu0 %v3706_v33  ;;  %v1217_v14 = vrot.slane %v1216_v39, 4  ;;  %v1266_v8 = vunpack.c.h.bf16 %v4990_v28  ;;  %v6892_v15 = vrot.slane %v1259_v2, 4  ;;  %v6894_v31 = vrot.slane %v1261_v7, 4  ;;  %v6914_v2 = vld [vmem:[%s6099_s10 + $0x280] sm:$0xff] }
 0x125   : > { %v9076_v57 = vpack.c.bf16 %v9074_v37, %v9075_v47  ;;  %v1248_v23 = vadd.f32 %v1247_v35, %v1246_v25  ;;  %v1278_v6 = vrot.slane %v1260_v36, 4  ;;  %v1279_v18 = vrot.slane %v1262_v61, 4  ;;  %v4996_v35 = vld [vmem:[%s6099_s10 + $0x290] sm:$0xff] }
 0x126   : > { %v6902_v59 = vrot.slane %v1263_v46, 4  ;;  %v3708_v16 = vld [vmem:[#allocation2 + $0x90] sm:$0x1]  ;;  %v1218_v3 = vadd.f32 %v1217_v14, %v1216_v39  ;;  %v1283_v48 = vrot.slane %v1264_v49, 4  ;;  %v6907_v50 = vrot.slane %v1265_v9, 4  ;;  %v4997_v9 = vld [vmem:[%s6099_s10 + $0x298] sm:$0xff] }
 0x127   : > { %5623 = vmatpush3.bf16.msra.mxu1 %v9076_v57  ;;  %v1287_v11 = vrot.slane %v1266_v8, 4  ;;  %v1249_v60 = vrot.slane %v1248_v23, 4  ;;  %v1280_v28 = vsel %vm282_vm0, %v1278_v6, %v1279_v18  ;;  %v1322_v42 = vunpack.c.h.bf16 %v6897_v56  ;;  %v4995_v39 = vld [vmem:[%s6099_s10 + $0x288] sm:$0xcc]  ;;  %v4998_v8 = vld [vmem:[%s6099_s10 + $0x2a0] sm:$0xff] }
 0x128   : > { %5625 = vmatprep.subr.bf16.mxu1 %v5624_v45  ;;  %4123 = vmatmul.mubr.f32.gmra.mrb[2].mxu1 %v3708_v16  ;;  %v1219_v45 = vrot.slane %v1218_v3, 2  ;;  %v1284_v10 = vsel %vm282_vm0, %v1279_v18, %v1283_v48  ;;  %v1324_v41 = vunpack.c.h.bf16 %v6910_v20  ;;  %v1326_v33 = vunpack.c.h.bf16 %v6914_v2 }
 0x129   : > { %v1288_v21 = vsel %vm282_vm0, %v1283_v48, %v1287_v11  ;;  %v1309_v54 = vsel %vm282_vm0, %v1287_v11, 0.0  ;;  %v1250_v36 = vadd.f32 %v1249_v60, %v1248_v23  ;;  %v1307_v7 = vadd.f32 %v1284_v10, %v1280_v28 }
 0x12a   : > { %v1220_v61 = vadd.f32 %v1219_v45, %v1218_v3  ;;  %v1328_v17 = vunpack.c.h.bf16 %v6917_v55  ;;  %v1353_v37 = vunpack.c.l.bf16 %v4995_v39  ;;  %v1354_v47 = vunpack.c.h.bf16 %v4995_v39 }
 0x12b   : > { %5627 = vmatpush3.bf16.msra.mxu1 %v5626_v12  ;;  %v1251_v49 = vrot.slane %v1250_v36, 2  ;;  %v1308_v62 = vadd.f32 %v1307_v7, %v1288_v21  ;;  %v1339_v12 = vadd.f32 %v1324_v41, %v1322_v42  ;;  %v1355_v57 = vunpack.c.l.bf16 %v4996_v35  ;;  %v6945_v41 = vld [vmem:[%s6099_s10 + $0x2a8] sm:$0xff] }
 0x12c   : > { %v1221_v14 = vrot.slane %v1220_v61, 1  ;;  %v1341_v16 = vsel %vm282_vm0, %v1328_v17, 0.0  ;;  %v1356_v48 = vunpack.c.h.bf16 %v4996_v35  ;;  %v1357_v11 = vunpack.c.l.bf16 %v4997_v9 }
 0x12d   : > { %v1252_v23 = vadd.f32 %v1251_v49, %v1250_v36  ;;  %v1310_v6 = vadd.f32 %v1309_v54, %v1308_v62  ;;  %v1340_v18 = vadd.f32 %v1339_v12, %v1326_v33  ;;  %v1358_v60 = vunpack.c.h.bf16 %v4997_v9  ;;  %v6954_v9 = vld [vmem:[%s6099_s10 + $0x2b0] sm:$0xff] }
 0x12e   : > { %v6938_v3 = vadd.f32 %v1221_v14, %v1220_v61  ;;  %v1359_v10 = vunpack.c.l.bf16 %v4998_v8  ;;  %v1360_v21 = vunpack.c.h.bf16 %v4998_v8  ;;  %v6940_v7 = vrot.slane %v1353_v37, 4 }
 0x12f   : > { %v1253_v28 = vrot.slane %v1252_v23, 1  ;;  %v1311_v45 = vrot.slane %v1310_v6, 4  ;;  %v1342_v42 = vadd.f32 %v1341_v16, %v1340_v18  ;;  %v6942_v36 = vrot.slane %v1355_v57, 4  ;;  %v6961_v57 = vld [vmem:[%s6099_s10 + $0x2c0] sm:$0x33] }
 0x130   : > { %v1372_v54 = vrot.slane %v1354_v47, 4  ;;  %v1373_v33 = vrot.slane %v1356_v48, 4  ;;  %v6949_v49 = vrot.slane %v1357_v11, 4  ;;  %v1377_v62 = vrot.slane %v1358_v60, 4  ;;  %v6958_v47 = vld [vmem:[%s6099_s10 + $0x2b8] sm:$0xff] }
 0x131   : > { %v6947_v39 = vadd.f32 %v1253_v28, %v1252_v23  ;;  %v1312_v35 = vadd.f32 %v1311_v45, %v1310_v6  ;;  %v1343_v61 = vrot.slane %v1342_v42, 4  ;;  %v6951_v17 = vrot.slane %v1359_v10, 4  ;;  %v5004_v10 = vld [vmem:[%s6099_s10 + $0x2c8] sm:$0xff] }
 0x132   : > { %v1381_v12 = vrot.slane %v1360_v21, 4  ;;  %v1374_v37 = vsel %vm282_vm0, %v1372_v54, %v1373_v33  ;;  %v1378_v6 = vsel %vm282_vm0, %v1373_v33, %v1377_v62  ;;  %v1416_v48 = vunpack.c.h.bf16 %v6945_v41 }
 0x133   : > { %v1313_v14 = vrot.slane %v1312_v35, 2  ;;  %v1344_v8 = vadd.f32 %v1343_v61, %v1342_v42  ;;  %v1401_v28 = vadd.f32 %v1378_v6, %v1374_v37  ;;  %v5003_v42 = vld [vmem:[%s6099_s10 + $0x2c0] sm:$0xcc]  ;;  %v1418_v21 = vunpack.c.h.bf16 %v6954_v9  ;;  %v5006_v37 = vld [vmem:[%s6099_s10 + $0x2d8] sm:$0xff] }
 0x134   : > { %v1382_v18 = vsel %vm282_vm0, %v1377_v62, %v1381_v12  ;;  %v1403_v16 = vsel %vm282_vm0, %v1381_v12, 0.0  ;;  %v1420_v61 = vunpack.c.h.bf16 %v6958_v47  ;;  %v1447_v6 = vunpack.c.l.bf16 %v5003_v42 }
 0x135   : > { %v1314_v11 = vadd.f32 %v1313_v14, %v1312_v35  ;;  %v1345_v60 = vrot.slane %v1344_v8, 2  ;;  %v1402_v23 = vadd.f32 %v1401_v28, %v1382_v18  ;;  %v1422_v35 = vunpack.c.h.bf16 %v6961_v57  ;;  %v5005_v14 = vld [vmem:[%s6099_s10 + $0x2d0] sm:$0xff] }
 0x136   : > { %v1433_v46 = vadd.f32 %v1418_v21, %v1416_v48  ;;  %v1448_v45 = vunpack.c.h.bf16 %v5003_v42  ;;  %v1449_v25 = vunpack.c.l.bf16 %v5004_v10  ;;  %v1450_v5 = vunpack.c.h.bf16 %v5004_v10 }
 0x137   : > { %v1315_v62 = vrot.slane %v1314_v11, 1  ;;  %v1346_v12 = vadd.f32 %v1345_v60, %v1344_v8  ;;  %v1404_v29 = vadd.f32 %v1403_v16, %v1402_v23  ;;  %v1435_v54 = vsel %vm282_vm0, %v1422_v35, 0.0 }
 0x138   : > { %v1434_v30 = vadd.f32 %v1433_v46, %v1420_v61  ;;  %v1451_v19 = vunpack.c.l.bf16 %v5005_v14  ;;  %v1452_v33 = vunpack.c.h.bf16 %v5005_v14  ;;  %v1453_v18 = vunpack.c.l.bf16 %v5006_v37 }
 0x139   : > { %v1316_v0 = vadd.f32 %v1315_v62, %v1314_v11  ;;  %v1347_v51 = vrot.slane %v1346_v12, 1  ;;  %v1405_v8 = vrot.slane %v1404_v29, 4  ;;  %v1454_v60 = vunpack.c.h.bf16 %v5006_v37 }
 0x13a   : > { %v1436_v28 = vadd.f32 %v1435_v54, %v1434_v30  ;;  %v6979_v44 = vrot.slane %v1447_v6, 4  ;;  %v6981_v48 = vrot.slane %v1449_v25, 4  ;;  %v1466_v42 = vrot.slane %v1448_v45, 4 }
 0x13b   : > { %v1348_v22 = vadd.f32 %v1347_v51, %v1346_v12  ;;  %v1406_v21 = vadd.f32 %v1405_v8, %v1404_v29  ;;  %v1467_v11 = vrot.slane %v1450_v5, 4  ;;  %v6983_v62 = vrot.slane %v1451_v19, 4 }
 0x13c   : > { %v1471_v23 = vrot.slane %v1452_v33, 4  ;;  %v1437_v16 = vrot.slane %v1436_v28, 4  ;;  %v6985_v46 = vrot.slane %v1453_v18, 4  ;;  %v1475_v10 = vrot.slane %v1454_v60, 4 }
 0x13d   : > { %v1538_v51 = vsel %vm677_vm1, %v6890_v63, %v6938_v3  ;;  %v1407_v61 = vrot.slane %v1406_v21, 2  ;;  %v1468_v30 = vsel %vm282_vm0, %v1466_v42, %v1467_v11  ;;  %v1141_v63 = vadd.f32 %v1135_v1, %v1133_v52 }
 0x13e   : > { %v1472_v25 = vsel %vm282_vm0, %v1467_v11, %v1471_v23  ;;  %v1540_v29 = vsel %vm680_vm2, %v1538_v51, %v6947_v39  ;;  %v1438_v5 = vadd.f32 %v1437_v16, %v1436_v28  ;;  %v1476_v19 = vsel %vm282_vm0, %v1471_v23, %v1475_v10 }
 0x13f   : > { %v1495_v45 = vadd.f32 %v1472_v25, %v1468_v30  ;;  %v1497_v54 = vsel %vm282_vm0, %v1475_v10, 0.0  ;;  %v1408_v33 = vadd.f32 %v1407_v61, %v1406_v21  ;;  %v1542_v12 = vsel %vm683_vm3, %v1540_v29, %v1316_v0 }
 0x140   : > { %v9077_v3 = vunpack.c.l.bf16 %v6802_v43  ;;  %v1439_v14 = vrot.slane %v1438_v5, 2  ;;  %v1544_v37 = vsel %vm282_vm0, %v1542_v12, %v1348_v22  ;;  %v1183_v6 = vsel %vm282_vm0, %v6838_v27, %v6846_v24 }
 0x141   : > { %v1496_v39 = vadd.f32 %v1495_v45, %v1476_v19  ;;  %v1409_v8 = vrot.slane %v1408_v33, 1  ;;  %v9078_v0 = vunpack.c.l.bf16 %v6794_v13  ;;  %v1188_v34 = vsel %vm282_vm0, %v6846_v24, %v6848_v4 }
 0x142   : > { %v1143_v35 = vsel %vm282_vm0, %v9077_v3, 0.0  ;;  %v1192_v32 = vsel %vm282_vm0, %v6848_v4, %v6854_v40  ;;  %v1440_v43 = vadd.f32 %v1439_v14, %v1438_v5  ;;  %v1203_v1 = vadd.f32 %v1188_v34, %v1183_v6 }
 0x143   : > { %v1142_v18 = vadd.f32 %v1141_v63, %v9078_v0  ;;  %v1498_v52 = vadd.f32 %v1497_v54, %v1496_v39  ;;  %v1205_v22 = vsel %vm282_vm0, %v6854_v40, 0.0  ;;  %v1410_v60 = vadd.f32 %v1409_v8, %v1408_v33 }
 0x144   : > { %v9079_v28 = vunpack.c.l.bf16 %v6841_v26  ;;  %v9080_v13 = vunpack.c.l.bf16 %v6851_v53  ;;  %v9081_v21 = vunpack.c.l.bf16 %v6865_v58  ;;  %v1441_v11 = vrot.slane %v1440_v43, 1 }
 0x145   : > { %v1144_v27 = vadd.f32 %v1143_v35, %v1142_v18  ;;  %v1499_v23 = vrot.slane %v1498_v52, 4  ;;  %v1204_v4 = vadd.f32 %v1203_v1, %v1192_v32  ;;  %v1277_v16 = vsel %vm282_vm0, %v6892_v15, %v6894_v31 }
 0x146   : > { %v1235_v42 = vadd.f32 %v9080_v13, %v9079_v28  ;;  %v1237_v24 = vsel %vm282_vm0, %v9081_v21, 0.0  ;;  %v1546_v40 = vsel %vm688_vm4, %v1544_v37, %v1410_v60  ;;  %v9082_v51 = vunpack.c.l.bf16 %v6857_v38 }
 0x147   : > { %v1145_v10 = vrot.slane %v1144_v27, 4  ;;  %v1282_v53 = vsel %vm282_vm0, %v6894_v31, %v6902_v59  ;;  %v1442_v58 = vadd.f32 %v1441_v11, %v1440_v43  ;;  %v1500_v61 = vadd.f32 %v1499_v23, %v1498_v52 }
 0x148   : > { %v1236_v26 = vadd.f32 %v1235_v42, %v9082_v51  ;;  %v1206_v30 = vadd.f32 %v1205_v22, %v1204_v4  ;;  %v1286_v25 = vsel %vm282_vm0, %v6902_v59, %v6907_v50  ;;  %v1297_v15 = vadd.f32 %v1282_v53, %v1277_v16 }
 0x149   : > { %v1146_v29 = vadd.f32 %v1145_v10, %v1144_v27  ;;  %v1299_v19 = vsel %vm282_vm0, %v6907_v50, 0.0  ;;  %v1501_v45 = vrot.slane %v1500_v61, 2  ;;  %v1548_v38 = vsel %vm691_vm5, %v1546_v40, %v1442_v58 }
 0x14a   : > { %v1238_v5 = vadd.f32 %v1237_v24, %v1236_v26  ;;  %v1207_v54 = vrot.slane %v1206_v30, 4  ;;  %v9083_v33 = vunpack.c.l.bf16 %v6897_v56  ;;  %v9084_v31 = vunpack.c.l.bf16 %v6910_v20 }
 0x14b   : > { %v1147_v63 = vrot.slane %v1146_v29, 2  ;;  %v1298_v35 = vadd.f32 %v1297_v15, %v1286_v25  ;;  %v9085_v59 = vunpack.c.l.bf16 %v6917_v55  ;;  %v1502_v39 = vadd.f32 %v1501_v45, %v1500_v61  ;;  %v3866_v45 = vld [vmem:[#allocation5 + $0x480] sm:$0xff] }
 0x14c   : > { %v1329_v12 = vadd.f32 %v9084_v31, %v9083_v33  ;;  %v1239_v3 = vrot.slane %v1238_v5, 4  ;;  %v1208_v37 = vadd.f32 %v1207_v54, %v1206_v30  ;;  %v9086_v50 = vunpack.c.l.bf16 %v6914_v2  ;;  %v7080_v54 = vld [vmem:[%s6099_s10 + $0x300] sm:$0xff] }
 0x14d   : > { %v1331_v14 = vsel %vm282_vm0, %v9085_v59, 0.0  ;;  %v1371_v8 = vsel %vm282_vm0, %v6940_v7, %v6942_v36  ;;  %v1148_v56 = vadd.f32 %v1147_v63, %v1146_v29  ;;  %v1300_v20 = vadd.f32 %v1299_v19, %v1298_v35 }
 0x14e   : > { %v1330_v6 = vadd.f32 %v1329_v12, %v9086_v50  ;;  %v1240_v0 = vadd.f32 %v1239_v3, %v1238_v5  ;;  %v1376_v18 = vsel %vm282_vm0, %v6942_v36, %v6949_v49  ;;  %v1503_v34 = vrot.slane %v1502_v39, 1 }
 0x14f   : > { %v1209_v55 = vrot.slane %v1208_v37, 2  ;;  %v1380_v43 = vsel %vm282_vm0, %v6949_v49, %v6951_v17  ;;  %v1149_v2 = vrot.slane %v1148_v56, 1  ;;  %v1301_v1 = vrot.slane %v1300_v20, 4 }
 0x150   : > { %v1332_v32 = vadd.f32 %v1331_v14, %v1330_v6  ;;  %v1241_v52 = vrot.slane %v1240_v0, 2  ;;  %v1391_v22 = vadd.f32 %v1376_v18, %v1371_v8  ;;  %v1504_v60 = vadd.f32 %v1503_v34, %v1502_v39 }
 0x151   : > { %v1210_v7 = vadd.f32 %v1209_v55, %v1208_v37  ;;  %v1393_v28 = vsel %vm282_vm0, %v6951_v17, 0.0  ;;  %v1150_v13 = vadd.f32 %v1149_v2, %v1148_v56  ;;  %v1302_v36 = vadd.f32 %v1301_v1, %v1300_v20  ;;  %v7090_v37 = vld [vmem:[%s6099_s10 + $0x310] sm:$0xff]  ;;  %v7094_v56 = vld [vmem:[%s6099_s10 + $0x318] sm:$0x33] }
 0x152   : > { %v1333_v27 = vrot.slane %v1332_v32, 4  ;;  %v1242_v42 = vadd.f32 %v1241_v52, %v1240_v0  ;;  %v1392_v21 = vadd.f32 %v1391_v22, %v1380_v43  ;;  %v1550_v24 = vsel %vm694_vm6, %v1548_v38, %v1504_v60  ;;  %v3867_v38 = vld [vmem:[#allocation5 + $0x488] sm:$0xff]  ;;  %v5016_v22 = vld [vmem:[%s6099_s10 + $0x320] sm:$0xff] }
 0x153   : > { %v1211_v11 = vrot.slane %v1210_v7, 1  ;;  %v9087_v49 = vunpack.c.l.bf16 %v6945_v41  ;;  %v9088_v4 = vunpack.c.l.bf16 %v6954_v9  ;;  %4192 = vmatprep.mubr.f32.mxu0 %v1550_v24  ;;  %v1303_v10 = vrot.slane %v1302_v36, 2  ;;  %v5018_v24 = vld [vmem:[%s6099_s10 + $0x330] sm:$0xff] }
 0x154   : > { %v1334_v23 = vadd.f32 %v1333_v27, %v1332_v32  ;;  %v1243_v40 = vrot.slane %v1242_v42, 1  ;;  %v1394_v51 = vadd.f32 %v1393_v28, %v1392_v21  ;;  %v9089_v26 = vunpack.c.l.bf16 %v6961_v57  ;;  %v5015_v32 = vld [vmem:[%s6099_s10 + $0x318] sm:$0xcc]  ;;  %v5017_v21 = vld [vmem:[%s6099_s10 + $0x328] sm:$0xff] }
 0x155   : > { %v1423_v16 = vadd.f32 %v9088_v4, %v9087_v49  ;;  %v1212_v53 = vadd.f32 %v1211_v11, %v1210_v7  ;;  %v9090_v61 = vunpack.c.l.bf16 %v6958_v47  ;;  %v1465_v41 = vsel %vm282_vm0, %v6979_v44, %v6981_v48 }
 0x156   : > { %v1425_v17 = vsel %vm282_vm0, %v9089_v26, 0.0  ;;  %v1335_v58 = vrot.slane %v1334_v23, 2  ;;  %v1244_v9 = vadd.f32 %v1243_v40, %v1242_v42  ;;  %v1304_v25 = vadd.f32 %v1303_v10, %v1302_v36 }
 0x157   : > { %v1424_v30 = vadd.f32 %v1423_v16, %v9090_v61  ;;  %v1395_v29 = vrot.slane %v1394_v51, 4  ;;  %v1470_v5 = vsel %vm282_vm0, %v6981_v48, %v6983_v62  ;;  %v1474_v19 = vsel %vm282_vm0, %v6983_v62, %v6985_v46  ;;  %v7087_v62 = vld [vmem:[%s6099_s10 + $0x308] sm:$0xff] }
 0x158   : > { %v1336_v57 = vadd.f32 %v1335_v58, %v1334_v23  ;;  %v1485_v47 = vadd.f32 %v1470_v5, %v1465_v41  ;;  %v1305_v44 = vrot.slane %v1304_v25, 1  ;;  %v1487_v31 = vsel %vm282_vm0, %v6985_v46, 0.0 }
 0x159   : > { %v1426_v15 = vadd.f32 %v1425_v17, %v1424_v30  ;;  %v1396_v33 = vadd.f32 %v1395_v29, %v1394_v51  ;;  %v1537_v48 = vsel %vm677_vm1, %v1150_v13, %v1212_v53  ;;  %v5628_v39 = vpack.c.bf16 %v3867_v38, %v3866_v45 }
 0x15a   : > { %v1337_v12 = vrot.slane %v1336_v57, 1  ;;  %v1486_v3 = vadd.f32 %v1485_v47, %v1474_v19  ;;  %v1539_v35 = vsel %vm680_vm2, %v1537_v48, %v1244_v9  ;;  %v1306_v59 = vadd.f32 %v1305_v44, %v1304_v25  ;;  %v7116_v19 = vld [vmem:[%s6099_s10 + $0x338] sm:$0xff] }
 0x15b   : > { %v1427_v63 = vrot.slane %v1426_v15, 4  ;;  %v1397_v14 = vrot.slane %v1396_v33, 2  ;;  %v1560_v50 = vunpack.c.l.bf16 %v7080_v54  ;;  %v1561_v0 = vunpack.c.h.bf16 %v7080_v54  ;;  %5629 = vmatprep.subr.bf16.mxu0 %v5628_v39 }
 0x15c   : > { %v1338_v6 = vadd.f32 %v1337_v12, %v1336_v57  ;;  %v1488_v8 = vadd.f32 %v1487_v31, %v1486_v3  ;;  %v1541_v18 = vsel %vm683_vm3, %v1539_v35, %v1306_v59  ;;  %v1562_v34 = vunpack.c.l.bf16 %v7087_v62  ;;  %v7128_v59 = vld [vmem:[%s6099_s10 + $0x348] sm:$0xff] }
 0x15d   : > { %v1428_v46 = vadd.f32 %v1427_v63, %v1426_v15  ;;  %v1398_v20 = vadd.f32 %v1397_v14, %v1396_v33  ;;  %v1563_v55 = vunpack.c.h.bf16 %v7087_v62  ;;  %v1565_v7 = vunpack.c.h.bf16 %v7090_v37  ;;  %v7122_v33 = vld [vmem:[%s6099_s10 + $0x340] sm:$0xff]  ;;  %v7131_v14 = vld [vmem:[%s6099_s10 + $0x350] sm:$0x33] }
 0x15e   : > { %v1489_v2 = vrot.slane %v1488_v8, 4  ;;  %v1543_v52 = vsel %vm282_vm0, %v1541_v18, %v1338_v6  ;;  %v1567_v28 = vunpack.c.h.bf16 %v7094_v56  ;;  %v1592_v11 = vunpack.c.l.bf16 %v5015_v32  ;;  %v5023_v18 = vld [vmem:[%s6099_s10 + $0x350] sm:$0xcc] }
 0x15f   : > { %v1429_v43 = vrot.slane %v1428_v46, 2  ;;  %v1399_v60 = vrot.slane %v1398_v20, 1  ;;  %v1578_v36 = vadd.f32 %v1563_v55, %v1561_v0  ;;  %v1593_v4 = vunpack.c.h.bf16 %v5015_v32 }
 0x160   : > { %v1490_v42 = vadd.f32 %v1489_v2, %v1488_v8  ;;  %v1580_v49 = vsel %vm282_vm0, %v1567_v28, 0.0  ;;  %v1594_v16 = vunpack.c.l.bf16 %v5016_v22  ;;  %v1595_v26 = vunpack.c.h.bf16 %v5016_v22 }
 0x161   : > { %v1430_v13 = vadd.f32 %v1429_v43, %v1428_v46  ;;  %v1400_v23 = vadd.f32 %v1399_v60, %v1398_v20  ;;  %v1579_v51 = vadd.f32 %v1578_v36, %v1565_v7  ;;  %v1596_v53 = vunpack.c.l.bf16 %v5017_v21 }
 0x162   : > { %v1491_v10 = vrot.slane %v1490_v42, 2  ;;  %v1597_v58 = vunpack.c.h.bf16 %v5017_v21  ;;  %v1598_v61 = vunpack.c.l.bf16 %v5018_v24  ;;  %v1599_v25 = vunpack.c.h.bf16 %v5018_v24  ;;  %v5026_v24 = vld [vmem:[%s6099_s10 + $0x368] sm:$0xff] }
 0x163   : > { %v1431_v40 = vrot.slane %v1430_v13, 1  ;;  %v1545_v17 = vsel %vm688_vm4, %v1543_v52, %v1400_v23  ;;  %v1581_v9 = vadd.f32 %v1580_v49, %v1579_v51  ;;  %v7111_v29 = vrot.slane %v1592_v11, 4  ;;  %v5024_v52 = vld [vmem:[%s6099_s10 + $0x358] sm:$0xff] }
 0x164   : > { %v1492_v41 = vadd.f32 %v1491_v10, %v1490_v42  ;;  %v7113_v5 = vrot.slane %v1594_v16, 4  ;;  %v1611_v57 = vrot.slane %v1593_v4, 4  ;;  %v1612_v15 = vrot.slane %v1595_v26, 4 }
 0x165   : > { %v1432_v30 = vadd.f32 %v1431_v40, %v1430_v13  ;;  %v1582_v38 = vrot.slane %v1581_v9, 4  ;;  %v7119_v44 = vrot.slane %v1596_v53, 4  ;;  %v1616_v48 = vrot.slane %v1597_v58, 4  ;;  %v5025_v13 = vld [vmem:[%s6099_s10 + $0x360] sm:$0xff] }
 0x166   : > { %v1493_v47 = vrot.slane %v1492_v41, 1  ;;  %v1613_v31 = vsel %vm282_vm0, %v1611_v57, %v1612_v15  ;;  %v7125_v12 = vrot.slane %v1598_v61, 4  ;;  %v1620_v63 = vrot.slane %v1599_v25, 4  ;;  %v7157_v57 = vld [vmem:[%s6099_s10 + $0x370] sm:$0xff] }
 0x167   : > { %v1547_v45 = vsel %vm691_vm5, %v1545_v17, %v1432_v30  ;;  %v1583_v35 = vadd.f32 %v1582_v38, %v1581_v9  ;;  %v1655_v6 = vunpack.c.h.bf16 %v7116_v19  ;;  %v1617_v46 = vsel %vm282_vm0, %v1612_v15, %v1616_v48 }
 0x168   : > { %v1494_v3 = vadd.f32 %v1493_v47, %v1492_v41  ;;  %v1621_v8 = vsel %vm282_vm0, %v1616_v48, %v1620_v63  ;;  %v1642_v0 = vsel %vm282_vm0, %v1620_v63, 0.0  ;;  %v1640_v43 = vadd.f32 %v1617_v46, %v1613_v31 }
 0x169   : > { %v1584_v32 = vrot.slane %v1583_v35, 2  ;;  %v1657_v2 = vunpack.c.h.bf16 %v7122_v33  ;;  %v1659_v60 = vunpack.c.h.bf16 %v7128_v59  ;;  %v1661_v28 = vunpack.c.h.bf16 %v7131_v14 }
 0x16a   : > { %v1549_v55 = vsel %vm694_vm6, %v1547_v45, %v1494_v3  ;;  %v1641_v36 = vadd.f32 %v1640_v43, %v1621_v8  ;;  %v1686_v11 = vunpack.c.l.bf16 %v5023_v18  ;;  %v1687_v49 = vunpack.c.h.bf16 %v5023_v18 }
 0x16b   : > { %4193 = vmatmul.mubr.f32.vlgmr.msra.gmra.mrb[4].mxu0 %v1549_v55  ;;  %v1585_v42 = vadd.f32 %v1584_v32, %v1583_v35  ;;  %v1672_v21 = vadd.f32 %v1657_v2, %v1655_v6  ;;  %v1674_v23 = vsel %vm282_vm0, %v1661_v28, 0.0  ;;  %v1688_v4 = vunpack.c.l.bf16 %v5024_v52  ;;  %v7164_v35 = vld [vmem:[%s6099_s10 + $0x378] sm:$0xff]  ;;  %v7167_v6 = vld [vmem:[%s6099_s10 + $0x380] sm:$0xff] }
 0x16c   : > { %v1689_v16 = vunpack.c.h.bf16 %v5024_v52  ;;  %v1643_v10 = vadd.f32 %v1642_v0, %v1641_v36  ;;  %v1690_v26 = vunpack.c.l.bf16 %v5025_v13  ;;  %v1691_v17 = vunpack.c.h.bf16 %v5025_v13  ;;  %v7175_v52 = vld [vmem:[%s6099_s10 + $0x388] sm:$0x33]  ;;  %v5041_v36 = vld [vmem:[%s6099_s10 + $0x3d0] sm:$0xff] }
 0x16d   : > { %v1586_v40 = vrot.slane %v1585_v42, 1  ;;  %v1673_v51 = vadd.f32 %v1672_v21, %v1659_v60  ;;  %v1692_v53 = vunpack.c.l.bf16 %v5026_v24  ;;  %v1693_v58 = vunpack.c.h.bf16 %v5026_v24  ;;  %v5031_v60 = vld [vmem:[%s6099_s10 + $0x388] sm:$0xcc] }
 0x16e   : > { %v7150_v61 = vrot.slane %v1686_v11, 4  ;;  %v1644_v41 = vrot.slane %v1643_v10, 4  ;;  %v7154_v25 = vrot.slane %v1688_v4, 4  ;;  %v1705_v15 = vrot.slane %v1687_v49, 4  ;;  %v5032_v49 = vld [vmem:[%s6099_s10 + $0x390] sm:$0xff] }
 0x16f   : > { %v7152_v30 = vadd.f32 %v1586_v40, %v1585_v42  ;;  %v1675_v9 = vadd.f32 %v1674_v23, %v1673_v51  ;;  %v1706_v47 = vrot.slane %v1689_v16, 4  ;;  %v7159_v45 = vrot.slane %v1690_v26, 4 }
 0x170   : > { %v1710_v38 = vrot.slane %v1691_v17, 4  ;;  %v1645_v31 = vadd.f32 %v1644_v41, %v1643_v10  ;;  %v7161_v63 = vrot.slane %v1692_v53, 4  ;;  %v1714_v3 = vrot.slane %v1693_v58, 4  ;;  %v5033_v10 = vld [vmem:[%s6099_s10 + $0x398] sm:$0xff]  ;;  %v5034_v58 = vld [vmem:[%s6099_s10 + $0x3a0] sm:$0xff] }
 0x171   : > { %v1676_v48 = vrot.slane %v1675_v9, 4  ;;  %v1707_v46 = vsel %vm282_vm0, %v1705_v15, %v1706_v47  ;;  %v1749_v18 = vunpack.c.h.bf16 %v7157_v57  ;;  %v1751_v42 = vunpack.c.h.bf16 %v7164_v35 }
 0x172   : > { %v1711_v8 = vsel %vm282_vm0, %v1706_v47, %v1710_v38  ;;  %v1646_v55 = vrot.slane %v1645_v31, 2  ;;  %v1715_v43 = vsel %vm282_vm0, %v1710_v38, %v1714_v3  ;;  %v1736_v28 = vsel %vm282_vm0, %v1714_v3, 0.0 }
 0x173   : > { %v1677_v32 = vadd.f32 %v1676_v48, %v1675_v9  ;;  %v1734_v2 = vadd.f32 %v1711_v8, %v1707_v46  ;;  %v1753_v23 = vunpack.c.h.bf16 %v7167_v6  ;;  %v1755_v16 = vunpack.c.h.bf16 %v7175_v52 }
 0x174   : > { %v1647_v21 = vadd.f32 %v1646_v55, %v1645_v31  ;;  %v1766_v40 = vadd.f32 %v1751_v42, %v1749_v18  ;;  %v1780_v51 = vunpack.c.l.bf16 %v5031_v60  ;;  %v1781_v41 = vunpack.c.h.bf16 %v5031_v60  ;;  %v7198_v42 = vld [vmem:[%s6099_s10 + $0x3a8] sm:$0xff] }
 0x175   : > { %v1678_v24 = vrot.slane %v1677_v32, 2  ;;  %v1735_v11 = vadd.f32 %v1734_v2, %v1715_v43  ;;  %v1768_v15 = vsel %vm282_vm0, %v1755_v16, 0.0  ;;  %v1782_v47 = vunpack.c.l.bf16 %v5032_v49 }
 0x176   : > { %v1648_v26 = vrot.slane %v1647_v21, 1  ;;  %v1767_v9 = vadd.f32 %v1766_v40, %v1753_v23  ;;  %v1783_v38 = vunpack.c.h.bf16 %v5032_v49  ;;  %v1784_v46 = vunpack.c.l.bf16 %v5033_v10 }
 0x177   : > { %v1679_v17 = vadd.f32 %v1678_v24, %v1677_v32  ;;  %v1737_v53 = vadd.f32 %v1736_v28, %v1735_v11  ;;  %v1785_v18 = vunpack.c.h.bf16 %v5033_v10  ;;  %v1786_v55 = vunpack.c.l.bf16 %v5034_v58 }
 0x178   : > { %v7189_v31 = vadd.f32 %v1648_v26, %v1647_v21  ;;  %v1769_v8 = vadd.f32 %v1768_v15, %v1767_v9  ;;  %v1787_v43 = vunpack.c.h.bf16 %v5034_v58  ;;  %v7193_v60 = vrot.slane %v1780_v51, 4  ;;  %v7205_v26 = vld [vmem:[%s6099_s10 + $0x3b0] sm:$0xff]  ;;  %v7212_v58 = vld [vmem:[%s6099_s10 + $0x3c0] sm:$0x33] }
 0x179   : > { %v1680_v48 = vrot.slane %v1679_v17, 1  ;;  %v1738_v3 = vrot.slane %v1737_v53, 4  ;;  %v7195_v28 = vrot.slane %v1782_v47, 4  ;;  %v1799_v24 = vrot.slane %v1781_v41, 4 }
 0x17a   : > { %v1770_v21 = vrot.slane %v1769_v8, 4  ;;  %v1800_v11 = vrot.slane %v1783_v38, 4  ;;  %v7200_v23 = vrot.slane %v1784_v46, 4  ;;  %v1804_v16 = vrot.slane %v1785_v18, 4 }
 0x17b   : > { %v7191_v32 = vadd.f32 %v1680_v48, %v1679_v17  ;;  %v1739_v2 = vadd.f32 %v1738_v3, %v1737_v53  ;;  %v7202_v40 = vrot.slane %v1786_v55, 4  ;;  %v1808_v10 = vrot.slane %v1787_v43, 4  ;;  %v7209_v53 = vld [vmem:[%s6099_s10 + $0x3b8] sm:$0xff]  ;;  %v5039_v55 = vld [vmem:[%s6099_s10 + $0x3c0] sm:$0xcc]  ;;  %v5040_v43 = vld [vmem:[%s6099_s10 + $0x3c8] sm:$0xff] }
 0x17c   : > { %v1771_v51 = vadd.f32 %v1770_v21, %v1769_v8  ;;  %v1801_v17 = vsel %vm282_vm0, %v1799_v24, %v1800_v11  ;;  %v1843_v9 = vunpack.c.h.bf16 %v7198_v42  ;;  %v1805_v47 = vsel %vm282_vm0, %v1800_v11, %v1804_v16 }
 0x17d   : > { %v1740_v49 = vrot.slane %v1739_v2, 2  ;;  %v1809_v38 = vsel %vm282_vm0, %v1804_v16, %v1808_v10  ;;  %v1830_v48 = vsel %vm282_vm0, %v1808_v10, 0.0  ;;  %v1828_v46 = vadd.f32 %v1805_v47, %v1801_v17  ;;  %v5042_v17 = vld [vmem:[%s6099_s10 + $0x3d8] sm:$0xff] }
 0x17e   : > { %v1772_v3 = vrot.slane %v1771_v51, 2  ;;  %v1845_v18 = vunpack.c.h.bf16 %v7205_v26  ;;  %v1849_v10 = vunpack.c.h.bf16 %v7212_v58  ;;  %v1874_v8 = vunpack.c.l.bf16 %v5039_v55 }
 0x17f   : > { %v1741_v15 = vadd.f32 %v1740_v49, %v1739_v2  ;;  %v1847_v2 = vunpack.c.h.bf16 %v7209_v53  ;;  %v1829_v16 = vadd.f32 %v1828_v46, %v1809_v38  ;;  %v1875_v4 = vunpack.c.h.bf16 %v5039_v55 }
 0x180   : > { %v1773_v49 = vadd.f32 %v1772_v3, %v1771_v51  ;;  %v1860_v41 = vadd.f32 %v1845_v18, %v1843_v9  ;;  %v1876_v13 = vunpack.c.l.bf16 %v5040_v43  ;;  %v1862_v24 = vsel %vm282_vm0, %v1849_v10, 0.0 }
 0x181   : > { %v1742_v21 = vrot.slane %v1741_v15, 1  ;;  %v1831_v22 = vadd.f32 %v1830_v48, %v1829_v16  ;;  %v1877_v20 = vunpack.c.h.bf16 %v5040_v43  ;;  %v1878_v39 = vunpack.c.l.bf16 %v5041_v36 }
 0x182   : > { %v1774_v0 = vrot.slane %v1773_v49, 1  ;;  %v1861_v7 = vadd.f32 %v1860_v41, %v1847_v2  ;;  %v1879_v1 = vunpack.c.h.bf16 %v5041_v36  ;;  %v1880_v11 = vunpack.c.l.bf16 %v5042_v17 }
 0x183   : > { %v1743_v47 = vadd.f32 %v1742_v21, %v1741_v15  ;;  %v1832_v38 = vrot.slane %v1831_v22, 4  ;;  %v1881_v46 = vunpack.c.h.bf16 %v5042_v17  ;;  %v7230_v9 = vrot.slane %v1874_v8, 4  ;;  %v3851_v8 = vld [vmem:[#allocation5 + $0x408] sm:$0xff] }
 0x184   : > { %v1775_v51 = vadd.f32 %v1774_v0, %v1773_v49  ;;  %v1863_v3 = vadd.f32 %v1862_v24, %v1861_v7  ;;  %v7232_v18 = vrot.slane %v1876_v13, 4  ;;  %v1893_v15 = vrot.slane %v1875_v4, 4  ;;  %v3850_v0 = vld [vmem:[#allocation5 + $0x400] sm:$0xff] }
 0x185   : > { %v1894_v55 = vrot.slane %v1877_v20, 4  ;;  %v1833_v21 = vadd.f32 %v1832_v38, %v1831_v22  ;;  %v7234_v48 = vrot.slane %v1878_v39, 4  ;;  %v1898_v41 = vrot.slane %v1879_v1, 4  ;;  %v3898_v22 = vld [vmem:[#allocation5 + $0x580] sm:$0xff]  ;;  %v3899_v1 = vld [vmem:[#allocation5 + $0x588] sm:$0xff] }
 0x186   : > { %v1864_v27 = vrot.slane %v1863_v3, 4  ;;  %v7237_v2 = vrot.slane %v1880_v11, 4  ;;  %v1902_v36 = vrot.slane %v1881_v46, 4  ;;  %v1965_v7 = vsel %vm677_vm1, %v7152_v30, %v7189_v31 }
 0x187   : > { %v1895_v43 = vsel %vm282_vm0, %v1893_v15, %v1894_v55  ;;  %v1834_v13 = vrot.slane %v1833_v21, 2  ;;  %v1899_v20 = vsel %vm282_vm0, %v1894_v55, %v1898_v41  ;;  %v1967_v39 = vsel %vm680_vm2, %v1965_v7, %v7191_v32 }
 0x188   : > { %v1865_v24 = vadd.f32 %v1864_v27, %v1863_v3  ;;  %v1903_v4 = vsel %vm282_vm0, %v1898_v41, %v1902_v36  ;;  %v1922_v11 = vadd.f32 %v1899_v20, %v1895_v43  ;;  %v1924_v49 = vsel %vm282_vm0, %v1902_v36, 0.0 }
 0x189   : > { %v1969_v16 = vsel %vm683_vm3, %v1967_v39, %v1743_v47  ;;  %v1835_v10 = vadd.f32 %v1834_v13, %v1833_v21  ;;  %v5630_v17 = vpack.c.bf16 %v3851_v8, %v3850_v0  ;;  %v5660_v38 = vpack.c.bf16 %v3899_v1, %v3898_v22 }
 0x18a   : > { %v1866_v30 = vrot.slane %v1865_v24, 2  ;;  %v1971_v31 = vsel %vm282_vm0, %v1969_v16, %v1775_v51  ;;  %v1923_v27 = vadd.f32 %v1922_v11, %v1903_v4  ;;  %v1568_v32 = vadd.f32 %v1562_v34, %v1560_v50 }
 0x18b   : > { %v9091_v3 = vunpack.c.l.bf16 %v7094_v56  ;;  %v1836_v15 = vrot.slane %v1835_v10, 1  ;;  %5631 = vmatpush3.bf16.msra.mxu0 %v5630_v17  ;;  %v1610_v47 = vsel %vm282_vm0, %v7111_v29, %v7113_v5  ;;  %v1615_v51 = vsel %vm282_vm0, %v7113_v5, %v7119_v44  ;;  %5661 = vmatprep.subr.bf16.mxu1 %v5660_v38 }
 0x18c   : > { %v1867_v55 = vadd.f32 %v1866_v30, %v1865_v24  ;;  %v1925_v21 = vadd.f32 %v1924_v49, %v1923_v27  ;;  %v9092_v54 = vunpack.c.l.bf16 %v7090_v37  ;;  %v1619_v50 = vsel %vm282_vm0, %v7119_v44, %v7125_v12 }
 0x18d   : > { %v1570_v46 = vsel %vm282_vm0, %v9091_v3, 0.0  ;;  %v1630_v56 = vadd.f32 %v1615_v51, %v1610_v47  ;;  %v1837_v34 = vadd.f32 %v1836_v15, %v1835_v10  ;;  %v1632_v43 = vsel %vm282_vm0, %v7125_v12, 0.0 }
 0x18e   : > { %v1569_v62 = vadd.f32 %v1568_v32, %v9092_v54  ;;  %v1868_v41 = vrot.slane %v1867_v55, 1  ;;  %v9093_v29 = vunpack.c.l.bf16 %v7116_v19  ;;  %v9094_v36 = vunpack.c.l.bf16 %v7122_v33 }
 0x18f   : > { %v1926_v7 = vrot.slane %v1925_v21, 4  ;;  %v1631_v8 = vadd.f32 %v1630_v56, %v1619_v50  ;;  %v9095_v37 = vunpack.c.l.bf16 %v7131_v14  ;;  %v1973_v44 = vsel %vm688_vm4, %v1971_v31, %v1837_v34 }
 0x190   : > { %v1662_v5 = vadd.f32 %v9094_v36, %v9093_v29  ;;  %v1571_v0 = vadd.f32 %v1570_v46, %v1569_v62  ;;  %v1869_v24 = vadd.f32 %v1868_v41, %v1867_v55  ;;  %v9096_v20 = vunpack.c.l.bf16 %v7128_v59 }
 0x191   : > { %v1664_v13 = vsel %vm282_vm0, %v9095_v37, 0.0  ;;  %v1704_v19 = vsel %vm282_vm0, %v7150_v61, %v7154_v25  ;;  %v1927_v12 = vadd.f32 %v1926_v7, %v1925_v21  ;;  %v1633_v22 = vadd.f32 %v1632_v43, %v1631_v8 }
 0x192   : > { %v1663_v39 = vadd.f32 %v1662_v5, %v9096_v20  ;;  %v1572_v33 = vrot.slane %v1571_v0, 4  ;;  %v1709_v1 = vsel %vm282_vm0, %v7154_v25, %v7159_v45  ;;  %v1975_v14 = vsel %vm691_vm5, %v1973_v44, %v1869_v24 }
 0x193   : > { %v1713_v11 = vsel %vm282_vm0, %v7159_v45, %v7161_v63  ;;  %v1724_v59 = vadd.f32 %v1709_v1, %v1704_v19  ;;  %v1928_v49 = vrot.slane %v1927_v12, 2  ;;  %v1634_v10 = vrot.slane %v1633_v22, 4 }
 0x194   : > { %v1665_v4 = vadd.f32 %v1664_v13, %v1663_v39  ;;  %v1573_v16 = vadd.f32 %v1572_v33, %v1571_v0  ;;  %v1726_v61 = vsel %vm282_vm0, %v7161_v63, 0.0  ;;  %v9097_v17 = vunpack.c.l.bf16 %v7157_v57 }
 0x195   : > { %v1725_v31 = vadd.f32 %v1724_v59, %v1713_v11  ;;  %v9098_v25 = vunpack.c.l.bf16 %v7164_v35  ;;  %v9099_v38 = vunpack.c.l.bf16 %v7175_v52  ;;  %v1929_v3 = vadd.f32 %v1928_v49, %v1927_v12  ;;  %v7324_v11 = vld [vmem:[#allocation5 + $0x500] sm:$0xff]  ;;  %v7326_v59 = vld [vmem:[#allocation5 + $0x508] sm:$0xff] }
 0x196   : > { %v1666_v30 = vrot.slane %v1665_v4, 4  ;;  %v1574_v45 = vrot.slane %v1573_v16, 2  ;;  %v1635_v46 = vadd.f32 %v1634_v10, %v1633_v22  ;;  %v1798_v15 = vsel %vm282_vm0, %v7193_v60, %v7195_v28 }
 0x197   : > { %v1756_v27 = vadd.f32 %v9098_v25, %v9097_v17  ;;  %v1758_v32 = vsel %vm282_vm0, %v9099_v38, 0.0  ;;  %v1727_v63 = vadd.f32 %v1726_v61, %v1725_v31  ;;  %v9100_v47 = vunpack.c.l.bf16 %v7167_v6  ;;  %v5008_v17 = vld [vmem:[%s6099_s10 + $0x2e8] sm:$0xff]  ;;  %v5009_v25 = vld [vmem:[%s6099_s10 + $0x2f0] sm:$0xff] }
 0x198   : > { %v1667_v55 = vadd.f32 %v1666_v30, %v1665_v4  ;;  %v1803_v57 = vsel %vm282_vm0, %v7195_v28, %v7200_v23  ;;  %v1930_v35 = vrot.slane %v1929_v3, 1  ;;  %v1575_v52 = vadd.f32 %v1574_v45, %v1573_v16 }
 0x199   : > { %v1757_v51 = vadd.f32 %v1756_v27, %v9100_v47  ;;  %v1636_v21 = vrot.slane %v1635_v46, 2  ;;  %v1807_v54 = vsel %vm282_vm0, %v7200_v23, %v7202_v40  ;;  %v1728_v50 = vrot.slane %v1727_v63, 4 }
 0x19a   : > { %v1668_v62 = vrot.slane %v1667_v55, 2  ;;  %v1818_v60 = vadd.f32 %v1803_v57, %v1798_v15  ;;  %v1931_v34 = vadd.f32 %v1930_v35, %v1929_v3  ;;  %v1576_v41 = vrot.slane %v1575_v52, 1  ;;  %v5010_v15 = vld [vmem:[%s6099_s10 + $0x2f8] sm:$0x33] }
 0x19b   : > { %v1759_v56 = vadd.f32 %v1758_v32, %v1757_v51  ;;  %v1637_v43 = vadd.f32 %v1636_v21, %v1635_v46  ;;  %v1820_v6 = vsel %vm282_vm0, %v7202_v40, 0.0  ;;  %v1729_v36 = vadd.f32 %v1728_v50, %v1727_v63 }
 0x19c   : > { %v1669_v29 = vadd.f32 %v1668_v62, %v1667_v55  ;;  %v1819_v5 = vadd.f32 %v1818_v60, %v1807_v54  ;;  %v1977_v7 = vsel %vm694_vm6, %v1975_v14, %v1931_v34  ;;  %v1577_v0 = vadd.f32 %v1576_v41, %v1575_v52 }
 0x19d   : > { %v1760_v28 = vrot.slane %v1759_v56, 4  ;;  %v1638_v8 = vrot.slane %v1637_v43, 1  ;;  %v9101_v23 = vunpack.c.l.bf16 %v7198_v42  ;;  %v9102_v37 = vunpack.c.l.bf16 %v7205_v26  ;;  %4267 = vmatprep.mubr.f32.mxu1 %v1977_v7 }
 0x19e   : > { %v1670_v24 = vrot.slane %v1669_v29, 1  ;;  %v1730_v44 = vrot.slane %v1729_v36, 2  ;;  %v1821_v39 = vadd.f32 %v1820_v6, %v1819_v5  ;;  %v9103_v19 = vunpack.c.l.bf16 %v7209_v53  ;;  %v5007_v53 = vld [vmem:[%s6099_s10 + $0x2e0] sm:$0xff]  ;;  %v3869_v6 = vld [vmem:[#allocation5 + $0x498] sm:$0xff] }
 0x19f   : > { %v1850_v13 = vadd.f32 %v9102_v37, %v9101_v23  ;;  %v1761_v20 = vadd.f32 %v1760_v28, %v1759_v56  ;;  %v1639_v40 = vadd.f32 %v1638_v8, %v1637_v43  ;;  %v9104_v33 = vunpack.c.l.bf16 %v7212_v58  ;;  %v3868_v43 = vld [vmem:[#allocation5 + $0x490] sm:$0xff] }
 0x1a0   : > { %v1892_v42 = vsel %vm282_vm0, %v7230_v9, %v7232_v18  ;;  %v1671_v26 = vadd.f32 %v1670_v24, %v1669_v29  ;;  %v1731_v1 = vadd.f32 %v1730_v44, %v1729_v36  ;;  %v1822_v4 = vrot.slane %v1821_v39, 4  ;;  %v7347_v29 = vld [vmem:[%s6099_s10 + $0x3e0] sm:$0xff]  ;;  %v7352_v24 = vld [vmem:[%s6099_s10 + $0x3f0] sm:$0xff] }
 0x1a1   : > { %v1851_v12 = vadd.f32 %v1850_v13, %v9103_v19  ;;  %v1852_v22 = vsel %vm282_vm0, %v9104_v33, 0.0  ;;  %v1762_v14 = vrot.slane %v1761_v20, 2  ;;  %v1897_v58 = vsel %vm282_vm0, %v7232_v18, %v7234_v48  ;;  %v5044_v13 = vld [vmem:[%s6099_s10 + $0x3e8] sm:$0xff]  ;;  %v3853_v33 = vld [vmem:[#allocation5 + $0x418] sm:$0xff] }
 0x1a2   : > { %v1901_v9 = vsel %vm282_vm0, %v7234_v48, %v7237_v2  ;;  %v1914_v16 = vsel %vm282_vm0, %v7237_v2, 0.0  ;;  %v1732_v10 = vrot.slane %v1731_v1, 1  ;;  %v1823_v30 = vadd.f32 %v1822_v4, %v1821_v39  ;;  %v7362_v4 = vld [vmem:[#allocation5 + $0x598] sm:$0xff] }
 0x1a3   : > { %v1853_v49 = vadd.f32 %v1852_v22, %v1851_v12  ;;  %v1763_v61 = vadd.f32 %v1762_v14, %v1761_v20  ;;  %v1912_v31 = vadd.f32 %v1897_v58, %v1892_v42  ;;  %v1964_v38 = vsel %vm677_vm1, %v1577_v0, %v1639_v40  ;;  %v7355_v40 = vld [vmem:[%s6099_s10 + $0x3f8] sm:$0x33]  ;;  %v3852_v12 = vld [vmem:[#allocation5 + $0x410] sm:$0xff] }
 0x1a4   : > { %v5662_v18 = vpack.c.bf16 %v7326_v59, %v7324_v11  ;;  %v1510_v32 = vunpack.c.h.bf16 %v5007_v53  ;;  %v1733_v3 = vadd.f32 %v1732_v10, %v1731_v1  ;;  %v1824_v48 = vrot.slane %v1823_v30, 2  ;;  %v7360_v14 = vld [vmem:[#allocation5 + $0x590] sm:$0xff] }
 0x1a5   : > { %v1854_v27 = vrot.slane %v1853_v49, 4  ;;  %v1764_v45 = vrot.slane %v1763_v61, 1  ;;  %v1913_v46 = vadd.f32 %v1912_v31, %v1901_v9  ;;  %v1966_v2 = vsel %vm680_vm2, %v1964_v38, %v1671_v26  ;;  %v7366_v31 = vld [vmem:[#allocation5 + $0x510] sm:$0xff] }
 0x1a6   : > { %v1512_v63 = vunpack.c.h.bf16 %v5008_v17  ;;  %v1514_v47 = vunpack.c.h.bf16 %v5009_v25  ;;  %v1825_v57 = vadd.f32 %v1824_v48, %v1823_v30  ;;  %v1968_v52 = vsel %vm683_vm3, %v1966_v2, %v1733_v3  ;;  %v3870_v3 = vld [vmem:[#allocation5 + $0x4a0] sm:$0xff] }
 0x1a7   : > { %v1855_v55 = vadd.f32 %v1854_v27, %v1853_v49  ;;  %v1765_v51 = vadd.f32 %v1764_v45, %v1763_v61  ;;  %v1915_v35 = vadd.f32 %v1914_v16, %v1913_v46  ;;  %v1516_v54 = vunpack.c.h.bf16 %v5010_v15  ;;  %v3871_v45 = vld [vmem:[#allocation5 + $0x4a8] sm:$0xff]  ;;  %v3854_v48 = vld [vmem:[#allocation5 + $0x420] sm:$0xff] }
 0x1a8   : > { %v1527_v62 = vadd.f32 %v1512_v63, %v1510_v32  ;;  %v1509_v50 = vunpack.c.l.bf16 %v5007_v53  ;;  %v1826_v56 = vrot.slane %v1825_v57, 1  ;;  %v1511_v41 = vunpack.c.l.bf16 %v5008_v17  ;;  %v7368_v17 = vld [vmem:[#allocation5 + $0x518] sm:$0xff]  ;;  %v3855_v63 = vld [vmem:[#allocation5 + $0x428] sm:$0xff] }
 0x1a9   : > { %v1856_v21 = vrot.slane %v1855_v55, 2  ;;  %v1916_v60 = vrot.slane %v1915_v35, 4  ;;  %v1970_v34 = vsel %vm282_vm0, %v1968_v52, %v1765_v51  ;;  %v1529_v5 = vsel %vm282_vm0, %v1516_v54, 0.0  ;;  %v7377_v51 = vld [vmem:[#allocation5 + $0x5a8] sm:$0xff]  ;;  %v7380_v54 = vld [vmem:[#allocation5 + $0x520] sm:$0xff] }
 0x1aa   : > { %v1528_v28 = vadd.f32 %v1527_v62, %v1514_v47  ;;  %v1513_v7 = vunpack.c.l.bf16 %v5009_v25  ;;  %v1827_v0 = vadd.f32 %v1826_v56, %v1825_v57  ;;  %v1515_v23 = vunpack.c.l.bf16 %v5010_v15  ;;  %v7375_v47 = vld [vmem:[#allocation5 + $0x5a0] sm:$0xff]  ;;  %v7382_v62 = vld [vmem:[#allocation5 + $0x528] sm:$0xff] }
 0x1ab   : > { %v1857_v36 = vadd.f32 %v1856_v21, %v1855_v55  ;;  %v1917_v8 = vadd.f32 %v1916_v60, %v1915_v35  ;;  %v1517_v37 = vadd.f32 %v1511_v41, %v1509_v50  ;;  %v5632_v39 = vpack.c.bf16 %v3869_v6, %v3868_v43  ;;  %v3872_v50 = vld [vmem:[#allocation5 + $0x4b0] sm:$0xff]  ;;  %v7385_v56 = vld [vmem:[%s6099_s10 + $0x400] sm:$0xff]  ;;  %v3873_v6 = vld [vmem:[#allocation5 + $0x4b8] sm:$0xff] }
 0x1ac   : > { %v1530_v20 = vadd.f32 %v1529_v5, %v1528_v28  ;;  %v1937_v19 = vunpack.c.h.bf16 %v7347_v29  ;;  %v1972_v42 = vsel %vm688_vm4, %v1970_v34, %v1827_v0  ;;  %v1519_v1 = vsel %vm282_vm0, %v1515_v23, 0.0  ;;  %v7396_v23 = vld [vmem:[#allocation5 + $0x5b8] sm:$0xff] }
 0x1ad   : > { %v1858_v44 = vrot.slane %v1857_v36, 1  ;;  %v1918_v22 = vrot.slane %v1917_v8, 2  ;;  %v1518_v26 = vadd.f32 %v1517_v37, %v1513_v7  ;;  %5633 = vmatprep.subr.bf16.mxu0 %v5632_v39  ;;  %v1939_v58 = vunpack.c.h.bf16 %v5044_v13  ;;  %v7398_v37 = vld [vmem:[#allocation5 + $0x530] sm:$0xff] }
 0x1ae   : > { %v1531_v49 = vrot.slane %v1530_v20, 4  ;;  %v1941_v9 = vunpack.c.h.bf16 %v7352_v24  ;;  %v1943_v61 = vunpack.c.h.bf16 %v7355_v40  ;;  %v5634_v30 = vpack.c.bf16 %v3853_v33, %v3852_v12  ;;  %v7408_v12 = vld [vmem:[#allocation5 + $0x440] sm:$0xff]  ;;  %v7410_v33 = vld [vmem:[#allocation5 + $0x448] sm:$0xff] }
 0x1af   : > { %v1859_v53 = vadd.f32 %v1858_v44, %v1857_v36  ;;  %v1919_v16 = vadd.f32 %v1918_v22, %v1917_v8  ;;  %v1520_v10 = vadd.f32 %v1519_v1, %v1518_v26  ;;  %v1954_v38 = vadd.f32 %v1939_v58, %v1937_v19  ;;  %v7392_v36 = vld [vmem:[#allocation5 + $0x438] sm:$0xff]  ;;  %v7394_v8 = vld [vmem:[#allocation5 + $0x5b0] sm:$0xff]  ;;  %v7404_v44 = vld [vmem:[#allocation5 + $0x4c8] sm:$0xff] }
 0x1b0   : > { %v1532_v27 = vadd.f32 %v1531_v49, %v1530_v20  ;;  %v5664_v32 = vpack.c.bf16 %v7362_v4, %v7360_v14  ;;  %v1956_v55 = vsel %vm282_vm0, %v1943_v61, 0.0  ;;  %5635 = vmatpush3.bf16.msra.mxu0 %v5634_v30  ;;  %v1936_v2 = vunpack.c.l.bf16 %v7347_v29  ;;  %v7390_v29 = vld [vmem:[#allocation5 + $0x430] sm:$0xff]  ;;  %v7412_v22 = vld [vmem:[#allocation5 + $0x5c0] sm:$0xff] }
 0x1b1   : > { %v1974_v25 = vsel %vm691_vm5, %v1972_v42, %v1859_v53  ;;  %v1920_v46 = vrot.slane %v1919_v16, 1  ;;  %v1521_v15 = vrot.slane %v1520_v10, 4  ;;  %v1955_v35 = vadd.f32 %v1954_v38, %v1941_v9  ;;  %v7414_v42 = vld [vmem:[#allocation5 + $0x5c8] sm:$0xff]  ;;  %v7418_v58 = vld [vmem:[#allocation5 + $0x540] sm:$0xff]  ;;  %v7433_v38 = vld [vmem:[#allocation5 + $0x458] sm:$0xff] }
 0x1b2   : > { %v1533_v57 = vrot.slane %v1532_v27, 2  ;;  %v1938_v52 = vunpack.c.l.bf16 %v5044_v13  ;;  %v1940_v21 = vunpack.c.l.bf16 %v7352_v24  ;;  %v1942_v41 = vunpack.c.l.bf16 %v7355_v40  ;;  %v7400_v13 = vld [vmem:[#allocation5 + $0x538] sm:$0xff]  ;;  %v7402_v24 = vld [vmem:[#allocation5 + $0x4c0] sm:$0xff]  ;;  %v7420_v9 = vld [vmem:[#allocation5 + $0x548] sm:$0xff] }
 0x1b3   : > { %v1921_v60 = vadd.f32 %v1920_v46, %v1919_v16  ;;  %v1522_v34 = vadd.f32 %v1521_v15, %v1520_v10  ;;  %v5666_v43 = vpack.c.bf16 %v7368_v17, %v7366_v31  ;;  %v1957_v5 = vadd.f32 %v1956_v55, %v1955_v35  ;;  %v7422_v16 = vld [vmem:[#allocation5 + $0x4d0] sm:$0xff]  ;;  %v7446_v15 = vld [vmem:[#allocation5 + $0x5d8] sm:$0xff]  ;;  %v7464_v35 = vld [vmem:[#allocation5 + $0x468] sm:$0xff] }
 0x1b4   : > { %v1534_v28 = vadd.f32 %v1533_v57, %v1532_v27  ;;  %v1944_v7 = vadd.f32 %v1938_v52, %v1936_v2  ;;  %v5636_v0 = vpack.c.bf16 %v3871_v45, %v3870_v3  ;;  %v1946_v40 = vsel %vm282_vm0, %v1942_v41, 0.0  ;;  %v7431_v27 = vld [vmem:[#allocation5 + $0x450] sm:$0xff]  ;;  %v7436_v3 = vld [vmem:[%s6099_s10 + $0x408] sm:$0xff]  ;;  %v7450_v2 = vld [vmem:[#allocation5 + $0x558] sm:$0xff] }
 0x1b5   : > { %v1976_v20 = vsel %vm694_vm6, %v1974_v25, %v1921_v60  ;;  %v1523_v39 = vrot.slane %v1522_v34, 2  ;;  %v5638_v19 = vpack.c.bf16 %v3855_v63, %v3854_v48  ;;  %v1958_v1 = vrot.slane %v1957_v5, 4  ;;  %v7429_v25 = vld [vmem:[#allocation5 + $0x4d8] sm:$0xff]  ;;  %v7448_v55 = vld [vmem:[#allocation5 + $0x550] sm:$0xff]  ;;  %v7452_v63 = vld [vmem:[#allocation5 + $0x4e0] sm:$0xff] }
 0x1b6   : > { %4268 = vmatmul.mubr.f32.vlgmr.msra.gmra.mrb[4].mxu1 %v1976_v20  ;;  %v1535_v26 = vrot.slane %v1534_v28, 1  ;;  %v1945_v53 = vadd.f32 %v1944_v7, %v1940_v21  ;;  %5637 = vmatprep.subr.bf16.mxu0 %v5636_v0  ;;  %v5668_v49 = vpack.c.bf16 %v7377_v51, %v7375_v47  ;;  %v5670_v61 = vpack.c.bf16 %v7382_v62, %v7380_v54  ;;  %v7454_v47 = vld [vmem:[#allocation5 + $0x4e8] sm:$0xff]  ;;  %v7462_v57 = vld [vmem:[#allocation5 + $0x460] sm:$0xff]  ;;  %v7485_v7 = vld [vmem:[#allocation5 + $0x4f0] sm:$0xff] }
 0x1b7   : > { %5663 = vmatpush3.bf16.msra.mxu1 %v5662_v18  ;;  %v1524_v10 = vadd.f32 %v1523_v39, %v1522_v34  ;;  %5639 = vmatpush3.bf16.msra.mxu0 %v5638_v19  ;;  %v5640_v30 = vpack.c.bf16 %v3873_v6, %v3872_v50  ;;  %v1987_v45 = vunpack.c.l.bf16 %v7385_v56  ;;  %v1959_v46 = vadd.f32 %v1958_v1, %v1957_v5  ;;  %v7444_v18 = vld [vmem:[#allocation5 + $0x5d0] sm:$0xff]  ;;  %v7466_v52 = vld [vmem:[#allocation5 + $0x5e0] sm:$0xff]  ;;  %v7472_v41 = vld [vmem:[#allocation5 + $0x5e8] sm:$0xff] }
 0x1b8   : > { %v1536_v48 = vadd.f32 %v1535_v26, %v1534_v28  ;;  %5665 = vmatprep.subr.bf16.mxu1 %v5664_v32  ;;  %v1947_v11 = vadd.f32 %v1946_v40, %v1945_v53  ;;  %v5642_v59 = vpack.c.bf16 %v7392_v36, %v7390_v29  ;;  %v5672_v14 = vpack.c.bf16 %v7396_v23, %v7394_v8  ;;  %v7474_v6 = vld [vmem:[#allocation5 + $0x560] sm:$0xff]  ;;  %v7476_v29 = vld [vmem:[#allocation5 + $0x568] sm:$0xff]  ;;  %v7487_v0 = vld [vmem:[#allocation5 + $0x4f8] sm:$0xff] }
 0x1b9   : > { %v1525_v51 = vrot.slane %v1524_v10, 1  ;;  %5641 = vmatprep.subr.bf16.mxu0 %v5640_v30  ;;  %v5674_v4 = vpack.c.bf16 %v7400_v13, %v7398_v37  ;;  %v5644_v32 = vpack.c.bf16 %v7404_v44, %v7402_v24  ;;  %v1960_v21 = vrot.slane %v1959_v46, 2  ;;  %v7489_v8 = vld [vmem:[#allocation5 + $0x470] sm:$0xff]  ;;  %v7494_v17 = vld [vmem:[#allocation5 + $0x478] sm:$0xff] }
 0x1ba   : > { %1554 = vst [vmem:[#allocation2 + $0xa8] sm:$0x1] %v1536_v48  ;;  %v1948_v50 = vrot.slane %v1947_v11, 4  ;;  %v5646_v60 = vpack.c.bf16 %v7410_v33, %v7408_v12  ;;  %v5676_v34 = vpack.c.bf16 %v7414_v42, %v7412_v22  ;;  %v5678_v28 = vpack.c.bf16 %v7420_v9, %v7418_v58  ;;  %v7498_v20 = vld [vmem:[#allocation5 + $0x5f8] sm:$0xff]  ;;  %v7509_v26 = vld [vmem:[#allocation5 + $0x570] sm:$0xff] }
 0x1bb   : > { %v1526_v36 = vadd.f32 %v1525_v51, %v1524_v10  ;;  %5667 = vmatpush3.bf16.msra.mxu1 %v5666_v43  ;;  %5643 = vmatpush3.bf16.msra.mxu0 %v5642_v59  ;;  %v5648_v5 = vpack.c.bf16 %v7429_v25, %v7422_v16  ;;  %v1988_v23 = vunpack.c.h.bf16 %v7385_v56  ;;  %v1961_v24 = vadd.f32 %v1960_v21, %v1959_v46  ;;  %v7496_v43 = vld [vmem:[#allocation5 + $0x5f0] sm:$0xff]  ;;  %v7511_v1 = vld [vmem:[#allocation5 + $0x578] sm:$0xff]  ;;  %v5052_v59 = vld [vmem:[%s6099_s10 + $0x420] sm:$0xff] }
 0x1bc   : > { %v1949_v44 = vadd.f32 %v1948_v50, %v1947_v11  ;;  %5669 = vmatprep.subr.bf16.mxu1 %v5668_v49  ;;  %5645 = vmatprep.subr.bf16.mxu0 %v5644_v32  ;;  %v5650_v31 = vpack.c.bf16 %v7433_v38, %v7431_v27  ;;  %v1989_v39 = vunpack.c.l.bf16 %v7436_v3  ;;  %v5680_v40 = vpack.c.bf16 %v7446_v15, %v7444_v18  ;;  %v7514_v53 = vld [vmem:[%s6099_s10 + $0x410] sm:$0xff]  ;;  %v7521_v25 = vld [vmem:[%s6099_s10 + $0x418] sm:$0x33]  ;;  %v5051_v11 = vld [vmem:[%s6099_s10 + $0x418] sm:$0xcc] }
 0x1bd   : > { %1553 = vst [vmem:[#allocation2 + $0xa0] sm:$0x1] %v1526_v36  ;;  %v5682_v19 = vpack.c.bf16 %v7450_v2, %v7448_v55  ;;  %v5652_v12 = vpack.c.bf16 %v7454_v47, %v7452_v63  ;;  %v5654_v33 = vpack.c.bf16 %v7464_v35, %v7462_v57  ;;  %v1962_v49 = vrot.slane %v1961_v24, 1  ;;  %v5054_v50 = vld [vmem:[%s6099_s10 + $0x430] sm:$0xff]  ;;  %v5060_v15 = vld [vmem:[%s6099_s10 + $0x458] sm:$0xff] }
 0x1be   : > { %v1950_v16 = vrot.slane %v1949_v44, 2  ;;  %v5684_v10 = vpack.c.bf16 %v7472_v41, %v7466_v52  ;;  %v5686_v30 = vpack.c.bf16 %v7476_v29, %v7474_v6  ;;  %v5656_v27 = vpack.c.bf16 %v7487_v0, %v7485_v7 }
 0x1bf   : > { %5671 = vmatpush3.bf16.msra.mxu1 %v5670_v61  ;;  %5647 = vmatpush3.bf16.msra.mxu0 %v5646_v60  ;;  %v5658_v38 = vpack.c.bf16 %v7494_v17, %v7489_v8  ;;  %v5688_v48 = vpack.c.bf16 %v7498_v20, %v7496_v43  ;;  %v1990_v46 = vunpack.c.h.bf16 %v7436_v3  ;;  %v1963_v63 = vadd.f32 %v1962_v49, %v1961_v24  ;;  %v5053_v61 = vld [vmem:[%s6099_s10 + $0x428] sm:$0xff] }
 0x1c0   : > { %v1951_v47 = vadd.f32 %v1950_v16, %v1949_v44  ;;  %5673 = vmatprep.subr.bf16.mxu1 %v5672_v14  ;;  %5649 = vmatprep.subr.bf16.mxu0 %v5648_v5  ;;  %v5690_v54 = vpack.c.bf16 %v7511_v1, %v7509_v26  ;;  %v1992_v32 = vunpack.c.h.bf16 %v7514_v53  ;;  %v1994_v35 = vunpack.c.h.bf16 %v7521_v25  ;;  %v5067_v26 = vld [vmem:[%s6099_s10 + $0x488] sm:$0xcc] }
 0x1c1   : > { %v3711_v51 = vld [vmem:[#allocation2 + $0xa8] sm:$0x1]  ;;  %v2005_v21 = vadd.f32 %v1990_v46, %v1988_v23  ;;  %1981 = vst [vmem:[#allocation2 + $0xb8] sm:$0x1] %v1963_v63  ;;  %v2019_v14 = vunpack.c.l.bf16 %v5051_v11  ;;  %v2020_v36 = vunpack.c.h.bf16 %v5051_v11  ;;  %v2021_v5 = vunpack.c.l.bf16 %v5052_v59  ;;  %v7551_v63 = vld [vmem:[%s6099_s10 + $0x438] sm:$0xff] }
 0x1c2   : > { %4197 = vmatprep.mubr.f32.mxu0 %v3711_v51  ;;  %v1952_v60 = vrot.slane %v1951_v47, 1  ;;  %v2007_v0 = vsel %vm282_vm0, %v1994_v35, 0.0  ;;  %v2022_v24 = vunpack.c.h.bf16 %v5052_v59  ;;  %v2023_v44 = vunpack.c.l.bf16 %v5053_v61  ;;  %v7558_v59 = vld [vmem:[%s6099_s10 + $0x440] sm:$0xff]  ;;  %v7568_v51 = vld [vmem:[%s6099_s10 + $0x448] sm:$0xff] }
 0x1c3   : > { %5675 = vmatpush3.bf16.msra.mxu1 %v5674_v4  ;;  %5651 = vmatpush3.bf16.msra.mxu0 %v5650_v31  ;;  %v2006_v7 = vadd.f32 %v2005_v21, %v1992_v32  ;;  %v2024_v16 = vunpack.c.h.bf16 %v5053_v61  ;;  %v2025_v46 = vunpack.c.l.bf16 %v5054_v50  ;;  %v2026_v11 = vunpack.c.h.bf16 %v5054_v50  ;;  %v7571_v32 = vld [vmem:[%s6099_s10 + $0x450] sm:$0x33]  ;;  %v5059_v50 = vld [vmem:[%s6099_s10 + $0x450] sm:$0xcc] }
 0x1c4   : > { %v3710_v23 = vld [vmem:[#allocation2 + $0xa0] sm:$0x1]  ;;  %v1953_v49 = vadd.f32 %v1952_v60, %v1951_v47  ;;  %5677 = vmatprep.subr.bf16.mxu1 %v5676_v34  ;;  %5653 = vmatprep.subr.bf16.mxu0 %v5652_v12  ;;  %v7553_v13 = vrot.slane %v2019_v14, 4  ;;  %v7555_v4 = vrot.slane %v2021_v5, 4  ;;  %v2038_v31 = vrot.slane %v2020_v36, 4 }
 0x1c5   : > { %4198 = vmatmul.mubr.f32.gmra.mrb[6].mxu0 %v3710_v23  ;;  %v2008_v37 = vadd.f32 %v2007_v0, %v2006_v7  ;;  %v2039_v22 = vrot.slane %v2022_v24, 4  ;;  %v7560_v42 = vrot.slane %v2023_v44, 4  ;;  %v2043_v34 = vrot.slane %v2024_v16, 4  ;;  %v5061_v24 = vld [vmem:[%s6099_s10 + $0x460] sm:$0xff]  ;;  %v5062_v16 = vld [vmem:[%s6099_s10 + $0x468] sm:$0xff] }
 0x1c6   : > { %1980 = vst [vmem:[#allocation2 + $0xb0] sm:$0x1] %v1953_v49  ;;  %v7562_v12 = vrot.slane %v2025_v46, 4  ;;  %v2047_v61 = vrot.slane %v2026_v11, 4  ;;  %v2082_v21 = vunpack.c.h.bf16 %v7551_v63  ;;  %v2088_v0 = vunpack.c.h.bf16 %v7571_v32 }
 0x1c7   : > { %5679 = vmatpush3.bf16.msra.mxu1 %v5678_v28  ;;  %5655 = vmatpush3.bf16.msra.mxu0 %v5654_v33  ;;  %v2009_v47 = vrot.slane %v2008_v37, 4  ;;  %v2040_v58 = vsel %vm282_vm0, %v2038_v31, %v2039_v22  ;;  %v2044_v9 = vsel %vm282_vm0, %v2039_v22, %v2043_v34  ;;  %v2084_v33 = vunpack.c.h.bf16 %v7558_v59 }
 0x1c8   : > { %5681 = vmatprep.subr.bf16.mxu1 %v5680_v40  ;;  %5657 = vmatprep.subr.bf16.mxu0 %v5656_v27  ;;  %v3713_v60 = vld [vmem:[#allocation2 + $0xb8] sm:$0x1]  ;;  %v2048_v36 = vsel %vm282_vm0, %v2043_v34, %v2047_v61  ;;  %v2067_v5 = vadd.f32 %v2044_v9, %v2040_v58  ;;  %v2069_v18 = vsel %vm282_vm0, %v2047_v61, 0.0  ;;  %v2086_v27 = vunpack.c.h.bf16 %v7568_v51  ;;  %v7610_v58 = vld [vmem:[%s6099_s10 + $0x470] sm:$0xff] }
 0x1c9   : > { %v2010_v14 = vadd.f32 %v2009_v47, %v2008_v37  ;;  %4272 = vmatprep.mubr.f32.mxu1 %v3713_v60  ;;  %v2099_v49 = vadd.f32 %v2084_v33, %v2082_v21  ;;  %v2113_v46 = vunpack.c.l.bf16 %v5059_v50  ;;  %v2101_v11 = vsel %vm282_vm0, %v2088_v0, 0.0 }
 0x1ca   : > { %v2068_v23 = vadd.f32 %v2067_v5, %v2048_v36  ;;  %v2114_v37 = vunpack.c.h.bf16 %v5059_v50  ;;  %v2115_v31 = vunpack.c.l.bf16 %v5060_v15  ;;  %v2116_v22 = vunpack.c.h.bf16 %v5060_v15  ;;  %v7622_v36 = vld [vmem:[%s6099_s10 + $0x478] sm:$0xff] }
 0x1cb   : > { %5683 = vmatpush3.bf16.msra.mxu1 %v5682_v19  ;;  %5659 = vmatpush3.bf16.msra.mxu0 %v5658_v38  ;;  %v2011_v44 = vrot.slane %v2010_v14, 2  ;;  %v2100_v8 = vadd.f32 %v2099_v49, %v2086_v27  ;;  %v2117_v17 = vunpack.c.l.bf16 %v5061_v24  ;;  %v2118_v38 = vunpack.c.h.bf16 %v5061_v24  ;;  %v7634_v24 = vld [vmem:[%s6099_s10 + $0x488] sm:$0x33] }
 0x1cc   : > { %5685 = vmatprep.subr.bf16.mxu1 %v5684_v10  ;;  %v2070_v19 = vadd.f32 %v2069_v18, %v2068_v23  ;;  %v2119_v34 = vunpack.c.l.bf16 %v5062_v16  ;;  %v2120_v47 = vunpack.c.h.bf16 %v5062_v16  ;;  %v7602_v61 = vrot.slane %v2113_v46, 4 }
 0x1cd   : > { %v3712_v55 = vld [vmem:[#allocation2 + $0xb0] sm:$0x1]  ;;  %v2012_v2 = vadd.f32 %v2011_v44, %v2010_v14  ;;  %v2102_v10 = vadd.f32 %v2101_v11, %v2100_v8  ;;  %v7607_v21 = vrot.slane %v2115_v31, 4  ;;  %v2132_v9 = vrot.slane %v2114_v37, 4 }
 0x1ce   : > { %4273 = vmatmul.mubr.f32.gmra.mrb[6].mxu1 %v3712_v55  ;;  %v2071_v41 = vrot.slane %v2070_v19, 4  ;;  %v2133_v33 = vrot.slane %v2116_v22, 4  ;;  %v7615_v50 = vrot.slane %v2117_v17, 4  ;;  %v2137_v6 = vrot.slane %v2118_v38, 4  ;;  %v5068_v31 = vld [vmem:[%s6099_s10 + $0x490] sm:$0xff] }
 0x1cf   : > { %5687 = vmatpush3.bf16.msra.mxu1 %v5686_v30  ;;  %v2013_v52 = vrot.slane %v2012_v2, 1  ;;  %v2103_v60 = vrot.slane %v2102_v10, 4  ;;  %v7619_v14 = vrot.slane %v2119_v34, 4  ;;  %v2141_v20 = vrot.slane %v2120_v47, 4  ;;  %v5069_v34 = vld [vmem:[%s6099_s10 + $0x498] sm:$0xff]  ;;  %v5070_v47 = vld [vmem:[%s6099_s10 + $0x4a0] sm:$0xff] }
 0x1d0   : > { %5689 = vmatprep.subr.bf16.mxu1 %v5688_v48  ;;  %v2072_v30 = vadd.f32 %v2071_v41, %v2070_v19  ;;  %v2134_v5 = vsel %vm282_vm0, %v2132_v9, %v2133_v33  ;;  %v2138_v43 = vsel %vm282_vm0, %v2133_v33, %v2137_v6  ;;  %v7627_v48 = vld [vmem:[%s6099_s10 + $0x480] sm:$0xff]  ;;  %v2176_v44 = vunpack.c.h.bf16 %v7610_v58 }
 0x1d1   : > { %v7617_v29 = vadd.f32 %v2013_v52, %v2012_v2  ;;  %v2104_v27 = vadd.f32 %v2103_v60, %v2102_v10  ;;  %v2161_v0 = vadd.f32 %v2138_v43, %v2134_v5  ;;  %v2142_v23 = vsel %vm282_vm0, %v2137_v6, %v2141_v20 }
 0x1d2   : > { %v2073_v15 = vrot.slane %v2072_v30, 2  ;;  %v2163_v49 = vsel %vm282_vm0, %v2141_v20, 0.0  ;;  %v2178_v46 = vunpack.c.h.bf16 %v7622_v36  ;;  %v2180_v22 = vunpack.c.h.bf16 %v7627_v48 }
 0x1d3   : > { %5691 = vmatpush3.bf16.msra.mxu1 %v5690_v54  ;;  %v2105_v54 = vrot.slane %v2104_v27, 2  ;;  %v2162_v11 = vadd.f32 %v2161_v0, %v2142_v23  ;;  %v2182_v2 = vunpack.c.h.bf16 %v7634_v24  ;;  %v2207_v52 = vunpack.c.l.bf16 %v5067_v26 }
 0x1d4   : > { %v2074_v1 = vadd.f32 %v2073_v15, %v2072_v30  ;;  %v2193_v19 = vadd.f32 %v2178_v46, %v2176_v44  ;;  %v2208_v9 = vunpack.c.h.bf16 %v5067_v26  ;;  %v2209_v33 = vunpack.c.l.bf16 %v5068_v31  ;;  %v7657_v46 = vld [vmem:[%s6099_s10 + $0x4a8] sm:$0xff] }
 0x1d5   : > { %v2106_v17 = vadd.f32 %v2105_v54, %v2104_v27  ;;  %v2164_v38 = vadd.f32 %v2163_v49, %v2162_v11  ;;  %v2195_v10 = vsel %vm282_vm0, %v2182_v2, 0.0  ;;  %v2210_v5 = vunpack.c.h.bf16 %v5068_v31  ;;  %v7662_v31 = vld [vmem:[%s6099_s10 + $0x4b0] sm:$0xff] }
 0x1d6   : > { %v2075_v8 = vrot.slane %v2074_v1, 1  ;;  %v2194_v41 = vadd.f32 %v2193_v19, %v2180_v22  ;;  %v2211_v20 = vunpack.c.l.bf16 %v5069_v34  ;;  %v2212_v15 = vunpack.c.h.bf16 %v5069_v34 }
 0x1d7   : > { %v2107_v30 = vrot.slane %v2106_v17, 1  ;;  %v2165_v60 = vrot.slane %v2164_v38, 4  ;;  %v2213_v27 = vunpack.c.l.bf16 %v5070_v47  ;;  %v2214_v23 = vunpack.c.h.bf16 %v5070_v47  ;;  %v7670_v47 = vld [vmem:[%s6099_s10 + $0x4b8] sm:$0xff] }
 0x1d8   : > { %v7650_v6 = vadd.f32 %v2075_v8, %v2074_v1  ;;  %v2196_v43 = vadd.f32 %v2195_v10, %v2194_v41  ;;  %v7654_v49 = vrot.slane %v2207_v52, 4  ;;  %v7659_v1 = vrot.slane %v2209_v33, 4 }
 0x1d9   : > { %v7652_v0 = vadd.f32 %v2107_v30, %v2106_v17  ;;  %v2166_v44 = vadd.f32 %v2165_v60, %v2164_v38  ;;  %v2226_v54 = vrot.slane %v2208_v9, 4  ;;  %v2227_v11 = vrot.slane %v2210_v5, 4  ;;  %v7675_v9 = vld [vmem:[%s6099_s10 + $0x4c0] sm:$0x33] }
 0x1da   : > { %v2197_v26 = vrot.slane %v2196_v43, 4  ;;  %v7664_v2 = vrot.slane %v2211_v20, 4  ;;  %v2231_v19 = vrot.slane %v2212_v15, 4  ;;  %v7666_v8 = vrot.slane %v2213_v27, 4  ;;  %v5075_v15 = vld [vmem:[%s6099_s10 + $0x4c0] sm:$0xcc] }
 0x1db   : > { %v2167_v22 = vrot.slane %v2166_v44, 2  ;;  %v2228_v38 = vsel %vm282_vm0, %v2226_v54, %v2227_v11  ;;  %v2235_v34 = vrot.slane %v2214_v23, 4  ;;  %v2270_v33 = vunpack.c.h.bf16 %v7657_v46  ;;  %v5076_v54 = vld [vmem:[%s6099_s10 + $0x4c8] sm:$0xff] }
 0x1dc   : > { %v2198_v17 = vadd.f32 %v2197_v26, %v2196_v43  ;;  %v2232_v10 = vsel %vm282_vm0, %v2227_v11, %v2231_v19  ;;  %v2274_v26 = vunpack.c.h.bf16 %v7670_v47  ;;  %v2276_v52 = vunpack.c.h.bf16 %v7675_v9 }
 0x1dd   : > { %v2168_v41 = vadd.f32 %v2167_v22, %v2166_v44  ;;  %v2236_v5 = vsel %vm282_vm0, %v2231_v19, %v2235_v34  ;;  %v2255_v43 = vadd.f32 %v2232_v10, %v2228_v38  ;;  %v2257_v20 = vsel %vm282_vm0, %v2235_v34, 0.0  ;;  %v5077_v19 = vld [vmem:[%s6099_s10 + $0x4d0] sm:$0xff]  ;;  %v5078_v10 = vld [vmem:[%s6099_s10 + $0x4d8] sm:$0xff] }
 0x1de   : > { %v2199_v60 = vrot.slane %v2198_v17, 2  ;;  %v2272_v44 = vunpack.c.h.bf16 %v7662_v31  ;;  %v2301_v34 = vunpack.c.l.bf16 %v5075_v15  ;;  %v2302_v55 = vunpack.c.h.bf16 %v5075_v15 }
 0x1df   : > { %v2169_v27 = vrot.slane %v2168_v41, 1  ;;  %v2256_v22 = vadd.f32 %v2255_v43, %v2236_v5  ;;  %v2289_v40 = vsel %vm282_vm0, %v2276_v52, 0.0  ;;  %v2303_v23 = vunpack.c.l.bf16 %v5076_v54 }
 0x1e0   : > { %v2200_v11 = vadd.f32 %v2199_v60, %v2198_v17  ;;  %v2287_v38 = vadd.f32 %v2272_v44, %v2270_v33  ;;  %v2304_v28 = vunpack.c.h.bf16 %v5076_v54  ;;  %v2305_v35 = vunpack.c.l.bf16 %v5077_v19 }
 0x1e1   : > { %v2170_v37 = vadd.f32 %v2169_v27, %v2168_v41  ;;  %v2258_v18 = vadd.f32 %v2257_v20, %v2256_v22  ;;  %v2306_v17 = vunpack.c.h.bf16 %v5077_v19  ;;  %v2307_v43 = vunpack.c.l.bf16 %v5078_v10 }
 0x1e2   : > { %v2201_v16 = vrot.slane %v2200_v11, 1  ;;  %v2288_v7 = vadd.f32 %v2287_v38, %v2274_v26  ;;  %v2308_v30 = vunpack.c.h.bf16 %v5078_v10  ;;  %v7691_v57 = vrot.slane %v2301_v34, 4 }
 0x1e3   : > { %v2259_v5 = vrot.slane %v2258_v18, 4  ;;  %v7693_v41 = vrot.slane %v2303_v23, 4  ;;  %v2320_v33 = vrot.slane %v2302_v55, 4  ;;  %v2321_v27 = vrot.slane %v2304_v28, 4 }
 0x1e4   : > { %v2202_v60 = vadd.f32 %v2201_v16, %v2200_v11  ;;  %v2290_v62 = vadd.f32 %v2289_v40, %v2288_v7  ;;  %v7695_v20 = vrot.slane %v2305_v35, 4  ;;  %v2325_v52 = vrot.slane %v2306_v17, 4 }
 0x1e5   : > { %v2260_v15 = vadd.f32 %v2259_v5, %v2258_v18  ;;  %v7697_v26 = vrot.slane %v2307_v43, 4  ;;  %v2329_v54 = vrot.slane %v2308_v30, 4  ;;  %v2392_v16 = vsel %vm677_vm1, %v7617_v29, %v7650_v6 }
 0x1e6   : > { %v2291_v44 = vrot.slane %v2290_v62, 4  ;;  %v2322_v40 = vsel %vm282_vm0, %v2320_v33, %v2321_v27  ;;  %v2326_v7 = vsel %vm282_vm0, %v2321_v27, %v2325_v52  ;;  %v2394_v18 = vsel %vm680_vm2, %v2392_v16, %v7652_v0 }
 0x1e7   : > { %v2261_v11 = vrot.slane %v2260_v15, 2  ;;  %v2330_v35 = vsel %vm282_vm0, %v2325_v52, %v2329_v54  ;;  %v2349_v55 = vadd.f32 %v2326_v7, %v2322_v40  ;;  %v2351_v23 = vsel %vm282_vm0, %v2329_v54, 0.0 }
 0x1e8   : > { %v2292_v28 = vadd.f32 %v2291_v44, %v2290_v62  ;;  %v2396_v30 = vsel %vm683_vm3, %v2394_v18, %v2170_v37  ;;  %v1995_v29 = vadd.f32 %v1989_v39, %v1987_v45  ;;  %v9105_v6 = vunpack.c.l.bf16 %v7521_v25 }
 0x1e9   : > { %v2262_v22 = vadd.f32 %v2261_v11, %v2260_v15  ;;  %v2350_v0 = vadd.f32 %v2349_v55, %v2330_v35  ;;  %v2398_v62 = vsel %vm282_vm0, %v2396_v30, %v2202_v60  ;;  %v2037_v10 = vsel %vm282_vm0, %v7553_v13, %v7555_v4 }
 0x1ea   : > { %v1997_v19 = vsel %vm282_vm0, %v9105_v6, 0.0  ;;  %v2293_v38 = vrot.slane %v2292_v28, 2  ;;  %v9106_v37 = vunpack.c.l.bf16 %v7514_v53  ;;  %v2042_v56 = vsel %vm282_vm0, %v7555_v4, %v7560_v42 }
 0x1eb   : > { %v2263_v34 = vrot.slane %v2262_v22, 1  ;;  %v2046_v3 = vsel %vm282_vm0, %v7560_v42, %v7562_v12  ;;  %v2352_v39 = vadd.f32 %v2351_v23, %v2350_v0  ;;  %v2057_v25 = vadd.f32 %v2042_v56, %v2037_v10 }
 0x1ec   : > { %v1996_v17 = vadd.f32 %v1995_v29, %v9106_v37  ;;  %v2294_v45 = vadd.f32 %v2293_v38, %v2292_v28  ;;  %v2059_v60 = vsel %vm282_vm0, %v7562_v12, 0.0  ;;  %v9107_v43 = vunpack.c.l.bf16 %v7551_v63 }
 0x1ed   : > { %v2264_v5 = vadd.f32 %v2263_v34, %v2262_v22  ;;  %v9108_v53 = vunpack.c.l.bf16 %v7558_v59  ;;  %v9109_v15 = vunpack.c.l.bf16 %v7571_v32  ;;  %v2353_v52 = vrot.slane %v2352_v39, 4 }
 0x1ee   : > { %v1998_v13 = vadd.f32 %v1997_v19, %v1996_v17  ;;  %v2295_v27 = vrot.slane %v2294_v45, 1  ;;  %v2058_v42 = vadd.f32 %v2057_v25, %v2046_v3  ;;  %v2131_v44 = vsel %vm282_vm0, %v7602_v61, %v7607_v21 }
 0x1ef   : > { %v2089_v33 = vadd.f32 %v9108_v53, %v9107_v43  ;;  %v2091_v4 = vsel %vm282_vm0, %v9109_v15, 0.0  ;;  %v2400_v12 = vsel %vm688_vm4, %v2398_v62, %v2264_v5  ;;  %v9110_v16 = vunpack.c.l.bf16 %v7568_v51 }
 0x1f0   : > { %v1999_v54 = vrot.slane %v1998_v13, 4  ;;  %v2136_v59 = vsel %vm282_vm0, %v7607_v21, %v7615_v50  ;;  %v2296_v32 = vadd.f32 %v2295_v27, %v2294_v45  ;;  %v2354_v11 = vadd.f32 %v2353_v52, %v2352_v39 }
 0x1f1   : > { %v2090_v63 = vadd.f32 %v2089_v33, %v9110_v16  ;;  %v2060_v40 = vadd.f32 %v2059_v60, %v2058_v42  ;;  %v2140_v7 = vsel %vm282_vm0, %v7615_v50, %v7619_v14  ;;  %v2151_v61 = vadd.f32 %v2136_v59, %v2131_v44 }
 0x1f2   : > { %v2000_v18 = vadd.f32 %v1999_v54, %v1998_v13  ;;  %v2153_v35 = vsel %vm282_vm0, %v7619_v14, 0.0  ;;  %v2355_v55 = vrot.slane %v2354_v11, 2  ;;  %v2402_v51 = vsel %vm691_vm5, %v2400_v12, %v2296_v32 }
 0x1f3   : > { %v2092_v28 = vadd.f32 %v2091_v4, %v2090_v63  ;;  %v2061_v23 = vrot.slane %v2060_v40, 4  ;;  %v9111_v22 = vunpack.c.l.bf16 %v7610_v58  ;;  %v9112_v21 = vunpack.c.l.bf16 %v7622_v36 }
 0x1f4   : > { %v2001_v29 = vrot.slane %v2000_v18, 2  ;;  %v2152_v19 = vadd.f32 %v2151_v61, %v2140_v7  ;;  %v9113_v50 = vunpack.c.l.bf16 %v7634_v24  ;;  %v2356_v0 = vadd.f32 %v2355_v55, %v2354_v11  ;;  %v3930_v55 = vld [vmem:[#allocation5 + $0x680] sm:$0xff] }
 0x1f5   : > { %v2183_v30 = vadd.f32 %v9112_v21, %v9111_v22  ;;  %v2093_v6 = vrot.slane %v2092_v28, 4  ;;  %v2062_v62 = vadd.f32 %v2061_v23, %v2060_v40  ;;  %v9114_v14 = vunpack.c.l.bf16 %v7627_v48  ;;  %v7792_v23 = vld [vmem:[%s6099_s10 + $0x500] sm:$0xff] }
 0x1f6   : > { %v2185_v38 = vsel %vm282_vm0, %v9113_v50, 0.0  ;;  %v2225_v34 = vsel %vm282_vm0, %v7654_v49, %v7659_v1  ;;  %v2002_v58 = vadd.f32 %v2001_v29, %v2000_v18  ;;  %v2154_v36 = vadd.f32 %v2153_v35, %v2152_v19 }
 0x1f7   : > { %v2184_v10 = vadd.f32 %v2183_v30, %v9114_v14  ;;  %v2094_v37 = vadd.f32 %v2093_v6, %v2092_v28  ;;  %v2230_v17 = vsel %vm282_vm0, %v7659_v1, %v7664_v2  ;;  %v2357_v56 = vrot.slane %v2356_v0, 1 }
 0x1f8   : > { %v2063_v24 = vrot.slane %v2062_v62, 2  ;;  %v2234_v45 = vsel %vm282_vm0, %v7664_v2, %v7666_v8  ;;  %v2003_v48 = vrot.slane %v2002_v58, 1  ;;  %v2155_v25 = vrot.slane %v2154_v36, 4 }
 0x1f9   : > { %v2186_v3 = vadd.f32 %v2185_v38, %v2184_v10  ;;  %v2095_v39 = vrot.slane %v2094_v37, 2  ;;  %v2245_v60 = vadd.f32 %v2230_v17, %v2225_v34  ;;  %v2358_v5 = vadd.f32 %v2357_v56, %v2356_v0 }
 0x1fa   : > { %v2064_v49 = vadd.f32 %v2063_v24, %v2062_v62  ;;  %v2247_v43 = vsel %vm282_vm0, %v7666_v8, 0.0  ;;  %v2004_v53 = vadd.f32 %v2003_v48, %v2002_v58  ;;  %v2156_v1 = vadd.f32 %v2155_v25, %v2154_v36  ;;  %v7802_v62 = vld [vmem:[%s6099_s10 + $0x510] sm:$0xff]  ;;  %v7806_v58 = vld [vmem:[%s6099_s10 + $0x518] sm:$0x33] }
 0x1fb   : > { %v2187_v13 = vrot.slane %v2186_v3, 4  ;;  %v2096_v33 = vadd.f32 %v2095_v39, %v2094_v37  ;;  %v2246_v15 = vadd.f32 %v2245_v60, %v2234_v45  ;;  %v2404_v4 = vsel %vm694_vm6, %v2402_v51, %v2358_v5  ;;  %v3931_v51 = vld [vmem:[#allocation5 + $0x688] sm:$0xff]  ;;  %v5088_v60 = vld [vmem:[%s6099_s10 + $0x520] sm:$0xff] }
 0x1fc   : > { %v2065_v27 = vrot.slane %v2064_v49, 1  ;;  %v9115_v2 = vunpack.c.l.bf16 %v7657_v46  ;;  %v9116_v42 = vunpack.c.l.bf16 %v7662_v31  ;;  %4342 = vmatprep.mubr.f32.mxu0 %v2404_v4  ;;  %v2157_v54 = vrot.slane %v2156_v1, 2  ;;  %v5090_v4 = vld [vmem:[%s6099_s10 + $0x530] sm:$0xff] }
 0x1fd   : > { %v2188_v52 = vadd.f32 %v2187_v13, %v2186_v3  ;;  %v2097_v12 = vrot.slane %v2096_v33, 1  ;;  %v2248_v16 = vadd.f32 %v2247_v43, %v2246_v15  ;;  %v9117_v63 = vunpack.c.l.bf16 %v7675_v9  ;;  %v5087_v3 = vld [vmem:[%s6099_s10 + $0x518] sm:$0xcc]  ;;  %v5089_v15 = vld [vmem:[%s6099_s10 + $0x528] sm:$0xff] }
 0x1fe   : > { %v2277_v44 = vadd.f32 %v9116_v42, %v9115_v2  ;;  %v2066_v59 = vadd.f32 %v2065_v27, %v2064_v49  ;;  %v9118_v11 = vunpack.c.l.bf16 %v7670_v47  ;;  %v2319_v46 = vsel %vm282_vm0, %v7691_v57, %v7693_v41 }
 0x1ff   : > { %v2279_v8 = vsel %vm282_vm0, %v9117_v63, 0.0  ;;  %v2189_v32 = vrot.slane %v2188_v52, 2  ;;  %v2098_v31 = vadd.f32 %v2097_v12, %v2096_v33  ;;  %v2158_v7 = vadd.f32 %v2157_v54, %v2156_v1 }
 0x200   : > { %v2278_v40 = vadd.f32 %v2277_v44, %v9118_v11  ;;  %v2249_v18 = vrot.slane %v2248_v16, 4  ;;  %v2324_v28 = vsel %vm282_vm0, %v7693_v41, %v7695_v20  ;;  %v2328_v35 = vsel %vm282_vm0, %v7695_v20, %v7697_v26  ;;  %v7799_v20 = vld [vmem:[%s6099_s10 + $0x508] sm:$0xff] }
 0x201   : > { %v2190_v9 = vadd.f32 %v2189_v32, %v2188_v52  ;;  %v2339_v47 = vadd.f32 %v2324_v28, %v2319_v46  ;;  %v2159_v57 = vrot.slane %v2158_v7, 1  ;;  %v2341_v21 = vsel %vm282_vm0, %v7697_v26, 0.0 }
 0x202   : > { %v2280_v61 = vadd.f32 %v2279_v8, %v2278_v40  ;;  %v2250_v22 = vadd.f32 %v2249_v18, %v2248_v16  ;;  %v2391_v41 = vsel %vm677_vm1, %v2004_v53, %v2066_v59  ;;  %v5692_v0 = vpack.c.bf16 %v3931_v51, %v3930_v55 }
 0x203   : > { %v2191_v30 = vrot.slane %v2190_v9, 1  ;;  %v2340_v6 = vadd.f32 %v2339_v47, %v2328_v35  ;;  %v2393_v19 = vsel %vm680_vm2, %v2391_v41, %v2098_v31  ;;  %v2160_v50 = vadd.f32 %v2159_v57, %v2158_v7  ;;  %v7828_v35 = vld [vmem:[%s6099_s10 + $0x538] sm:$0xff] }
 0x204   : > { %v2281_v29 = vrot.slane %v2280_v61, 4  ;;  %v2251_v38 = vrot.slane %v2250_v22, 2  ;;  %v2414_v14 = vunpack.c.l.bf16 %v7792_v23  ;;  %v2415_v37 = vunpack.c.h.bf16 %v7792_v23  ;;  %5693 = vmatprep.subr.bf16.mxu0 %v5692_v0 }
 0x205   : > { %v2192_v10 = vadd.f32 %v2191_v30, %v2190_v9  ;;  %v2342_v34 = vadd.f32 %v2341_v21, %v2340_v6  ;;  %v2395_v17 = vsel %vm683_vm3, %v2393_v19, %v2160_v50  ;;  %v2416_v56 = vunpack.c.l.bf16 %v7799_v20  ;;  %v7840_v50 = vld [vmem:[%s6099_s10 + $0x548] sm:$0xff] }
 0x206   : > { %v2282_v26 = vadd.f32 %v2281_v29, %v2280_v61  ;;  %v2252_v36 = vadd.f32 %v2251_v38, %v2250_v22  ;;  %v2417_v24 = vunpack.c.h.bf16 %v7799_v20  ;;  %v2419_v49 = vunpack.c.h.bf16 %v7802_v62  ;;  %v7834_v22 = vld [vmem:[%s6099_s10 + $0x540] sm:$0xff]  ;;  %v7843_v38 = vld [vmem:[%s6099_s10 + $0x550] sm:$0x33] }
 0x207   : > { %v2343_v48 = vrot.slane %v2342_v34, 4  ;;  %v2397_v39 = vsel %vm282_vm0, %v2395_v17, %v2192_v10  ;;  %v2421_v43 = vunpack.c.h.bf16 %v7806_v58  ;;  %v2446_v27 = vunpack.c.l.bf16 %v5087_v3  ;;  %v5095_v17 = vld [vmem:[%s6099_s10 + $0x550] sm:$0xcc] }
 0x208   : > { %v2283_v45 = vrot.slane %v2282_v26, 2  ;;  %v2253_v5 = vrot.slane %v2252_v36, 1  ;;  %v2432_v1 = vadd.f32 %v2417_v24, %v2415_v37  ;;  %v2447_v42 = vunpack.c.h.bf16 %v5087_v3 }
 0x209   : > { %v2344_v33 = vadd.f32 %v2343_v48, %v2342_v34  ;;  %v2434_v2 = vsel %vm282_vm0, %v2421_v43, 0.0  ;;  %v2448_v44 = vunpack.c.l.bf16 %v5088_v60  ;;  %v2449_v63 = vunpack.c.h.bf16 %v5088_v60 }
 0x20a   : > { %v2284_v53 = vadd.f32 %v2283_v45, %v2282_v26  ;;  %v2254_v52 = vadd.f32 %v2253_v5, %v2252_v36  ;;  %v2433_v16 = vadd.f32 %v2432_v1, %v2419_v49  ;;  %v2450_v59 = vunpack.c.l.bf16 %v5089_v15 }
 0x20b   : > { %v2345_v54 = vrot.slane %v2344_v33, 2  ;;  %v2451_v32 = vunpack.c.h.bf16 %v5089_v15  ;;  %v2452_v11 = vunpack.c.l.bf16 %v5090_v4  ;;  %v2453_v7 = vunpack.c.h.bf16 %v5090_v4  ;;  %v5098_v4 = vld [vmem:[%s6099_s10 + $0x568] sm:$0xff] }
 0x20c   : > { %v2285_v12 = vrot.slane %v2284_v53, 1  ;;  %v2399_v8 = vsel %vm688_vm4, %v2397_v39, %v2254_v52  ;;  %v2435_v31 = vadd.f32 %v2434_v2, %v2433_v16  ;;  %v7823_v18 = vrot.slane %v2446_v27, 4  ;;  %v5096_v39 = vld [vmem:[%s6099_s10 + $0x558] sm:$0xff] }
 0x20d   : > { %v2346_v46 = vadd.f32 %v2345_v54, %v2344_v33  ;;  %v7825_v28 = vrot.slane %v2448_v44, 4  ;;  %v2465_v9 = vrot.slane %v2447_v42, 4  ;;  %v2466_v61 = vrot.slane %v2449_v63, 4 }
 0x20e   : > { %v2286_v40 = vadd.f32 %v2285_v12, %v2284_v53  ;;  %v2436_v51 = vrot.slane %v2435_v31, 4  ;;  %v7831_v57 = vrot.slane %v2450_v59, 4  ;;  %v2470_v41 = vrot.slane %v2451_v32, 4  ;;  %v5097_v53 = vld [vmem:[%s6099_s10 + $0x560] sm:$0xff] }
 0x20f   : > { %v2347_v47 = vrot.slane %v2346_v46, 1  ;;  %v2467_v21 = vsel %vm282_vm0, %v2465_v9, %v2466_v61  ;;  %v7837_v30 = vrot.slane %v2452_v11, 4  ;;  %v2474_v29 = vrot.slane %v2453_v7, 4  ;;  %v7869_v9 = vld [vmem:[%s6099_s10 + $0x570] sm:$0xff] }
 0x210   : > { %v2401_v55 = vsel %vm691_vm5, %v2399_v8, %v2286_v40  ;;  %v2437_v19 = vadd.f32 %v2436_v51, %v2435_v31  ;;  %v2509_v10 = vunpack.c.h.bf16 %v7828_v35  ;;  %v2471_v26 = vsel %vm282_vm0, %v2466_v61, %v2470_v41 }
 0x211   : > { %v2348_v6 = vadd.f32 %v2347_v47, %v2346_v46  ;;  %v2475_v34 = vsel %vm282_vm0, %v2470_v41, %v2474_v29  ;;  %v2496_v37 = vsel %vm282_vm0, %v2474_v29, 0.0  ;;  %v2494_v45 = vadd.f32 %v2471_v26, %v2467_v21 }
 0x212   : > { %v2438_v3 = vrot.slane %v2437_v19, 2  ;;  %v2511_v48 = vunpack.c.h.bf16 %v7834_v22  ;;  %v2513_v5 = vunpack.c.h.bf16 %v7840_v50  ;;  %v2515_v43 = vunpack.c.h.bf16 %v7843_v38 }
 0x213   : > { %v2403_v24 = vsel %vm694_vm6, %v2401_v55, %v2348_v6  ;;  %v2495_v1 = vadd.f32 %v2494_v45, %v2475_v34  ;;  %v2540_v27 = vunpack.c.l.bf16 %v5095_v17  ;;  %v2541_v2 = vunpack.c.h.bf16 %v5095_v17 }
 0x214   : > { %4343 = vmatmul.mubr.f32.vlgmr.msra.gmra.mrb[8].mxu0 %v2403_v24  ;;  %v2439_v33 = vadd.f32 %v2438_v3, %v2437_v19  ;;  %v2526_v15 = vadd.f32 %v2511_v48, %v2509_v10  ;;  %v2528_v52 = vsel %vm282_vm0, %v2515_v43, 0.0  ;;  %v2542_v42 = vunpack.c.l.bf16 %v5096_v39  ;;  %v7876_v19 = vld [vmem:[%s6099_s10 + $0x578] sm:$0xff]  ;;  %v7879_v10 = vld [vmem:[%s6099_s10 + $0x580] sm:$0xff] }
 0x215   : > { %v2543_v44 = vunpack.c.h.bf16 %v5096_v39  ;;  %v2497_v54 = vadd.f32 %v2496_v37, %v2495_v1  ;;  %v2544_v63 = vunpack.c.l.bf16 %v5097_v53  ;;  %v2545_v8 = vunpack.c.h.bf16 %v5097_v53  ;;  %v7887_v39 = vld [vmem:[%s6099_s10 + $0x588] sm:$0x33]  ;;  %v5113_v1 = vld [vmem:[%s6099_s10 + $0x5d0] sm:$0xff] }
 0x216   : > { %v2440_v12 = vrot.slane %v2439_v33, 1  ;;  %v2527_v16 = vadd.f32 %v2526_v15, %v2513_v5  ;;  %v2546_v59 = vunpack.c.l.bf16 %v5098_v4  ;;  %v2547_v32 = vunpack.c.h.bf16 %v5098_v4  ;;  %v5103_v5 = vld [vmem:[%s6099_s10 + $0x588] sm:$0xcc] }
 0x217   : > { %v7862_v11 = vrot.slane %v2540_v27, 4  ;;  %v2498_v46 = vrot.slane %v2497_v54, 4  ;;  %v7866_v7 = vrot.slane %v2542_v42, 4  ;;  %v2559_v61 = vrot.slane %v2541_v2, 4  ;;  %v5104_v2 = vld [vmem:[%s6099_s10 + $0x590] sm:$0xff] }
 0x218   : > { %v7864_v40 = vadd.f32 %v2440_v12, %v2439_v33  ;;  %v2529_v31 = vadd.f32 %v2528_v52, %v2527_v16  ;;  %v2560_v47 = vrot.slane %v2543_v44, 4  ;;  %v7871_v55 = vrot.slane %v2544_v63, 4 }
 0x219   : > { %v2564_v51 = vrot.slane %v2545_v8, 4  ;;  %v2499_v21 = vadd.f32 %v2498_v46, %v2497_v54  ;;  %v7873_v29 = vrot.slane %v2546_v59, 4  ;;  %v2568_v6 = vrot.slane %v2547_v32, 4  ;;  %v5105_v54 = vld [vmem:[%s6099_s10 + $0x598] sm:$0xff]  ;;  %v5106_v32 = vld [vmem:[%s6099_s10 + $0x5a0] sm:$0xff] }
 0x21a   : > { %v2530_v41 = vrot.slane %v2529_v31, 4  ;;  %v2561_v26 = vsel %vm282_vm0, %v2559_v61, %v2560_v47  ;;  %v2603_v17 = vunpack.c.h.bf16 %v7869_v9  ;;  %v2605_v33 = vunpack.c.h.bf16 %v7876_v19 }
 0x21b   : > { %v2565_v34 = vsel %vm282_vm0, %v2560_v47, %v2564_v51  ;;  %v2500_v24 = vrot.slane %v2499_v21, 2  ;;  %v2569_v45 = vsel %vm282_vm0, %v2564_v51, %v2568_v6  ;;  %v2590_v43 = vsel %vm282_vm0, %v2568_v6, 0.0 }
 0x21c   : > { %v2531_v3 = vadd.f32 %v2530_v41, %v2529_v31  ;;  %v2588_v48 = vadd.f32 %v2565_v34, %v2561_v26  ;;  %v2607_v52 = vunpack.c.h.bf16 %v7879_v10  ;;  %v2609_v44 = vunpack.c.h.bf16 %v7887_v39 }
 0x21d   : > { %v2501_v15 = vadd.f32 %v2500_v24, %v2499_v21  ;;  %v2620_v12 = vadd.f32 %v2605_v33, %v2603_v17  ;;  %v2634_v16 = vunpack.c.l.bf16 %v5103_v5  ;;  %v2635_v46 = vunpack.c.h.bf16 %v5103_v5  ;;  %v7910_v33 = vld [vmem:[%s6099_s10 + $0x5a8] sm:$0xff] }
 0x21e   : > { %v2532_v4 = vrot.slane %v2531_v3, 2  ;;  %v2589_v27 = vadd.f32 %v2588_v48, %v2569_v45  ;;  %v2622_v61 = vsel %vm282_vm0, %v2609_v44, 0.0  ;;  %v2636_v47 = vunpack.c.l.bf16 %v5104_v2 }
 0x21f   : > { %v2502_v63 = vrot.slane %v2501_v15, 1  ;;  %v2621_v31 = vadd.f32 %v2620_v12, %v2607_v52  ;;  %v2637_v51 = vunpack.c.h.bf16 %v5104_v2  ;;  %v2638_v26 = vunpack.c.l.bf16 %v5105_v54 }
 0x220   : > { %v2533_v8 = vadd.f32 %v2532_v4, %v2531_v3  ;;  %v2591_v59 = vadd.f32 %v2590_v43, %v2589_v27  ;;  %v2639_v17 = vunpack.c.h.bf16 %v5105_v54  ;;  %v2640_v24 = vunpack.c.l.bf16 %v5106_v32 }
 0x221   : > { %v7901_v21 = vadd.f32 %v2502_v63, %v2501_v15  ;;  %v2623_v34 = vadd.f32 %v2622_v61, %v2621_v31  ;;  %v2641_v45 = vunpack.c.h.bf16 %v5106_v32  ;;  %v7905_v5 = vrot.slane %v2634_v16, 4  ;;  %v7917_v63 = vld [vmem:[%s6099_s10 + $0x5b0] sm:$0xff]  ;;  %v7924_v32 = vld [vmem:[%s6099_s10 + $0x5c0] sm:$0x33] }
 0x222   : > { %v2534_v41 = vrot.slane %v2533_v8, 1  ;;  %v2592_v6 = vrot.slane %v2591_v59, 4  ;;  %v7907_v43 = vrot.slane %v2636_v47, 4  ;;  %v2653_v4 = vrot.slane %v2635_v46, 4 }
 0x223   : > { %v2624_v15 = vrot.slane %v2623_v34, 4  ;;  %v2654_v27 = vrot.slane %v2637_v51, 4  ;;  %v7912_v52 = vrot.slane %v2638_v26, 4  ;;  %v2658_v44 = vrot.slane %v2639_v17, 4 }
 0x224   : > { %v7903_v3 = vadd.f32 %v2534_v41, %v2533_v8  ;;  %v2593_v48 = vadd.f32 %v2592_v6, %v2591_v59  ;;  %v7914_v12 = vrot.slane %v2640_v24, 4  ;;  %v2662_v54 = vrot.slane %v2641_v45, 4  ;;  %v7921_v59 = vld [vmem:[%s6099_s10 + $0x5b8] sm:$0xff]  ;;  %v5111_v24 = vld [vmem:[%s6099_s10 + $0x5c0] sm:$0xcc]  ;;  %v5112_v45 = vld [vmem:[%s6099_s10 + $0x5c8] sm:$0xff] }
 0x225   : > { %v2625_v16 = vadd.f32 %v2624_v15, %v2623_v34  ;;  %v2655_v8 = vsel %vm282_vm0, %v2653_v4, %v2654_v27  ;;  %v2697_v31 = vunpack.c.h.bf16 %v7910_v33  ;;  %v2659_v47 = vsel %vm282_vm0, %v2654_v27, %v2658_v44 }
 0x226   : > { %v2594_v2 = vrot.slane %v2593_v48, 2  ;;  %v2663_v51 = vsel %vm282_vm0, %v2658_v44, %v2662_v54  ;;  %v2684_v41 = vsel %vm282_vm0, %v2662_v54, 0.0  ;;  %v2682_v26 = vadd.f32 %v2659_v47, %v2655_v8  ;;  %v5114_v8 = vld [vmem:[%s6099_s10 + $0x5d8] sm:$0xff] }
 0x227   : > { %v2626_v6 = vrot.slane %v2625_v16, 2  ;;  %v2699_v17 = vunpack.c.h.bf16 %v7917_v63  ;;  %v2703_v54 = vunpack.c.h.bf16 %v7924_v32  ;;  %v2728_v34 = vunpack.c.l.bf16 %v5111_v24 }
 0x228   : > { %v2595_v61 = vadd.f32 %v2594_v2, %v2593_v48  ;;  %v2701_v48 = vunpack.c.h.bf16 %v7921_v59  ;;  %v2683_v44 = vadd.f32 %v2682_v26, %v2663_v51  ;;  %v2729_v42 = vunpack.c.h.bf16 %v5111_v24 }
 0x229   : > { %v2627_v2 = vadd.f32 %v2626_v6, %v2625_v16  ;;  %v2714_v46 = vadd.f32 %v2699_v17, %v2697_v31  ;;  %v2730_v53 = vunpack.c.l.bf16 %v5112_v45  ;;  %v2716_v4 = vsel %vm282_vm0, %v2703_v54, 0.0 }
 0x22a   : > { %v2596_v15 = vrot.slane %v2595_v61, 1  ;;  %v2685_v60 = vadd.f32 %v2684_v41, %v2683_v44  ;;  %v2731_v36 = vunpack.c.h.bf16 %v5112_v45  ;;  %v2732_v0 = vunpack.c.l.bf16 %v5113_v1 }
 0x22b   : > { %v2628_v37 = vrot.slane %v2627_v2, 1  ;;  %v2715_v49 = vadd.f32 %v2714_v46, %v2701_v48  ;;  %v2733_v25 = vunpack.c.h.bf16 %v5113_v1  ;;  %v2734_v27 = vunpack.c.l.bf16 %v5114_v8 }
 0x22c   : > { %v2597_v47 = vadd.f32 %v2596_v15, %v2595_v61  ;;  %v2686_v51 = vrot.slane %v2685_v60, 4  ;;  %v2735_v26 = vunpack.c.h.bf16 %v5114_v8  ;;  %v7942_v31 = vrot.slane %v2728_v34, 4  ;;  %v3915_v34 = vld [vmem:[#allocation5 + $0x608] sm:$0xff] }
 0x22d   : > { %v2629_v16 = vadd.f32 %v2628_v37, %v2627_v2  ;;  %v2717_v6 = vadd.f32 %v2716_v4, %v2715_v49  ;;  %v7944_v17 = vrot.slane %v2730_v53, 4  ;;  %v2747_v61 = vrot.slane %v2729_v42, 4  ;;  %v3914_v37 = vld [vmem:[#allocation5 + $0x600] sm:$0xff] }
 0x22e   : > { %v2748_v24 = vrot.slane %v2731_v36, 4  ;;  %v2687_v15 = vadd.f32 %v2686_v51, %v2685_v60  ;;  %v7946_v41 = vrot.slane %v2732_v0, 4  ;;  %v2752_v46 = vrot.slane %v2733_v25, 4  ;;  %v3962_v60 = vld [vmem:[#allocation5 + $0x780] sm:$0xff]  ;;  %v3963_v25 = vld [vmem:[#allocation5 + $0x788] sm:$0xff] }
 0x22f   : > { %v2718_v13 = vrot.slane %v2717_v6, 4  ;;  %v7949_v48 = vrot.slane %v2734_v27, 4  ;;  %v2756_v1 = vrot.slane %v2735_v26, 4  ;;  %v2819_v49 = vsel %vm677_vm1, %v7864_v40, %v7901_v21 }
 0x230   : > { %v2749_v45 = vsel %vm282_vm0, %v2747_v61, %v2748_v24  ;;  %v2688_v53 = vrot.slane %v2687_v15, 2  ;;  %v2753_v36 = vsel %vm282_vm0, %v2748_v24, %v2752_v46  ;;  %v2821_v0 = vsel %vm680_vm2, %v2819_v49, %v7903_v3 }
 0x231   : > { %v2719_v4 = vadd.f32 %v2718_v13, %v2717_v6  ;;  %v2757_v42 = vsel %vm282_vm0, %v2752_v46, %v2756_v1  ;;  %v2776_v27 = vadd.f32 %v2753_v36, %v2749_v45  ;;  %v2778_v2 = vsel %vm282_vm0, %v2756_v1, 0.0 }
 0x232   : > { %v2823_v44 = vsel %vm683_vm3, %v2821_v0, %v2597_v47  ;;  %v2689_v54 = vadd.f32 %v2688_v53, %v2687_v15  ;;  %v5694_v8 = vpack.c.bf16 %v3915_v34, %v3914_v37  ;;  %v5724_v51 = vpack.c.bf16 %v3963_v25, %v3962_v60 }
 0x233   : > { %v2720_v40 = vrot.slane %v2719_v4, 2  ;;  %v2825_v21 = vsel %vm282_vm0, %v2823_v44, %v2629_v16  ;;  %v2777_v13 = vadd.f32 %v2776_v27, %v2757_v42  ;;  %v2422_v3 = vadd.f32 %v2416_v56, %v2414_v14 }
 0x234   : > { %v9119_v6 = vunpack.c.l.bf16 %v7806_v58  ;;  %v2690_v61 = vrot.slane %v2689_v54, 1  ;;  %5695 = vmatpush3.bf16.msra.mxu0 %v5694_v8  ;;  %v2464_v47 = vsel %vm282_vm0, %v7823_v18, %v7825_v28  ;;  %v2469_v16 = vsel %vm282_vm0, %v7825_v28, %v7831_v57  ;;  %5725 = vmatprep.subr.bf16.mxu1 %v5724_v51 }
 0x235   : > { %v2721_v24 = vadd.f32 %v2720_v40, %v2719_v4  ;;  %v2779_v15 = vadd.f32 %v2778_v2, %v2777_v13  ;;  %v9120_v23 = vunpack.c.l.bf16 %v7802_v62  ;;  %v2473_v14 = vsel %vm282_vm0, %v7831_v57, %v7837_v30 }
 0x236   : > { %v2424_v26 = vsel %vm282_vm0, %v9119_v6, 0.0  ;;  %v2484_v58 = vadd.f32 %v2469_v16, %v2464_v47  ;;  %v2691_v56 = vadd.f32 %v2690_v61, %v2689_v54  ;;  %v2486_v45 = vsel %vm282_vm0, %v7837_v30, 0.0 }
 0x237   : > { %v2423_v20 = vadd.f32 %v2422_v3, %v9120_v23  ;;  %v2722_v46 = vrot.slane %v2721_v24, 1  ;;  %v9121_v18 = vunpack.c.l.bf16 %v7828_v35  ;;  %v9122_v1 = vunpack.c.l.bf16 %v7834_v22 }
 0x238   : > { %v2780_v49 = vrot.slane %v2779_v15, 4  ;;  %v2485_v34 = vadd.f32 %v2484_v58, %v2473_v14  ;;  %v9123_v62 = vunpack.c.l.bf16 %v7843_v38  ;;  %v2827_v57 = vsel %vm688_vm4, %v2825_v21, %v2691_v56 }
 0x239   : > { %v2516_v28 = vadd.f32 %v9122_v1, %v9121_v18  ;;  %v2425_v37 = vadd.f32 %v2424_v26, %v2423_v20  ;;  %v2723_v4 = vadd.f32 %v2722_v46, %v2721_v24  ;;  %v9124_v36 = vunpack.c.l.bf16 %v7840_v50 }
 0x23a   : > { %v2518_v53 = vsel %vm282_vm0, %v9123_v62, 0.0  ;;  %v2558_v35 = vsel %vm282_vm0, %v7862_v11, %v7866_v7  ;;  %v2781_v30 = vadd.f32 %v2780_v49, %v2779_v15  ;;  %v2487_v60 = vadd.f32 %v2486_v45, %v2485_v34 }
 0x23b   : > { %v2517_v0 = vadd.f32 %v2516_v28, %v9124_v36  ;;  %v2426_v22 = vrot.slane %v2425_v37, 4  ;;  %v2563_v25 = vsel %vm282_vm0, %v7866_v7, %v7871_v55  ;;  %v2829_v38 = vsel %vm691_vm5, %v2827_v57, %v2723_v4 }
 0x23c   : > { %v2567_v27 = vsel %vm282_vm0, %v7871_v55, %v7873_v29  ;;  %v2578_v50 = vadd.f32 %v2563_v25, %v2558_v35  ;;  %v2782_v2 = vrot.slane %v2781_v30, 2  ;;  %v2488_v54 = vrot.slane %v2487_v60, 4 }
 0x23d   : > { %v2519_v42 = vadd.f32 %v2518_v53, %v2517_v0  ;;  %v2427_v44 = vadd.f32 %v2426_v22, %v2425_v37  ;;  %v2580_v11 = vsel %vm282_vm0, %v7873_v29, 0.0  ;;  %v9125_v8 = vunpack.c.l.bf16 %v7869_v9 }
 0x23e   : > { %v2579_v21 = vadd.f32 %v2578_v50, %v2567_v27  ;;  %v9126_v7 = vunpack.c.l.bf16 %v7876_v19  ;;  %v9127_v51 = vunpack.c.l.bf16 %v7887_v39  ;;  %v2783_v6 = vadd.f32 %v2782_v2, %v2781_v30  ;;  %v8036_v27 = vld [vmem:[#allocation5 + $0x700] sm:$0xff]  ;;  %v8038_v50 = vld [vmem:[#allocation5 + $0x708] sm:$0xff] }
 0x23f   : > { %v2520_v40 = vrot.slane %v2519_v42, 4  ;;  %v2428_v55 = vrot.slane %v2427_v44, 2  ;;  %v2489_v26 = vadd.f32 %v2488_v54, %v2487_v60  ;;  %v2652_v61 = vsel %vm282_vm0, %v7905_v5, %v7907_v43 }
 0x240   : > { %v2610_v13 = vadd.f32 %v9126_v7, %v9125_v8  ;;  %v2612_v3 = vsel %vm282_vm0, %v9127_v51, 0.0  ;;  %v2581_v29 = vadd.f32 %v2580_v11, %v2579_v21  ;;  %v9128_v47 = vunpack.c.l.bf16 %v7879_v10  ;;  %v5080_v8 = vld [vmem:[%s6099_s10 + $0x4e8] sm:$0xff]  ;;  %v5081_v7 = vld [vmem:[%s6099_s10 + $0x4f0] sm:$0xff] }
 0x241   : > { %v2521_v24 = vadd.f32 %v2520_v40, %v2519_v42  ;;  %v2657_v9 = vsel %vm282_vm0, %v7907_v43, %v7912_v52  ;;  %v2784_v19 = vrot.slane %v2783_v6, 1  ;;  %v2429_v39 = vadd.f32 %v2428_v55, %v2427_v44 }
 0x242   : > { %v2611_v16 = vadd.f32 %v2610_v13, %v9128_v47  ;;  %v2490_v15 = vrot.slane %v2489_v26, 2  ;;  %v2661_v23 = vsel %vm282_vm0, %v7912_v52, %v7914_v12  ;;  %v2582_v14 = vrot.slane %v2581_v29, 4 }
 0x243   : > { %v2522_v20 = vrot.slane %v2521_v24, 2  ;;  %v2672_v5 = vadd.f32 %v2657_v9, %v2652_v61  ;;  %v2785_v56 = vadd.f32 %v2784_v19, %v2783_v6  ;;  %v2430_v46 = vrot.slane %v2429_v39, 1  ;;  %v5082_v61 = vld [vmem:[%s6099_s10 + $0x4f8] sm:$0x33] }
 0x244   : > { %v2613_v58 = vadd.f32 %v2612_v3, %v2611_v16  ;;  %v2491_v45 = vadd.f32 %v2490_v15, %v2489_v26  ;;  %v2674_v10 = vsel %vm282_vm0, %v7914_v12, 0.0  ;;  %v2583_v1 = vadd.f32 %v2582_v14, %v2581_v29 }
 0x245   : > { %v2523_v18 = vadd.f32 %v2522_v20, %v2521_v24  ;;  %v2673_v28 = vadd.f32 %v2672_v5, %v2661_v23  ;;  %v2831_v49 = vsel %vm694_vm6, %v2829_v38, %v2785_v56  ;;  %v2431_v37 = vadd.f32 %v2430_v46, %v2429_v39 }
 0x246   : > { %v2614_v43 = vrot.slane %v2613_v58, 4  ;;  %v2492_v34 = vrot.slane %v2491_v45, 1  ;;  %v9129_v52 = vunpack.c.l.bf16 %v7910_v33  ;;  %v9130_v62 = vunpack.c.l.bf16 %v7917_v63  ;;  %4417 = vmatprep.mubr.f32.mxu1 %v2831_v49 }
 0x247   : > { %v2524_v4 = vrot.slane %v2523_v18, 1  ;;  %v2584_v57 = vrot.slane %v2583_v1, 2  ;;  %v2675_v0 = vadd.f32 %v2674_v10, %v2673_v28  ;;  %v9131_v35 = vunpack.c.l.bf16 %v7921_v59  ;;  %v5079_v59 = vld [vmem:[%s6099_s10 + $0x4e0] sm:$0xff]  ;;  %v3933_v10 = vld [vmem:[#allocation5 + $0x698] sm:$0xff] }
 0x248   : > { %v2704_v53 = vadd.f32 %v9130_v62, %v9129_v52  ;;  %v2615_v36 = vadd.f32 %v2614_v43, %v2613_v58  ;;  %v2493_v12 = vadd.f32 %v2492_v34, %v2491_v45  ;;  %v9132_v22 = vunpack.c.l.bf16 %v7924_v32  ;;  %v3932_v45 = vld [vmem:[#allocation5 + $0x690] sm:$0xff] }
 0x249   : > { %v2746_v33 = vsel %vm282_vm0, %v7942_v31, %v7944_v17  ;;  %v2525_v63 = vadd.f32 %v2524_v4, %v2523_v18  ;;  %v2585_v25 = vadd.f32 %v2584_v57, %v2583_v1  ;;  %v2676_v42 = vrot.slane %v2675_v0, 4  ;;  %v8059_v18 = vld [vmem:[%s6099_s10 + $0x5e0] sm:$0xff]  ;;  %v8064_v4 = vld [vmem:[%s6099_s10 + $0x5f0] sm:$0xff] }
 0x24a   : > { %v2705_v30 = vadd.f32 %v2704_v53, %v9131_v35  ;;  %v2706_v60 = vsel %vm282_vm0, %v9132_v22, 0.0  ;;  %v2616_v38 = vrot.slane %v2615_v36, 2  ;;  %v2751_v32 = vsel %vm282_vm0, %v7944_v17, %v7946_v41  ;;  %v5116_v53 = vld [vmem:[%s6099_s10 + $0x5e8] sm:$0xff]  ;;  %v3917_v22 = vld [vmem:[#allocation5 + $0x618] sm:$0xff] }
 0x24b   : > { %v2755_v31 = vsel %vm282_vm0, %v7946_v41, %v7949_v48  ;;  %v2768_v44 = vsel %vm282_vm0, %v7949_v48, 0.0  ;;  %v2586_v54 = vrot.slane %v2585_v25, 1  ;;  %v2677_v40 = vadd.f32 %v2676_v42, %v2675_v0  ;;  %v8074_v42 = vld [vmem:[#allocation5 + $0x798] sm:$0xff] }
 0x24c   : > { %v2707_v2 = vadd.f32 %v2706_v60, %v2705_v30  ;;  %v2617_v11 = vadd.f32 %v2616_v38, %v2615_v36  ;;  %v2766_v21 = vadd.f32 %v2751_v32, %v2746_v33  ;;  %v2818_v51 = vsel %vm677_vm1, %v2431_v37, %v2493_v12  ;;  %v8067_v12 = vld [vmem:[%s6099_s10 + $0x5f8] sm:$0x33]  ;;  %v3916_v30 = vld [vmem:[#allocation5 + $0x610] sm:$0xff] }
 0x24d   : > { %v5726_v17 = vpack.c.bf16 %v8038_v50, %v8036_v27  ;;  %v2364_v3 = vunpack.c.h.bf16 %v5079_v59  ;;  %v2587_v6 = vadd.f32 %v2586_v54, %v2585_v25  ;;  %v2678_v41 = vrot.slane %v2677_v40, 2  ;;  %v8072_v38 = vld [vmem:[#allocation5 + $0x790] sm:$0xff] }
 0x24e   : > { %v2708_v13 = vrot.slane %v2707_v2, 4  ;;  %v2618_v55 = vrot.slane %v2617_v11, 1  ;;  %v2767_v26 = vadd.f32 %v2766_v21, %v2755_v31  ;;  %v2820_v48 = vsel %vm680_vm2, %v2818_v51, %v2525_v63  ;;  %v8078_v21 = vld [vmem:[#allocation5 + $0x710] sm:$0xff] }
 0x24f   : > { %v2366_v29 = vunpack.c.h.bf16 %v5080_v8  ;;  %v2368_v47 = vunpack.c.h.bf16 %v5081_v7  ;;  %v2679_v9 = vadd.f32 %v2678_v41, %v2677_v40  ;;  %v2822_v39 = vsel %vm683_vm3, %v2820_v48, %v2587_v6  ;;  %v3934_v6 = vld [vmem:[#allocation5 + $0x6a0] sm:$0xff] }
 0x250   : > { %v2709_v24 = vadd.f32 %v2708_v13, %v2707_v2  ;;  %v2619_v16 = vadd.f32 %v2618_v55, %v2617_v11  ;;  %v2769_v19 = vadd.f32 %v2768_v44, %v2767_v26  ;;  %v2370_v23 = vunpack.c.h.bf16 %v5082_v61  ;;  %v3935_v55 = vld [vmem:[#allocation5 + $0x6a8] sm:$0xff]  ;;  %v3918_v41 = vld [vmem:[#allocation5 + $0x620] sm:$0xff] }
 0x251   : > { %v2381_v20 = vadd.f32 %v2366_v29, %v2364_v3  ;;  %v2363_v14 = vunpack.c.l.bf16 %v5079_v59  ;;  %v2680_v58 = vrot.slane %v2679_v9, 1  ;;  %v2365_v46 = vunpack.c.l.bf16 %v5080_v8  ;;  %v8080_v8 = vld [vmem:[#allocation5 + $0x718] sm:$0xff]  ;;  %v3919_v29 = vld [vmem:[#allocation5 + $0x628] sm:$0xff] }
 0x252   : > { %v2710_v15 = vrot.slane %v2709_v24, 2  ;;  %v2770_v5 = vrot.slane %v2769_v19, 4  ;;  %v2824_v56 = vsel %vm282_vm0, %v2822_v39, %v2619_v16  ;;  %v2383_v28 = vsel %vm282_vm0, %v2370_v23, 0.0  ;;  %v8089_v16 = vld [vmem:[#allocation5 + $0x7a8] sm:$0xff]  ;;  %v8092_v23 = vld [vmem:[#allocation5 + $0x720] sm:$0xff] }
 0x253   : > { %v2382_v43 = vadd.f32 %v2381_v20, %v2368_v47  ;;  %v2367_v49 = vunpack.c.l.bf16 %v5081_v7  ;;  %v2681_v37 = vadd.f32 %v2680_v58, %v2679_v9  ;;  %v2369_v52 = vunpack.c.l.bf16 %v5082_v61  ;;  %v8087_v47 = vld [vmem:[#allocation5 + $0x7a0] sm:$0xff]  ;;  %v8094_v20 = vld [vmem:[#allocation5 + $0x728] sm:$0xff] }
 0x254   : > { %v2711_v1 = vadd.f32 %v2710_v15, %v2709_v24  ;;  %v2771_v34 = vadd.f32 %v2770_v5, %v2769_v19  ;;  %v2371_v62 = vadd.f32 %v2365_v46, %v2363_v14  ;;  %v5696_v0 = vpack.c.bf16 %v3933_v10, %v3932_v45  ;;  %v3936_v14 = vld [vmem:[#allocation5 + $0x6b0] sm:$0xff]  ;;  %v8097_v58 = vld [vmem:[%s6099_s10 + $0x600] sm:$0xff]  ;;  %v3937_v10 = vld [vmem:[#allocation5 + $0x6b8] sm:$0xff] }
 0x255   : > { %v2384_v36 = vadd.f32 %v2383_v28, %v2382_v43  ;;  %v2791_v35 = vunpack.c.h.bf16 %v8059_v18  ;;  %v2826_v33 = vsel %vm688_vm4, %v2824_v56, %v2681_v37  ;;  %v2373_v25 = vsel %vm282_vm0, %v2369_v52, 0.0  ;;  %v8108_v52 = vld [vmem:[#allocation5 + $0x7b8] sm:$0xff] }
 0x256   : > { %v2712_v57 = vrot.slane %v2711_v1, 1  ;;  %v2772_v60 = vrot.slane %v2771_v34, 2  ;;  %v2372_v63 = vadd.f32 %v2371_v62, %v2367_v49  ;;  %5697 = vmatprep.subr.bf16.mxu0 %v5696_v0  ;;  %v2793_v32 = vunpack.c.h.bf16 %v5116_v53  ;;  %v8110_v62 = vld [vmem:[#allocation5 + $0x730] sm:$0xff] }
 0x257   : > { %v2385_v2 = vrot.slane %v2384_v36, 4  ;;  %v2795_v31 = vunpack.c.h.bf16 %v8064_v4  ;;  %v2797_v11 = vunpack.c.h.bf16 %v8067_v12  ;;  %v5698_v40 = vpack.c.bf16 %v3917_v22, %v3916_v30  ;;  %v8120_v30 = vld [vmem:[#allocation5 + $0x640] sm:$0xff]  ;;  %v8122_v22 = vld [vmem:[#allocation5 + $0x648] sm:$0xff] }
 0x258   : > { %v2713_v59 = vadd.f32 %v2712_v57, %v2711_v1  ;;  %v2773_v44 = vadd.f32 %v2772_v60, %v2771_v34  ;;  %v2374_v54 = vadd.f32 %v2373_v25, %v2372_v63  ;;  %v2808_v51 = vadd.f32 %v2793_v32, %v2791_v35  ;;  %v8104_v1 = vld [vmem:[#allocation5 + $0x638] sm:$0xff]  ;;  %v8106_v34 = vld [vmem:[#allocation5 + $0x7b0] sm:$0xff]  ;;  %v8116_v57 = vld [vmem:[#allocation5 + $0x6c8] sm:$0xff] }
 0x259   : > { %v2386_v13 = vadd.f32 %v2385_v2, %v2384_v36  ;;  %v5728_v3 = vpack.c.bf16 %v8074_v42, %v8072_v38  ;;  %v2810_v24 = vsel %vm282_vm0, %v2797_v11, 0.0  ;;  %5699 = vmatpush3.bf16.msra.mxu0 %v5698_v40  ;;  %v2790_v48 = vunpack.c.l.bf16 %v8059_v18  ;;  %v8102_v18 = vld [vmem:[#allocation5 + $0x630] sm:$0xff]  ;;  %v8124_v60 = vld [vmem:[#allocation5 + $0x7c0] sm:$0xff] }
 0x25a   : > { %v2828_v7 = vsel %vm691_vm5, %v2826_v33, %v2713_v59  ;;  %v2774_v26 = vrot.slane %v2773_v44, 1  ;;  %v2375_v61 = vrot.slane %v2374_v54, 4  ;;  %v2809_v19 = vadd.f32 %v2808_v51, %v2795_v31  ;;  %v8126_v33 = vld [vmem:[#allocation5 + $0x7c8] sm:$0xff]  ;;  %v8130_v32 = vld [vmem:[#allocation5 + $0x740] sm:$0xff]  ;;  %v8145_v51 = vld [vmem:[#allocation5 + $0x658] sm:$0xff] }
 0x25b   : > { %v2387_v9 = vrot.slane %v2386_v13, 2  ;;  %v2792_v39 = vunpack.c.l.bf16 %v5116_v53  ;;  %v2794_v15 = vunpack.c.l.bf16 %v8064_v4  ;;  %v2796_v46 = vunpack.c.l.bf16 %v8067_v12  ;;  %v8112_v53 = vld [vmem:[#allocation5 + $0x738] sm:$0xff]  ;;  %v8114_v4 = vld [vmem:[#allocation5 + $0x6c0] sm:$0xff]  ;;  %v8132_v31 = vld [vmem:[#allocation5 + $0x748] sm:$0xff] }
 0x25c   : > { %v2775_v5 = vadd.f32 %v2774_v26, %v2773_v44  ;;  %v2376_v56 = vadd.f32 %v2375_v61, %v2374_v54  ;;  %v5730_v45 = vpack.c.bf16 %v8080_v8, %v8078_v21  ;;  %v2811_v28 = vadd.f32 %v2810_v24, %v2809_v19  ;;  %v8134_v44 = vld [vmem:[#allocation5 + $0x6d0] sm:$0xff]  ;;  %v8158_v61 = vld [vmem:[#allocation5 + $0x7d8] sm:$0xff]  ;;  %v8176_v19 = vld [vmem:[#allocation5 + $0x668] sm:$0xff] }
 0x25d   : > { %v2388_v43 = vadd.f32 %v2387_v9, %v2386_v13  ;;  %v2798_v49 = vadd.f32 %v2792_v39, %v2790_v48  ;;  %v5700_v37 = vpack.c.bf16 %v3935_v55, %v3934_v6  ;;  %v2800_v12 = vsel %vm282_vm0, %v2796_v46, 0.0  ;;  %v8143_v13 = vld [vmem:[#allocation5 + $0x650] sm:$0xff]  ;;  %v8148_v6 = vld [vmem:[%s6099_s10 + $0x608] sm:$0xff]  ;;  %v8162_v48 = vld [vmem:[#allocation5 + $0x758] sm:$0xff] }
 0x25e   : > { %v2830_v36 = vsel %vm694_vm6, %v2828_v7, %v2775_v5  ;;  %v2377_v0 = vrot.slane %v2376_v56, 2  ;;  %v5702_v35 = vpack.c.bf16 %v3919_v29, %v3918_v41  ;;  %v2812_v25 = vrot.slane %v2811_v28, 4  ;;  %v8141_v7 = vld [vmem:[#allocation5 + $0x6d8] sm:$0xff]  ;;  %v8160_v24 = vld [vmem:[#allocation5 + $0x750] sm:$0xff]  ;;  %v8164_v29 = vld [vmem:[#allocation5 + $0x6e0] sm:$0xff] }
 0x25f   : > { %4418 = vmatmul.mubr.f32.vlgmr.msra.gmra.mrb[8].mxu1 %v2830_v36  ;;  %v2389_v63 = vrot.slane %v2388_v43, 1  ;;  %v2799_v59 = vadd.f32 %v2798_v49, %v2794_v15  ;;  %5701 = vmatprep.subr.bf16.mxu0 %v5700_v37  ;;  %v5732_v2 = vpack.c.bf16 %v8089_v16, %v8087_v47  ;;  %v5734_v11 = vpack.c.bf16 %v8094_v20, %v8092_v23  ;;  %v8166_v47 = vld [vmem:[#allocation5 + $0x6e8] sm:$0xff]  ;;  %v8174_v9 = vld [vmem:[#allocation5 + $0x660] sm:$0xff]  ;;  %v8197_v49 = vld [vmem:[#allocation5 + $0x6f0] sm:$0xff] }
 0x260   : > { %5727 = vmatpush3.bf16.msra.mxu1 %v5726_v17  ;;  %v2378_v54 = vadd.f32 %v2377_v0, %v2376_v56  ;;  %5703 = vmatpush3.bf16.msra.mxu0 %v5702_v35  ;;  %v5704_v40 = vpack.c.bf16 %v3937_v10, %v3936_v14  ;;  %v2841_v55 = vunpack.c.l.bf16 %v8097_v58  ;;  %v2813_v26 = vadd.f32 %v2812_v25, %v2811_v28  ;;  %v8156_v17 = vld [vmem:[#allocation5 + $0x7d0] sm:$0xff]  ;;  %v8178_v39 = vld [vmem:[#allocation5 + $0x7e0] sm:$0xff]  ;;  %v8184_v46 = vld [vmem:[#allocation5 + $0x7e8] sm:$0xff] }
 0x261   : > { %v2390_v41 = vadd.f32 %v2389_v63, %v2388_v43  ;;  %5729 = vmatprep.subr.bf16.mxu1 %v5728_v3  ;;  %v2801_v27 = vadd.f32 %v2800_v12, %v2799_v59  ;;  %v5706_v50 = vpack.c.bf16 %v8104_v1, %v8102_v18  ;;  %v5736_v38 = vpack.c.bf16 %v8108_v52, %v8106_v34  ;;  %v8186_v10 = vld [vmem:[#allocation5 + $0x760] sm:$0xff]  ;;  %v8188_v18 = vld [vmem:[#allocation5 + $0x768] sm:$0xff]  ;;  %v8199_v37 = vld [vmem:[#allocation5 + $0x6f8] sm:$0xff] }
 0x262   : > { %v2379_v16 = vrot.slane %v2378_v54, 1  ;;  %5705 = vmatprep.subr.bf16.mxu0 %v5704_v40  ;;  %v5738_v42 = vpack.c.bf16 %v8112_v53, %v8110_v62  ;;  %v5708_v3 = vpack.c.bf16 %v8116_v57, %v8114_v4  ;;  %v2814_v15 = vrot.slane %v2813_v26, 2  ;;  %v8201_v34 = vld [vmem:[#allocation5 + $0x670] sm:$0xff]  ;;  %v8206_v8 = vld [vmem:[#allocation5 + $0x678] sm:$0xff] }
 0x263   : > { %2408 = vst [vmem:[#allocation2 + $0xc8] sm:$0x1] %v2390_v41  ;;  %v2802_v14 = vrot.slane %v2801_v27, 4  ;;  %v5710_v5 = vpack.c.bf16 %v8122_v22, %v8120_v30  ;;  %v5740_v56 = vpack.c.bf16 %v8126_v33, %v8124_v60  ;;  %v5742_v43 = vpack.c.bf16 %v8132_v31, %v8130_v32  ;;  %v8210_v36 = vld [vmem:[#allocation5 + $0x7f8] sm:$0xff]  ;;  %v8221_v63 = vld [vmem:[#allocation5 + $0x770] sm:$0xff] }
 0x264   : > { %v2380_v1 = vadd.f32 %v2379_v16, %v2378_v54  ;;  %5731 = vmatpush3.bf16.msra.mxu1 %v5730_v45  ;;  %5707 = vmatpush3.bf16.msra.mxu0 %v5706_v50  ;;  %v5712_v28 = vpack.c.bf16 %v8141_v7, %v8134_v44  ;;  %v2842_v52 = vunpack.c.h.bf16 %v8097_v58  ;;  %v2815_v4 = vadd.f32 %v2814_v15, %v2813_v26  ;;  %v8208_v45 = vld [vmem:[#allocation5 + $0x7f0] sm:$0xff]  ;;  %v8223_v25 = vld [vmem:[#allocation5 + $0x778] sm:$0xff]  ;;  %v5124_v50 = vld [vmem:[%s6099_s10 + $0x620] sm:$0xff] }
 0x265   : > { %v2803_v57 = vadd.f32 %v2802_v14, %v2801_v27  ;;  %5733 = vmatprep.subr.bf16.mxu1 %v5732_v2  ;;  %5709 = vmatprep.subr.bf16.mxu0 %v5708_v3  ;;  %v5714_v21 = vpack.c.bf16 %v8145_v51, %v8143_v13  ;;  %v2843_v0 = vunpack.c.l.bf16 %v8148_v6  ;;  %v5744_v12 = vpack.c.bf16 %v8158_v61, %v8156_v17  ;;  %v8226_v59 = vld [vmem:[%s6099_s10 + $0x610] sm:$0xff]  ;;  %v8233_v7 = vld [vmem:[%s6099_s10 + $0x618] sm:$0x33]  ;;  %v5123_v27 = vld [vmem:[%s6099_s10 + $0x618] sm:$0xcc] }
 0x266   : > { %2407 = vst [vmem:[#allocation2 + $0xc0] sm:$0x1] %v2380_v1  ;;  %v5746_v35 = vpack.c.bf16 %v8162_v48, %v8160_v24  ;;  %v5716_v30 = vpack.c.bf16 %v8166_v47, %v8164_v29  ;;  %v5718_v22 = vpack.c.bf16 %v8176_v19, %v8174_v9  ;;  %v2816_v2 = vrot.slane %v2815_v4, 1  ;;  %v5126_v14 = vld [vmem:[%s6099_s10 + $0x630] sm:$0xff]  ;;  %v5132_v61 = vld [vmem:[%s6099_s10 + $0x658] sm:$0xff] }
 0x267   : > { %v2804_v44 = vrot.slane %v2803_v57, 2  ;;  %v5748_v54 = vpack.c.bf16 %v8184_v46, %v8178_v39  ;;  %v5750_v40 = vpack.c.bf16 %v8188_v18, %v8186_v10  ;;  %v5720_v13 = vpack.c.bf16 %v8199_v37, %v8197_v49 }
 0x268   : > { %5735 = vmatpush3.bf16.msra.mxu1 %v5734_v11  ;;  %5711 = vmatpush3.bf16.msra.mxu0 %v5710_v5  ;;  %v5722_v51 = vpack.c.bf16 %v8206_v8, %v8201_v34  ;;  %v5752_v41 = vpack.c.bf16 %v8210_v36, %v8208_v45  ;;  %v2844_v26 = vunpack.c.h.bf16 %v8148_v6  ;;  %v2817_v29 = vadd.f32 %v2816_v2, %v2815_v4  ;;  %v5125_v11 = vld [vmem:[%s6099_s10 + $0x628] sm:$0xff] }
 0x269   : > { %v2805_v47 = vadd.f32 %v2804_v44, %v2803_v57  ;;  %5737 = vmatprep.subr.bf16.mxu1 %v5736_v38  ;;  %5713 = vmatprep.subr.bf16.mxu0 %v5712_v28  ;;  %v5754_v23 = vpack.c.bf16 %v8223_v25, %v8221_v63  ;;  %v2846_v3 = vunpack.c.h.bf16 %v8226_v59  ;;  %v2848_v19 = vunpack.c.h.bf16 %v8233_v7  ;;  %v5139_v63 = vld [vmem:[%s6099_s10 + $0x688] sm:$0xcc] }
 0x26a   : > { %v3715_v16 = vld [vmem:[#allocation2 + $0xc8] sm:$0x1]  ;;  %v2859_v15 = vadd.f32 %v2844_v26, %v2842_v52  ;;  %2835 = vst [vmem:[#allocation2 + $0xd8] sm:$0x1] %v2817_v29  ;;  %v2873_v38 = vunpack.c.l.bf16 %v5123_v27  ;;  %v2874_v1 = vunpack.c.h.bf16 %v5123_v27  ;;  %v2875_v28 = vunpack.c.l.bf16 %v5124_v50  ;;  %v8263_v29 = vld [vmem:[%s6099_s10 + $0x638] sm:$0xff] }
 0x26b   : > { %4347 = vmatprep.mubr.f32.mxu0 %v3715_v16  ;;  %v2806_v5 = vrot.slane %v2805_v47, 1  ;;  %v2861_v37 = vsel %vm282_vm0, %v2848_v19, 0.0  ;;  %v2876_v4 = vunpack.c.h.bf16 %v5124_v50  ;;  %v2877_v57 = vunpack.c.l.bf16 %v5125_v11  ;;  %v8270_v50 = vld [vmem:[%s6099_s10 + $0x640] sm:$0xff]  ;;  %v8280_v16 = vld [vmem:[%s6099_s10 + $0x648] sm:$0xff] }
 0x26c   : > { %5739 = vmatpush3.bf16.msra.mxu1 %v5738_v42  ;;  %5715 = vmatpush3.bf16.msra.mxu0 %v5714_v21  ;;  %v2860_v49 = vadd.f32 %v2859_v15, %v2846_v3  ;;  %v2878_v44 = vunpack.c.h.bf16 %v5125_v11  ;;  %v2879_v26 = vunpack.c.l.bf16 %v5126_v14  ;;  %v2880_v27 = vunpack.c.h.bf16 %v5126_v14  ;;  %v8283_v3 = vld [vmem:[%s6099_s10 + $0x650] sm:$0x33]  ;;  %v5131_v14 = vld [vmem:[%s6099_s10 + $0x650] sm:$0xcc] }
 0x26d   : > { %v3714_v52 = vld [vmem:[#allocation2 + $0xc0] sm:$0x1]  ;;  %v2807_v2 = vadd.f32 %v2806_v5, %v2805_v47  ;;  %5741 = vmatprep.subr.bf16.mxu1 %v5740_v56  ;;  %5717 = vmatprep.subr.bf16.mxu0 %v5716_v30  ;;  %v8265_v53 = vrot.slane %v2873_v38, 4  ;;  %v8267_v42 = vrot.slane %v2875_v28, 4  ;;  %v2892_v21 = vrot.slane %v2874_v1, 4 }
 0x26e   : > { %4348 = vmatmul.mubr.f32.gmra.mrb[10].mxu0 %v3714_v52  ;;  %v2862_v62 = vadd.f32 %v2861_v37, %v2860_v49  ;;  %v2893_v60 = vrot.slane %v2876_v4, 4  ;;  %v8272_v33 = vrot.slane %v2877_v57, 4  ;;  %v2897_v56 = vrot.slane %v2878_v44, 4  ;;  %v5133_v4 = vld [vmem:[%s6099_s10 + $0x660] sm:$0xff]  ;;  %v5134_v44 = vld [vmem:[%s6099_s10 + $0x668] sm:$0xff] }
 0x26f   : > { %2834 = vst [vmem:[#allocation2 + $0xd0] sm:$0x1] %v2807_v2  ;;  %v8274_v30 = vrot.slane %v2879_v26, 4  ;;  %v2901_v11 = vrot.slane %v2880_v27, 4  ;;  %v2936_v15 = vunpack.c.h.bf16 %v8263_v29  ;;  %v2942_v37 = vunpack.c.h.bf16 %v8283_v3 }
 0x270   : > { %5743 = vmatpush3.bf16.msra.mxu1 %v5742_v43  ;;  %5719 = vmatpush3.bf16.msra.mxu0 %v5718_v22  ;;  %v2863_v47 = vrot.slane %v2862_v62, 4  ;;  %v2894_v32 = vsel %vm282_vm0, %v2892_v21, %v2893_v60  ;;  %v2898_v31 = vsel %vm282_vm0, %v2893_v60, %v2897_v56  ;;  %v2938_v22 = vunpack.c.h.bf16 %v8270_v50 }
 0x271   : > { %5745 = vmatprep.subr.bf16.mxu1 %v5744_v12  ;;  %5721 = vmatprep.subr.bf16.mxu0 %v5720_v13  ;;  %v3717_v5 = vld [vmem:[#allocation2 + $0xd8] sm:$0x1]  ;;  %v2902_v1 = vsel %vm282_vm0, %v2897_v56, %v2901_v11  ;;  %v2921_v28 = vadd.f32 %v2898_v31, %v2894_v32  ;;  %v2923_v17 = vsel %vm282_vm0, %v2901_v11, 0.0  ;;  %v2940_v13 = vunpack.c.h.bf16 %v8280_v16  ;;  %v8322_v32 = vld [vmem:[%s6099_s10 + $0x670] sm:$0xff] }
 0x272   : > { %v2864_v38 = vadd.f32 %v2863_v47, %v2862_v62  ;;  %4422 = vmatprep.mubr.f32.mxu1 %v3717_v5  ;;  %v2953_v2 = vadd.f32 %v2938_v22, %v2936_v15  ;;  %v2967_v26 = vunpack.c.l.bf16 %v5131_v14  ;;  %v2955_v27 = vsel %vm282_vm0, %v2942_v37, 0.0 }
 0x273   : > { %v2922_v52 = vadd.f32 %v2921_v28, %v2902_v1  ;;  %v2968_v62 = vunpack.c.h.bf16 %v5131_v14  ;;  %v2969_v21 = vunpack.c.l.bf16 %v5132_v61  ;;  %v2970_v60 = vunpack.c.h.bf16 %v5132_v61  ;;  %v8334_v1 = vld [vmem:[%s6099_s10 + $0x678] sm:$0xff] }
 0x274   : > { %5747 = vmatpush3.bf16.msra.mxu1 %v5746_v35  ;;  %5723 = vmatpush3.bf16.msra.mxu0 %v5722_v51  ;;  %v2865_v57 = vrot.slane %v2864_v38, 2  ;;  %v2954_v34 = vadd.f32 %v2953_v2, %v2940_v13  ;;  %v2971_v8 = vunpack.c.l.bf16 %v5133_v4  ;;  %v2972_v51 = vunpack.c.h.bf16 %v5133_v4  ;;  %v8346_v4 = vld [vmem:[%s6099_s10 + $0x688] sm:$0x33] }
 0x275   : > { %5749 = vmatprep.subr.bf16.mxu1 %v5748_v54  ;;  %v2924_v35 = vadd.f32 %v2923_v17, %v2922_v52  ;;  %v2973_v56 = vunpack.c.l.bf16 %v5134_v44  ;;  %v2974_v47 = vunpack.c.h.bf16 %v5134_v44  ;;  %v8314_v11 = vrot.slane %v2967_v26, 4 }
 0x276   : > { %v3716_v24 = vld [vmem:[#allocation2 + $0xd0] sm:$0x1]  ;;  %v2866_v48 = vadd.f32 %v2865_v57, %v2864_v38  ;;  %v2956_v54 = vadd.f32 %v2955_v27, %v2954_v34  ;;  %v8319_v15 = vrot.slane %v2969_v21, 4  ;;  %v2986_v31 = vrot.slane %v2968_v62, 4 }
 0x277   : > { %4423 = vmatmul.mubr.f32.gmra.mrb[10].mxu1 %v3716_v24  ;;  %v2925_v46 = vrot.slane %v2924_v35, 4  ;;  %v2987_v22 = vrot.slane %v2970_v60, 4  ;;  %v8327_v14 = vrot.slane %v2971_v8, 4  ;;  %v2991_v10 = vrot.slane %v2972_v51, 4  ;;  %v5140_v21 = vld [vmem:[%s6099_s10 + $0x690] sm:$0xff] }
 0x278   : > { %5751 = vmatpush3.bf16.msra.mxu1 %v5750_v40  ;;  %v2867_v39 = vrot.slane %v2866_v48, 1  ;;  %v2957_v5 = vrot.slane %v2956_v54, 4  ;;  %v8331_v38 = vrot.slane %v2973_v56, 4  ;;  %v2995_v36 = vrot.slane %v2974_v47, 4  ;;  %v5141_v56 = vld [vmem:[%s6099_s10 + $0x698] sm:$0xff]  ;;  %v5142_v47 = vld [vmem:[%s6099_s10 + $0x6a0] sm:$0xff] }
 0x279   : > { %5753 = vmatprep.subr.bf16.mxu1 %v5752_v41  ;;  %v2926_v40 = vadd.f32 %v2925_v46, %v2924_v35  ;;  %v2988_v28 = vsel %vm282_vm0, %v2986_v31, %v2987_v22  ;;  %v2992_v45 = vsel %vm282_vm0, %v2987_v22, %v2991_v10  ;;  %v8339_v41 = vld [vmem:[%s6099_s10 + $0x680] sm:$0xff]  ;;  %v3030_v57 = vunpack.c.h.bf16 %v8322_v32 }
 0x27a   : > { %v8329_v18 = vadd.f32 %v2867_v39, %v2866_v48  ;;  %v2958_v13 = vadd.f32 %v2957_v5, %v2956_v54  ;;  %v3015_v37 = vadd.f32 %v2992_v45, %v2988_v28  ;;  %v2996_v52 = vsel %vm282_vm0, %v2991_v10, %v2995_v36 }
 0x27b   : > { %v2927_v61 = vrot.slane %v2926_v40, 2  ;;  %v3017_v2 = vsel %vm282_vm0, %v2995_v36, 0.0  ;;  %v3032_v26 = vunpack.c.h.bf16 %v8334_v1  ;;  %v3034_v60 = vunpack.c.h.bf16 %v8339_v41 }
 0x27c   : > { %5755 = vmatpush3.bf16.msra.mxu1 %v5754_v23  ;;  %v2959_v23 = vrot.slane %v2958_v13, 2  ;;  %v3016_v27 = vadd.f32 %v3015_v37, %v2996_v52  ;;  %v3036_v48 = vunpack.c.h.bf16 %v8346_v4  ;;  %v3061_v39 = vunpack.c.l.bf16 %v5139_v63 }
 0x27d   : > { %v2928_v25 = vadd.f32 %v2927_v61, %v2926_v40  ;;  %v3047_v35 = vadd.f32 %v3032_v26, %v3030_v57  ;;  %v3062_v31 = vunpack.c.h.bf16 %v5139_v63  ;;  %v3063_v22 = vunpack.c.l.bf16 %v5140_v21  ;;  %v8369_v26 = vld [vmem:[%s6099_s10 + $0x6a8] sm:$0xff] }
 0x27e   : > { %v2960_v8 = vadd.f32 %v2959_v23, %v2958_v13  ;;  %v3018_v51 = vadd.f32 %v3017_v2, %v3016_v27  ;;  %v3049_v54 = vsel %vm282_vm0, %v3036_v48, 0.0  ;;  %v3064_v28 = vunpack.c.h.bf16 %v5140_v21  ;;  %v8374_v21 = vld [vmem:[%s6099_s10 + $0x6b0] sm:$0xff] }
 0x27f   : > { %v2929_v34 = vrot.slane %v2928_v25, 1  ;;  %v3048_v46 = vadd.f32 %v3047_v35, %v3034_v60  ;;  %v3065_v36 = vunpack.c.l.bf16 %v5141_v56  ;;  %v3066_v61 = vunpack.c.h.bf16 %v5141_v56 }
 0x280   : > { %v2961_v40 = vrot.slane %v2960_v8, 1  ;;  %v3019_v5 = vrot.slane %v3018_v51, 4  ;;  %v3067_v13 = vunpack.c.l.bf16 %v5142_v47  ;;  %v3068_v52 = vunpack.c.h.bf16 %v5142_v47  ;;  %v8382_v47 = vld [vmem:[%s6099_s10 + $0x6b8] sm:$0xff] }
 0x281   : > { %v8362_v10 = vadd.f32 %v2929_v34, %v2928_v25  ;;  %v3050_v45 = vadd.f32 %v3049_v54, %v3048_v46  ;;  %v8366_v2 = vrot.slane %v3061_v39, 4  ;;  %v8371_v25 = vrot.slane %v3063_v22, 4 }
 0x282   : > { %v8364_v37 = vadd.f32 %v2961_v40, %v2960_v8  ;;  %v3020_v57 = vadd.f32 %v3019_v5, %v3018_v51  ;;  %v3080_v23 = vrot.slane %v3062_v31, 4  ;;  %v3081_v27 = vrot.slane %v3064_v28, 4  ;;  %v8387_v31 = vld [vmem:[%s6099_s10 + $0x6c0] sm:$0x33] }
 0x283   : > { %v3051_v63 = vrot.slane %v3050_v45, 4  ;;  %v8376_v48 = vrot.slane %v3065_v36, 4  ;;  %v3085_v35 = vrot.slane %v3066_v61, 4  ;;  %v8378_v34 = vrot.slane %v3067_v13, 4  ;;  %v5147_v61 = vld [vmem:[%s6099_s10 + $0x6c0] sm:$0xcc] }
 0x284   : > { %v3021_v60 = vrot.slane %v3020_v57, 2  ;;  %v3082_v51 = vsel %vm282_vm0, %v3080_v23, %v3081_v27  ;;  %v3089_v56 = vrot.slane %v3068_v52, 4  ;;  %v3124_v22 = vunpack.c.h.bf16 %v8369_v26  ;;  %v5148_v23 = vld [vmem:[%s6099_s10 + $0x6c8] sm:$0xff] }
 0x285   : > { %v3052_v8 = vadd.f32 %v3051_v63, %v3050_v45  ;;  %v3086_v54 = vsel %vm282_vm0, %v3081_v27, %v3085_v35  ;;  %v3128_v63 = vunpack.c.h.bf16 %v8382_v47  ;;  %v3130_v39 = vunpack.c.h.bf16 %v8387_v31 }
 0x286   : > { %v3022_v46 = vadd.f32 %v3021_v60, %v3020_v57  ;;  %v3090_v28 = vsel %vm282_vm0, %v3085_v35, %v3089_v56  ;;  %v3109_v45 = vadd.f32 %v3086_v54, %v3082_v51  ;;  %v3111_v36 = vsel %vm282_vm0, %v3089_v56, 0.0  ;;  %v5149_v35 = vld [vmem:[%s6099_s10 + $0x6d0] sm:$0xff]  ;;  %v5150_v54 = vld [vmem:[%s6099_s10 + $0x6d8] sm:$0xff] }
 0x287   : > { %v3053_v5 = vrot.slane %v3052_v8, 2  ;;  %v3126_v57 = vunpack.c.h.bf16 %v8374_v21  ;;  %v3155_v56 = vunpack.c.l.bf16 %v5147_v61  ;;  %v3156_v24 = vunpack.c.h.bf16 %v5147_v61 }
 0x288   : > { %v3023_v13 = vrot.slane %v3022_v46, 1  ;;  %v3110_v60 = vadd.f32 %v3109_v45, %v3090_v28  ;;  %v3143_v12 = vsel %vm282_vm0, %v3130_v39, 0.0  ;;  %v3157_v52 = vunpack.c.l.bf16 %v5148_v23 }
 0x289   : > { %v3054_v27 = vadd.f32 %v3053_v5, %v3052_v8  ;;  %v3141_v51 = vadd.f32 %v3126_v57, %v3124_v22  ;;  %v3158_v43 = vunpack.c.h.bf16 %v5148_v23  ;;  %v3159_v19 = vunpack.c.l.bf16 %v5149_v35 }
 0x28a   : > { %v3024_v62 = vadd.f32 %v3023_v13, %v3022_v46  ;;  %v3112_v17 = vadd.f32 %v3111_v36, %v3110_v60  ;;  %v3160_v8 = vunpack.c.h.bf16 %v5149_v35  ;;  %v3161_v45 = vunpack.c.l.bf16 %v5150_v54 }
 0x28b   : > { %v3055_v44 = vrot.slane %v3054_v27, 1  ;;  %v3142_v49 = vadd.f32 %v3141_v51, %v3128_v63  ;;  %v3162_v40 = vunpack.c.h.bf16 %v5150_v54  ;;  %v8403_v9 = vrot.slane %v3155_v56, 4 }
 0x28c   : > { %v3113_v28 = vrot.slane %v3112_v17, 4  ;;  %v8405_v46 = vrot.slane %v3157_v52, 4  ;;  %v3174_v22 = vrot.slane %v3156_v24, 4  ;;  %v3175_v13 = vrot.slane %v3158_v43, 4 }
 0x28d   : > { %v3056_v5 = vadd.f32 %v3055_v44, %v3054_v27  ;;  %v3144_v20 = vadd.f32 %v3143_v12, %v3142_v49  ;;  %v8407_v36 = vrot.slane %v3159_v19, 4  ;;  %v3179_v39 = vrot.slane %v3160_v8, 4 }
 0x28e   : > { %v3114_v61 = vadd.f32 %v3113_v28, %v3112_v17  ;;  %v8409_v63 = vrot.slane %v3161_v45, 4  ;;  %v3183_v23 = vrot.slane %v3162_v40, 4  ;;  %v3246_v44 = vsel %vm677_vm1, %v8329_v18, %v8362_v10 }
 0x28f   : > { %v3145_v57 = vrot.slane %v3144_v20, 4  ;;  %v3176_v12 = vsel %vm282_vm0, %v3174_v22, %v3175_v13  ;;  %v3180_v49 = vsel %vm282_vm0, %v3175_v13, %v3179_v39  ;;  %v3248_v17 = vsel %vm680_vm2, %v3246_v44, %v8364_v37 }
 0x290   : > { %v3115_v27 = vrot.slane %v3114_v61, 2  ;;  %v3184_v19 = vsel %vm282_vm0, %v3179_v39, %v3183_v23  ;;  %v3203_v24 = vadd.f32 %v3180_v49, %v3176_v12  ;;  %v3205_v52 = vsel %vm282_vm0, %v3183_v23, 0.0 }
 0x291   : > { %v3146_v43 = vadd.f32 %v3145_v57, %v3144_v20  ;;  %v3250_v40 = vsel %vm683_vm3, %v3248_v17, %v3024_v62  ;;  %v2849_v18 = vadd.f32 %v2843_v0, %v2841_v55  ;;  %v9133_v10 = vunpack.c.l.bf16 %v8233_v7 }
 0x292   : > { %v3116_v60 = vadd.f32 %v3115_v27, %v3114_v61  ;;  %v3204_v37 = vadd.f32 %v3203_v24, %v3184_v19  ;;  %v3252_v20 = vsel %vm282_vm0, %v3250_v40, %v3056_v5  ;;  %v2891_v54 = vsel %vm282_vm0, %v8265_v53, %v8267_v42  ;;  %v8463_v24 = vpop.f32.mrb[0].mxu0 }
 0x293   : > { %v2851_v35 = vsel %vm282_vm0, %v9133_v10, 0.0  ;;  %v3147_v51 = vrot.slane %v3146_v43, 2  ;;  %v9134_v62 = vunpack.c.l.bf16 %v8226_v59  ;;  %v2896_v58 = vsel %vm282_vm0, %v8267_v42, %v8272_v33 }
 0x294   : > { %v3117_v56 = vrot.slane %v3116_v60, 1  ;;  %v2900_v6 = vsel %vm282_vm0, %v8272_v33, %v8274_v30  ;;  %v3206_v0 = vadd.f32 %v3205_v52, %v3204_v37  ;;  %v2911_v7 = vadd.f32 %v2896_v58, %v2891_v54 }
 0x295   : > { %v2850_v8 = vadd.f32 %v2849_v18, %v9134_v62  ;;  %v3148_v55 = vadd.f32 %v3147_v51, %v3146_v43  ;;  %v2913_v5 = vsel %vm282_vm0, %v8274_v30, 0.0  ;;  %v9135_v45 = vunpack.c.l.bf16 %v8263_v29 }
 0x296   : > { %v3118_v28 = vadd.f32 %v3117_v56, %v3116_v60  ;;  %v9136_v59 = vunpack.c.l.bf16 %v8270_v50  ;;  %v9137_v61 = vunpack.c.l.bf16 %v8283_v3  ;;  %v3207_v39 = vrot.slane %v3206_v0, 4 }
 0x297   : > { %v2852_v53 = vadd.f32 %v2851_v35, %v2850_v8  ;;  %v3149_v13 = vrot.slane %v3148_v55, 1  ;;  %v2912_v33 = vadd.f32 %v2911_v7, %v2900_v6  ;;  %v2985_v57 = vsel %vm282_vm0, %v8314_v11, %v8319_v15 }
 0x298   : > { %v2943_v22 = vadd.f32 %v9136_v59, %v9135_v45  ;;  %v2945_v42 = vsel %vm282_vm0, %v9137_v61, 0.0  ;;  %v3254_v30 = vsel %vm688_vm4, %v3252_v20, %v3118_v28  ;;  %v9138_v44 = vunpack.c.l.bf16 %v8280_v16  ;;  %v8465_v16 = vpop.f32.mrb[0].mxu1 }
 0x299   : > { %v2853_v23 = vrot.slane %v2852_v53, 4  ;;  %v2990_v50 = vsel %vm282_vm0, %v8319_v15, %v8327_v14  ;;  %v3150_v3 = vadd.f32 %v3149_v13, %v3148_v55  ;;  %v3208_v27 = vadd.f32 %v3207_v39, %v3206_v0  ;;  %9139 = vst [vmem:[#allocation12_spill] sm:$0xff] %v8465_v16  ;;  %v8474_v35 = vpop.f32.mrb[1].mxu1 }
 0x29a   : > { %v2944_v29 = vadd.f32 %v2943_v22, %v9138_v44  ;;  %v2914_v12 = vadd.f32 %v2913_v5, %v2912_v33  ;;  %v2994_v49 = vsel %vm282_vm0, %v8327_v14, %v8331_v38  ;;  %v3005_v11 = vadd.f32 %v2990_v50, %v2985_v57  ;;  %v8472_v14 = vpop.f32.mrb[1].mxu0  ;;  %9142 = vst [vmem:[#allocation13_spill] sm:$0xff] %v8474_v35  ;;  %v8481_v62 = vpop.f32.mrb[2].mxu1 }
 0x29b   : > { %v2854_v17 = vadd.f32 %v2853_v23, %v2852_v53  ;;  %v3007_v19 = vsel %vm282_vm0, %v8331_v38, 0.0  ;;  %v3209_v52 = vrot.slane %v3208_v27, 2  ;;  %v3256_v15 = vsel %vm691_vm5, %v3254_v30, %v3150_v3  ;;  %v8479_v56 = vpop.f32.mrb[2].mxu0  ;;  %9145 = vst [vmem:[#allocation15_spill] sm:$0xff] %v8481_v62  ;;  %v8490_v0 = vpop.f32.mrb[3].mxu1 }
 0x29c   : > { %v2946_v43 = vadd.f32 %v2945_v42, %v2944_v29  ;;  %v2915_v60 = vrot.slane %v2914_v12, 4  ;;  %v9140_v40 = vunpack.c.l.bf16 %v8322_v32  ;;  %v9141_v18 = vunpack.c.l.bf16 %v8334_v1  ;;  %9144 = vst [vmem:[#allocation14_spill] sm:$0xff] %v8479_v56  ;;  %v8488_v55 = vpop.f32.mrb[3].mxu0  ;;  %9148 = vst [vmem:[#allocation17_spill] sm:$0xff] %v8490_v0  ;;  %v8497_v45 = vpop.f32.mrb[4].mxu1 }
 0x29d   : > { %v2855_v51 = vrot.slane %v2854_v17, 2  ;;  %v3006_v38 = vadd.f32 %v3005_v11, %v2994_v49  ;;  %v9143_v20 = vunpack.c.l.bf16 %v8346_v4  ;;  %v3210_v8 = vadd.f32 %v3209_v52, %v3208_v27  ;;  %9147 = vst [vmem:[#allocation16_spill] sm:$0xff] %v8488_v55  ;;  %v8495_v53 = vpop.f32.mrb[4].mxu0  ;;  %9150 = vst [vmem:[#allocation19_spill] sm:$0xff] %v8497_v45  ;;  %v8504_v42 = vpop.f32.mrb[5].mxu1 }
 0x29e   : > { %v3037_v10 = vadd.f32 %v9141_v18, %v9140_v40  ;;  %v2947_v37 = vrot.slane %v2946_v43, 4  ;;  %v2916_v32 = vadd.f32 %v2915_v60, %v2914_v12  ;;  %v9146_v1 = vunpack.c.l.bf16 %v8339_v41  ;;  %9149 = vst [vmem:[#allocation18_spill] sm:$0xff] %v8495_v53  ;;  %v8502_v61 = vpop.f32.mrb[5].mxu0  ;;  %9152 = vst [vmem:[#allocation21_spill] sm:$0xff] %v8504_v42 }
 0x29f   : > { %v3039_v54 = vsel %vm282_vm0, %v9143_v20, 0.0  ;;  %v3079_v6 = vsel %vm282_vm0, %v8366_v2, %v8371_v25  ;;  %v2856_v4 = vadd.f32 %v2855_v51, %v2854_v17  ;;  %v3008_v5 = vadd.f32 %v3007_v19, %v3006_v38  ;;  %9151 = vst [vmem:[#allocation20_spill] sm:$0xff] %v8502_v61 }
 0x2a0   : > { %v3038_v58 = vadd.f32 %v3037_v10, %v9146_v1  ;;  %v2948_v7 = vadd.f32 %v2947_v37, %v2946_v43  ;;  %v3084_v28 = vsel %vm282_vm0, %v8371_v25, %v8376_v48  ;;  %v3211_v41 = vrot.slane %v3210_v8, 1  ;;  %v8506_v25 = vpop.f32.mrb[6].mxu0 }
 0x2a1   : > { %v2917_v59 = vrot.slane %v2916_v32, 2  ;;  %v3088_v2 = vsel %vm282_vm0, %v8376_v48, %v8378_v34  ;;  %v2857_v13 = vrot.slane %v2856_v4, 1  ;;  %v3009_v33 = vrot.slane %v3008_v5, 4  ;;  %9153 = vst [vmem:[#allocation22_spill] sm:$0xff] %v8506_v25  ;;  %v8508_v30 = vpop.f32.mrb[6].mxu1  ;;  %v8512_v3 = vpop.f32.mrb[7].mxu0 }
 0x2a2   : > { %v3040_v22 = vadd.f32 %v3039_v54, %v3038_v58  ;;  %v2949_v39 = vrot.slane %v2948_v7, 2  ;;  %v3099_v57 = vadd.f32 %v3084_v28, %v3079_v6  ;;  %9154 = vst [vmem:[#allocation23_spill] sm:$0xff] %v8508_v30  ;;  %v3212_v23 = vadd.f32 %v3211_v41, %v3210_v8  ;;  %9155 = vst [vmem:[#allocation24_spill] sm:$0xff] %v8512_v3  ;;  %v8514_v48 = vpop.f32.mrb[7].mxu1  ;;  %v8542_v41 = vld [vmem:[%s6099_s10 + $0x708] sm:$0xff]  ;;  %v5186_v25 = vld [vmem:[%s6099_s10 + $0x7d8] sm:$0xff] }
 0x2a3   : > { %v2918_v44 = vadd.f32 %v2917_v59, %v2916_v32  ;;  %v3101_v50 = vsel %vm282_vm0, %v8378_v34, 0.0  ;;  %9156 = vst [vmem:[#allocation25_spill] sm:$0xff] %v8514_v48  ;;  %v2858_v27 = vadd.f32 %v2857_v13, %v2856_v4  ;;  %v3010_v49 = vadd.f32 %v3009_v33, %v3008_v5  ;;  %v8536_v4 = vld [vmem:[%s6099_s10 + $0x700] sm:$0xff] }
 0x2a4   : > { %v3041_v29 = vrot.slane %v3040_v22, 4  ;;  %v2950_v12 = vadd.f32 %v2949_v39, %v2948_v7  ;;  %v3100_v17 = vadd.f32 %v3099_v57, %v3088_v2  ;;  %v3258_v43 = vsel %vm694_vm6, %v3256_v15, %v3212_v23 }
 0x2a5   : > { %v2919_v11 = vrot.slane %v2918_v44, 1  ;;  %v9157_v52 = vunpack.c.l.bf16 %v8369_v26  ;;  %v9158_v60 = vunpack.c.l.bf16 %v8374_v21  ;;  %4492 = vmatprep.mubr.f32.mxu0 %v3258_v43  ;;  %v3011_v34 = vrot.slane %v3010_v49, 2  ;;  %v5159_v43 = vld [vmem:[%s6099_s10 + $0x718] sm:$0xcc] }
 0x2a6   : > { %v3042_v19 = vadd.f32 %v3041_v29, %v3040_v22  ;;  %v2951_v18 = vrot.slane %v2950_v12, 1  ;;  %v3102_v10 = vadd.f32 %v3101_v50, %v3100_v17  ;;  %v9159_v51 = vunpack.c.l.bf16 %v8387_v31  ;;  %v8551_v29 = vld [vmem:[%s6099_s10 + $0x718] sm:$0x33] }
 0x2a7   : > { %v3131_v40 = vadd.f32 %v9158_v60, %v9157_v52  ;;  %v2920_v38 = vadd.f32 %v2919_v11, %v2918_v44  ;;  %v9160_v15 = vunpack.c.l.bf16 %v8382_v47  ;;  %v3173_v26 = vsel %vm282_vm0, %v8403_v9, %v8405_v46 }
 0x2a8   : > { %v3133_v37 = vsel %vm282_vm0, %v9159_v51, 0.0  ;;  %v3043_v20 = vrot.slane %v3042_v19, 2  ;;  %v2952_v21 = vadd.f32 %v2951_v18, %v2950_v12  ;;  %v3012_v8 = vadd.f32 %v3011_v34, %v3010_v49 }
 0x2a9   : > { %v3132_v54 = vadd.f32 %v3131_v40, %v9160_v15  ;;  %v3103_v32 = vrot.slane %v3102_v10, 4  ;;  %v3178_v31 = vsel %vm282_vm0, %v8405_v46, %v8407_v36  ;;  %v3182_v47 = vsel %vm282_vm0, %v8407_v36, %v8409_v63  ;;  %v8546_v36 = vld [vmem:[%s6099_s10 + $0x710] sm:$0xff]  ;;  %v5160_v40 = vld [vmem:[%s6099_s10 + $0x720] sm:$0xff] }
 0x2aa   : > { %v3044_v1 = vadd.f32 %v3043_v20, %v3042_v19  ;;  %v3193_v6 = vadd.f32 %v3178_v31, %v3173_v26  ;;  %v3013_v7 = vrot.slane %v3012_v8, 1  ;;  %v3195_v9 = vsel %vm282_vm0, %v8409_v63, 0.0  ;;  %v5162_v15 = vld [vmem:[%s6099_s10 + $0x730] sm:$0xff] }
 0x2ab   : > { %v3134_v58 = vadd.f32 %v3133_v37, %v3132_v54  ;;  %v3104_v5 = vadd.f32 %v3103_v32, %v3102_v10  ;;  %v3245_v28 = vsel %vm677_vm1, %v2858_v27, %v2920_v38  ;;  %v3269_v57 = vunpack.c.h.bf16 %v8536_v4  ;;  %v5161_v37 = vld [vmem:[%s6099_s10 + $0x728] sm:$0xff] }
 0x2ac   : > { %v3045_v46 = vrot.slane %v3044_v1, 1  ;;  %v3194_v22 = vadd.f32 %v3193_v6, %v3182_v47  ;;  %v3247_v2 = vsel %vm680_vm2, %v3245_v28, %v2952_v21  ;;  %v3014_v13 = vadd.f32 %v3013_v7, %v3012_v8 }
 0x2ad   : > { %v3135_v59 = vrot.slane %v3134_v58, 4  ;;  %v3105_v39 = vrot.slane %v3104_v5, 2  ;;  %v3271_v49 = vunpack.c.h.bf16 %v8542_v41  ;;  %v3273_v60 = vunpack.c.h.bf16 %v8546_v36 }
 0x2ae   : > { %v3046_v63 = vadd.f32 %v3045_v46, %v3044_v1  ;;  %v3196_v44 = vadd.f32 %v3195_v9, %v3194_v22  ;;  %v3249_v12 = vsel %vm683_vm3, %v3247_v2, %v3014_v13  ;;  %v3275_v10 = vunpack.c.h.bf16 %v8551_v29 }
 0x2af   : > { %v3136_v23 = vadd.f32 %v3135_v59, %v3134_v58  ;;  %v3106_v27 = vadd.f32 %v3105_v39, %v3104_v5  ;;  %v3286_v51 = vadd.f32 %v3271_v49, %v3269_v57  ;;  %v3300_v54 = vunpack.c.l.bf16 %v5159_v43 }
 0x2b0   : > { %v3197_v19 = vrot.slane %v3196_v44, 4  ;;  %v3251_v52 = vsel %vm282_vm0, %v3249_v12, %v3046_v63  ;;  %v3301_v26 = vunpack.c.h.bf16 %v5159_v43  ;;  %v3288_v32 = vsel %vm282_vm0, %v3275_v10, 0.0 }
 0x2b1   : > { %v3137_v11 = vrot.slane %v3136_v23, 2  ;;  %v3107_v18 = vrot.slane %v3106_v27, 1  ;;  %v3287_v8 = vadd.f32 %v3286_v51, %v3273_v60  ;;  %v3302_v31 = vunpack.c.l.bf16 %v5160_v40  ;;  %v8581_v60 = vld [vmem:[%s6099_s10 + $0x740] sm:$0xff]  ;;  %v8588_v51 = vld [vmem:[%s6099_s10 + $0x750] sm:$0x33] }
 0x2b2   : > { %v3198_v20 = vadd.f32 %v3197_v19, %v3196_v44  ;;  %v3303_v47 = vunpack.c.h.bf16 %v5160_v40  ;;  %v3304_v6 = vunpack.c.l.bf16 %v5161_v37  ;;  %v3305_v9 = vunpack.c.h.bf16 %v5161_v37  ;;  %v8584_v40 = vld [vmem:[%s6099_s10 + $0x748] sm:$0xff] }
 0x2b3   : > { %v3138_v38 = vadd.f32 %v3137_v11, %v3136_v23  ;;  %v3108_v21 = vadd.f32 %v3107_v18, %v3106_v27  ;;  %v3289_v5 = vadd.f32 %v3288_v32, %v3287_v8  ;;  %v3306_v28 = vunpack.c.l.bf16 %v5162_v15  ;;  %v8572_v23 = vld [vmem:[%s6099_s10 + $0x738] sm:$0xff] }
 0x2b4   : > { %v3199_v58 = vrot.slane %v3198_v20, 2  ;;  %v3307_v22 = vunpack.c.h.bf16 %v5162_v15  ;;  %v8567_v2 = vrot.slane %v3300_v54, 4  ;;  %v8569_v39 = vrot.slane %v3302_v31, 4 }
 0x2b5   : > { %v3139_v1 = vrot.slane %v3138_v38, 1  ;;  %v3253_v7 = vsel %vm688_vm4, %v3251_v52, %v3108_v21  ;;  %v3290_v13 = vrot.slane %v3289_v5, 4  ;;  %v3319_v57 = vrot.slane %v3301_v26, 4  ;;  %v5167_v21 = vld [vmem:[%s6099_s10 + $0x750] sm:$0xcc] }
 0x2b6   : > { %v3200_v59 = vadd.f32 %v3199_v58, %v3198_v20  ;;  %v3320_v63 = vrot.slane %v3303_v47, 4  ;;  %v8575_v12 = vrot.slane %v3304_v6, 4  ;;  %v3324_v49 = vrot.slane %v3305_v9, 4  ;;  %v5168_v58 = vld [vmem:[%s6099_s10 + $0x758] sm:$0xff]  ;;  %v5169_v9 = vld [vmem:[%s6099_s10 + $0x760] sm:$0xff] }
 0x2b7   : > { %v3140_v46 = vadd.f32 %v3139_v1, %v3138_v38  ;;  %v3291_v43 = vadd.f32 %v3290_v13, %v3289_v5  ;;  %v8578_v19 = vrot.slane %v3306_v28, 4  ;;  %v3328_v52 = vrot.slane %v3307_v22, 4 }
 0x2b8   : > { %v3201_v44 = vrot.slane %v3200_v59, 1  ;;  %v3321_v11 = vsel %vm282_vm0, %v3319_v57, %v3320_v63  ;;  %v3325_v10 = vsel %vm282_vm0, %v3320_v63, %v3324_v49  ;;  %v3363_v38 = vunpack.c.h.bf16 %v8572_v23 }
 0x2b9   : > { %v3255_v27 = vsel %vm691_vm5, %v3253_v7, %v3140_v46  ;;  %v3292_v20 = vrot.slane %v3291_v43, 2  ;;  %v3329_v15 = vsel %vm282_vm0, %v3324_v49, %v3328_v52  ;;  %v3348_v54 = vadd.f32 %v3325_v10, %v3321_v11 }
 0x2ba   : > { %v3202_v18 = vadd.f32 %v3201_v44, %v3200_v59  ;;  %v3350_v26 = vsel %vm282_vm0, %v3328_v52, 0.0  ;;  %v3365_v31 = vunpack.c.h.bf16 %v8581_v60  ;;  %v3367_v7 = vunpack.c.h.bf16 %v8584_v40  ;;  %v5170_v59 = vld [vmem:[%s6099_s10 + $0x768] sm:$0xff] }
 0x2bb   : > { %v3293_v47 = vadd.f32 %v3292_v20, %v3291_v43  ;;  %v3349_v6 = vadd.f32 %v3348_v54, %v3329_v15  ;;  %v3369_v28 = vunpack.c.h.bf16 %v8588_v51  ;;  %v3394_v22 = vunpack.c.l.bf16 %v5167_v21  ;;  %v8609_v15 = vld [vmem:[%s6099_s10 + $0x770] sm:$0xff] }
 0x2bc   : > { %v3257_v8 = vsel %vm694_vm6, %v3255_v27, %v3202_v18  ;;  %v3380_v46 = vadd.f32 %v3365_v31, %v3363_v38  ;;  %v3395_v13 = vunpack.c.h.bf16 %v5167_v21  ;;  %v3396_v44 = vunpack.c.l.bf16 %v5168_v58 }
 0x2bd   : > { %4493 = vmatmul.mubr.f32.vlgmr.msra.gmra.mrb[12].mxu0 %v3257_v8  ;;  %v3294_v57 = vrot.slane %v3293_v47, 1  ;;  %v3351_v63 = vadd.f32 %v3350_v26, %v3349_v6  ;;  %v3397_v27 = vunpack.c.h.bf16 %v5168_v58  ;;  %v3382_v43 = vsel %vm282_vm0, %v3369_v28, 0.0 }
 0x2be   : > { %v3381_v49 = vadd.f32 %v3380_v46, %v3367_v7  ;;  %v3398_v11 = vunpack.c.l.bf16 %v5169_v9  ;;  %v3399_v52 = vunpack.c.h.bf16 %v5169_v9  ;;  %v3400_v20 = vunpack.c.l.bf16 %v5170_v59  ;;  %v8620_v46 = vld [vmem:[%s6099_s10 + $0x778] sm:$0xff] }
 0x2bf   : > { %v8606_v18 = vadd.f32 %v3294_v57, %v3293_v47  ;;  %v3352_v10 = vrot.slane %v3351_v63, 4  ;;  %v3401_v38 = vunpack.c.h.bf16 %v5170_v59  ;;  %v8611_v21 = vrot.slane %v3394_v22, 4  ;;  %v8623_v59 = vld [vmem:[%s6099_s10 + $0x780] sm:$0xff]  ;;  %v5176_v22 = vld [vmem:[%s6099_s10 + $0x790] sm:$0xff] }
 0x2c0   : > { %v3383_v54 = vadd.f32 %v3382_v43, %v3381_v49  ;;  %v8613_v26 = vrot.slane %v3396_v44, 4  ;;  %v3413_v8 = vrot.slane %v3395_v13, 4  ;;  %v3414_v58 = vrot.slane %v3397_v27, 4  ;;  %v8629_v44 = vld [vmem:[%s6099_s10 + $0x788] sm:$0x33] }
 0x2c1   : > { %v3353_v31 = vadd.f32 %v3352_v10, %v3351_v63  ;;  %v8615_v6 = vrot.slane %v3398_v11, 4  ;;  %v3418_v47 = vrot.slane %v3399_v52, 4  ;;  %v8617_v9 = vrot.slane %v3400_v20, 4  ;;  %v5175_v10 = vld [vmem:[%s6099_s10 + $0x788] sm:$0xcc] }
 0x2c2   : > { %v3384_v7 = vrot.slane %v3383_v54, 4  ;;  %v3422_v28 = vrot.slane %v3401_v38, 4  ;;  %v3415_v13 = vsel %vm282_vm0, %v3413_v8, %v3414_v58  ;;  %v3457_v27 = vunpack.c.h.bf16 %v8609_v15  ;;  %v5178_v38 = vld [vmem:[%s6099_s10 + $0x7a0] sm:$0xff] }
 0x2c3   : > { %v3354_v57 = vrot.slane %v3353_v31, 2  ;;  %v3419_v63 = vsel %vm282_vm0, %v3414_v58, %v3418_v47  ;;  %v3459_v8 = vunpack.c.h.bf16 %v8620_v46  ;;  %v3489_v37 = vunpack.c.h.bf16 %v5175_v10 }
 0x2c4   : > { %v3385_v49 = vadd.f32 %v3384_v7, %v3383_v54  ;;  %v3423_v43 = vsel %vm282_vm0, %v3418_v47, %v3422_v28  ;;  %v3442_v11 = vadd.f32 %v3419_v63, %v3415_v13  ;;  %v3444_v52 = vsel %vm282_vm0, %v3422_v28, 0.0  ;;  %v5177_v63 = vld [vmem:[%s6099_s10 + $0x798] sm:$0xff] }
 0x2c5   : > { %v3355_v20 = vadd.f32 %v3354_v57, %v3353_v31  ;;  %v3461_v54 = vunpack.c.h.bf16 %v8623_v59  ;;  %v3463_v13 = vunpack.c.h.bf16 %v8629_v44  ;;  %v3474_v28 = vadd.f32 %v3459_v8, %v3457_v27 }
 0x2c6   : > { %v3386_v1 = vrot.slane %v3385_v49, 2  ;;  %v3443_v5 = vadd.f32 %v3442_v11, %v3423_v43  ;;  %v3488_v31 = vunpack.c.l.bf16 %v5175_v10  ;;  %v3490_v34 = vunpack.c.l.bf16 %v5176_v22 }
 0x2c7   : > { %v3356_v7 = vrot.slane %v3355_v20, 1  ;;  %v3475_v17 = vadd.f32 %v3474_v28, %v3461_v54  ;;  %v3476_v43 = vsel %vm282_vm0, %v3463_v13, 0.0  ;;  %v3491_v11 = vunpack.c.h.bf16 %v5176_v22 }
 0x2c8   : > { %v3387_v57 = vadd.f32 %v3386_v1, %v3385_v49  ;;  %v3445_v32 = vadd.f32 %v3444_v52, %v3443_v5  ;;  %v3492_v33 = vunpack.c.l.bf16 %v5177_v63  ;;  %v3493_v48 = vunpack.c.h.bf16 %v5177_v63  ;;  %v8650_v49 = vld [vmem:[%s6099_s10 + $0x7a8] sm:$0xff]  ;;  %v8661_v63 = vld [vmem:[%s6099_s10 + $0x7b0] sm:$0xff] }
 0x2c9   : > { %v8644_v58 = vadd.f32 %v3356_v7, %v3355_v20  ;;  %v3477_v30 = vadd.f32 %v3476_v43, %v3475_v17  ;;  %v3494_v27 = vunpack.c.l.bf16 %v5178_v38  ;;  %v3495_v1 = vunpack.c.h.bf16 %v5178_v38 }
 0x2ca   : > { %v3388_v50 = vrot.slane %v3387_v57, 1  ;;  %v3446_v47 = vrot.slane %v3445_v32, 4  ;;  %v8647_v5 = vrot.slane %v3488_v31, 4  ;;  %v8654_v20 = vrot.slane %v3490_v34, 4  ;;  %v8664_v31 = vld [vmem:[%s6099_s10 + $0x7b8] sm:$0xff] }
 0x2cb   : > { %v3507_v22 = vrot.slane %v3489_v37, 4  ;;  %v3478_v8 = vrot.slane %v3477_v30, 4  ;;  %v3508_v54 = vrot.slane %v3491_v11, 4  ;;  %v8656_v7 = vrot.slane %v3492_v33, 4  ;;  %v8670_v33 = vld [vmem:[%s6099_s10 + $0x7c0] sm:$0x33] }
 0x2cc   : > { %v8652_v52 = vadd.f32 %v3388_v50, %v3387_v57  ;;  %v3447_v10 = vadd.f32 %v3446_v47, %v3445_v32  ;;  %v3512_v17 = vrot.slane %v3493_v48, 4  ;;  %v8658_v28 = vrot.slane %v3494_v27, 4  ;;  %v5183_v27 = vld [vmem:[%s6099_s10 + $0x7c0] sm:$0xcc] }
 0x2cd   : > { %v3516_v38 = vrot.slane %v3495_v1, 4  ;;  %v3479_v34 = vadd.f32 %v3478_v8, %v3477_v30  ;;  %v3509_v37 = vsel %vm282_vm0, %v3507_v22, %v3508_v54  ;;  %v3551_v48 = vunpack.c.h.bf16 %v8650_v49 }
 0x2ce   : > { %v3448_v13 = vrot.slane %v3447_v10, 2  ;;  %v3513_v32 = vsel %vm282_vm0, %v3508_v54, %v3512_v17  ;;  %v3553_v22 = vunpack.c.h.bf16 %v8661_v63  ;;  %v5184_v54 = vld [vmem:[%s6099_s10 + $0x7c8] sm:$0xff]  ;;  %v3582_v42 = vunpack.c.l.bf16 %v5183_v27 }
 0x2cf   : > { %v3517_v57 = vsel %vm282_vm0, %v3512_v17, %v3516_v38  ;;  %v3536_v43 = vadd.f32 %v3513_v32, %v3509_v37  ;;  %v3538_v11 = vsel %vm282_vm0, %v3516_v38, 0.0  ;;  %v3480_v1 = vrot.slane %v3479_v34, 2  ;;  %v5185_v38 = vld [vmem:[%s6099_s10 + $0x7d0] sm:$0xff] }
 0x2d0   : > { %v3449_v47 = vadd.f32 %v3448_v13, %v3447_v10  ;;  %v3555_v10 = vunpack.c.h.bf16 %v8664_v31  ;;  %v3557_v37 = vunpack.c.h.bf16 %v8670_v33  ;;  %v3568_v32 = vadd.f32 %v3553_v22, %v3551_v48 }
 0x2d1   : > { %v3537_v3 = vadd.f32 %v3536_v43, %v3517_v57  ;;  %v3481_v13 = vadd.f32 %v3480_v1, %v3479_v34  ;;  %v3583_v61 = vunpack.c.h.bf16 %v5183_v27  ;;  %v3584_v53 = vunpack.c.l.bf16 %v5184_v54 }
 0x2d2   : > { %v3450_v50 = vrot.slane %v3449_v47, 1  ;;  %v3569_v8 = vadd.f32 %v3568_v32, %v3555_v10  ;;  %v3570_v62 = vsel %vm282_vm0, %v3557_v37, 0.0  ;;  %v3585_v57 = vunpack.c.h.bf16 %v5184_v54 }
 0x2d3   : > { %v3539_v30 = vadd.f32 %v3538_v11, %v3537_v3  ;;  %v3482_v0 = vrot.slane %v3481_v13, 1  ;;  %v3586_v55 = vunpack.c.l.bf16 %v5185_v38  ;;  %v3587_v56 = vunpack.c.h.bf16 %v5185_v38 }
 0x2d4   : > { %v3451_v45 = vadd.f32 %v3450_v50, %v3449_v47  ;;  %v3588_v17 = vunpack.c.l.bf16 %v5186_v25  ;;  %v3571_v1 = vadd.f32 %v3570_v62, %v3569_v8  ;;  %v3589_v35 = vunpack.c.h.bf16 %v5186_v25 }
 0x2d5   : > { %v3540_v43 = vrot.slane %v3539_v30, 4  ;;  %v3483_v34 = vadd.f32 %v3482_v0, %v3481_v13  ;;  %v8686_v48 = vrot.slane %v3582_v42, 4  ;;  %v8688_v16 = vrot.slane %v3584_v53, 4 }
 0x2d6   : > { %v3601_v3 = vrot.slane %v3583_v61, 4  ;;  %v3602_v50 = vrot.slane %v3585_v57, 4  ;;  %v3572_v47 = vrot.slane %v3571_v1, 4  ;;  %v8690_v11 = vrot.slane %v3586_v55, 4 }
 0x2d7   : > { %v3541_v22 = vadd.f32 %v3540_v43, %v3539_v30  ;;  %v3606_v27 = vrot.slane %v3587_v56, 4  ;;  %v8692_v10 = vrot.slane %v3588_v17, 4  ;;  %v3610_v32 = vrot.slane %v3589_v35, 4 }
 0x2d8   : > { %v3603_v37 = vsel %vm282_vm0, %v3601_v3, %v3602_v50  ;;  %v3673_v62 = vsel %vm677_vm1, %v8606_v18, %v8644_v58  ;;  %v3573_v0 = vadd.f32 %v3572_v47, %v3571_v1  ;;  %v9161_v55 = vunpack.c.l.bf16 %v8536_v4 }
 0x2d9   : > { %v3542_v54 = vrot.slane %v3541_v22, 2  ;;  %v3607_v53 = vsel %vm282_vm0, %v3602_v50, %v3606_v27  ;;  %v3675_v61 = vsel %vm680_vm2, %v3673_v62, %v8652_v52  ;;  %v9162_v56 = vunpack.c.l.bf16 %v8542_v41 }
 0x2da   : > { %v3611_v30 = vsel %vm282_vm0, %v3606_v27, %v3610_v32  ;;  %v3630_v8 = vadd.f32 %v3607_v53, %v3603_v37  ;;  %v3632_v35 = vsel %vm282_vm0, %v3610_v32, 0.0  ;;  %v3574_v17 = vrot.slane %v3573_v0, 2 }
 0x2db   : > { %v3276_v42 = vadd.f32 %v9162_v56, %v9161_v55  ;;  %v3543_v25 = vadd.f32 %v3542_v54, %v3541_v22  ;;  %v3677_v18 = vsel %vm683_vm3, %v3675_v61, %v3451_v45  ;;  %v9163_v58 = vunpack.c.l.bf16 %v8546_v36 }
 0x2dc   : > { %v9164_v38 = vunpack.c.l.bf16 %v8551_v29  ;;  %v3631_v57 = vadd.f32 %v3630_v8, %v3611_v30  ;;  %v3679_v41 = vsel %vm282_vm0, %v3677_v18, %v3483_v34  ;;  %v3318_v43 = vsel %vm282_vm0, %v8567_v2, %v8569_v39 }
 0x2dd   : > { %v3277_v13 = vadd.f32 %v3276_v42, %v9163_v58  ;;  %v3544_v4 = vrot.slane %v3543_v25, 1  ;;  %v3575_v1 = vadd.f32 %v3574_v17, %v3573_v0  ;;  %v3323_v45 = vsel %vm282_vm0, %v8569_v39, %v8575_v12 }
 0x2de   : > { %v3278_v52 = vsel %vm282_vm0, %v9164_v38, 0.0  ;;  %v3327_v36 = vsel %vm282_vm0, %v8575_v12, %v8578_v19  ;;  %v3633_v3 = vadd.f32 %v3632_v35, %v3631_v57  ;;  %v3338_v50 = vadd.f32 %v3323_v45, %v3318_v43 }
 0x2df   : > { %v3279_v22 = vadd.f32 %v3278_v52, %v3277_v13  ;;  %v3545_v29 = vadd.f32 %v3544_v4, %v3543_v25  ;;  %v3340_v34 = vsel %vm282_vm0, %v8578_v19, 0.0  ;;  %v3576_v47 = vrot.slane %v3575_v1, 1 }
 0x2e0   : > { %v9165_v2 = vunpack.c.l.bf16 %v8572_v23  ;;  %v9166_v54 = vunpack.c.l.bf16 %v8581_v60  ;;  %v9167_v32 = vunpack.c.l.bf16 %v8588_v51  ;;  %v3634_v62 = vrot.slane %v3633_v3, 4 }
 0x2e1   : > { %v3280_v27 = vrot.slane %v3279_v22, 4  ;;  %v3681_v12 = vsel %vm688_vm4, %v3679_v41, %v3545_v29  ;;  %v3339_v0 = vadd.f32 %v3338_v50, %v3327_v36  ;;  %v3412_v53 = vsel %vm282_vm0, %v8611_v21, %v8613_v26 }
 0x2e2   : > { %v3370_v37 = vadd.f32 %v9166_v54, %v9165_v2  ;;  %v3372_v39 = vsel %vm282_vm0, %v9167_v32, 0.0  ;;  %v3577_v19 = vadd.f32 %v3576_v47, %v3575_v1  ;;  %v9168_v55 = vunpack.c.l.bf16 %v8584_v40 }
 0x2e3   : > { %v3281_v61 = vadd.f32 %v3280_v27, %v3279_v22  ;;  %v3417_v60 = vsel %vm282_vm0, %v8613_v26, %v8615_v6  ;;  %v3635_v51 = vadd.f32 %v3634_v62, %v3633_v3  ;;  %v3341_v56 = vadd.f32 %v3340_v34, %v3339_v0 }
 0x2e4   : > { %v3371_v23 = vadd.f32 %v3370_v37, %v9168_v55  ;;  %v3421_v42 = vsel %vm282_vm0, %v8615_v6, %v8617_v9  ;;  %v3432_v25 = vadd.f32 %v3417_v60, %v3412_v53  ;;  %v3683_v30 = vsel %vm691_vm5, %v3681_v12, %v3577_v19 }
 0x2e5   : > { %v3282_v8 = vrot.slane %v3281_v61, 2  ;;  %v3434_v35 = vsel %vm282_vm0, %v8617_v9, 0.0  ;;  %v3636_v17 = vrot.slane %v3635_v51, 2  ;;  %v3342_v18 = vrot.slane %v3341_v56, 4 }
 0x2e6   : > { %v3373_v21 = vadd.f32 %v3372_v39, %v3371_v23  ;;  %v3433_v58 = vadd.f32 %v3432_v25, %v3421_v42  ;;  %v9169_v26 = vunpack.c.l.bf16 %v8609_v15  ;;  %v9170_v13 = vunpack.c.l.bf16 %v8620_v46 }
 0x2e7   : > { %v8747_v40 = vpop.f32.mrb[8].mxu0  ;;  %v3283_v6 = vadd.f32 %v3282_v8, %v3281_v61  ;;  %v9171_v57 = vunpack.c.l.bf16 %v8629_v44  ;;  %v3506_v9 = vsel %vm282_vm0, %v8647_v5, %v8654_v20  ;;  %v3637_v43 = vadd.f32 %v3636_v17, %v3635_v51  ;;  %v5151_v8 = vld [vmem:[%s6099_s10 + $0x6e0] sm:$0xff] }
 0x2e8   : > { %v3464_v38 = vadd.f32 %v9170_v13, %v9169_v26  ;;  %v8753_v52 = vpop.f32.mrb[9].mxu0  ;;  %v3374_v4 = vrot.slane %v3373_v21, 4  ;;  %v3343_v1 = vadd.f32 %v3342_v18, %v3341_v56  ;;  %v3435_v22 = vadd.f32 %v3434_v35, %v3433_v58  ;;  %v5152_v13 = vld [vmem:[%s6099_s10 + $0x6e8] sm:$0xff] }
 0x2e9   : > { %v3466_v41 = vsel %vm282_vm0, %v9171_v57, 0.0  ;;  %v9172_v15 = vunpack.c.l.bf16 %v8623_v59  ;;  %v3284_v46 = vrot.slane %v3283_v6, 1  ;;  %v3511_v29 = vsel %vm282_vm0, %v8654_v20, %v8656_v7  ;;  %v5154_v57 = vld [vmem:[%s6099_s10 + $0x6f8] sm:$0x33] }
 0x2ea   : > { %v3375_v36 = vadd.f32 %v3374_v4, %v3373_v21  ;;  %v3515_v44 = vsel %vm282_vm0, %v8656_v7, %v8658_v28  ;;  %v3638_v3 = vrot.slane %v3637_v43, 1  ;;  %v3344_v50 = vrot.slane %v3343_v1, 2 }
 0x2eb   : > { %v3465_v45 = vadd.f32 %v3464_v38, %v9172_v15  ;;  %v3436_v34 = vrot.slane %v3435_v22, 4  ;;  %v3285_v47 = vadd.f32 %v3284_v46, %v3283_v6  ;;  %v3526_v2 = vadd.f32 %v3511_v29, %v3506_v9  ;;  %v5153_v38 = vld [vmem:[%s6099_s10 + $0x6f0] sm:$0xff] }
 0x2ec   : > { %v3376_v27 = vrot.slane %v3375_v36, 2  ;;  %v3528_v59 = vsel %vm282_vm0, %v8658_v28, 0.0  ;;  %v3639_v54 = vadd.f32 %v3638_v3, %v3637_v43  ;;  %v3345_v37 = vadd.f32 %v3344_v50, %v3343_v1 }
 0x2ed   : > { %v3467_v5 = vadd.f32 %v3466_v41, %v3465_v45  ;;  %v3437_v32 = vadd.f32 %v3436_v34, %v3435_v22  ;;  %v3527_v20 = vadd.f32 %v3526_v2, %v3515_v44  ;;  %v9173_v12 = vunpack.c.l.bf16 %v8650_v49 }
 0x2ee   : > { %v3377_v62 = vadd.f32 %v3376_v27, %v3375_v36  ;;  %v9174_v7 = vunpack.c.l.bf16 %v8661_v63  ;;  %v9175_v53 = vunpack.c.l.bf16 %v8670_v33  ;;  %v3685_v61 = vsel %vm694_vm6, %v3683_v30, %v3639_v54 }
 0x2ef   : > { %v3468_v39 = vrot.slane %v3467_v5, 4  ;;  %v3346_v55 = vrot.slane %v3345_v37, 1  ;;  %v3438_v28 = vrot.slane %v3437_v32, 2  ;;  %4567 = vmatprep.mubr.f32.mxu1 %v3685_v61  ;;  %v3529_v51 = vadd.f32 %v3528_v59, %v3527_v20 }
 0x2f0   : > { %v3558_v0 = vadd.f32 %v9174_v7, %v9173_v12  ;;  %v3560_v19 = vsel %vm282_vm0, %v9175_v53, 0.0  ;;  %v3378_v60 = vrot.slane %v3377_v62, 1  ;;  %v9176_v56 = vunpack.c.l.bf16 %v8664_v31  ;;  %v5189_v12 = vld [vmem:[%s6099_s10 + $0x7f0] sm:$0xff] }
 0x2f1   : > { %v3469_v23 = vadd.f32 %v3468_v39, %v3467_v5  ;;  %v3600_v63 = vsel %vm282_vm0, %v8686_v48, %v8688_v16  ;;  %v3347_v33 = vadd.f32 %v3346_v55, %v3345_v37  ;;  %v3439_v42 = vadd.f32 %v3438_v28, %v3437_v32  ;;  %v5188_v37 = vld [vmem:[%s6099_s10 + $0x7e8] sm:$0xff] }
 0x2f2   : > { %v3559_v49 = vadd.f32 %v3558_v0, %v9176_v56  ;;  %v3605_v30 = vsel %vm282_vm0, %v8688_v16, %v8690_v11  ;;  %v3379_v21 = vadd.f32 %v3378_v60, %v3377_v62  ;;  %v3530_v35 = vrot.slane %v3529_v51, 4 }
 0x2f3   : > { %v3470_v25 = vrot.slane %v3469_v23, 2  ;;  %v3609_v31 = vsel %vm282_vm0, %v8690_v11, %v8692_v10  ;;  %v3440_v18 = vrot.slane %v3439_v42, 1  ;;  %v3620_v26 = vadd.f32 %v3605_v30, %v3600_v63 }
 0x2f4   : > { %v3561_v17 = vadd.f32 %v3560_v19, %v3559_v49  ;;  %v3622_v48 = vsel %vm282_vm0, %v8692_v10, 0.0  ;;  %v3531_v6 = vadd.f32 %v3530_v35, %v3529_v51  ;;  %v3672_v16 = vsel %vm677_vm1, %v3285_v47, %v3347_v33  ;;  %v5187_v47 = vld [vmem:[%s6099_s10 + $0x7e0] sm:$0xff]  ;;  %v5190_v19 = vld [vmem:[%s6099_s10 + $0x7f8] sm:$0x33] }
 0x2f5   : > { %v3471_v58 = vadd.f32 %v3470_v25, %v3469_v23  ;;  %v3218_v41 = vunpack.c.h.bf16 %v5151_v8  ;;  %v3441_v9 = vadd.f32 %v3440_v18, %v3439_v42  ;;  %v3621_v1 = vadd.f32 %v3620_v26, %v3609_v31 }
 0x2f6   : > { %v3562_v4 = vrot.slane %v3561_v17, 4  ;;  %v3674_v11 = vsel %vm680_vm2, %v3672_v16, %v3379_v21  ;;  %v3532_v22 = vrot.slane %v3531_v6, 2  ;;  %v3220_v45 = vunpack.c.h.bf16 %v5152_v13 }
 0x2f7   : > { %v3472_v43 = vrot.slane %v3471_v58, 1  ;;  %v3222_v46 = vunpack.c.h.bf16 %v5153_v38  ;;  %v3623_v36 = vadd.f32 %v3622_v48, %v3621_v1  ;;  %v3676_v29 = vsel %vm683_vm3, %v3674_v11, %v3441_v9  ;;  %v9177_v11 = vld [vmem:[#allocation12_spill] sm:$0xff] }
 0x2f8   : > { %v3563_v15 = vadd.f32 %v3562_v4, %v3561_v17  ;;  %v3224_v44 = vunpack.c.h.bf16 %v5154_v57  ;;  %v3533_v3 = vadd.f32 %v3532_v22, %v3531_v6  ;;  %v3235_v34 = vadd.f32 %v3220_v45, %v3218_v41  ;;  %v9178_v22 = vld [vmem:[#allocation13_spill] sm:$0xff] }
 0x2f9   : > { %v3473_v10 = vadd.f32 %v3472_v43, %v3471_v58  ;;  %v3217_v5 = vunpack.c.l.bf16 %v5151_v8  ;;  %v3624_v27 = vrot.slane %v3623_v36, 4  ;;  %v3219_v54 = vunpack.c.l.bf16 %v5152_v13 }
 0x2fa   : > { %v3564_v50 = vrot.slane %v3563_v15, 2  ;;  %v3237_v59 = vsel %vm282_vm0, %v3224_v44, 0.0  ;;  %v3534_v32 = vrot.slane %v3533_v3, 1  ;;  %v3236_v62 = vadd.f32 %v3235_v34, %v3222_v46 }
 0x2fb   : > { %v3678_v2 = vsel %vm282_vm0, %v3676_v29, %v3473_v10  ;;  %v3221_v20 = vunpack.c.l.bf16 %v5153_v38  ;;  %v3625_v7 = vadd.f32 %v3624_v27, %v3623_v36  ;;  %v3223_v0 = vunpack.c.l.bf16 %v5154_v57  ;;  %v9179_v36 = vld [vmem:[#allocation14_spill] sm:$0xff]  ;;  %v9180_v29 = vld [vmem:[#allocation16_spill] sm:$0xff]  ;;  %v9182_v27 = vld [vmem:[#allocation17_spill] sm:$0xff] }
 0x2fc   : > { %v3565_v39 = vadd.f32 %v3564_v50, %v3563_v15  ;;  %v3225_v53 = vadd.f32 %v3219_v54, %v3217_v5  ;;  %v3645_v61 = vunpack.c.h.bf16 %v5187_v47  ;;  %v3535_v55 = vadd.f32 %v3534_v32, %v3533_v3  ;;  %v9184_v54 = vld [vmem:[#allocation20_spill] sm:$0xff] }
 0x2fd   : > { %v3238_v23 = vadd.f32 %v3237_v59, %v3236_v62  ;;  %v3647_v60 = vunpack.c.h.bf16 %v5188_v37  ;;  %v3626_v51 = vrot.slane %v3625_v7, 2  ;;  %v3227_v49 = vsel %vm282_vm0, %v3223_v0, 0.0  ;;  %v9183_v59 = vld [vmem:[#allocation18_spill] sm:$0xff]  ;;  %v9185_v62 = vld [vmem:[#allocation19_spill] sm:$0xff]  ;;  %v9188_v0 = vld [vmem:[#allocation24_spill] sm:$0xff] }
 0x2fe   : > { %v3566_v28 = vrot.slane %v3565_v39, 1  ;;  %v3226_v56 = vadd.f32 %v3225_v53, %v3221_v20  ;;  %v3649_v63 = vunpack.c.h.bf16 %v5189_v12  ;;  %v3680_v42 = vsel %vm688_vm4, %v3678_v2, %v3535_v55  ;;  %v9186_v20 = vld [vmem:[#allocation21_spill] sm:$0xff] }
 0x2ff   : > { %v3239_v25 = vrot.slane %v3238_v23, 4  ;;  %v3651_v30 = vunpack.c.h.bf16 %v5190_v19  ;;  %v3627_v8 = vadd.f32 %v3626_v51, %v3625_v7  ;;  %v3662_v35 = vadd.f32 %v3647_v60, %v3645_v61  ;;  %v9187_v7 = vld [vmem:[#allocation22_spill] sm:$0xff]  ;;  %v9189_v51 = vld [vmem:[#allocation23_spill] sm:$0xff] }
 0x300   : > { %v3567_v33 = vadd.f32 %v3566_v28, %v3565_v39  ;;  %v3228_v21 = vadd.f32 %v3227_v49, %v3226_v56  ;;  %v3644_v17 = vunpack.c.l.bf16 %v5187_v47  ;;  %v3646_v26 = vunpack.c.l.bf16 %v5188_v37  ;;  %v9181_v47 = vld [vmem:[#allocation15_spill] sm:$0xff]  ;;  %v9190_v56 = vld [vmem:[#allocation25_spill] sm:$0xff] }
 0x301   : > { %v3240_v18 = vadd.f32 %v3239_v25, %v3238_v23  ;;  %v3664_v58 = vsel %vm282_vm0, %v3651_v30, 0.0  ;;  %v3628_v48 = vrot.slane %v3627_v8, 1  ;;  %v3663_v38 = vadd.f32 %v3662_v35, %v3649_v63 }
 0x302   : > { %v3682_v31 = vsel %vm691_vm5, %v3680_v42, %v3567_v33  ;;  %v3229_v13 = vrot.slane %v3228_v21, 4  ;;  %v3648_v6 = vunpack.c.l.bf16 %v5189_v12  ;;  %v3650_v16 = vunpack.c.l.bf16 %v5190_v19 }
 0x303   : > { %v3241_v4 = vrot.slane %v3240_v18, 2  ;;  %v3652_v57 = vadd.f32 %v3646_v26, %v3644_v17  ;;  %v5230_v41 = vadd.f32 %v8472_v14, %v8463_v24  ;;  %v3629_v9 = vadd.f32 %v3628_v48, %v3627_v8 }
 0x304   : > { %v3230_v43 = vadd.f32 %v3229_v13, %v3228_v21  ;;  %v3665_v1 = vadd.f32 %v3664_v58, %v3663_v38  ;;  %v5268_v15 = vadd.f32 %v9178_v22, %v9177_v11  ;;  %v3654_v10 = vsel %vm282_vm0, %v3650_v16, 0.0 }
 0x305   : > { %v3242_v45 = vadd.f32 %v3241_v4, %v3240_v18  ;;  %v3653_v46 = vadd.f32 %v3652_v57, %v3648_v6  ;;  %v5233_v44 = vadd.f32 %v9180_v29, %v9179_v36  ;;  %v3684_v3 = vsel %vm694_vm6, %v3682_v31, %v3629_v9 }
 0x306   : > { %v3231_v50 = vrot.slane %v3230_v43, 2  ;;  %v3666_v34 = vrot.slane %v3665_v1, 4  ;;  %v4120_v5 = vadd.f32 %v5268_v15, %v5230_v41  ;;  %4568 = vmatmul.mubr.f32.vlgmr.msra.gmra.mrb[12].mxu1 %v3684_v3  ;;  %v5271_v2 = vadd.f32 %v9182_v27, %v9181_v47 }
 0x307   : > { %v3243_v24 = vrot.slane %v3242_v45, 1  ;;  %v3655_v14 = vadd.f32 %v3654_v10, %v3653_v46  ;;  %v5306_v37 = vadd.f32 %v9184_v54, %v9183_v59  ;;  %v5344_v12 = vadd.f32 %v9186_v20, %v9185_v62  ;;  %v4580_v46 = vld [vmem:[%s8839_s7] sm:$0xff]  ;;  %v4581_v10 = vld [vmem:[%s8839_s7 + $0x8] sm:$0x1] }
 0x308   : > { %v3232_v32 = vadd.f32 %v3231_v50, %v3230_v43  ;;  %v3667_v39 = vadd.f32 %v3666_v34, %v3665_v1  ;;  %v5309_v53 = vadd.f32 %v9188_v0, %v9187_v7  ;;  %v4125_v55 = vadd.f32 %v5271_v2, %v5233_v44  ;;  %4603 = vrot.lane.b32.xlu0 %v4580_v46, %s5944_s8  ;;  %v4582_v44 = vld [vmem:[%s8839_s7 + $0x9] sm:$0xff] }
 0x309   : > { %v3244_v19 = vadd.f32 %v3243_v24, %v3242_v45  ;;  %v3656_v61 = vrot.slane %v3655_v14, 4  ;;  %v4195_v28 = vadd.f32 %v5306_v37, %v4120_v5  ;;  %v5347_v49 = vadd.f32 %v9190_v56, %v9189_v51  ;;  %4611 = vrot.lane.b32.xlu1 %v4580_v46, %s5945_s23 }
 0x30a   : > { %v3233_v23 = vrot.slane %v3232_v32, 1  ;;  %v3668_v60 = vrot.slane %v3667_v39, 2  ;;  %v5382_v63 = vadd.f32 %v8753_v52, %v8747_v40  ;;  %v4200_v25 = vadd.f32 %v5309_v53, %v4125_v55 }
 0x30b   : > { %3262 = vst [vmem:[#allocation2 + $0xe8] sm:$0x1] %v3244_v19  ;;  %v3657_v33 = vadd.f32 %v3656_v61, %v3655_v14  ;;  %v4270_v42 = vadd.f32 %v5344_v12, %v4195_v28  ;;  %v4585_v36 = vlaneseq }
 0x30c   : > { %v3234_v30 = vadd.f32 %v3233_v23, %v3232_v32  ;;  %v3669_v8 = vadd.f32 %v3668_v60, %v3667_v39  ;;  %v4275_v35 = vadd.f32 %v5347_v49, %v4200_v25  ;;  %4605 = vrot.lane.b32.xlu0 %v4581_v10, %s5944_s8 }
 0x30d   : > { %v3658_v21 = vrot.slane %v3657_v33, 2  ;;  %v4345_v17 = vadd.f32 %v5382_v63, %v4270_v42  ;;  %4613 = vrot.lane.b32.xlu1 %v4581_v10, %s5945_s23  ;;  %v8847_v29 = vshrl.u32 %v4585_v36, 7  ;;  %v4586_v20 = vand.u32 127, %v4585_v36 }
 0x30e   : > { %3261 = vst [vmem:[#allocation2 + $0xe0] sm:$0x1] %v3234_v30  ;;  %v3670_v31 = vrot.slane %v3669_v8, 1 }
 0x30f   : > { %v3659_v18 = vadd.f32 %v3658_v21, %v3657_v33  ;;  %v8851_v3 = vsub.s32 1, %v8847_v29  ;;  %v4689_v50 = vsub.s32 4, %v8847_v29  ;;  %v4739_v34 = vsub.s32 7, %v8847_v29  ;;  %v4583_v21 = vld [vmem:[%s8839_s7 + $0x11] sm:$0xff] }
 0x310   : > { %v3671_v58 = vadd.f32 %v3670_v31, %v3669_v8  ;;  %v4591_v12 = vand.u32 15, %v4586_v20  ;;  %v4669_v7 = vsub.s32 3, %v8847_v29  ;;  %v4721_v0 = vsub.s32 6, %v8847_v29 }
 0x311   : > { %v3660_v26 = vrot.slane %v3659_v18, 1  ;;  %v4646_v5 = vrot.slane %v4582_v44, %v8851_v3  ;;  %v4690_v24 = vrot.slane %v4582_v44, %v4689_v50  ;;  %v4740_v14 = vrot.slane %v4582_v44, %v4739_v34 }
 0x312   : > { %v3719_v48 = vld [vmem:[#allocation2 + $0xe8] sm:$0x1]  ;;  %3689 = vst [vmem:[#allocation2 + $0xf8] sm:$0x1] %v3671_v58  ;;  %v4639_v53 = vsub.s32 0, %v8847_v29  ;;  %vm8863_vm7 = vcmp.ne.s32.totalorder %v4591_v12, 0  ;;  %v4682_v55 = vrot.slane %v4582_v44, %v4669_v7  ;;  %v4732_v28 = vrot.slane %v4582_v44, %v4721_v0 }
 0x313   : > { %4497 = vmatprep.mubr.f32.mxu0 %v3719_v48  ;;  %v3661_v13 = vadd.f32 %v3660_v26, %v3659_v18  ;;  %v4647_v47 = vmul.f32 %v4646_v5, %v4580_v46  ;;  %v4691_v27 = vmul.f32 %v4690_v24, %v4580_v46  ;;  %v4741_v2 = vmul.f32 %v4740_v14, %v4580_v46 }
 0x314   : > { %v4692_v59 = vmul.f32 %v4690_v24, %v4581_v10  ;;  %v4742_v54 = vmul.f32 %v4740_v14, %v4581_v10  ;;  %v4640_v61 = vrot.slane %v4582_v44, %v4639_v53  ;;  %v8874_v30 = vsub.s32 2, %v8847_v29 }
 0x315   : > { %v3718_v38 = vld [vmem:[#allocation2 + $0xe0] sm:$0x1]  ;;  %3688 = vst [vmem:[#allocation2 + $0xf0] sm:$0x1] %v3661_v13  ;;  %v4697_v8 = vsub.s32 5, %v8847_v29  ;;  %vm8883_vm8 = vcmp.ne.s32.totalorder %v4591_v12, 15 }
 0x316   : > { %4498 = vmatmul.mubr.f32.gmra.mrb[14].mxu0 %v3718_v38  ;;  %v4664_v26 = vrot.slane %v4583_v21, %v8874_v30 }
 0x317   : > { %v4714_v58 = vrot.slane %v4583_v21, %v4697_v8 }
 0x319   : > { %v3721_v40 = vld [vmem:[#allocation2 + $0xf8] sm:$0x1] }
 0x31a   : > { %4572 = vmatprep.mubr.f32.mxu1 %v3721_v40  ;;  %v4652_v40 = vrot.slane %v4582_v44, %v8874_v30 }
 0x31c   : > { %v3720_v52 = vld [vmem:[#allocation2 + $0xf0] sm:$0x1] }
 0x31d   : > { %4573 = vmatmul.mubr.f32.gmra.mrb[14].mxu1 %v3720_v52  ;;  %v4698_v52 = vrot.slane %v4582_v44, %v4697_v8 }
 0x332   : > { %v5418_v6 = vpop.f32.mrb[8].mxu1 }
 0x333   : > { %v5419_v4 = vpop.f32.mrb[9].mxu1 }
 0x334   : > { %v5420_v16 = vadd.f32 %v5419_v4, %v5418_v6  ;;  %v4748_v6 = vrot.slane %v4583_v21, %v4639_v53 }
 0x336   : > { %v4420_v57 = vadd.f32 %v5420_v16, %v4345_v17  ;;  %v8879_v17 = vld [vmem:[%s8839_s7 + $0x19] sm:$0x7] }
 0x337   : > { %v4764_v48 = vrot.slane %v8879_v17, %v4639_v53 }
 0x341   : > { %v5383_v41 = vpop.f32.mrb[10].mxu0 }
 0x342   : > { %v5384_v9 = vpop.f32.mrb[11].mxu0 }
 0x343   : > { %v5385_v43 = vadd.f32 %v5384_v9, %v5383_v41 }
 0x345   : > { %v4350_v1 = vadd.f32 %v5385_v43, %v4275_v35 }
 0x34a   : > { %v5421_v11 = vpop.f32.mrb[10].mxu1 }
 0x34b   : > { %v5422_v22 = vpop.f32.mrb[11].mxu1 }
 0x34c   : > { %v5423_v15 = vadd.f32 %v5422_v22, %v5421_v11 }
 0x34e   : > { %v8829_v45 = vadd.f32 %v5423_v15, %v4350_v1 }
 0x37a   : > { %v4604_v23 = vpop.permute.xlu0 %4603 }
 0x37b   : > { %v4609_v60 = vsel %vm8863_vm7, %v4604_v23, 0.0  ;;  %v4612_v41 = vpop.permute.xlu1 %4611 }
 0x37c   : > { %v4641_v51 = vmul.f32 %v4640_v61, %v4609_v60  ;;  %v4683_v56 = vmul.f32 %v4682_v55, %v4609_v60  ;;  %v4733_v49 = vmul.f32 %v4732_v28, %v4609_v60  ;;  %v4617_v43 = vsel %vm8883_vm8, %v4612_v41, 0.0 }
 0x37d   : > { %v4653_v11 = vmul.f32 %v4652_v40, %v4617_v43  ;;  %v4699_v22 = vmul.f32 %v4698_v52, %v4617_v43  ;;  %v4749_v15 = vmul.f32 %v4748_v6, %v4617_v43 }
 0x37e   : > { %v4648_v63 = vadd.f32 %v4647_v47, %v4641_v51  ;;  %v4693_v33 = vadd.f32 %v4691_v27, %v4683_v56  ;;  %v4743_v42 = vadd.f32 %v4741_v2, %v4733_v49  ;;  %v4606_v9 = vpop.permute.xlu0 %4605  ;;  %v4658_v51 = vrot.slane %v4583_v21, %v8851_v3 }
 0x37f   : > { %v4610_v1 = vsel %vm8863_vm7, %v4606_v9, 0.0  ;;  %v4614_v14 = vpop.permute.xlu1 %4613  ;;  %v4706_v56 = vrot.slane %v4583_v21, %v4689_v50  ;;  %v4756_v49 = vrot.slane %v4583_v21, %v4739_v34 }
 0x380   : > { %v4684_v46 = vmul.f32 %v4682_v55, %v4610_v1  ;;  %v4734_v10 = vmul.f32 %v4732_v28, %v4610_v1  ;;  %v4654_v36 = vadd.f32 %v4653_v11, %v4648_v63  ;;  %v4701_v44 = vadd.f32 %v4699_v22, %v4693_v33 }
 0x381   : > { %v4751_v5 = vadd.f32 %v4749_v15, %v4743_v42  ;;  %v4618_v27 = vsel %vm8883_vm8, %v4614_v14, 0.0  ;;  %v4670_v33 = vrot.slane %v4583_v21, %v4669_v7 }
 0x382   : > { %v4694_v24 = vadd.f32 %v4692_v59, %v4684_v46  ;;  %v4744_v47 = vadd.f32 %v4742_v54, %v4734_v10 }
 0x390   : > { %v5456_v37 = vpop.f32.mrb[12].mxu0 }
 0x391   : > { %v5457_v32 = vpop.f32.mrb[13].mxu0 }
 0x392   : > { %v5458_v39 = vadd.f32 %v5457_v32, %v5456_v37  ;;  %v4700_v37 = vmul.f32 %v4698_v52, %v4618_v27  ;;  %v4750_v32 = vmul.f32 %v4748_v6, %v4618_v27 }
 0x394   : > { %v4495_v62 = vadd.f32 %v5458_v39, %v4420_v57  ;;  %v4702_v20 = vadd.f32 %v4700_v37, %v4694_v24  ;;  %v4752_v12 = vadd.f32 %v4750_v32, %v4744_v47 }
 0x3d9   : > { %v5494_v25 = vpop.f32.mrb[12].mxu1 }
 0x3da   : > { %v5495_v35 = vpop.f32.mrb[13].mxu1 }
 0x3db   : > { %v5496_v31 = vadd.f32 %v5495_v35, %v5494_v25  ;;  %v4722_v35 = vrot.slane %v4583_v21, %v4721_v0 }
 0x3dd   : > { %v4570_v18 = vadd.f32 %v5496_v31, %v4495_v62  ;;  %v4772_v31 = vrot.slane %v8879_v17, %v8851_v3 }
 0x3df   : > { %v4578_v13 = vmul.f32 0.002232143, %v4570_v18 }
 0x3e1   : > { %4621 = vrot.lane.b32.xlu0 %v4578_v13, %s5944_s8  ;;  %v4665_v4 = vmul.f32 %v4664_v26, %v4578_v13  ;;  %v4715_v16 = vmul.f32 %v4714_v58, %v4578_v13  ;;  %v4765_v57 = vmul.f32 %v4764_v48, %v4578_v13 }
 0x3e5   : > { %4629 = vrot.lane.b32.xlu0 %v4578_v13, %s5945_s23 }
 0x3e9   : > { %v5459_v2 = vpop.f32.mrb[14].mxu0 }
 0x3ea   : > { %v5460_v39 = vpop.f32.mrb[15].mxu0 }
 0x3eb   : > { %v5461_v62 = vadd.f32 %v5460_v39, %v5459_v2 }
 0x3ed   : > { %v4500_v53 = vadd.f32 %v5461_v62, %v8829_v45 }
 0x3f0   : > { %v5497_v61 = vpop.f32.mrb[14].mxu1 }
 0x3f1   : > { %v5498_v55 = vpop.f32.mrb[15].mxu1 }
 0x3f2   : > { %v5499_v28 = vadd.f32 %v5498_v55, %v5497_v61 }
 0x3f4   : > { %v4575_v23 = vadd.f32 %v5499_v28, %v4500_v53 }
 0x3f6   : > { %v4579_v60 = vmul.f32 0.002232143, %v4575_v23 }
 0x3f8   : > { %4623 = vrot.lane.b32.xlu1 %v4579_v60, %s5944_s8  ;;  %v4716_v59 = vmul.f32 %v4714_v58, %v4579_v60  ;;  %v4766_v54 = vmul.f32 %v4764_v48, %v4579_v60 }
 0x3fc   : > { %4631 = vrot.lane.b32.xlu1 %v4579_v60, %s5945_s23 }
 0x453   : > { %v4622_v45 = vpop.permute.xlu0 %4621 }
 0x454   : > { %v4627_v63 = vsel %vm8863_vm7, %v4622_v45, 0.0 }
 0x455   : > { %v4659_v42 = vmul.f32 %v4658_v51, %v4627_v63  ;;  %v4707_v25 = vmul.f32 %v4706_v56, %v4627_v63  ;;  %v4757_v8 = vmul.f32 %v4756_v49, %v4627_v63 }
 0x457   : > { %v4660_v50 = vadd.f32 %v4659_v42, %v4654_v36  ;;  %v4709_v18 = vadd.f32 %v4707_v25, %v4701_v44  ;;  %v4759_v58 = vadd.f32 %v4757_v8, %v4751_v5  ;;  %v4630_v34 = vpop.permute.xlu0 %4629  ;;  %v4788_v5 = vrot.slane %v8879_v17, %v8874_v30 }
 0x458   : > { %v4635_v26 = vsel %vm8883_vm8, %v4630_v34, 0.0 }
 0x459   : > { %v4666_v48 = vadd.f32 %v4665_v4, %v4660_v50  ;;  %v4671_v13 = vmul.f32 %v4670_v33, %v4635_v26  ;;  %v4717_v40 = vadd.f32 %v4715_v16, %v4709_v18  ;;  %v4723_v7 = vmul.f32 %v4722_v35, %v4635_v26 }
 0x45a   : > { %v4767_v52 = vadd.f32 %v4765_v57, %v4759_v58  ;;  %v4773_v6 = vmul.f32 %v4772_v31, %v4635_v26 }
 0x45b   : > { %v4672_v41 = vadd.f32 %v4671_v13, %v4666_v48  ;;  %v4725_v9 = vadd.f32 %v4723_v7, %v4717_v40 }
 0x45c   : > { %v4775_v29 = vadd.f32 %v4773_v6, %v4767_v52 }
 0x45d   : > { %v4674_v0 = vrot.slane %v4672_v41, 7 }
 0x45e   : > { %v4779_v19 = vrot.slane %v4775_v29, 1 }
 0x45f   : > { %v4676_v21 = vsel %vm677_vm1, 0.0, %v4674_v0 }
 0x460   : > { %v4727_v3 = vadd.f32 %v4725_v9, %v4676_v21 }
 0x46a   : > { %v4624_v43 = vpop.permute.xlu1 %4623 }
 0x46b   : > { %v4628_v1 = vsel %vm8863_vm7, %v4624_v43, 0.0 }
 0x46c   : > { %v4708_v11 = vmul.f32 %v4706_v56, %v4628_v1  ;;  %v4758_v22 = vmul.f32 %v4756_v49, %v4628_v1 }
 0x46e   : > { %v4710_v4 = vadd.f32 %v4708_v11, %v4702_v20  ;;  %v4760_v15 = vadd.f32 %v4758_v22, %v4752_v12  ;;  %v4632_v16 = vpop.permute.xlu1 %4631 }
 0x46f   : > { %v4636_v57 = vsel %vm8883_vm8, %v4632_v16, 0.0 }
 0x470   : > { %v4718_v46 = vadd.f32 %v4716_v59, %v4710_v4  ;;  %v4724_v10 = vmul.f32 %v4722_v35, %v4636_v57  ;;  %v4768_v36 = vadd.f32 %v4766_v54, %v4760_v15  ;;  %v4774_v44 = vmul.f32 %v4772_v31, %v4636_v57 }
 0x472   : > { %v4726_v24 = vadd.f32 %v4724_v10, %v4718_v46  ;;  %v4776_v14 = vadd.f32 %v4774_v44, %v4768_v36 }
 0x474   : > { %v4728_v47 = vadd.f32 %v4726_v24, %v4674_v0  ;;  %v4780_v27 = vrot.slane %v4776_v14, 1 }
 0x476   : > { %v4781_v2 = vsel %vm694_vm6, %v4779_v19, %v4780_v27  ;;  %v4790_v37 = vadd.f32 %v4788_v5, %v4728_v47 }
 0x477   : > { %v4783_v38 = vadd.f32 %v4781_v2, %v4727_v3 }
 0x478   : > { %v4792_v32 = vmax.f32 %v4790_v37, 0.0 }
 0x479   : > { %v4789_v39 = vadd.f32 %v4788_v5, %v4783_v38 }
 0x47a   : > { %4794 = vst [vmem:[%s267_s11 + $0x8] sm:$0x1] %v4792_v32 }
 0x47b   : > { %v4791_v62 = vmax.f32 %v4789_v39, 0.0 }
 0x47d   : > { %4793 = vst [vmem:[%s267_s11] sm:$0xff] %v4791_v62 }
 0x47e PF: > { %s17_s17 = sadd.s32 1, %s5938_s17   ;;  %s9195_s12 = smov %s5922_s13 }
 0x47f   : > { %p14_p1 = scmp.ge.s32.totalorder %s17_s17, 6   ;;  %s9196_s13 = smov %s5926_s14 }
 0x480   : > { %s9197_s14 = smov %s6052_s26  ;;  %s9198_s15 = smov %s5934_s16 }
 0x481   : > { %s9199_s16 = smov %s9201_s25  ;;  %16 = sbr.rel (!%p14_p1) target bundleno = 5 (0x5), region = 86 }
 0x488   :  { %4824 = vsyncpa [#allocation4], 1 }
 0x489   :  { %4826 = vsyncpa [#allocation4 + $0x1], 1 }
 0x48a   :  { %4827 = vsyncpa [#allocation6], 1 }

</bundles_post_ra>
